<compile_context>
chip_gen: v6e
topology: v6e:2x2x1
jax: 0.10.0
libtpu: 0.0.40
codegen_flags: <defaults>
</compile_context>

<pallas_src>
import functools
import math

import jax
import jax.numpy as jnp
from jax import lax
from jax.experimental import pallas as pl
from jax.experimental.pallas import tpu as pltpu

_VMEM_LIMIT = 64 * 1024 * 1024


def _pick_tile(dim, target, mult):
    """Largest tile <= target that divides dim, in multiples of `mult`."""
    if dim <= target:
        return dim
    t = (target // mult) * mult
    while t >= mult:
        if dim % t == 0:
            return t
        t -= mult
    return dim  # fall back to full dim (always valid)


# ---------------------------- Pallas kernels ----------------------------

def _ln_matmul_kernel(x_ref, w_ref, g_ref, b_ref, o_ref, *, gelu):
    # LayerNorm(x) @ W, optional fused GELU(tanh). x: (tm, K), w: (K, tn).
    x = x_ref[...].astype(jnp.float32)
    mu = jnp.mean(x, axis=-1, keepdims=True)
    var = jnp.mean(jnp.square(x - mu), axis=-1, keepdims=True)
    xhat = (x - mu) * lax.rsqrt(var + 1e-5)          # eps = 1e-5 (nn.LayerNorm)
    xn = xhat * g_ref[...].astype(jnp.float32) + b_ref[...].astype(jnp.float32)
    y = jnp.dot(xn.astype(jnp.bfloat16), w_ref[...],
                preferred_element_type=jnp.float32)
    if gelu:
        c = math.sqrt(2.0 / math.pi)
        y = 0.5 * y * (1.0 + jnp.tanh(c * (y + 0.044715 * y * y * y)))
    o_ref[...] = y.astype(o_ref.dtype)


def _matmul_resid_kernel(x_ref, w_ref, r_ref, o_ref, acc_ref):
    # Tiled x @ W with K-reduction accumulator; residual add fused in finalize.
    @pl.when(pl.program_id(2) == 0)
    def _():
        acc_ref[...] = jnp.zeros_like(acc_ref)

    acc_ref[...] += jnp.dot(x_ref[...], w_ref[...],
                            preferred_element_type=jnp.float32)

    @pl.when(pl.program_id(2) == pl.num_programs(2) - 1)
    def _():
        o_ref[...] = (acc_ref[...] + r_ref[...].astype(jnp.float32)
                      ).astype(o_ref.dtype)


def _flash_attn_kernel(q_ref, k_ref, v_ref, o_ref, m_ref, l_ref, acc_ref, *,
                       scale, tq, tk):
    # One (batch*head) per b; online softmax over KV tiles; causal tile skip.
    qi = pl.program_id(1)
    ki = pl.program_id(2)

    @pl.when(ki == 0)
    def _():
        m_ref[...] = jnp.full(m_ref.shape, -1e30, dtype=m_ref.dtype)
        l_ref[...] = jnp.zeros_like(l_ref)
        acc_ref[...] = jnp.zeros_like(acc_ref)

    @pl.when(ki * tk <= qi * tq + (tq - 1))          # skip fully-masked tiles
    def _():
        q = q_ref[0]                                  # (tq, Dh) bf16
        k = k_ref[0]                                  # (tk, Dh) bf16
        v = v_ref[0]
        s = lax.dot_general(q, k, (((1,), (1,)), ((), ())),
                            preferred_element_type=jnp.float32) * scale
        row = qi * tq + lax.broadcasted_iota(jnp.int32, (tq, tk), 0)
        col = ki * tk + lax.broadcasted_iota(jnp.int32, (tq, tk), 1)
        s = jnp.where(col <= row, s, -1e30)
        m_prev = m_ref[...]
        m_new = jnp.maximum(m_prev, jnp.max(s, axis=-1, keepdims=True))
        alpha = jnp.exp(m_prev - m_new)
        p = jnp.exp(s - m_new)
        l_ref[...] = alpha * l_ref[...] + jnp.sum(p, axis=-1, keepdims=True)
        acc_ref[...] = alpha * acc_ref[...] + jnp.dot(
            p.astype(v.dtype), v, preferred_element_type=jnp.float32)
        m_ref[...] = m_new

    @pl.when(ki == pl.num_programs(2) - 1)
    def _():
        inv_l = pl.reciprocal(l_ref[...], approx=True)
        o_ref[0] = (acc_ref[...] * inv_l).astype(o_ref.dtype)


# ---------------------------- wrappers ----------------------------

def ln_linear_pallas(x, w, gamma, beta, *, gelu=False, out_dtype=jnp.bfloat16):
    """LayerNorm(x) @ w [+ GELU].  x: (M, K) bf16, w: (K, N) bf16."""
    M, K = x.shape
    K2, N = w.shape
    assert K == K2
    tm = _pick_tile(M, 256, 16)
    tn = _pick_tile(N, 256, 128)
    grid = (M // tm, N // tn)
    out_bytes = M * N * jnp.dtype(out_dtype).itemsize
    cost = pl.CostEstimate(flops=2 * M * N * K,
                           transcendentals=(M * N if gelu else 0) + M,
                           bytes_accessed=2 * (M * K + K * N) + out_bytes)
    return pl.pallas_call(
        functools.partial(_ln_matmul_kernel, gelu=gelu),
        out_shape=jax.ShapeDtypeStruct((M, N), out_dtype),
        grid=grid,
        in_specs=[
            pl.BlockSpec((tm, K), lambda i, j: (i, 0)),
            pl.BlockSpec((K, tn), lambda i, j: (0, j)),
            pl.BlockSpec((1, K), lambda i, j: (0, 0)),
            pl.BlockSpec((1, K), lambda i, j: (0, 0)),
        ],
        out_specs=pl.BlockSpec((tm, tn), lambda i, j: (i, j)),
        compiler_params=pltpu.CompilerParams(
            dimension_semantics=("parallel", "parallel"),
            vmem_limit_bytes=_VMEM_LIMIT),
        cost_estimate=cost,
    )(x, w, gamma.reshape(1, K), beta.reshape(1, K))


def linear_residual_pallas(x, w, resid, *, out_dtype=jnp.bfloat16):
    """(x @ w) + resid with a tiled K reduction.  x: (M, K), w: (K, N)."""
    M, K = x.shape
    K2, N = w.shape
    assert K == K2 and resid.shape == (M, N)
    tm = _pick_tile(M, 256, 16)
    tn = _pick_tile(N, 256, 128)
    tk = _pick_tile(K, 512, 128)
    grid = (M // tm, N // tn, K // tk)
    cost = pl.CostEstimate(flops=2 * M * N * K, transcendentals=0,
                           bytes_accessed=2 * (M * K + K * N + 2 * M * N))
    return pl.pallas_call(
        _matmul_resid_kernel,
        out_shape=jax.ShapeDtypeStruct((M, N), out_dtype),
        grid=grid,
        in_specs=[
            pl.BlockSpec((tm, tk), lambda i, j, k: (i, k)),
            pl.BlockSpec((tk, tn), lambda i, j, k: (k, j)),
            pl.BlockSpec((tm, tn), lambda i, j, k: (i, j)),
        ],
        out_specs=pl.BlockSpec((tm, tn), lambda i, j, k: (i, j)),
        scratch_shapes=[pltpu.VMEM((tm, tn), jnp.float32)],
        compiler_params=pltpu.CompilerParams(
            dimension_semantics=("parallel", "parallel", "arbitrary"),
            vmem_limit_bytes=_VMEM_LIMIT),
        cost_estimate=cost,
    )(x, w, resid)


def flash_attention_pallas(q, k, v):
    """Causal SDPA.  q/k/v: (B*H, T, Dh) bf16 -> (B*H, T, Dh) bf16."""
    BH, T, Dh = q.shape
    tq = _pick_tile(T, 256, 16)
    tk = _pick_tile(T, 256, 16)
    scale = 1.0 / math.sqrt(Dh)
    grid = (BH, T // tq, T // tk)
    q_spec = pl.BlockSpec((1, tq, Dh), lambda b, qi, ki: (b, qi, 0))
    kv_spec = pl.BlockSpec((1, tk, Dh), lambda b, qi, ki: (b, ki, 0))
    cost = pl.CostEstimate(flops=4 * BH * T * T * Dh,
                           transcendentals=BH * T * T,
                           bytes_accessed=2 * 4 * BH * T * Dh)
    return pl.pallas_call(
        functools.partial(_flash_attn_kernel, scale=scale, tq=tq, tk=tk),
        out_shape=jax.ShapeDtypeStruct((BH, T, Dh), jnp.bfloat16),
        grid=grid,
        in_specs=[q_spec, kv_spec, kv_spec],
        out_specs=q_spec,
        scratch_shapes=[pltpu.VMEM((tq, 1), jnp.float32),
                        pltpu.VMEM((tq, 1), jnp.float32),
                        pltpu.VMEM((tq, Dh), jnp.float32)],
        compiler_params=pltpu.CompilerParams(
            dimension_semantics=("parallel", "parallel", "arbitrary"),
            vmem_limit_bytes=_VMEM_LIMIT),
        cost_estimate=cost,
    )(q, k, v)


# ---------------------------- parameters ----------------------------

def init_params(key, cfg):
    C = cfg["n_embd"]
    V = cfg["vocab_size"]
    L = cfg["n_layer"]
    BS = cfg["block_size"]
    std = 0.02
    res_std = 0.02 * (2 * L) ** (-0.5)     # RESIDUAL_LAYER_W_INIT scaling

    keys = iter(jax.random.split(key, 2 + 4 * L))

    wte = jax.random.normal(next(keys), (V, C), jnp.float32) * std
    params = {
        "wte": wte.astype(jnp.bfloat16),                        # (V, C) gather
        # lm_head weight tied with wte; transposed ONCE at init to (C, V)
        # so the MXU consumes it directly (no per-forward HBM transpose).
        "lm_head_w": jnp.transpose(wte).astype(jnp.bfloat16),
        "wpe": (jax.random.normal(next(keys), (BS, C), jnp.float32)
                * std).astype(jnp.bfloat16),
        "lnf_g": jnp.ones((C,), jnp.float32),
        "lnf_b": jnp.zeros((C,), jnp.float32),
        "blocks": [],
    }
    for _ in range(L):
        blk = {
            "ln1_g": jnp.ones((C,), jnp.float32),
            "ln1_b": jnp.zeros((C,), jnp.float32),
            # Linear weights stored pre-transposed as (in, out) in bf16.
            "attn_w": (jax.random.normal(next(keys), (C, 3 * C), jnp.float32)
                       * std).astype(jnp.bfloat16),
            "attn_proj_w": (jax.random.normal(next(keys), (C, C), jnp.float32)
                            * res_std).astype(jnp.bfloat16),
            "ln2_g": jnp.ones((C,), jnp.float32),
            "ln2_b": jnp.zeros((C,), jnp.float32),
            "fc_w": (jax.random.normal(next(keys), (C, 4 * C), jnp.float32)
                     * std).astype(jnp.bfloat16),
            "mlp_proj_w": (jax.random.normal(next(keys), (4 * C, C),
                                             jnp.float32)
                           * res_std).astype(jnp.bfloat16),
        }
        params["blocks"].append(blk)
    return params


# ---------------------------- GPT forward ----------------------------

def gpt_forward(params, idx, cfg):
    B, T = idx.shape
    assert T <= cfg["block_size"]
    C = cfg["n_embd"]
    H = cfg["n_head"]
    Dh = C // H

    tok_emb = params["wte"][idx]                  # (B, T, C) gather (glue)
    pos_emb = params["wpe"][:T]                   # (T, C)
    x = (tok_emb + pos_emb[None, :, :]).reshape(B * T, C)   # bf16 residual

    for blk in params["blocks"]:
        # ---- causal self-attention (ln1 fused into qkv matmul) ----
        qkv = ln_linear_pallas(x, blk["attn_w"], blk["ln1_g"], blk["ln1_b"])
        qkv = qkv.reshape(B, T, 3, H, Dh)
        q = qkv[:, :, 0].transpose(0, 2, 1, 3).reshape(B * H, T, Dh)
        k = qkv[:, :, 1].transpose(0, 2, 1, 3).reshape(B * H, T, Dh)
        v = qkv[:, :, 2].transpose(0, 2, 1, 3).reshape(B * H, T, Dh)
        y = flash_attention_pallas(q, k, v)
        y = y.reshape(B, H, T, Dh).transpose(0, 2, 1, 3).reshape(B * T, C)
        # c_proj with residual add fused into the matmul epilogue
        x = linear_residual_pallas(y, blk["attn_proj_w"], x)

        # ---- MLP (ln2 + c_fc + GELU fused; c_proj + residual fused) ----
        h = ln_linear_pallas(x, blk["fc_w"], blk["ln2_g"], blk["ln2_b"],
                             gelu=True)
        x = linear_residual_pallas(h, blk["mlp_proj_w"], x)

    # final LayerNorm fused into the tied lm_head matmul (vocab-tiled)
    logits = ln_linear_pallas(x, params["lm_head_w"],
                              params["lnf_g"], params["lnf_b"],
                              out_dtype=jnp.float32)
    logits = logits.reshape(B, T, -1)
    # targets=None path: loss is None (cross-entropy branch not exercised)
    return logits, None


# ---------------------------- main ----------------------------

if __name__ == "__main__":
    cfg = dict(block_size=128, vocab_size=512, n_layer=2, n_head=4, n_embd=128)
    B, T = 2, 128

    root = jax.random.PRNGKey(0)
    k_params, k_idx = jax.random.split(root)
    params = init_params(k_params, cfg)
    idx = jax.random.randint(k_idx, (B, T), 0, cfg["vocab_size"],
                             dtype=jnp.int32)

    fwd = jax.jit(lambda p, i: gpt_forward(p, i, cfg))
    logits, loss = fwd(params, idx)
    logits = jax.block_until_ready(logits)

    assert logits.shape == (B, T, cfg["vocab_size"])
    assert loss is None
    assert bool(jnp.all(jnp.isfinite(logits)))
    print("KERNEL_OK")
</pallas_src>

<mosaic_0001>
module attributes {stable_mosaic.version = 11 : i64} {
  func.func @_ln_matmul_kernel(%arg0: i32, %arg1: i32, %arg2: memref<256x128xbf16, #tpu.memory_space<vmem>>, %arg3: memref<128x128xbf16, #tpu.memory_space<vmem>>, %arg4: memref<1x128xf32, #tpu.memory_space<vmem>>, %arg5: memref<1x128xf32, #tpu.memory_space<vmem>>, %arg6: memref<256x128xbf16, #tpu.memory_space<vmem>>) attributes {dimension_semantics = [#tpu.dimension_semantics<parallel>, #tpu.dimension_semantics<parallel>], iteration_bounds = array<i64: 1, 3>, scalar_prefetch = 0 : i64, scratch_operands = 0 : i64, tpu.core_type = #tpu.core_type<tc>, window_params = [{transform_indices = @transform_0, window_bounds = array<i64: 256, 128>}, {transform_indices = @transform_1, window_bounds = array<i64: 128, 128>}, {pipeline_mode = #tpu.pipeline_mode<synchronous>, transform_indices = @transform_2, window_bounds = array<i64: 1, 128>}, {pipeline_mode = #tpu.pipeline_mode<synchronous>, transform_indices = @transform_3, window_bounds = array<i64: 1, 128>}, {transform_indices = @transform_4, window_bounds = array<i64: 256, 128>}]} {
    %c0 = arith.constant 0 : index
    %c0_0 = arith.constant 0 : index
    %0 = vector.load %arg2[%c0, %c0_0] : memref<256x128xbf16, #tpu.memory_space<vmem>>, vector<256x128xbf16>
    %1 = arith.extf %0 : vector<256x128xbf16> to vector<256x128xf32>
    %cst = arith.constant dense<0.000000e+00> : vector<256xf32>
    %2 = vector.multi_reduction <add>, %1, %cst [1] : vector<256x128xf32> to vector<256xf32>
    %3 = vector.shape_cast %2 : vector<256xf32> to vector<256x1xf32>
    %cst_1 = arith.constant 1.280000e+02 : f32
    %4 = vector.broadcast %cst_1 : f32 to vector<256x1xf32>
    %5 = arith.divf %3, %4 : vector<256x1xf32>
    %6 = vector.broadcast %5 : vector<256x1xf32> to vector<256x128xf32>
    %7 = arith.subf %1, %6 : vector<256x128xf32>
    %8 = arith.mulf %7, %7 : vector<256x128xf32>
    %cst_2 = arith.constant dense<0.000000e+00> : vector<256xf32>
    %9 = vector.multi_reduction <add>, %8, %cst_2 [1] : vector<256x128xf32> to vector<256xf32>
    %10 = vector.shape_cast %9 : vector<256xf32> to vector<256x1xf32>
    %cst_3 = arith.constant 1.280000e+02 : f32
    %11 = vector.broadcast %cst_3 : f32 to vector<256x1xf32>
    %12 = arith.divf %10, %11 : vector<256x1xf32>
    %13 = vector.broadcast %5 : vector<256x1xf32> to vector<256x128xf32>
    %14 = arith.subf %1, %13 : vector<256x128xf32>
    %cst_4 = arith.constant 9.99999974E-6 : f32
    %15 = vector.broadcast %cst_4 : f32 to vector<256x1xf32>
    %16 = arith.addf %12, %15 : vector<256x1xf32>
    %17 = math.rsqrt %16 : vector<256x1xf32>
    %18 = vector.broadcast %17 : vector<256x1xf32> to vector<256x128xf32>
    %19 = arith.mulf %14, %18 : vector<256x128xf32>
    %c0_5 = arith.constant 0 : index
    %c0_6 = arith.constant 0 : index
    %20 = vector.load %arg4[%c0_5, %c0_6] : memref<1x128xf32, #tpu.memory_space<vmem>>, vector<1x128xf32>
    %21 = vector.broadcast %20 : vector<1x128xf32> to vector<256x128xf32>
    %22 = arith.mulf %19, %21 : vector<256x128xf32>
    %c0_7 = arith.constant 0 : index
    %c0_8 = arith.constant 0 : index
    %23 = vector.load %arg5[%c0_7, %c0_8] : memref<1x128xf32, #tpu.memory_space<vmem>>, vector<1x128xf32>
    %24 = vector.broadcast %23 : vector<1x128xf32> to vector<256x128xf32>
    %25 = arith.addf %22, %24 : vector<256x128xf32>
    %26 = arith.truncf %25 : vector<256x128xf32> to vector<256x128xbf16>
    %c0_9 = arith.constant 0 : index
    %c0_10 = arith.constant 0 : index
    %27 = vector.load %arg3[%c0_9, %c0_10] : memref<128x128xbf16, #tpu.memory_space<vmem>>, vector<128x128xbf16>
    %cst_11 = arith.constant dense<0.000000e+00> : vector<256x128xf32>
    %28 = tpu.matmul %26, %27, %cst_11 {dimension_numbers = #tpu.dot_dimension_numbers<[1], [0], [0], [1], [0, 0, 1, 1], [], []>} : vector<256x128xbf16>, vector<128x128xbf16>, vector<256x128xf32> -> vector<256x128xf32>
    %29 = arith.truncf %28 : vector<256x128xf32> to vector<256x128xbf16>
    %c0_12 = arith.constant 0 : index
    %c0_13 = arith.constant 0 : index
    %30 = vector.load %arg6[%c0_12, %c0_13] : memref<256x128xbf16, #tpu.memory_space<vmem>>, vector<256x128xbf16>
    tpu.vector_store %arg6[%c0_12, %c0_13], %29 {strides = array<i32>} : memref<256x128xbf16, #tpu.memory_space<vmem>>, vector<256x128xbf16>,
    return
  }
  func.func @transform_0(%arg0: i32, %arg1: i32) -> (i32, i32) {
    %c0_i32 = arith.constant 0 : i32
    %c0_i32_0 = arith.constant 0 : i32
    return %arg0, %c0_i32 : i32, i32
  }
  func.func @transform_1(%arg0: i32, %arg1: i32) -> (i32, i32) {
    %c0_i32 = arith.constant 0 : i32
    %c0_i32_0 = arith.constant 0 : i32
    return %c0_i32, %arg1 : i32, i32
  }
  func.func @transform_2(%arg0: i32, %arg1: i32) -> (i32, i32) {
    %c0_i32 = arith.constant 0 : i32
    %c0_i32_0 = arith.constant 0 : i32
    %c0_i32_1 = arith.constant 0 : i32
    return %c0_i32, %c0_i32_0 : i32, i32
  }
  func.func @transform_3(%arg0: i32, %arg1: i32) -> (i32, i32) {
    %c0_i32 = arith.constant 0 : i32
    %c0_i32_0 = arith.constant 0 : i32
    %c0_i32_1 = arith.constant 0 : i32
    return %c0_i32, %c0_i32_0 : i32, i32
  }
  func.func @transform_4(%arg0: i32, %arg1: i32) -> (i32, i32) {
    %c0_i32 = arith.constant 0 : i32
    return %arg0, %arg1 : i32, i32
  }
}

module attributes {stable_mosaic.version = 11 : i64} {
  func.func @_flash_attn_kernel(%arg0: i32, %arg1: i32, %arg2: i32, %arg3: memref<1x128x32xbf16, #tpu.memory_space<vmem>>, %arg4: memref<1x128x32xbf16, #tpu.memory_space<vmem>>, %arg5: memref<1x128x32xbf16, #tpu.memory_space<vmem>>, %arg6: memref<1x128x32xbf16, #tpu.memory_space<vmem>>, %arg7: memref<128x1xf32, #tpu.memory_space<vmem>>, %arg8: memref<128x1xf32, #tpu.memory_space<vmem>>, %arg9: memref<128x32xf32, #tpu.memory_space<vmem>>) attributes {dimension_semantics = [#tpu.dimension_semantics<parallel>, #tpu.dimension_semantics<parallel>, #tpu.dimension_semantics<arbitrary>], iteration_bounds = array<i64: 8, 1, 1>, scalar_prefetch = 0 : i64, scratch_operands = 3 : i64, tpu.core_type = #tpu.core_type<tc>, window_params = [{transform_indices = @transform_0, window_bounds = array<i64: 1, 128, 32>}, {transform_indices = @transform_1, window_bounds = array<i64: 1, 128, 32>}, {transform_indices = @transform_2, window_bounds = array<i64: 1, 128, 32>}, {transform_indices = @transform_3, window_bounds = array<i64: 1, 128, 32>}]} {
    %c0_i32 = arith.constant 0 : i32
    %0 = arith.cmpi eq, %arg2, %c0_i32 : i32
    %1 = arith.extui %0 : i1 to i32
    %c0_i32_0 = arith.constant 0 : i32
    %2 = arith.cmpi ne, %1, %c0_i32_0 : i32
    scf.if %2 {
      %cst = arith.constant -1.000000e+30 : f32
      %12 = vector.broadcast %cst : f32 to vector<128x1xf32>
      %c0 = arith.constant 0 : index
      %c0_5 = arith.constant 0 : index
      %13 = vector.load %arg7[%c0, %c0_5] : memref<128x1xf32, #tpu.memory_space<vmem>>, vector<128x1xf32>
      tpu.vector_store %arg7[%c0, %c0_5], %12 {strides = array<i32>} : memref<128x1xf32, #tpu.memory_space<vmem>>, vector<128x1xf32>,
      %cst_6 = arith.constant 0.000000e+00 : f32
      %14 = vector.broadcast %cst_6 : f32 to vector<128x1xf32>
      %c0_7 = arith.constant 0 : index
      %c0_8 = arith.constant 0 : index
      %15 = vector.load %arg8[%c0_7, %c0_8] : memref<128x1xf32, #tpu.memory_space<vmem>>, vector<128x1xf32>
      tpu.vector_store %arg8[%c0_7, %c0_8], %14 {strides = array<i32>} : memref<128x1xf32, #tpu.memory_space<vmem>>, vector<128x1xf32>,
      %cst_9 = arith.constant 0.000000e+00 : f32
      %16 = vector.broadcast %cst_9 : f32 to vector<128x32xf32>
      %c0_10 = arith.constant 0 : index
      %c0_11 = arith.constant 0 : index
      %17 = vector.load %arg9[%c0_10, %c0_11] : memref<128x32xf32, #tpu.memory_space<vmem>>, vector<128x32xf32>
      tpu.vector_store %arg9[%c0_10, %c0_11], %16 {strides = array<i32>} : memref<128x32xf32, #tpu.memory_space<vmem>>, vector<128x32xf32>,
    } else {
    }
    %c128_i32 = arith.constant 128 : i32
    %3 = arith.muli %arg2, %c128_i32 : i32
    %c128_i32_1 = arith.constant 128 : i32
    %4 = arith.muli %arg1, %c128_i32_1 : i32
    %c127_i32 = arith.constant 127 : i32
    %5 = arith.addi %4, %c127_i32 : i32
    %6 = arith.cmpi sle, %3, %5 : i32
    %7 = arith.extui %6 : i1 to i32
    %c0_i32_2 = arith.constant 0 : i32
    %8 = arith.cmpi ne, %7, %c0_i32_2 : i32
    scf.if %8 {
      %c0 = arith.constant 0 : index
      %c0_5 = arith.constant 0 : index
      %c0_6 = arith.constant 0 : index
      %12 = vector.load %arg3[%c0, %c0_5, %c0_6] : memref<1x128x32xbf16, #tpu.memory_space<vmem>>, vector<1x128x32xbf16>
      %13 = vector.shape_cast %12 : vector<1x128x32xbf16> to vector<128x32xbf16>
      %c0_7 = arith.constant 0 : index
      %c0_8 = arith.constant 0 : index
      %c0_9 = arith.constant 0 : index
      %14 = vector.load %arg4[%c0_7, %c0_8, %c0_9] : memref<1x128x32xbf16, #tpu.memory_space<vmem>>, vector<1x128x32xbf16>
      %15 = vector.shape_cast %14 : vector<1x128x32xbf16> to vector<128x32xbf16>
      %c0_10 = arith.constant 0 : index
      %c0_11 = arith.constant 0 : index
      %c0_12 = arith.constant 0 : index
      %16 = vector.load %arg5[%c0_10, %c0_11, %c0_12] : memref<1x128x32xbf16, #tpu.memory_space<vmem>>, vector<1x128x32xbf16>
      %17 = vector.shape_cast %16 : vector<1x128x32xbf16> to vector<128x32xbf16>
      %cst = arith.constant dense<0.000000e+00> : vector<128x128xf32>
      %18 = tpu.matmul %13, %15, %cst {dimension_numbers = #tpu.dot_dimension_numbers<[1], [1], [0], [0], [0, 0, 1, 0], [], []>} : vector<128x32xbf16>, vector<128x32xbf16>, vector<128x128xf32> -> vector<128x128xf32>
      %cst_13 = arith.constant 0.176776692 : f32
      %19 = vector.broadcast %cst_13 : f32 to vector<128x128xf32>
      %20 = arith.mulf %18, %19 : vector<128x128xf32>
      %c128_i32_14 = arith.constant 128 : i32
      %21 = arith.muli %arg1, %c128_i32_14 : i32
      %22 = tpu.iota {dimensions = array<i32: 0>} : vector<128x128xi32>
      %23 = vector.broadcast %21 : i32 to vector<128x128xi32>
      %24 = arith.addi %23, %22 : vector<128x128xi32>
      %c128_i32_15 = arith.constant 128 : i32
      %25 = arith.muli %arg2, %c128_i32_15 : i32
      %26 = tpu.iota {dimensions = array<i32: 1>} : vector<128x128xi32>
      %27 = vector.broadcast %25 : i32 to vector<128x128xi32>
      %28 = arith.addi %27, %26 : vector<128x128xi32>
      %29 = arith.cmpi sle, %28, %24 : vector<128x128xi32>
      %cst_16 = arith.constant -1.000000e+30 : f32
      %30 = vector.broadcast %cst_16 : f32 to vector<128x128xf32>
      %31 = arith.select %29, %20, %30 : vector<128x128xi1>, vector<128x128xf32>
      %c0_17 = arith.constant 0 : index
      %c0_18 = arith.constant 0 : index
      %32 = vector.load %arg7[%c0_17, %c0_18] : memref<128x1xf32, #tpu.memory_space<vmem>>, vector<128x1xf32>
      %cst_19 = arith.constant dense<0xFF800000> : vector<128xf32>
      %33 = vector.multi_reduction <maximumf>, %31, %cst_19 [1] : vector<128x128xf32> to vector<128xf32>
      %34 = vector.shape_cast %33 : vector<128xf32> to vector<128x1xf32>
      %35 = arith.maximumf %32, %34 : vector<128x1xf32>
      %36 = arith.subf %32, %35 : vector<128x1xf32>
      %37 = math.exp %36 : vector<128x1xf32>
      %38 = vector.broadcast %35 : vector<128x1xf32> to vector<128x128xf32>
      %39 = arith.subf %31, %38 : vector<128x128xf32>
      %40 = math.exp %39 : vector<128x128xf32>
      %c0_20 = arith.constant 0 : index
      %c0_21 = arith.constant 0 : index
      %41 = vector.load %arg8[%c0_20, %c0_21] : memref<128x1xf32, #tpu.memory_space<vmem>>, vector<128x1xf32>
      %42 = arith.mulf %37, %41 : vector<128x1xf32>
      %cst_22 = arith.constant dense<0.000000e+00> : vector<128xf32>
      %43 = vector.multi_reduction <add>, %40, %cst_22 [1] : vector<128x128xf32> to vector<128xf32>
      %44 = vector.shape_cast %43 : vector<128xf32> to vector<128x1xf32>
      %45 = arith.addf %42, %44 : vector<128x1xf32>
      %c0_23 = arith.constant 0 : index
      %c0_24 = arith.constant 0 : index
      %46 = vector.load %arg8[%c0_23, %c0_24] : memref<128x1xf32, #tpu.memory_space<vmem>>, vector<128x1xf32>
      tpu.vector_store %arg8[%c0_23, %c0_24], %45 {strides = array<i32>} : memref<128x1xf32, #tpu.memory_space<vmem>>, vector<128x1xf32>,
      %c0_25 = arith.constant 0 : index
      %c0_26 = arith.constant 0 : index
      %47 = vector.load %arg9[%c0_25, %c0_26] : memref<128x32xf32, #tpu.memory_space<vmem>>, vector<128x32xf32>
      %48 = vector.broadcast %37 : vector<128x1xf32> to vector<128x32xf32>
      %49 = arith.mulf %48, %47 : vector<128x32xf32>
      %50 = arith.truncf %40 : vector<128x128xf32> to vector<128x128xbf16>
      %cst_27 = arith.constant dense<0.000000e+00> : vector<128x32xf32>
      %51 = tpu.matmul %50, %17, %cst_27 {dimension_numbers = #tpu.dot_dimension_numbers<[1], [0], [0], [1], [0, 0, 1, 1], [], []>} : vector<128x128xbf16>, vector<128x32xbf16>, vector<128x32xf32> -> vector<128x32xf32>
      %52 = arith.addf %49, %51 : vector<128x32xf32>
      %c0_28 = arith.constant 0 : index
      %c0_29 = arith.constant 0 : index
      %53 = vector.load %arg9[%c0_28, %c0_29] : memref<128x32xf32, #tpu.memory_space<vmem>>, vector<128x32xf32>
      tpu.vector_store %arg9[%c0_28, %c0_29], %52 {strides = array<i32>} : memref<128x32xf32, #tpu.memory_space<vmem>>, vector<128x32xf32>,
      %c0_30 = arith.constant 0 : index
      %c0_31 = arith.constant 0 : index
      %54 = vector.load %arg7[%c0_30, %c0_31] : memref<128x1xf32, #tpu.memory_space<vmem>>, vector<128x1xf32>
      tpu.vector_store %arg7[%c0_30, %c0_31], %35 {strides = array<i32>} : memref<128x1xf32, #tpu.memory_space<vmem>>, vector<128x1xf32>,
    } else {
    }
    %c0_i32_3 = arith.constant 0 : i32
    %9 = arith.cmpi eq, %arg2, %c0_i32_3 : i32
    %10 = arith.extui %9 : i1 to i32
    %c0_i32_4 = arith.constant 0 : i32
    %11 = arith.cmpi ne, %10, %c0_i32_4 : i32
    scf.if %11 {
      %c0 = arith.constant 0 : index
      %c0_5 = arith.constant 0 : index
      %12 = vector.load %arg8[%c0, %c0_5] : memref<128x1xf32, #tpu.memory_space<vmem>>, vector<128x1xf32>
      %13 = tpu.reciprocal %12 {approx = true} : vector<128x1xf32> -> vector<128x1xf32>
      %c0_6 = arith.constant 0 : index
      %c0_7 = arith.constant 0 : index
      %14 = vector.load %arg9[%c0_6, %c0_7] : memref<128x32xf32, #tpu.memory_space<vmem>>, vector<128x32xf32>
      %15 = vector.broadcast %13 : vector<128x1xf32> to vector<128x32xf32>
      %16 = arith.mulf %14, %15 : vector<128x32xf32>
      %17 = arith.truncf %16 : vector<128x32xf32> to vector<128x32xbf16>
      %c0_8 = arith.constant 0 : index
      %c0_9 = arith.constant 0 : index
      %c0_10 = arith.constant 0 : index
      %18 = vector.load %arg6[%c0_8, %c0_9, %c0_10] : memref<1x128x32xbf16, #tpu.memory_space<vmem>>, vector<1x128x32xbf16>
      %19 = vector.shape_cast %18 : vector<1x128x32xbf16> to vector<128x32xbf16>
      %20 = vector.shape_cast %17 : vector<128x32xbf16> to vector<1x128x32xbf16>
      tpu.vector_store %arg6[%c0_8, %c0_9, %c0_10], %20 {strides = array<i32>} : memref<1x128x32xbf16, #tpu.memory_space<vmem>>, vector<1x128x32xbf16>,
    } else {
    }
    return
  }
  func.func @transform_0(%arg0: i32, %arg1: i32, %arg2: i32) -> (i32, i32, i32) {
    %c0_i32 = arith.constant 0 : i32
    %c0_i32_0 = arith.constant 0 : i32
    return %arg0, %arg1, %c0_i32 : i32, i32, i32
  }
  func.func @transform_1(%arg0: i32, %arg1: i32, %arg2: i32) -> (i32, i32, i32) {
    %c0_i32 = arith.constant 0 : i32
    %c0_i32_0 = arith.constant 0 : i32
    return %arg0, %arg2, %c0_i32 : i32, i32, i32
  }
  func.func @transform_2(%arg0: i32, %arg1: i32, %arg2: i32) -> (i32, i32, i32) {
    %c0_i32 = arith.constant 0 : i32
    %c0_i32_0 = arith.constant 0 : i32
    return %arg0, %arg2, %c0_i32 : i32, i32, i32
  }
  func.func @transform_3(%arg0: i32, %arg1: i32, %arg2: i32) -> (i32, i32, i32) {
    %c0_i32 = arith.constant 0 : i32
    %c0_i32_0 = arith.constant 0 : i32
    return %arg0, %arg1, %c0_i32 : i32, i32, i32
  }
}

module attributes {stable_mosaic.version = 11 : i64} {
  func.func @_ln_matmul_kernel(%arg0: i32, %arg1: i32, %arg2: memref<256x128xbf16, #tpu.memory_space<vmem>>, %arg3: memref<128x256xbf16, #tpu.memory_space<vmem>>, %arg4: memref<1x128xf32, #tpu.memory_space<vmem>>, %arg5: memref<1x128xf32, #tpu.memory_space<vmem>>, %arg6: memref<256x256xbf16, #tpu.memory_space<vmem>>) attributes {dimension_semantics = [#tpu.dimension_semantics<parallel>, #tpu.dimension_semantics<parallel>], iteration_bounds = array<i64: 1, 2>, scalar_prefetch = 0 : i64, scratch_operands = 0 : i64, tpu.core_type = #tpu.core_type<tc>, window_params = [{transform_indices = @transform_0, window_bounds = array<i64: 256, 128>}, {transform_indices = @transform_1, window_bounds = array<i64: 128, 256>}, {pipeline_mode = #tpu.pipeline_mode<synchronous>, transform_indices = @transform_2, window_bounds = array<i64: 1, 128>}, {pipeline_mode = #tpu.pipeline_mode<synchronous>, transform_indices = @transform_3, window_bounds = array<i64: 1, 128>}, {transform_indices = @transform_4, window_bounds = array<i64: 256, 256>}]} {
    %c0 = arith.constant 0 : index
    %c0_0 = arith.constant 0 : index
    %0 = vector.load %arg2[%c0, %c0_0] : memref<256x128xbf16, #tpu.memory_space<vmem>>, vector<256x128xbf16>
    %1 = arith.extf %0 : vector<256x128xbf16> to vector<256x128xf32>
    %cst = arith.constant dense<0.000000e+00> : vector<256xf32>
    %2 = vector.multi_reduction <add>, %1, %cst [1] : vector<256x128xf32> to vector<256xf32>
    %3 = vector.shape_cast %2 : vector<256xf32> to vector<256x1xf32>
    %cst_1 = arith.constant 1.280000e+02 : f32
    %4 = vector.broadcast %cst_1 : f32 to vector<256x1xf32>
    %5 = arith.divf %3, %4 : vector<256x1xf32>
    %6 = vector.broadcast %5 : vector<256x1xf32> to vector<256x128xf32>
    %7 = arith.subf %1, %6 : vector<256x128xf32>
    %8 = arith.mulf %7, %7 : vector<256x128xf32>
    %cst_2 = arith.constant dense<0.000000e+00> : vector<256xf32>
    %9 = vector.multi_reduction <add>, %8, %cst_2 [1] : vector<256x128xf32> to vector<256xf32>
    %10 = vector.shape_cast %9 : vector<256xf32> to vector<256x1xf32>
    %cst_3 = arith.constant 1.280000e+02 : f32
    %11 = vector.broadcast %cst_3 : f32 to vector<256x1xf32>
    %12 = arith.divf %10, %11 : vector<256x1xf32>
    %13 = vector.broadcast %5 : vector<256x1xf32> to vector<256x128xf32>
    %14 = arith.subf %1, %13 : vector<256x128xf32>
    %cst_4 = arith.constant 9.99999974E-6 : f32
    %15 = vector.broadcast %cst_4 : f32 to vector<256x1xf32>
    %16 = arith.addf %12, %15 : vector<256x1xf32>
    %17 = math.rsqrt %16 : vector<256x1xf32>
    %18 = vector.broadcast %17 : vector<256x1xf32> to vector<256x128xf32>
    %19 = arith.mulf %14, %18 : vector<256x128xf32>
    %c0_5 = arith.constant 0 : index
    %c0_6 = arith.constant 0 : index
    %20 = vector.load %arg4[%c0_5, %c0_6] : memref<1x128xf32, #tpu.memory_space<vmem>>, vector<1x128xf32>
    %21 = vector.broadcast %20 : vector<1x128xf32> to vector<256x128xf32>
    %22 = arith.mulf %19, %21 : vector<256x128xf32>
    %c0_7 = arith.constant 0 : index
    %c0_8 = arith.constant 0 : index
    %23 = vector.load %arg5[%c0_7, %c0_8] : memref<1x128xf32, #tpu.memory_space<vmem>>, vector<1x128xf32>
    %24 = vector.broadcast %23 : vector<1x128xf32> to vector<256x128xf32>
    %25 = arith.addf %22, %24 : vector<256x128xf32>
    %26 = arith.truncf %25 : vector<256x128xf32> to vector<256x128xbf16>
    %c0_9 = arith.constant 0 : index
    %c0_10 = arith.constant 0 : index
    %27 = vector.load %arg3[%c0_9, %c0_10] : memref<128x256xbf16, #tpu.memory_space<vmem>>, vector<128x256xbf16>
    %cst_11 = arith.constant dense<0.000000e+00> : vector<256x256xf32>
    %28 = tpu.matmul %26, %27, %cst_11 {dimension_numbers = #tpu.dot_dimension_numbers<[1], [0], [0], [1], [0, 0, 1, 1], [], []>} : vector<256x128xbf16>, vector<128x256xbf16>, vector<256x256xf32> -> vector<256x256xf32>
    %cst_12 = arith.constant 5.000000e-01 : f32
    %29 = vector.broadcast %cst_12 : f32 to vector<256x256xf32>
    %30 = arith.mulf %29, %28 : vector<256x256xf32>
    %cst_13 = arith.constant 4.471500e-02 : f32
    %31 = vector.broadcast %cst_13 : f32 to vector<256x256xf32>
    %32 = arith.mulf %31, %28 : vector<256x256xf32>
    %33 = arith.mulf %32, %28 : vector<256x256xf32>
    %34 = arith.mulf %33, %28 : vector<256x256xf32>
    %35 = arith.addf %28, %34 : vector<256x256xf32>
    %cst_14 = arith.constant 0.797884583 : f32
    %36 = vector.broadcast %cst_14 : f32 to vector<256x256xf32>
    %37 = arith.mulf %36, %35 : vector<256x256xf32>
    %38 = math.tanh %37 : vector<256x256xf32>
    %cst_15 = arith.constant 1.000000e+00 : f32
    %39 = vector.broadcast %cst_15 : f32 to vector<256x256xf32>
    %40 = arith.addf %39, %38 : vector<256x256xf32>
    %41 = arith.mulf %30, %40 : vector<256x256xf32>
    %42 = arith.truncf %41 : vector<256x256xf32> to vector<256x256xbf16>
    %c0_16 = arith.constant 0 : index
    %c0_17 = arith.constant 0 : index
    %43 = vector.load %arg6[%c0_16, %c0_17] : memref<256x256xbf16, #tpu.memory_space<vmem>>, vector<256x256xbf16>
    tpu.vector_store %arg6[%c0_16, %c0_17], %42 {strides = array<i32>} : memref<256x256xbf16, #tpu.memory_space<vmem>>, vector<256x256xbf16>,
    return
  }
  func.func @transform_0(%arg0: i32, %arg1: i32) -> (i32, i32) {
    %c0_i32 = arith.constant 0 : i32
    %c0_i32_0 = arith.constant 0 : i32
    return %arg0, %c0_i32 : i32, i32
  }
  func.func @transform_1(%arg0: i32, %arg1: i32) -> (i32, i32) {
    %c0_i32 = arith.constant 0 : i32
    %c0_i32_0 = arith.constant 0 : i32
    return %c0_i32, %arg1 : i32, i32
  }
  func.func @transform_2(%arg0: i32, %arg1: i32) -> (i32, i32) {
    %c0_i32 = arith.constant 0 : i32
    %c0_i32_0 = arith.constant 0 : i32
    %c0_i32_1 = arith.constant 0 : i32
    return %c0_i32, %c0_i32_0 : i32, i32
  }
  func.func @transform_3(%arg0: i32, %arg1: i32) -> (i32, i32) {
    %c0_i32 = arith.constant 0 : i32
    %c0_i32_0 = arith.constant 0 : i32
    %c0_i32_1 = arith.constant 0 : i32
    return %c0_i32, %c0_i32_0 : i32, i32
  }
  func.func @transform_4(%arg0: i32, %arg1: i32) -> (i32, i32) {
    %c0_i32 = arith.constant 0 : i32
    return %arg0, %arg1 : i32, i32
  }
}

module attributes {stable_mosaic.version = 11 : i64} {
  func.func @_matmul_resid_kernel(%arg0: i32, %arg1: i32, %arg2: i32, %arg3: memref<256x128xbf16, #tpu.memory_space<vmem>>, %arg4: memref<128x128xbf16, #tpu.memory_space<vmem>>, %arg5: memref<256x128xbf16, #tpu.memory_space<vmem>>, %arg6: memref<256x128xbf16, #tpu.memory_space<vmem>>, %arg7: memref<256x128xf32, #tpu.memory_space<vmem>>) attributes {dimension_semantics = [#tpu.dimension_semantics<parallel>, #tpu.dimension_semantics<parallel>, #tpu.dimension_semantics<arbitrary>], iteration_bounds = array<i64: 1, 1, 1>, scalar_prefetch = 0 : i64, scratch_operands = 1 : i64, tpu.core_type = #tpu.core_type<tc>, window_params = [{transform_indices = @transform_0, window_bounds = array<i64: 256, 128>}, {transform_indices = @transform_1, window_bounds = array<i64: 128, 128>}, {transform_indices = @transform_2, window_bounds = array<i64: 256, 128>}, {transform_indices = @transform_3, window_bounds = array<i64: 256, 128>}]} {
    %c0_i32 = arith.constant 0 : i32
    %0 = arith.cmpi eq, %arg2, %c0_i32 : i32
    %1 = arith.extui %0 : i1 to i32
    %c0_i32_0 = arith.constant 0 : i32
    %2 = arith.cmpi ne, %1, %c0_i32_0 : i32
    scf.if %2 {
      %cst_10 = arith.constant 0.000000e+00 : f32
      %12 = vector.broadcast %cst_10 : f32 to vector<256x128xf32>
      %c0_11 = arith.constant 0 : index
      %c0_12 = arith.constant 0 : index
      %13 = vector.load %arg7[%c0_11, %c0_12] : memref<256x128xf32, #tpu.memory_space<vmem>>, vector<256x128xf32>
      tpu.vector_store %arg7[%c0_11, %c0_12], %12 {strides = array<i32>} : memref<256x128xf32, #tpu.memory_space<vmem>>, vector<256x128xf32>,
    } else {
    }
    %c0 = arith.constant 0 : index
    %c0_1 = arith.constant 0 : index
    %3 = vector.load %arg7[%c0, %c0_1] : memref<256x128xf32, #tpu.memory_space<vmem>>, vector<256x128xf32>
    %c0_2 = arith.constant 0 : index
    %c0_3 = arith.constant 0 : index
    %4 = vector.load %arg3[%c0_2, %c0_3] : memref<256x128xbf16, #tpu.memory_space<vmem>>, vector<256x128xbf16>
    %c0_4 = arith.constant 0 : index
    %c0_5 = arith.constant 0 : index
    %5 = vector.load %arg4[%c0_4, %c0_5] : memref<128x128xbf16, #tpu.memory_space<vmem>>, vector<128x128xbf16>
    %cst = arith.constant dense<0.000000e+00> : vector<256x128xf32>
    %6 = tpu.matmul %4, %5, %cst {dimension_numbers = #tpu.dot_dimension_numbers<[1], [0], [0], [1], [0, 0, 1, 1], [], []>} : vector<256x128xbf16>, vector<128x128xbf16>, vector<256x128xf32> -> vector<256x128xf32>
    %7 = arith.addf %3, %6 : vector<256x128xf32>
    %c0_6 = arith.constant 0 : index
    %c0_7 = arith.constant 0 : index
    %8 = vector.load %arg7[%c0_6, %c0_7] : memref<256x128xf32, #tpu.memory_space<vmem>>, vector<256x128xf32>
    tpu.vector_store %arg7[%c0_6, %c0_7], %7 {strides = array<i32>} : memref<256x128xf32, #tpu.memory_space<vmem>>, vector<256x128xf32>,
    %c0_i32_8 = arith.constant 0 : i32
    %9 = arith.cmpi eq, %arg2, %c0_i32_8 : i32
    %10 = arith.extui %9 : i1 to i32
    %c0_i32_9 = arith.constant 0 : i32
    %11 = arith.cmpi ne, %10, %c0_i32_9 : i32
    scf.if %11 {
      %c0_10 = arith.constant 0 : index
      %c0_11 = arith.constant 0 : index
      %12 = vector.load %arg7[%c0_10, %c0_11] : memref<256x128xf32, #tpu.memory_space<vmem>>, vector<256x128xf32>
      %c0_12 = arith.constant 0 : index
      %c0_13 = arith.constant 0 : index
      %13 = vector.load %arg5[%c0_12, %c0_13] : memref<256x128xbf16, #tpu.memory_space<vmem>>, vector<256x128xbf16>
      %14 = arith.extf %13 : vector<256x128xbf16> to vector<256x128xf32>
      %15 = arith.addf %12, %14 : vector<256x128xf32>
      %16 = arith.truncf %15 : vector<256x128xf32> to vector<256x128xbf16>
      %c0_14 = arith.constant 0 : index
      %c0_15 = arith.constant 0 : index
      %17 = vector.load %arg6[%c0_14, %c0_15] : memref<256x128xbf16, #tpu.memory_space<vmem>>, vector<256x128xbf16>
      tpu.vector_store %arg6[%c0_14, %c0_15], %16 {strides = array<i32>} : memref<256x128xbf16, #tpu.memory_space<vmem>>, vector<256x128xbf16>,
    } else {
    }
    return
  }
  func.func @transform_0(%arg0: i32, %arg1: i32, %arg2: i32) -> (i32, i32) {
    %c0_i32 = arith.constant 0 : i32
    return %arg0, %arg2 : i32, i32
  }
  func.func @transform_1(%arg0: i32, %arg1: i32, %arg2: i32) -> (i32, i32) {
    %c0_i32 = arith.constant 0 : i32
    return %arg2, %arg1 : i32, i32
  }
  func.func @transform_2(%arg0: i32, %arg1: i32, %arg2: i32) -> (i32, i32) {
    %c0_i32 = arith.constant 0 : i32
    return %arg0, %arg1 : i32, i32
  }
  func.func @transform_3(%arg0: i32, %arg1: i32, %arg2: i32) -> (i32, i32) {
    %c0_i32 = arith.constant 0 : i32
    return %arg0, %arg1 : i32, i32
  }
}

module attributes {stable_mosaic.version = 11 : i64} {
  func.func @_matmul_resid_kernel(%arg0: i32, %arg1: i32, %arg2: i32, %arg3: memref<256x512xbf16, #tpu.memory_space<vmem>>, %arg4: memref<512x128xbf16, #tpu.memory_space<vmem>>, %arg5: memref<256x128xbf16, #tpu.memory_space<vmem>>, %arg6: memref<256x128xbf16, #tpu.memory_space<vmem>>, %arg7: memref<256x128xf32, #tpu.memory_space<vmem>>) attributes {dimension_semantics = [#tpu.dimension_semantics<parallel>, #tpu.dimension_semantics<parallel>, #tpu.dimension_semantics<arbitrary>], iteration_bounds = array<i64: 1, 1, 1>, scalar_prefetch = 0 : i64, scratch_operands = 1 : i64, tpu.core_type = #tpu.core_type<tc>, window_params = [{transform_indices = @transform_0, window_bounds = array<i64: 256, 512>}, {transform_indices = @transform_1, window_bounds = array<i64: 512, 128>}, {transform_indices = @transform_2, window_bounds = array<i64: 256, 128>}, {transform_indices = @transform_3, window_bounds = array<i64: 256, 128>}]} {
    %c0_i32 = arith.constant 0 : i32
    %0 = arith.cmpi eq, %arg2, %c0_i32 : i32
    %1 = arith.extui %0 : i1 to i32
    %c0_i32_0 = arith.constant 0 : i32
    %2 = arith.cmpi ne, %1, %c0_i32_0 : i32
    scf.if %2 {
      %cst_10 = arith.constant 0.000000e+00 : f32
      %12 = vector.broadcast %cst_10 : f32 to vector<256x128xf32>
      %c0_11 = arith.constant 0 : index
      %c0_12 = arith.constant 0 : index
      %13 = vector.load %arg7[%c0_11, %c0_12] : memref<256x128xf32, #tpu.memory_space<vmem>>, vector<256x128xf32>
      tpu.vector_store %arg7[%c0_11, %c0_12], %12 {strides = array<i32>} : memref<256x128xf32, #tpu.memory_space<vmem>>, vector<256x128xf32>,
    } else {
    }
    %c0 = arith.constant 0 : index
    %c0_1 = arith.constant 0 : index
    %3 = vector.load %arg7[%c0, %c0_1] : memref<256x128xf32, #tpu.memory_space<vmem>>, vector<256x128xf32>
    %c0_2 = arith.constant 0 : index
    %c0_3 = arith.constant 0 : index
    %4 = vector.load %arg3[%c0_2, %c0_3] : memref<256x512xbf16, #tpu.memory_space<vmem>>, vector<256x512xbf16>
    %c0_4 = arith.constant 0 : index
    %c0_5 = arith.constant 0 : index
    %5 = vector.load %arg4[%c0_4, %c0_5] : memref<512x128xbf16, #tpu.memory_space<vmem>>, vector<512x128xbf16>
    %cst = arith.constant dense<0.000000e+00> : vector<256x128xf32>
    %6 = tpu.matmul %4, %5, %cst {dimension_numbers = #tpu.dot_dimension_numbers<[1], [0], [0], [1], [0, 0, 1, 1], [], []>} : vector<256x512xbf16>, vector<512x128xbf16>, vector<256x128xf32> -> vector<256x128xf32>
    %7 = arith.addf %3, %6 : vector<256x128xf32>
    %c0_6 = arith.constant 0 : index
    %c0_7 = arith.constant 0 : index
    %8 = vector.load %arg7[%c0_6, %c0_7] : memref<256x128xf32, #tpu.memory_space<vmem>>, vector<256x128xf32>
    tpu.vector_store %arg7[%c0_6, %c0_7], %7 {strides = array<i32>} : memref<256x128xf32, #tpu.memory_space<vmem>>, vector<256x128xf32>,
    %c0_i32_8 = arith.constant 0 : i32
    %9 = arith.cmpi eq, %arg2, %c0_i32_8 : i32
    %10 = arith.extui %9 : i1 to i32
    %c0_i32_9 = arith.constant 0 : i32
    %11 = arith.cmpi ne, %10, %c0_i32_9 : i32
    scf.if %11 {
      %c0_10 = arith.constant 0 : index
      %c0_11 = arith.constant 0 : index
      %12 = vector.load %arg7[%c0_10, %c0_11] : memref<256x128xf32, #tpu.memory_space<vmem>>, vector<256x128xf32>
      %c0_12 = arith.constant 0 : index
      %c0_13 = arith.constant 0 : index
      %13 = vector.load %arg5[%c0_12, %c0_13] : memref<256x128xbf16, #tpu.memory_space<vmem>>, vector<256x128xbf16>
      %14 = arith.extf %13 : vector<256x128xbf16> to vector<256x128xf32>
      %15 = arith.addf %12, %14 : vector<256x128xf32>
      %16 = arith.truncf %15 : vector<256x128xf32> to vector<256x128xbf16>
      %c0_14 = arith.constant 0 : index
      %c0_15 = arith.constant 0 : index
      %17 = vector.load %arg6[%c0_14, %c0_15] : memref<256x128xbf16, #tpu.memory_space<vmem>>, vector<256x128xbf16>
      tpu.vector_store %arg6[%c0_14, %c0_15], %16 {strides = array<i32>} : memref<256x128xbf16, #tpu.memory_space<vmem>>, vector<256x128xbf16>,
    } else {
    }
    return
  }
  func.func @transform_0(%arg0: i32, %arg1: i32, %arg2: i32) -> (i32, i32) {
    %c0_i32 = arith.constant 0 : i32
    return %arg0, %arg2 : i32, i32
  }
  func.func @transform_1(%arg0: i32, %arg1: i32, %arg2: i32) -> (i32, i32) {
    %c0_i32 = arith.constant 0 : i32
    return %arg2, %arg1 : i32, i32
  }
  func.func @transform_2(%arg0: i32, %arg1: i32, %arg2: i32) -> (i32, i32) {
    %c0_i32 = arith.constant 0 : i32
    return %arg0, %arg1 : i32, i32
  }
  func.func @transform_3(%arg0: i32, %arg1: i32, %arg2: i32) -> (i32, i32) {
    %c0_i32 = arith.constant 0 : i32
    return %arg0, %arg1 : i32, i32
  }
}

module attributes {stable_mosaic.version = 11 : i64} {
  func.func @_ln_matmul_kernel(%arg0: i32, %arg1: i32, %arg2: memref<256x128xbf16, #tpu.memory_space<vmem>>, %arg3: memref<128x256xbf16, #tpu.memory_space<vmem>>, %arg4: memref<1x128xf32, #tpu.memory_space<vmem>>, %arg5: memref<1x128xf32, #tpu.memory_space<vmem>>, %arg6: memref<256x256xf32, #tpu.memory_space<vmem>>) attributes {dimension_semantics = [#tpu.dimension_semantics<parallel>, #tpu.dimension_semantics<parallel>], iteration_bounds = array<i64: 1, 2>, scalar_prefetch = 0 : i64, scratch_operands = 0 : i64, tpu.core_type = #tpu.core_type<tc>, window_params = [{transform_indices = @transform_0, window_bounds = array<i64: 256, 128>}, {transform_indices = @transform_1, window_bounds = array<i64: 128, 256>}, {pipeline_mode = #tpu.pipeline_mode<synchronous>, transform_indices = @transform_2, window_bounds = array<i64: 1, 128>}, {pipeline_mode = #tpu.pipeline_mode<synchronous>, transform_indices = @transform_3, window_bounds = array<i64: 1, 128>}, {transform_indices = @transform_4, window_bounds = array<i64: 256, 256>}]} {
    %c0 = arith.constant 0 : index
    %c0_0 = arith.constant 0 : index
    %0 = vector.load %arg2[%c0, %c0_0] : memref<256x128xbf16, #tpu.memory_space<vmem>>, vector<256x128xbf16>
    %1 = arith.extf %0 : vector<256x128xbf16> to vector<256x128xf32>
    %cst = arith.constant dense<0.000000e+00> : vector<256xf32>
    %2 = vector.multi_reduction <add>, %1, %cst [1] : vector<256x128xf32> to vector<256xf32>
    %3 = vector.shape_cast %2 : vector<256xf32> to vector<256x1xf32>
    %cst_1 = arith.constant 1.280000e+02 : f32
    %4 = vector.broadcast %cst_1 : f32 to vector<256x1xf32>
    %5 = arith.divf %3, %4 : vector<256x1xf32>
    %6 = vector.broadcast %5 : vector<256x1xf32> to vector<256x128xf32>
    %7 = arith.subf %1, %6 : vector<256x128xf32>
    %8 = arith.mulf %7, %7 : vector<256x128xf32>
    %cst_2 = arith.constant dense<0.000000e+00> : vector<256xf32>
    %9 = vector.multi_reduction <add>, %8, %cst_2 [1] : vector<256x128xf32> to vector<256xf32>
    %10 = vector.shape_cast %9 : vector<256xf32> to vector<256x1xf32>
    %cst_3 = arith.constant 1.280000e+02 : f32
    %11 = vector.broadcast %cst_3 : f32 to vector<256x1xf32>
    %12 = arith.divf %10, %11 : vector<256x1xf32>
    %13 = vector.broadcast %5 : vector<256x1xf32> to vector<256x128xf32>
    %14 = arith.subf %1, %13 : vector<256x128xf32>
    %cst_4 = arith.constant 9.99999974E-6 : f32
    %15 = vector.broadcast %cst_4 : f32 to vector<256x1xf32>
    %16 = arith.addf %12, %15 : vector<256x1xf32>
    %17 = math.rsqrt %16 : vector<256x1xf32>
    %18 = vector.broadcast %17 : vector<256x1xf32> to vector<256x128xf32>
    %19 = arith.mulf %14, %18 : vector<256x128xf32>
    %c0_5 = arith.constant 0 : index
    %c0_6 = arith.constant 0 : index
    %20 = vector.load %arg4[%c0_5, %c0_6] : memref<1x128xf32, #tpu.memory_space<vmem>>, vector<1x128xf32>
    %21 = vector.broadcast %20 : vector<1x128xf32> to vector<256x128xf32>
    %22 = arith.mulf %19, %21 : vector<256x128xf32>
    %c0_7 = arith.constant 0 : index
    %c0_8 = arith.constant 0 : index
    %23 = vector.load %arg5[%c0_7, %c0_8] : memref<1x128xf32, #tpu.memory_space<vmem>>, vector<1x128xf32>
    %24 = vector.broadcast %23 : vector<1x128xf32> to vector<256x128xf32>
    %25 = arith.addf %22, %24 : vector<256x128xf32>
    %26 = arith.truncf %25 : vector<256x128xf32> to vector<256x128xbf16>
    %c0_9 = arith.constant 0 : index
    %c0_10 = arith.constant 0 : index
    %27 = vector.load %arg3[%c0_9, %c0_10] : memref<128x256xbf16, #tpu.memory_space<vmem>>, vector<128x256xbf16>
    %cst_11 = arith.constant dense<0.000000e+00> : vector<256x256xf32>
    %28 = tpu.matmul %26, %27, %cst_11 {dimension_numbers = #tpu.dot_dimension_numbers<[1], [0], [0], [1], [0, 0, 1, 1], [], []>} : vector<256x128xbf16>, vector<128x256xbf16>, vector<256x256xf32> -> vector<256x256xf32>
    %c0_12 = arith.constant 0 : index
    %c0_13 = arith.constant 0 : index
    %29 = vector.load %arg6[%c0_12, %c0_13] : memref<256x256xf32, #tpu.memory_space<vmem>>, vector<256x256xf32>
    tpu.vector_store %arg6[%c0_12, %c0_13], %28 {strides = array<i32>} : memref<256x256xf32, #tpu.memory_space<vmem>>, vector<256x256xf32>,
    return
  }
  func.func @transform_0(%arg0: i32, %arg1: i32) -> (i32, i32) {
    %c0_i32 = arith.constant 0 : i32
    %c0_i32_0 = arith.constant 0 : i32
    return %arg0, %c0_i32 : i32, i32
  }
  func.func @transform_1(%arg0: i32, %arg1: i32) -> (i32, i32) {
    %c0_i32 = arith.constant 0 : i32
    %c0_i32_0 = arith.constant 0 : i32
    return %c0_i32, %arg1 : i32, i32
  }
  func.func @transform_2(%arg0: i32, %arg1: i32) -> (i32, i32) {
    %c0_i32 = arith.constant 0 : i32
    %c0_i32_0 = arith.constant 0 : i32
    %c0_i32_1 = arith.constant 0 : i32
    return %c0_i32, %c0_i32_0 : i32, i32
  }
  func.func @transform_3(%arg0: i32, %arg1: i32) -> (i32, i32) {
    %c0_i32 = arith.constant 0 : i32
    %c0_i32_0 = arith.constant 0 : i32
    %c0_i32_1 = arith.constant 0 : i32
    return %c0_i32, %c0_i32_0 : i32, i32
  }
  func.func @transform_4(%arg0: i32, %arg1: i32) -> (i32, i32) {
    %c0_i32 = arith.constant 0 : i32
    return %arg0, %arg1 : i32, i32
  }
}

</mosaic_0001>

<bundles_post_ra>
// kernel: _lambda_.11
= control target key start
LH: loop header
LB: loop body
LE: loop exit
PB: predicated region body
PF: predicated region fallthrough
CT: control target
= control target key end

     0   :  { %s2015_s15 = smov 0   ;;  %s2017_s16 = smov 0   ;;  %s2677_s0 = inlined_call_operand.vmem [shape: bf16[256,128], index: 0, kind: input, shape index: {}]   ;;  %s2678_s1 = inlined_call_operand.vmem [shape: bf16[128,384], index: 1, kind: input, shape index: {}]   ;;  %s2679_s2 = inlined_call_operand.vmem [shape: f32[1,128], index: 2, kind: input, shape index: {}]   ;;  %s2680_s3 = inlined_call_operand.vmem [shape: f32[1,128], index: 3, kind: input, shape index: {}]   ;;  %s2681_s4 = inlined_call_operand.vmem [shape: bf16[256,384], index: 4, kind: output, shape index: {}]  }
   0x1   :  { %s2019_s17 = smov 0   ;;  %s2021_s18 = smov 0  }
   0x2   :  { %s2023_s19 = smov 0  }
   0x3 LB: > { %s23_s20 = sadd.s32 1, %s1984_s18  ;;  %s1488_s21 = sadd.s32 4294967295, %s1988_s19   ;;  %s1988_s19 = sphi %s2023_s19, %s14_s19   ;;  %s1984_s18 = sphi %s2021_s18, %s2686_s18   ;;  %s1980_s17 = sphi %s2019_s17, %s2685_s17   ;;  %s1976_s16 = sphi %s2017_s16, %s2684_s16   ;;  %s1972_s15 = sphi %s2015_s15, %s2683_s15  }
   0x4   : > { %p24_p0 = scmp.ge.s32.totalorder %s23_s20, 3  ;;  %p66_p1 = scmp.ne.s32.totalorder %s1976_s16, %s1972_s15 }
   0x5   : > { %p67_p2 = scmp.eq.s32.totalorder %s1988_s19, 0  ;;  %p140_p4 = scmp.eq.s32.totalorder %s1488_s21, 2 }
   0x6   : > { %s2688_s20 = smov (%p24_p0, %s23_s20), 0  ;;  %s59_s23 = sadd.s32 1, %s1976_s16 }
   0x7   : > { %p68_p3 = por %p67_p2, %p66_p1  ;;  %s56_s22 = ssub.s32 %s1984_s18, %s2688_s20 }
   0x8   : > { %p57_p5 = scmp.eq.s32.totalorder %s56_s22, 0  ;;  %p2050_p6 = por %p140_p4, %p66_p1 }
   0x9   : > { %p1492_p7 = scmp.ge.s32.totalorder %s1988_s19, 3 }
   0xa   : > { %s2055_s25 = scalar_select %p57_p5, %s1976_s16, %s59_s23  }
   0xb   : > { %177 = sbr.rel (%p1492_p7) target bundleno = 30 (0x1e), region = 28 }
  0x10   : > { %180 = sbr.rel (!%p68_p3) target bundleno = 30 (0x1e), region = 32  ;;  %s182_s26 = sand.u32 (%p68_p3), 1, %s1976_s16  }
  0x11   : > { %s1494_s27 = sshll.u32 (%p68_p3), %s1984_s18, 2  ;;  %s1493_s28 = sshll.u32 (%p68_p3), %s182_s26, 6 }
  0x12   : > { %s2063_s5 = scalar_lea.vmem (%p68_p3), %s2678_s1, %s1494_s27  ;;  %s184_s6 = scalar_lea.vmem (%p68_p3), [#allocation2], %s1493_s28 }
  0x13   : > { %v203_v0 = vld [vmem:[%s2063_s5] sm:$0xf] (%p68_p3)  ;;  %v205_v1 = vld [vmem:[%s2063_s5 + $0xc] sm:$0xf] (%p68_p3)  ;;  %v207_v2 = vld [vmem:[%s2063_s5 + $0x18] sm:$0xf] (%p68_p3) }
  0x14   : > { %204 = vst [vmem:[%s184_s6] sm:$0xf] (%p68_p3), %v203_v0  ;;  %206 = vst [vmem:[%s184_s6 + $0x4] sm:$0xf] (%p68_p3), %v205_v1  ;;  %v209_v3 = vld [vmem:[%s2063_s5 + $0x24] sm:$0xf] (%p68_p3) }
  0x15   : > { %v211_v4 = vld [vmem:[%s2063_s5 + $0x30] sm:$0xf]  ;;  %208 = vst [vmem:[%s184_s6 + $0x8] sm:$0xf] %v207_v2  ;;  %210 = vst [vmem:[%s184_s6 + $0xc] sm:$0xf] %v209_v3 }
  0x16   : > { %212 = vst [vmem:[%s184_s6 + $0x10] sm:$0xf] %v211_v4  ;;  %v213_v5 = vld [vmem:[%s2063_s5 + $0x3c] sm:$0xf]  ;;  %v215_v6 = vld [vmem:[%s2063_s5 + $0x48] sm:$0xf] }
  0x17   : > { %v217_v7 = vld [vmem:[%s2063_s5 + $0x54] sm:$0xf]  ;;  %214 = vst [vmem:[%s184_s6 + $0x14] sm:$0xf] %v213_v5  ;;  %216 = vst [vmem:[%s184_s6 + $0x18] sm:$0xf] %v215_v6 }
  0x18   : > { %218 = vst [vmem:[%s184_s6 + $0x1c] sm:$0xf] %v217_v7  ;;  %v219_v8 = vld [vmem:[%s2063_s5 + $0x60] sm:$0xf]  ;;  %v221_v9 = vld [vmem:[%s2063_s5 + $0x6c] sm:$0xf] }
  0x19   : > { %v223_v10 = vld [vmem:[%s2063_s5 + $0x78] sm:$0xf]  ;;  %220 = vst [vmem:[%s184_s6 + $0x20] sm:$0xf] %v219_v8  ;;  %222 = vst [vmem:[%s184_s6 + $0x24] sm:$0xf] %v221_v9 }
  0x1a   : > { %224 = vst [vmem:[%s184_s6 + $0x28] sm:$0xf] %v223_v10  ;;  %v225_v11 = vld [vmem:[%s2063_s5 + $0x84] sm:$0xf]  ;;  %v227_v12 = vld [vmem:[%s2063_s5 + $0x90] sm:$0xf] }
  0x1b   : > { %v229_v13 = vld [vmem:[%s2063_s5 + $0x9c] sm:$0xf]  ;;  %226 = vst [vmem:[%s184_s6 + $0x2c] sm:$0xf] %v225_v11  ;;  %228 = vst [vmem:[%s184_s6 + $0x30] sm:$0xf] %v227_v12 }
  0x1c   : > { %230 = vst [vmem:[%s184_s6 + $0x34] sm:$0xf] %v229_v13  ;;  %v231_v14 = vld [vmem:[%s2063_s5 + $0xa8] sm:$0xf]  ;;  %v233_v15 = vld [vmem:[%s2063_s5 + $0xb4] sm:$0xf] }
  0x1d   : > { %232 = vst [vmem:[%s184_s6 + $0x38] sm:$0xf] %v231_v14  ;;  %234 = vst [vmem:[%s184_s6 + $0x3c] sm:$0xf] %v233_v15 }
  0x1e PF: > { %p1495_p8 = scmp.ge.s32.totalorder %s1988_s19, 1  ;;  %p289_p9 = scmp.lt.s32.totalorder %s1988_s19, 4 }
  0x20   : > { %p290_p10 = pnand %p1495_p8, %p289_p9 }
  0x21   : > { %s296_s29 = sand.u32 (!%p290_p10), 1, %s1972_s15  }
  0x22   : > { %293 = sbr.rel (%p290_p10) target bundleno = 624 (0x270), region = 73  ;;  %s1496_s30 = sshll.u32 (!%p290_p10), %s296_s29, 6 }
  0x23   : > { %s2320_s5 = scalar_lea.vmem (!%p290_p10), [#allocation2], %s1496_s30  ;;  %s1497_s10 = sshll.u32 (!%p290_p10), %s296_s29, 7 }
  0x24   : > { %s2572_s11 = scalar_lea.vmem (!%p290_p10), [#allocation3], %s1497_s10 }
  0x27   : > { %v2086_v16 = vld [vmem:[%s2677_s0] sm:$0xff]   ;;  %v2104_v22 = vld [vmem:[%s2677_s0 + $0x8] sm:$0xff]   ;;  %v2126_v28 = vld [vmem:[%s2677_s0 + $0x10] sm:$0xff]   ;;  %s1541_s15 = sshll.u32 (%p2050_p6), %s1980_s17, 2 }
  0x28   : > { %v2091_v17 = vld [vmem:[%s2677_s0 + $0x40] sm:$0xff]   ;;  %v1578_v18 = vunpack.c.l.bf16 %v2086_v16  ;;  %v1579_v20 = vunpack.c.h.bf16 %v2086_v16  ;;  %v1582_v23 = vunpack.c.l.bf16 %v2104_v22  ;;  %v1583_v24 = vunpack.c.h.bf16 %v2104_v22  ;;  %v2115_v25 = vld [vmem:[%s2677_s0 + $0x48] sm:$0xff]   ;;  %v2137_v31 = vld [vmem:[%s2677_s0 + $0x50] sm:$0xff]   ;;  %s2598_s14 = scalar_lea.vmem (%p2050_p6), %s2681_s4, %s1541_s15 }
  0x29   : > { %v1610_v19 = vunpack.c.l.bf16 %v2091_v17  ;;  %v1611_v21 = vunpack.c.h.bf16 %v2091_v17  ;;  %v1614_v26 = vunpack.c.l.bf16 %v2115_v25  ;;  %v1615_v27 = vunpack.c.h.bf16 %v2115_v25  ;;  %v2148_v34 = vld [vmem:[%s2677_s0 + $0x18] sm:$0xff]   ;;  %v2170_v40 = vld [vmem:[%s2677_s0 + $0x20] sm:$0xff]   ;;  %v2192_v46 = vld [vmem:[%s2677_s0 + $0x28] sm:$0xff]  }
  0x2a   : > { %397 = vadd.xlane.f32.xlu0 %v1578_v18  ;;  %v1586_v29 = vunpack.c.l.bf16 %v2126_v28  ;;  %v1587_v30 = vunpack.c.h.bf16 %v2126_v28  ;;  %v1618_v32 = vunpack.c.l.bf16 %v2137_v31  ;;  %v1619_v33 = vunpack.c.h.bf16 %v2137_v31  ;;  %v2159_v37 = vld [vmem:[%s2677_s0 + $0x58] sm:$0xff]   ;;  %v2181_v43 = vld [vmem:[%s2677_s0 + $0x60] sm:$0xff]   ;;  %v2203_v49 = vld [vmem:[%s2677_s0 + $0x68] sm:$0xff]  }
  0x2b   : > { %429 = vadd.xlane.f32.xlu1 %v1610_v19  ;;  %v1590_v35 = vunpack.c.l.bf16 %v2148_v34  ;;  %v1591_v36 = vunpack.c.h.bf16 %v2148_v34  ;;  %v1622_v38 = vunpack.c.l.bf16 %v2159_v37  ;;  %v1623_v39 = vunpack.c.h.bf16 %v2159_v37  ;;  %v2214_v52 = vld [vmem:[%s2677_s0 + $0x30] sm:$0xff]   ;;  %v2236_v58 = vld [vmem:[%s2677_s0 + $0x38] sm:$0xff]  }
  0x2c   : > { %v1594_v41 = vunpack.c.l.bf16 %v2170_v40  ;;  %v1595_v42 = vunpack.c.h.bf16 %v2170_v40  ;;  %v1626_v44 = vunpack.c.l.bf16 %v2181_v43  ;;  %v1627_v45 = vunpack.c.h.bf16 %v2181_v43  ;;  %v2225_v55 = vld [vmem:[%s2677_s0 + $0x70] sm:$0xff]   ;;  %v2247_v61 = vld [vmem:[%s2677_s0 + $0x78] sm:$0xff]  }
  0x2d   : > { %v1598_v47 = vunpack.c.l.bf16 %v2192_v46  ;;  %v1599_v48 = vunpack.c.h.bf16 %v2192_v46  ;;  %v1630_v50 = vunpack.c.l.bf16 %v2203_v49  ;;  %v1631_v51 = vunpack.c.h.bf16 %v2203_v49  ;;  %v1878_v28 = vld [vmem:[%s2320_s5 + $0x38] sm:$0xff]  }
  0x2e   : > { %399 = vadd.xlane.f32.xlu0 %v1579_v20  ;;  %v1602_v53 = vunpack.c.l.bf16 %v2214_v52  ;;  %v1603_v54 = vunpack.c.h.bf16 %v2214_v52  ;;  %v1634_v56 = vunpack.c.l.bf16 %v2225_v55  ;;  %v1635_v57 = vunpack.c.h.bf16 %v2225_v55  ;;  %1774 = vmatprep.subr.bf16.mxu0 %v1878_v28 }
  0x2f   : > { %431 = vadd.xlane.f32.xlu1 %v1611_v21  ;;  %v1606_v59 = vunpack.c.l.bf16 %v2236_v58  ;;  %v1607_v60 = vunpack.c.h.bf16 %v2236_v58  ;;  %v1638_v62 = vunpack.c.l.bf16 %v2247_v61  ;;  %v1639_v63 = vunpack.c.h.bf16 %v2247_v61  ;;  %1822 = vmatprep.subr.bf16.mxu1 %v1878_v28 }
  0x30   : > { %1775 = vmatpush3.bf16.msra.mxu0 %v1878_v28  ;;  %1830 = vmatpush3.bf16.msra.mxu1 %v1878_v28 }
  0x32   : > { %401 = vadd.xlane.f32.xlu0 %v1582_v23 }
  0x33   : > { %403 = vadd.xlane.f32.xlu1 %v1583_v24 }
  0x36   : > { %433 = vadd.xlane.f32.xlu0 %v1614_v26 }
  0x37   : > { %435 = vadd.xlane.f32.xlu1 %v1615_v27 }
  0x3a   : > { %405 = vadd.xlane.f32.xlu0 %v1586_v29 }
  0x3b   : > { %407 = vadd.xlane.f32.xlu1 %v1587_v30 }
  0x3e   : > { %437 = vadd.xlane.f32.xlu0 %v1618_v32 }
  0x3f   : > { %439 = vadd.xlane.f32.xlu1 %v1619_v33 }
  0x42   : > { %409 = vadd.xlane.f32.xlu0 %v1590_v35 }
  0x43   : > { %411 = vadd.xlane.f32.xlu1 %v1591_v36 }
  0x46   : > { %441 = vadd.xlane.f32.xlu0 %v1622_v38 }
  0x47   : > { %443 = vadd.xlane.f32.xlu1 %v1623_v39 }
  0x4a   : > { %413 = vadd.xlane.f32.xlu0 %v1594_v41 }
  0x4b   : > { %415 = vadd.xlane.f32.xlu1 %v1595_v42 }
  0x4e   : > { %445 = vadd.xlane.f32.xlu0 %v1626_v44 }
  0x4f   : > { %447 = vadd.xlane.f32.xlu1 %v1627_v45 }
  0x52   : > { %417 = vadd.xlane.f32.xlu0 %v1598_v47 }
  0x53   : > { %419 = vadd.xlane.f32.xlu1 %v1599_v48 }
  0x56   : > { %449 = vadd.xlane.f32.xlu0 %v1630_v50 }
  0x57   : > { %451 = vadd.xlane.f32.xlu1 %v1631_v51 }
  0x5a   : > { %421 = vadd.xlane.f32.xlu0 %v1602_v53 }
  0x5b   : > { %423 = vadd.xlane.f32.xlu1 %v1603_v54 }
  0x5e   : > { %453 = vadd.xlane.f32.xlu0 %v1634_v56 }
  0x5f   : > { %455 = vadd.xlane.f32.xlu1 %v1635_v57 }
  0x62   : > { %425 = vadd.xlane.f32.xlu0 %v1606_v59 }
  0x63   : > { %427 = vadd.xlane.f32.xlu1 %v1607_v60 }
  0x66   : > { %457 = vadd.xlane.f32.xlu0 %v1638_v62 }
  0x67   : > { %459 = vadd.xlane.f32.xlu1 %v1639_v63 }
  0xb3   : > { %v398_v0 = vpop.xlane.xlu0 %397 }
  0xb4   : > { %v430_v1 = vpop.xlane.xlu1 %429  ;;  %v462_v2 = vmul.f32 0.0078125, %v398_v0 }
  0xb5   : > { %v478_v3 = vmul.f32 0.0078125, %v430_v1 }
  0xb6   : > { %v2261_v4 = vsub.f32 %v1578_v18, %v462_v2 }
  0xb7   : > { %v2265_v5 = vsub.f32 %v1610_v19, %v478_v3  ;;  %v400_v6 = vpop.xlane.xlu0 %399 }
  0xb8   : > { %v432_v7 = vpop.xlane.xlu1 %431  ;;  %v463_v8 = vmul.f32 0.0078125, %v400_v6  ;;  %v526_v9 = vmul.f32 %v2261_v4, %v2261_v4 }
  0xb9   : > { %v479_v10 = vmul.f32 0.0078125, %v432_v7  ;;  %v542_v13 = vmul.f32 %v2265_v5, %v2265_v5 }
  0xba   : > { %v2271_v11 = vsub.f32 %v1579_v20, %v463_v8  ;;  %558 = vadd.xlane.f32.xlu0 %v526_v9 }
  0xbb   : > { %v2275_v12 = vsub.f32 %v1611_v21, %v479_v10  ;;  %v402_v14 = vpop.xlane.xlu0 %401 }
  0xbc   : > { %v404_v15 = vpop.xlane.xlu1 %403  ;;  %v464_v18 = vmul.f32 0.0078125, %v402_v14  ;;  %v527_v19 = vmul.f32 %v2271_v11, %v2271_v11 }
  0xbd   : > { %v465_v0 = vmul.f32 0.0078125, %v404_v15  ;;  %v543_v20 = vmul.f32 %v2275_v12, %v2275_v12 }
  0xbe   : > { %v2283_v16 = vsub.f32 %v1582_v23, %v464_v18  ;;  %590 = vadd.xlane.f32.xlu0 %v542_v13  ;;  %560 = vadd.xlane.f32.xlu1 %v527_v19 }
  0xbf   : > { %v2287_v17 = vsub.f32 %v1583_v24, %v465_v0  ;;  %v434_v21 = vpop.xlane.xlu0 %433 }
  0xc0   : > { %v436_v1 = vpop.xlane.xlu1 %435  ;;  %v480_v2 = vmul.f32 0.0078125, %v434_v21  ;;  %v528_v3 = vmul.f32 %v2283_v16, %v2283_v16 }
  0xc1   : > { %v481_v6 = vmul.f32 0.0078125, %v436_v1  ;;  %v529_v24 = vmul.f32 %v2287_v17, %v2287_v17 }
  0xc2   : > { %v2295_v23 = vsub.f32 %v1614_v26, %v480_v2  ;;  %592 = vadd.xlane.f32.xlu1 %v543_v20  ;;  %562 = vadd.xlane.f32.xlu0 %v528_v3 }
  0xc3   : > { %v2299_v22 = vsub.f32 %v1615_v27, %v481_v6  ;;  %v406_v7 = vpop.xlane.xlu0 %405 }
  0xc4   : > { %v408_v8 = vpop.xlane.xlu1 %407  ;;  %v466_v9 = vmul.f32 0.0078125, %v406_v7  ;;  %v544_v10 = vmul.f32 %v2295_v23, %v2295_v23 }
  0xc5   : > { %v467_v13 = vmul.f32 0.0078125, %v408_v8  ;;  %v545_v27 = vmul.f32 %v2299_v22, %v2299_v22 }
  0xc6   : > { %v2307_v26 = vsub.f32 %v1586_v29, %v466_v9  ;;  %564 = vadd.xlane.f32.xlu1 %v529_v24  ;;  %594 = vadd.xlane.f32.xlu0 %v544_v10 }
  0xc7   : > { %v2311_v25 = vsub.f32 %v1587_v30, %v467_v13  ;;  %v438_v14 = vpop.xlane.xlu0 %437 }
  0xc8   : > { %v440_v15 = vpop.xlane.xlu1 %439  ;;  %v482_v18 = vmul.f32 0.0078125, %v438_v14  ;;  %v530_v19 = vmul.f32 %v2307_v26, %v2307_v26 }
  0xc9   : > { %v483_v29 = vmul.f32 0.0078125, %v440_v15  ;;  %v531_v20 = vmul.f32 %v2311_v25, %v2311_v25 }
  0xca   : > { %v2325_v30 = vsub.f32 %v1618_v32, %v482_v18  ;;  %596 = vadd.xlane.f32.xlu1 %v545_v27  ;;  %566 = vadd.xlane.f32.xlu0 %v530_v19  ;;  %v1879_v32 = vld [vmem:[%s2320_s5 + $0x30] sm:$0xff]  }
  0xcb   : > { %v2329_v0 = vsub.f32 %v1619_v33, %v483_v29  ;;  %v410_v21 = vpop.xlane.xlu0 %409  ;;  %1776 = vmatprep.subr.bf16.mxu0 %v1879_v32  ;;  %1823 = vmatprep.subr.bf16.mxu1 %v1879_v32 }
  0xcc   : > { %v412_v1 = vpop.xlane.xlu1 %411  ;;  %v468_v2 = vmul.f32 0.0078125, %v410_v21  ;;  %v546_v3 = vmul.f32 %v2325_v30, %v2325_v30  ;;  %1777 = vmatpush3.bf16.msra.mxu0 %v1879_v32  ;;  %1831 = vmatpush3.bf16.msra.mxu1 %v1879_v32 }
  0xcd   : > { %v469_v6 = vmul.f32 0.0078125, %v412_v1  ;;  %v547_v24 = vmul.f32 %v2329_v0, %v2329_v0 }
  0xce   : > { %v2338_v31 = vsub.f32 %v1590_v35, %v468_v2  ;;  %568 = vadd.xlane.f32.xlu1 %v531_v20  ;;  %598 = vadd.xlane.f32.xlu0 %v546_v3  ;;  %v1880_v35 = vld [vmem:[%s2320_s5 + $0x28] sm:$0xff]  }
  0xcf   : > { %v2342_v33 = vsub.f32 %v1591_v36, %v469_v6  ;;  %v442_v7 = vpop.xlane.xlu0 %441  ;;  %1778 = vmatprep.subr.bf16.mxu0 %v1880_v35  ;;  %1824 = vmatprep.subr.bf16.mxu1 %v1880_v35 }
  0xd0   : > { %v444_v8 = vpop.xlane.xlu1 %443  ;;  %v484_v9 = vmul.f32 0.0078125, %v442_v7  ;;  %v532_v10 = vmul.f32 %v2338_v31, %v2338_v31  ;;  %1779 = vmatpush3.bf16.msra.mxu0 %v1880_v35  ;;  %1832 = vmatpush3.bf16.msra.mxu1 %v1880_v35 }
  0xd1   : > { %v485_v13 = vmul.f32 0.0078125, %v444_v8  ;;  %v533_v27 = vmul.f32 %v2342_v33, %v2342_v33 }
  0xd2   : > { %v2351_v34 = vsub.f32 %v1622_v38, %v484_v9  ;;  %600 = vadd.xlane.f32.xlu1 %v547_v24  ;;  %570 = vadd.xlane.f32.xlu0 %v532_v10  ;;  %v1881_v38 = vld [vmem:[%s2320_s5 + $0x20] sm:$0xff]  }
  0xd3   : > { %v2355_v36 = vsub.f32 %v1623_v39, %v485_v13  ;;  %v414_v14 = vpop.xlane.xlu0 %413  ;;  %1780 = vmatprep.subr.bf16.mxu0 %v1881_v38  ;;  %1825 = vmatprep.subr.bf16.mxu1 %v1881_v38 }
  0xd4   : > { %v416_v15 = vpop.xlane.xlu1 %415  ;;  %v470_v18 = vmul.f32 0.0078125, %v414_v14  ;;  %v548_v19 = vmul.f32 %v2351_v34, %v2351_v34  ;;  %1781 = vmatpush3.bf16.msra.mxu0 %v1881_v38  ;;  %1833 = vmatpush3.bf16.msra.mxu1 %v1881_v38 }
  0xd5   : > { %v471_v29 = vmul.f32 0.0078125, %v416_v15  ;;  %v549_v28 = vmul.f32 %v2355_v36, %v2355_v36 }
  0xd6   : > { %v2364_v37 = vsub.f32 %v1594_v41, %v470_v18  ;;  %572 = vadd.xlane.f32.xlu1 %v533_v27  ;;  %602 = vadd.xlane.f32.xlu0 %v548_v19  ;;  %v1882_v41 = vld [vmem:[%s2320_s5 + $0x18] sm:$0xff]  }
  0xd7   : > { %v2368_v39 = vsub.f32 %v1595_v42, %v471_v29  ;;  %v446_v20 = vpop.xlane.xlu0 %445  ;;  %1782 = vmatprep.subr.bf16.mxu0 %v1882_v41  ;;  %1826 = vmatprep.subr.bf16.mxu1 %v1882_v41 }
  0xd8   : > { %v448_v21 = vpop.xlane.xlu1 %447  ;;  %v486_v1 = vmul.f32 0.0078125, %v446_v20  ;;  %v534_v2 = vmul.f32 %v2364_v37, %v2364_v37  ;;  %1783 = vmatpush3.bf16.msra.mxu0 %v1882_v41  ;;  %1834 = vmatpush3.bf16.msra.mxu1 %v1882_v41 }
  0xd9   : > { %v487_v3 = vmul.f32 0.0078125, %v448_v21  ;;  %v535_v6 = vmul.f32 %v2368_v39, %v2368_v39 }
  0xda   : > { %v2377_v40 = vsub.f32 %v1626_v44, %v486_v1  ;;  %604 = vadd.xlane.f32.xlu1 %v549_v28  ;;  %574 = vadd.xlane.f32.xlu0 %v534_v2  ;;  %v1883_v44 = vld [vmem:[%s2320_s5 + $0x10] sm:$0xff]  }
  0xdb   : > { %v2381_v42 = vsub.f32 %v1627_v45, %v487_v3  ;;  %v418_v32 = vpop.xlane.xlu0 %417  ;;  %1784 = vmatprep.subr.bf16.mxu0 %v1883_v44  ;;  %1827 = vmatprep.subr.bf16.mxu1 %v1883_v44 }
  0xdc   : > { %v420_v24 = vpop.xlane.xlu1 %419  ;;  %v472_v7 = vmul.f32 0.0078125, %v418_v32  ;;  %v550_v8 = vmul.f32 %v2377_v40, %v2377_v40  ;;  %1785 = vmatpush3.bf16.msra.mxu0 %v1883_v44  ;;  %1835 = vmatpush3.bf16.msra.mxu1 %v1883_v44 }
  0xdd   : > { %v473_v9 = vmul.f32 0.0078125, %v420_v24  ;;  %v551_v10 = vmul.f32 %v2381_v42, %v2381_v42 }
  0xde   : > { %v2390_v43 = vsub.f32 %v1598_v47, %v472_v7  ;;  %576 = vadd.xlane.f32.xlu1 %v535_v6  ;;  %606 = vadd.xlane.f32.xlu0 %v550_v8  ;;  %v1884_v47 = vld [vmem:[%s2320_s5 + $0x8] sm:$0xff]  }
  0xdf   : > { %v2394_v45 = vsub.f32 %v1599_v48, %v473_v9  ;;  %v450_v13 = vpop.xlane.xlu0 %449  ;;  %1786 = vmatprep.subr.bf16.mxu0 %v1884_v47  ;;  %1828 = vmatprep.subr.bf16.mxu1 %v1884_v47 }
  0xe0   : > { %v452_v35 = vpop.xlane.xlu1 %451  ;;  %v488_v27 = vmul.f32 0.0078125, %v450_v13  ;;  %v536_v14 = vmul.f32 %v2390_v43, %v2390_v43  ;;  %1787 = vmatpush3.bf16.msra.mxu0 %v1884_v47  ;;  %1836 = vmatpush3.bf16.msra.mxu1 %v1884_v47 }
  0xe1   : > { %v489_v15 = vmul.f32 0.0078125, %v452_v35  ;;  %v537_v18 = vmul.f32 %v2394_v45, %v2394_v45 }
  0xe2   : > { %v2403_v46 = vsub.f32 %v1630_v50, %v488_v27  ;;  %608 = vadd.xlane.f32.xlu1 %v551_v10  ;;  %578 = vadd.xlane.f32.xlu0 %v536_v14  ;;  %v1885_v50 = vld [vmem:[%s2320_s5] sm:$0xff]  }
  0xe3   : > { %v2407_v48 = vsub.f32 %v1631_v51, %v489_v15  ;;  %v422_v19 = vpop.xlane.xlu0 %421  ;;  %1788 = vmatprep.subr.bf16.mxu0 %v1885_v50  ;;  %1829 = vmatprep.subr.bf16.mxu1 %v1885_v50 }
  0xe4   : > { %v424_v29 = vpop.xlane.xlu1 %423  ;;  %v474_v38 = vmul.f32 0.0078125, %v422_v19  ;;  %v552_v28 = vmul.f32 %v2403_v46, %v2403_v46  ;;  %1789 = vmatpush3.bf16.msra.mxu0 %v1885_v50  ;;  %1837 = vmatpush3.bf16.msra.mxu1 %v1885_v50 }
  0xe5   : > { %v475_v20 = vmul.f32 0.0078125, %v424_v29  ;;  %v553_v21 = vmul.f32 %v2407_v48, %v2407_v48 }
  0xe6   : > { %v2416_v49 = vsub.f32 %v1602_v53, %v474_v38  ;;  %580 = vadd.xlane.f32.xlu1 %v537_v18  ;;  %610 = vadd.xlane.f32.xlu0 %v552_v28 }
  0xe7   : > { %v2420_v51 = vsub.f32 %v1603_v54, %v475_v20  ;;  %v454_v1 = vpop.xlane.xlu0 %453 }
  0xe8   : > { %v456_v2 = vpop.xlane.xlu1 %455  ;;  %v490_v3 = vmul.f32 0.0078125, %v454_v1  ;;  %v538_v41 = vmul.f32 %v2416_v49, %v2416_v49 }
  0xe9   : > { %v491_v6 = vmul.f32 0.0078125, %v456_v2  ;;  %v539_v54 = vmul.f32 %v2420_v51, %v2420_v51 }
  0xea   : > { %v2428_v53 = vsub.f32 %v1634_v56, %v490_v3  ;;  %612 = vadd.xlane.f32.xlu1 %v553_v21  ;;  %582 = vadd.xlane.f32.xlu0 %v538_v41 }
  0xeb   : > { %v2432_v52 = vsub.f32 %v1635_v57, %v491_v6  ;;  %v426_v32 = vpop.xlane.xlu0 %425 }
  0xec   : > { %v428_v24 = vpop.xlane.xlu1 %427  ;;  %v476_v7 = vmul.f32 0.0078125, %v426_v32  ;;  %v554_v8 = vmul.f32 %v2428_v53, %v2428_v53 }
  0xed   : > { %v477_v9 = vmul.f32 0.0078125, %v428_v24  ;;  %v555_v57 = vmul.f32 %v2432_v52, %v2432_v52 }
  0xee   : > { %v2440_v56 = vsub.f32 %v1606_v59, %v476_v7  ;;  %584 = vadd.xlane.f32.xlu1 %v539_v54  ;;  %614 = vadd.xlane.f32.xlu0 %v554_v8 }
  0xef   : > { %v2444_v55 = vsub.f32 %v1607_v60, %v477_v9  ;;  %v458_v44 = vpop.xlane.xlu0 %457 }
  0xf0   : > { %v460_v10 = vpop.xlane.xlu1 %459  ;;  %v492_v13 = vmul.f32 0.0078125, %v458_v44  ;;  %v540_v35 = vmul.f32 %v2440_v56, %v2440_v56 }
  0xf1   : > { %v493_v27 = vmul.f32 0.0078125, %v460_v10  ;;  %v541_v60 = vmul.f32 %v2444_v55, %v2444_v55 }
  0xf2   : > { %v2452_v59 = vsub.f32 %v1638_v62, %v492_v13  ;;  %616 = vadd.xlane.f32.xlu1 %v555_v57  ;;  %586 = vadd.xlane.f32.xlu0 %v540_v35 }
  0xf3   : > { %v2456_v58 = vsub.f32 %v1639_v63, %v493_v27 }
  0xf4   : > { %v556_v14 = vmul.f32 %v2452_v59, %v2452_v59 }
  0xf5   : > { %v557_v15 = vmul.f32 %v2456_v58, %v2456_v58 }
  0xf6   : > { %588 = vadd.xlane.f32.xlu1 %v541_v60  ;;  %618 = vadd.xlane.f32.xlu0 %v556_v14  ;;  %v2468_v60 = vld [vmem:[%s2679_s2] ss:$0 sm:$0xff] }
  0xfa   : > { %620 = vadd.xlane.f32.xlu1 %v557_v15 }
 0x143   : > { %v559_v62 = vpop.xlane.xlu0 %558 }
 0x144   : > { %v622_v47 = vmul.f32 0.0078125, %v559_v62 }
 0x146   : > { %v654_v18 = vadd.f32 1e-05, %v622_v47 }
 0x147   : > { %v561_v19 = vpop.xlane.xlu1 %560  ;;  %v591_v29 = vpop.xlane.xlu0 %590 }
 0x148   : > { %1886 = vrsqrt.f32 %v654_v18  ;;  %v623_v61 = vmul.f32 0.0078125, %v561_v19  ;;  %v638_v63 = vmul.f32 0.0078125, %v591_v29 }
 0x14a   : > { %v655_v38 = vadd.f32 1e-05, %v623_v61  ;;  %v670_v28 = vadd.f32 1e-05, %v638_v63 }
 0x14b   : > { %v593_v20 = vpop.xlane.xlu1 %592  ;;  %v563_v50 = vpop.xlane.xlu0 %562 }
 0x14c   : > { %1888 = vrsqrt.f32 %v655_v38  ;;  %v639_v21 = vmul.f32 0.0078125, %v593_v20  ;;  %v624_v1 = vmul.f32 0.0078125, %v563_v50 }
 0x14d   : > { %1890 = vrsqrt.f32 %v670_v28 }
 0x14e   : > { %v671_v2 = vadd.f32 1e-05, %v639_v21  ;;  %v656_v3 = vadd.f32 1e-05, %v624_v1 }
 0x14f   : > { %v565_v41 = vpop.xlane.xlu1 %564  ;;  %v595_v6 = vpop.xlane.xlu0 %594 }
 0x150   : > { %1892 = vrsqrt.f32 %v671_v2  ;;  %v625_v54 = vmul.f32 0.0078125, %v565_v41  ;;  %v640_v32 = vmul.f32 0.0078125, %v595_v6 }
 0x151   : > { %1894 = vrsqrt.f32 %v656_v3 }
 0x152   : > { %v657_v24 = vadd.f32 1e-05, %v625_v54  ;;  %v672_v7 = vadd.f32 1e-05, %v640_v32 }
 0x153   : > { %v597_v8 = vpop.xlane.xlu1 %596  ;;  %v567_v9 = vpop.xlane.xlu0 %566 }
 0x154   : > { %1896 = vrsqrt.f32 %v657_v24  ;;  %v641_v57 = vmul.f32 0.0078125, %v597_v8  ;;  %v626_v44 = vmul.f32 0.0078125, %v567_v9 }
 0x155   : > { %v1887_v10 = vpop.eup %1886  ;;  %1898 = vrsqrt.f32 %v672_v7 }
 0x156   : > { %v673_v13 = vadd.f32 1e-05, %v641_v57  ;;  %v658_v35 = vadd.f32 1e-05, %v626_v44  ;;  %v718_v27 = vmul.f32 %v1887_v10, %v2261_v4  ;;  %v2475_v4 = vld [vmem:[%s2680_s3] ss:$0 sm:$0xff] }
 0x157   : > { %v569_v14 = vpop.xlane.xlu1 %568  ;;  %v599_v15 = vpop.xlane.xlu0 %598 }
 0x158   : > { %1900 = vrsqrt.f32 %v673_v13  ;;  %v627_v62 = vmul.f32 0.0078125, %v569_v14  ;;  %v642_v47 = vmul.f32 0.0078125, %v599_v15  ;;  %v757_v19 = vmul.f32 %v2468_v60, %v718_v27 }
 0x159   : > { %v1889_v18 = vpop.eup %1888  ;;  %1902 = vrsqrt.f32 %v658_v35 }
 0x15a   : > { %v1891_v29 = vpop.eup %1890  ;;  %v659_v61 = vadd.f32 1e-05, %v627_v62  ;;  %v674_v63 = vadd.f32 1e-05, %v642_v47  ;;  %v719_v38 = vmul.f32 %v1889_v18, %v2271_v11  ;;  %v796_v41 = vadd.f32 %v2475_v4, %v757_v19 }
 0x15b   : > { %v601_v28 = vpop.xlane.xlu1 %600  ;;  %v571_v20 = vpop.xlane.xlu0 %570  ;;  %v734_v50 = vmul.f32 %v1891_v29, %v2265_v5 }
 0x15c   : > { %1904 = vrsqrt.f32 %v659_v61  ;;  %v643_v21 = vmul.f32 0.0078125, %v601_v28  ;;  %v628_v1 = vmul.f32 0.0078125, %v571_v20  ;;  %v758_v2 = vmul.f32 %v2468_v60, %v719_v38 }
 0x15d   : > { %v1893_v3 = vpop.eup %1892  ;;  %1906 = vrsqrt.f32 %v674_v63  ;;  %v773_v5 = vmul.f32 %v2468_v60, %v734_v50 }
 0x15e   : > { %v1895_v6 = vpop.eup %1894  ;;  %v675_v11 = vadd.f32 1e-05, %v643_v21  ;;  %v660_v54 = vadd.f32 1e-05, %v628_v1  ;;  %v797_v32 = vadd.f32 %v2475_v4, %v758_v2  ;;  %v735_v24 = vmul.f32 %v1893_v3, %v2275_v12 }
 0x15f   : > { %v573_v7 = vpop.xlane.xlu1 %572  ;;  %v603_v8 = vpop.xlane.xlu0 %602  ;;  %v720_v9 = vmul.f32 %v1895_v6, %v2283_v16  ;;  %v812_v16 = vadd.f32 %v2475_v4, %v773_v5 }
 0x160   : > { %1908 = vrsqrt.f32 %v675_v11  ;;  %v629_v57 = vmul.f32 0.0078125, %v573_v7  ;;  %v644_v44 = vmul.f32 0.0078125, %v603_v8  ;;  %v828_v10 = vpack.c.bf16 %v797_v32, %v796_v41 }
 0x161   : > { %v1897_v13 = vpop.eup %1896  ;;  %1910 = vrsqrt.f32 %v660_v54  ;;  %v774_v35 = vmul.f32 %v2468_v60, %v735_v24  ;;  %v759_v27 = vmul.f32 %v2468_v60, %v720_v9 }
 0x162   : > { %v1899_v14 = vpop.eup %1898  ;;  %v661_v15 = vadd.f32 1e-05, %v629_v57  ;;  %v676_v62 = vadd.f32 1e-05, %v644_v44  ;;  %1790 = vmatprep.mubr.bf16.mxu0 %v828_v10  ;;  %v721_v12 = vmul.f32 %v1897_v13, %v2287_v17 }
 0x163   : > { %v605_v47 = vpop.xlane.xlu1 %604  ;;  %v575_v18 = vpop.xlane.xlu0 %574  ;;  %v813_v19 = vadd.f32 %v2475_v4, %v774_v35  ;;  %v736_v29 = vmul.f32 %v1899_v14, %v2295_v23  ;;  %v798_v50 = vadd.f32 %v2475_v4, %v759_v27 }
 0x164   : > { %1912 = vrsqrt.f32 %v661_v15  ;;  %v645_v61 = vmul.f32 0.0078125, %v605_v47  ;;  %v630_v63 = vmul.f32 0.0078125, %v575_v18  ;;  %v760_v38 = vmul.f32 %v2468_v60, %v721_v12 }
 0x165   : > { %v1901_v28 = vpop.eup %1900  ;;  %1914 = vrsqrt.f32 %v676_v62  ;;  %v836_v20 = vpack.c.bf16 %v813_v19, %v812_v16  ;;  %v775_v6 = vmul.f32 %v2468_v60, %v736_v29 }
 0x166   : > { %v1903_v21 = vpop.eup %1902  ;;  %v677_v17 = vadd.f32 1e-05, %v645_v61  ;;  %v662_v1 = vadd.f32 1e-05, %v630_v63  ;;  %v799_v2 = vadd.f32 %v2475_v4, %v760_v38  ;;  %v737_v3 = vmul.f32 %v1901_v28, %v2299_v22 }
 0x167   : > { %1806 = vmatprep.mubr.bf16.mxu1 %v836_v20  ;;  %v577_v41 = vpop.xlane.xlu1 %576  ;;  %v607_v23 = vpop.xlane.xlu0 %606  ;;  %v722_v11 = vmul.f32 %v1903_v21, %v2307_v26  ;;  %v814_v26 = vadd.f32 %v2475_v4, %v775_v6 }
 0x168   : > { %1916 = vrsqrt.f32 %v677_v17  ;;  %v631_v54 = vmul.f32 0.0078125, %v577_v41  ;;  %v646_v32 = vmul.f32 0.0078125, %v607_v23  ;;  %v829_v24 = vpack.c.bf16 %v799_v2, %v798_v50 }
 0x169   : > { %v1905_v7 = vpop.eup %1904  ;;  %1918 = vrsqrt.f32 %v662_v1  ;;  %v776_v8 = vmul.f32 %v2468_v60, %v737_v3  ;;  %v761_v5 = vmul.f32 %v2468_v60, %v722_v11 }
 0x16a   : > { %v1907_v9 = vpop.eup %1906  ;;  %v663_v57 = vadd.f32 1e-05, %v631_v54  ;;  %v678_v22 = vadd.f32 1e-05, %v646_v32  ;;  %1791 = vmatmul.mubr.bf16.vlgmr.msra.gmra.mxu0 %v829_v24  ;;  %v723_v44 = vmul.f32 %v1905_v7, %v2311_v25 }
 0x16b   : > { %v609_v10 = vpop.xlane.xlu1 %608  ;;  %v579_v13 = vpop.xlane.xlu0 %578  ;;  %v815_v35 = vadd.f32 %v2475_v4, %v776_v8  ;;  %v738_v27 = vmul.f32 %v1907_v9, %v2325_v30  ;;  %v800_v18 = vadd.f32 %v2475_v4, %v761_v5 }
 0x16c   : > { %1920 = vrsqrt.f32 %v663_v57  ;;  %v647_v14 = vmul.f32 0.0078125, %v609_v10  ;;  %v632_v15 = vmul.f32 0.0078125, %v579_v13  ;;  %v762_v62 = vmul.f32 %v2468_v60, %v723_v44 }
 0x16d   : > { %v1909_v12 = vpop.eup %1908  ;;  %1922 = vrsqrt.f32 %v678_v22  ;;  %v837_v47 = vpack.c.bf16 %v815_v35, %v814_v26  ;;  %v777_v38 = vmul.f32 %v2468_v60, %v738_v27 }
 0x16e   : > { %v1911_v16 = vpop.eup %1910  ;;  %v679_v25 = vadd.f32 1e-05, %v647_v14  ;;  %v664_v19 = vadd.f32 1e-05, %v632_v15  ;;  %v801_v29 = vadd.f32 %v2475_v4, %v762_v62  ;;  %v739_v61 = vmul.f32 %v1909_v12, %v2329_v0 }
 0x16f   : > { %1807 = vmatmul.mubr.bf16.vlgmr.msra.gmra.mxu1 %v837_v47  ;;  %v581_v63 = vpop.xlane.xlu1 %580  ;;  %v611_v30 = vpop.xlane.xlu0 %610  ;;  %v724_v28 = vmul.f32 %v1911_v16, %v2338_v31  ;;  %v816_v31 = vadd.f32 %v2475_v4, %v777_v38 }
 0x170   : > { %1924 = vrsqrt.f32 %v679_v25  ;;  %v633_v20 = vmul.f32 0.0078125, %v581_v63  ;;  %v648_v50 = vmul.f32 0.0078125, %v611_v30  ;;  %v830_v21 = vpack.c.bf16 %v801_v29, %v800_v18 }
 0x171   : > { %v1913_v17 = vpop.eup %1912  ;;  %1926 = vrsqrt.f32 %v664_v19  ;;  %v778_v1 = vmul.f32 %v2468_v60, %v739_v61  ;;  %v763_v2 = vmul.f32 %v2468_v60, %v724_v28 }
 0x172   : > { %v1915_v3 = vpop.eup %1914  ;;  %v665_v41 = vadd.f32 1e-05, %v633_v20  ;;  %v680_v0 = vadd.f32 1e-05, %v648_v50  ;;  %1794 = vmatprep.mubr.bf16.mxu0 %v830_v21  ;;  %v725_v23 = vmul.f32 %v1913_v17, %v2342_v33 }
 0x173   : > { %v613_v6 = vpop.xlane.xlu1 %612  ;;  %v583_v11 = vpop.xlane.xlu0 %582  ;;  %v817_v54 = vadd.f32 %v2475_v4, %v778_v1  ;;  %v740_v32 = vmul.f32 %v1915_v3, %v2351_v34  ;;  %v802_v57 = vadd.f32 %v2475_v4, %v763_v2 }
 0x174   : > { %1928 = vrsqrt.f32 %v665_v41  ;;  %v649_v24 = vmul.f32 0.0078125, %v613_v6  ;;  %v634_v7 = vmul.f32 0.0078125, %v583_v11  ;;  %v764_v8 = vmul.f32 %v2468_v60, %v725_v23 }
 0x175   : > { %v1917_v5 = vpop.eup %1916  ;;  %1930 = vrsqrt.f32 %v680_v0  ;;  %v838_v9 = vpack.c.bf16 %v817_v54, %v816_v31  ;;  %v779_v35 = vmul.f32 %v2468_v60, %v740_v32 }
 0x176   : > { %v1919_v22 = vpop.eup %1918  ;;  %v681_v33 = vadd.f32 1e-05, %v649_v24  ;;  %v666_v44 = vadd.f32 1e-05, %v634_v7  ;;  %v803_v10 = vadd.f32 %v2475_v4, %v764_v8  ;;  %v741_v13 = vmul.f32 %v1917_v5, %v2355_v36 }
 0x177   : > { %1810 = vmatprep.mubr.bf16.mxu1 %v838_v9  ;;  %v585_v26 = vpop.xlane.xlu1 %584  ;;  %v615_v34 = vpop.xlane.xlu0 %614  ;;  %v726_v27 = vmul.f32 %v1919_v22, %v2364_v37  ;;  %v818_v37 = vadd.f32 %v2475_v4, %v779_v35 }
 0x178   : > { %1932 = vrsqrt.f32 %v681_v33  ;;  %v635_v14 = vmul.f32 0.0078125, %v585_v26  ;;  %v650_v15 = vmul.f32 0.0078125, %v615_v34  ;;  %v831_v62 = vpack.c.bf16 %v803_v10, %v802_v57 }
 0x179   : > { %v1921_v12 = vpop.eup %1920  ;;  %1934 = vrsqrt.f32 %v666_v44  ;;  %v780_v47 = vmul.f32 %v2468_v60, %v741_v13  ;;  %v765_v18 = vmul.f32 %v2468_v60, %v726_v27 }
 0x17a   : > { %v1923_v16 = vpop.eup %1922  ;;  %v667_v25 = vadd.f32 1e-05, %v635_v14  ;;  %v682_v36 = vadd.f32 1e-05, %v650_v15  ;;  %1795 = vmatmul.mubr.bf16.gmra.mxu0 %v831_v62  ;;  %v727_v19 = vmul.f32 %v1921_v12, %v2368_v39 }
 0x17b   : > { %v617_v29 = vpop.xlane.xlu1 %616  ;;  %v587_v61 = vpop.xlane.xlu0 %586  ;;  %v819_v63 = vadd.f32 %v2475_v4, %v780_v47  ;;  %v742_v30 = vmul.f32 %v1923_v16, %v2377_v40  ;;  %v804_v17 = vadd.f32 %v2475_v4, %v765_v18 }
 0x17c   : > { %1936 = vrsqrt.f32 %v667_v25  ;;  %v651_v38 = vmul.f32 0.0078125, %v617_v29  ;;  %v636_v28 = vmul.f32 0.0078125, %v587_v61  ;;  %v766_v20 = vmul.f32 %v2468_v60, %v727_v19 }
 0x17d   : > { %v1925_v50 = vpop.eup %1924  ;;  %1938 = vrsqrt.f32 %v682_v36  ;;  %v839_v21 = vpack.c.bf16 %v819_v63, %v818_v37  ;;  %v781_v23 = vmul.f32 %v2468_v60, %v742_v30 }
 0x17e   : > { %v1927_v1 = vpop.eup %1926  ;;  %v683_v39 = vadd.f32 1e-05, %v651_v38  ;;  %v668_v2 = vadd.f32 1e-05, %v636_v28  ;;  %v805_v3 = vadd.f32 %v2475_v4, %v766_v20  ;;  %v743_v41 = vmul.f32 %v1925_v50, %v2381_v42 }
 0x17f   : > { %1811 = vmatmul.mubr.bf16.gmra.mxu1 %v839_v21  ;;  %v589_v0 = vpop.xlane.xlu1 %588  ;;  %v619_v40 = vpop.xlane.xlu0 %618  ;;  %v728_v6 = vmul.f32 %v1927_v1, %v2390_v43  ;;  %v820_v22 = vadd.f32 %v2475_v4, %v781_v23 }
 0x180   : > { %1940 = vrsqrt.f32 %v683_v39  ;;  %v637_v11 = vmul.f32 0.0078125, %v589_v0  ;;  %v652_v31 = vmul.f32 0.0078125, %v619_v40  ;;  %v832_v54 = vpack.c.bf16 %v805_v3, %v804_v17 }
 0x181   : > { %v1929_v32 = vpop.eup %1928  ;;  %1942 = vrsqrt.f32 %v668_v2  ;;  %v782_v24 = vmul.f32 %v2468_v60, %v743_v41  ;;  %v767_v7 = vmul.f32 %v2468_v60, %v728_v6 }
 0x182   : > { %v1931_v8 = vpop.eup %1930  ;;  %v669_v5 = vadd.f32 1e-05, %v637_v11  ;;  %v684_v42 = vadd.f32 1e-05, %v652_v31  ;;  %1798 = vmatprep.mubr.bf16.mxu0 %v832_v54  ;;  %v729_v9 = vmul.f32 %v1929_v32, %v2394_v45 }
 0x183   : > { %v621_v57 = vpop.xlane.xlu1 %620  ;;  %v821_v43 = vadd.f32 %v2475_v4, %v782_v24  ;;  %v744_v33 = vmul.f32 %v1931_v8, %v2403_v46  ;;  %v806_v34 = vadd.f32 %v2475_v4, %v767_v7 }
 0x184   : > { %1944 = vrsqrt.f32 %v669_v5  ;;  %v653_v44 = vmul.f32 0.0078125, %v621_v57  ;;  %v768_v10 = vmul.f32 %v2468_v60, %v729_v9 }
 0x185   : > { %v1933_v13 = vpop.eup %1932  ;;  %1946 = vrsqrt.f32 %v684_v42  ;;  %v840_v26 = vpack.c.bf16 %v821_v43, %v820_v22  ;;  %v783_v15 = vmul.f32 %v2468_v60, %v744_v33 }
 0x186   : > { %v1935_v35 = vpop.eup %1934  ;;  %v685_v27 = vadd.f32 1e-05, %v653_v44  ;;  %v807_v45 = vadd.f32 %v2475_v4, %v768_v10  ;;  %v745_v14 = vmul.f32 %v1933_v13, %v2407_v48 }
 0x187   : > { %1814 = vmatprep.mubr.bf16.mxu1 %v840_v26  ;;  %v730_v46 = vmul.f32 %v1935_v35, %v2416_v49  ;;  %v822_v16 = vadd.f32 %v2475_v4, %v783_v15 }
 0x188   : > { %1948 = vrsqrt.f32 %v685_v27  ;;  %v833_v62 = vpack.c.bf16 %v807_v45, %v806_v34  ;;  %v784_v12 = vmul.f32 %v2468_v60, %v745_v14 }
 0x189   : > { %v1937_v47 = vpop.eup %1936  ;;  %v769_v48 = vmul.f32 %v2468_v60, %v730_v46 }
 0x18a   : > { %v1939_v18 = vpop.eup %1938  ;;  %1799 = vmatmul.mubr.bf16.gmra.mxu0 %v833_v62  ;;  %v823_v25 = vadd.f32 %v2475_v4, %v784_v12  ;;  %v731_v36 = vmul.f32 %v1937_v47, %v2420_v51 }
 0x18b   : > { %v746_v19 = vmul.f32 %v1939_v18, %v2428_v53  ;;  %v808_v63 = vadd.f32 %v2475_v4, %v769_v48 }
 0x18c   : > { %v841_v29 = vpack.c.bf16 %v823_v25, %v822_v16  ;;  %v770_v49 = vmul.f32 %v2468_v60, %v731_v36 }
 0x18d   : > { %v1941_v61 = vpop.eup %1940  ;;  %v785_v28 = vmul.f32 %v2468_v60, %v746_v19 }
 0x18e   : > { %v1943_v37 = vpop.eup %1942  ;;  %1815 = vmatmul.mubr.bf16.gmra.mxu1 %v841_v29  ;;  %v809_v30 = vadd.f32 %v2475_v4, %v770_v49  ;;  %v747_v38 = vmul.f32 %v1941_v61, %v2432_v52 }
 0x18f   : > { %v732_v51 = vmul.f32 %v1943_v37, %v2440_v56  ;;  %v824_v17 = vadd.f32 %v2475_v4, %v785_v28 }
 0x190   : > { %v834_v20 = vpack.c.bf16 %v809_v30, %v808_v63  ;;  %v786_v50 = vmul.f32 %v2468_v60, %v747_v38 }
 0x191   : > { %v1945_v53 = vpop.eup %1944  ;;  %v771_v2 = vmul.f32 %v2468_v60, %v732_v51 }
 0x192   : > { %v1947_v21 = vpop.eup %1946  ;;  %1802 = vmatprep.mubr.bf16.mxu0 %v834_v20  ;;  %v825_v1 = vadd.f32 %v2475_v4, %v786_v50  ;;  %v733_v39 = vmul.f32 %v1945_v53, %v2444_v55 }
 0x193   : > { %v748_v52 = vmul.f32 %v1947_v21, %v2452_v59  ;;  %v810_v0 = vadd.f32 %v2475_v4, %v771_v2 }
 0x194   : > { %v842_v3 = vpack.c.bf16 %v825_v1, %v824_v17  ;;  %v772_v56 = vmul.f32 %v2468_v60, %v733_v39 }
 0x195   : > { %v1949_v41 = vpop.eup %1948  ;;  %v787_v6 = vmul.f32 %v2468_v60, %v748_v52 }
 0x196   : > { %1818 = vmatprep.mubr.bf16.mxu1 %v842_v3  ;;  %v811_v40 = vadd.f32 %v2475_v4, %v772_v56  ;;  %v749_v23 = vmul.f32 %v1949_v41, %v2456_v58 }
 0x197   : > { %v826_v59 = vadd.f32 %v2475_v4, %v787_v6 }
 0x198   : > { %v835_v11 = vpack.c.bf16 %v811_v40, %v810_v0  ;;  %v788_v55 = vmul.f32 %v2468_v60, %v749_v23 }
 0x19a   : > { %1803 = vmatmul.mubr.bf16.gmra.mxu0 %v835_v11  ;;  %v827_v31 = vadd.f32 %v2475_v4, %v788_v55 }
 0x19c   : > { %v843_v54 = vpack.c.bf16 %v827_v31, %v826_v59 }
 0x19e   : > { %1819 = vmatmul.mubr.bf16.gmra.mxu1 %v843_v54 }
 0x22a   : > { %v1792_v32 = vpop.f32.mrf.mxu0 }
 0x22c   : > { %v942_v24 = vpop.f32.mrf.mxu0 }
 0x22e   : > { %v1793_v7 = vpop.f32.mrf.mxu0 }
 0x22f   : > { %v1648_v8 = vpack.c.bf16 %v1793_v7, %v1792_v32  ;;  %v1808_v5 = vpop.f32.mrf.mxu1 }
 0x230   : > { %v945_v58 = vpop.f32.mrf.mxu0 }
 0x231   : > { %1735 = vst [vmem:[%s2572_s11 + $0x8] sm:$0xff] %v1648_v8   ;;  %v1643_v60 = vpack.c.bf16 %v945_v58, %v942_v24  ;;  %v1006_v4 = vpop.f32.mrf.mxu1 }
 0x233   : > { %1644 = vst [vmem:[%s2572_s11] sm:$0xff] %v1643_v60   ;;  %v1809_v42 = vpop.f32.mrf.mxu1 }
 0x234   : > { %v1688_v9 = vpack.c.bf16 %v1809_v42, %v1808_v5 }
 0x235   : > { %v1009_v57 = vpop.f32.mrf.mxu1 }
 0x236   : > { %1743 = vst [vmem:[%s2572_s11 + $0x48] sm:$0xff] %v1688_v9   ;;  %v1683_v22 = vpack.c.bf16 %v1009_v57, %v1006_v4 }
 0x238   : > { %1742 = vst [vmem:[%s2572_s11 + $0x40] sm:$0xff] %v1683_v22   ;;  %v1261_v2 = vld [vmem:[%s2572_s11 + $0x8] sm:$0xf] (%p2050_p6)  ;;  %v1263_v52 = vld [vmem:[%s2572_s11 + $0xc] sm:$0xf] (%p2050_p6) }
 0x239   : > { %1262 = vst [vmem:[%s2598_s14 + $0x18] sm:$0xf] (%p2050_p6), %v1261_v2  ;;  %1264 = vst [vmem:[%s2598_s14 + $0x24] sm:$0xf] (%p2050_p6), %v1263_v52 }
 0x23a   : > { %v1796_v43 = vpop.f32.mrf.mxu0  ;;  %v1257_v1 = vld [vmem:[%s2572_s11] sm:$0xf] (%p2050_p6)  ;;  %v1259_v39 = vld [vmem:[%s2572_s11 + $0x4] sm:$0xf] (%p2050_p6) }
 0x23b   : > { %1258 = vst [vmem:[%s2598_s14] sm:$0xf] (%p2050_p6), %v1257_v1  ;;  %1260 = vst [vmem:[%s2598_s14 + $0xc] sm:$0xf] (%p2050_p6), %v1259_v39 }
 0x23c   : > { %v958_v33 = vpop.f32.mrf.mxu0 }
 0x23d   : > { %v1293_v7 = vld [vmem:[%s2572_s11 + $0x48] sm:$0xf] (%p2050_p6)  ;;  %v1295_v8 = vld [vmem:[%s2572_s11 + $0x4c] sm:$0xf] (%p2050_p6) }
 0x23e   : > { %v1797_v44 = vpop.f32.mrf.mxu0  ;;  %1294 = vst [vmem:[%s2598_s14 + $0xd8] sm:$0xf] (%p2050_p6), %v1293_v7  ;;  %1296 = vst [vmem:[%s2598_s14 + $0xe4] sm:$0xf] (%p2050_p6), %v1295_v8 }
 0x23f   : > { %v1658_v10 = vpack.c.bf16 %v1797_v44, %v1796_v43  ;;  %v1812_v13 = vpop.f32.mrf.mxu1  ;;  %v1289_v32 = vld [vmem:[%s2572_s11 + $0x40] sm:$0xf] (%p2050_p6)  ;;  %v1291_v24 = vld [vmem:[%s2572_s11 + $0x44] sm:$0xf] (%p2050_p6) }
 0x240   : > { %v961_v26 = vpop.f32.mrf.mxu0  ;;  %1290 = vst [vmem:[%s2598_s14 + $0xc0] sm:$0xf] (%p2050_p6), %v1289_v32  ;;  %1292 = vst [vmem:[%s2598_s14 + $0xcc] sm:$0xf] (%p2050_p6), %v1291_v24 }
 0x241   : > { %1737 = vst [vmem:[%s2572_s11 + $0x18] sm:$0xff] %v1658_v10   ;;  %v1653_v34 = vpack.c.bf16 %v961_v26, %v958_v33  ;;  %v1022_v35 = vpop.f32.mrf.mxu1 }
 0x243   : > { %1736 = vst [vmem:[%s2572_s11 + $0x10] sm:$0xff] %v1653_v34   ;;  %v1813_v27 = vpop.f32.mrf.mxu1 }
 0x244   : > { %v1698_v45 = vpack.c.bf16 %v1813_v27, %v1812_v13 }
 0x245   : > { %v1025_v14 = vpop.f32.mrf.mxu1 }
 0x246   : > { %1745 = vst [vmem:[%s2572_s11 + $0x58] sm:$0xff] %v1698_v45   ;;  %v1693_v15 = vpack.c.bf16 %v1025_v14, %v1022_v35 }
 0x248   : > { %1744 = vst [vmem:[%s2572_s11 + $0x50] sm:$0xff] %v1693_v15   ;;  %v1269_v41 = vld [vmem:[%s2572_s11 + $0x18] sm:$0xf] (%p2050_p6)  ;;  %v1271_v0 = vld [vmem:[%s2572_s11 + $0x1c] sm:$0xf] (%p2050_p6) }
 0x249   : > { %1270 = vst [vmem:[%s2598_s14 + $0x48] sm:$0xf] (%p2050_p6), %v1269_v41  ;;  %1272 = vst [vmem:[%s2598_s14 + $0x54] sm:$0xf] (%p2050_p6), %v1271_v0 }
 0x24a   : > { %v1800_v46 = vpop.f32.mrf.mxu0  ;;  %v1265_v3 = vld [vmem:[%s2572_s11 + $0x10] sm:$0xf] (%p2050_p6)  ;;  %v1267_v56 = vld [vmem:[%s2572_s11 + $0x14] sm:$0xf] (%p2050_p6) }
 0x24b   : > { %1266 = vst [vmem:[%s2598_s14 + $0x30] sm:$0xf] (%p2050_p6), %v1265_v3  ;;  %1268 = vst [vmem:[%s2598_s14 + $0x3c] sm:$0xf] (%p2050_p6), %v1267_v56 }
 0x24c   : > { %v974_v62 = vpop.f32.mrf.mxu0 }
 0x24d   : > { %v1301_v60 = vld [vmem:[%s2572_s11 + $0x58] sm:$0xf] (%p2050_p6)  ;;  %v1303_v4 = vld [vmem:[%s2572_s11 + $0x5c] sm:$0xf] (%p2050_p6) }
 0x24e   : > { %v1801_v12 = vpop.f32.mrf.mxu0  ;;  %v1816_v47 = vpop.f32.mrf.mxu1  ;;  %1302 = vst [vmem:[%s2598_s14 + $0x108] sm:$0xf] (%p2050_p6), %v1301_v60  ;;  %1304 = vst [vmem:[%s2598_s14 + $0x114] sm:$0xf] (%p2050_p6), %v1303_v4 }
 0x24f   : > { %v1668_v18 = vpack.c.bf16 %v1801_v12, %v1800_v46  ;;  %v1297_v5 = vld [vmem:[%s2572_s11 + $0x50] sm:$0xf] (%p2050_p6)  ;;  %v1299_v58 = vld [vmem:[%s2572_s11 + $0x54] sm:$0xf] (%p2050_p6) }
 0x250   : > { %v977_v16 = vpop.f32.mrf.mxu0  ;;  %v1038_v25 = vpop.f32.mrf.mxu1  ;;  %1298 = vst [vmem:[%s2598_s14 + $0xf0] sm:$0xf] (%p2050_p6), %v1297_v5  ;;  %1300 = vst [vmem:[%s2598_s14 + $0xfc] sm:$0xf] (%p2050_p6), %v1299_v58 }
 0x251   : > { %1739 = vst [vmem:[%s2572_s11 + $0x28] sm:$0xff] %v1668_v18   ;;  %v1663_v36 = vpack.c.bf16 %v977_v16, %v974_v62 }
 0x252   : > { %v1817_v48 = vpop.f32.mrf.mxu1 }
 0x253   : > { %1738 = vst [vmem:[%s2572_s11 + $0x20] sm:$0xff] %v1663_v36   ;;  %v1708_v19 = vpack.c.bf16 %v1817_v48, %v1816_v47 }
 0x254   : > { %v1041_v29 = vpop.f32.mrf.mxu1 }
 0x255   : > { %1747 = vst [vmem:[%s2572_s11 + $0x68] sm:$0xff] %v1708_v19   ;;  %v1703_v49 = vpack.c.bf16 %v1041_v29, %v1038_v25 }
 0x257   : > { %1746 = vst [vmem:[%s2572_s11 + $0x60] sm:$0xff] %v1703_v49  }
 0x258   : > { %v1277_v6 = vld [vmem:[%s2572_s11 + $0x28] sm:$0xf] (%p2050_p6)  ;;  %v1279_v11 = vld [vmem:[%s2572_s11 + $0x2c] sm:$0xf] (%p2050_p6) }
 0x259   : > { %1278 = vst [vmem:[%s2598_s14 + $0x78] sm:$0xf] (%p2050_p6), %v1277_v6  ;;  %1280 = vst [vmem:[%s2598_s14 + $0x84] sm:$0xf] (%p2050_p6), %v1279_v11 }
 0x25a   : > { %v1804_v61 = vpop.f32.mrf.mxu0  ;;  %v1273_v40 = vld [vmem:[%s2572_s11 + $0x20] sm:$0xf] (%p2050_p6)  ;;  %v1275_v23 = vld [vmem:[%s2572_s11 + $0x24] sm:$0xf] (%p2050_p6) }
 0x25b   : > { %1274 = vst [vmem:[%s2598_s14 + $0x60] sm:$0xf] (%p2050_p6), %v1273_v40  ;;  %1276 = vst [vmem:[%s2598_s14 + $0x6c] sm:$0xf] (%p2050_p6), %v1275_v23 }
 0x25c   : > { %v990_v37 = vpop.f32.mrf.mxu0  ;;  %v1309_v57 = vld [vmem:[%s2572_s11 + $0x68] sm:$0xf] (%p2050_p6)  ;;  %v1311_v22 = vld [vmem:[%s2572_s11 + $0x6c] sm:$0xf] (%p2050_p6) }
 0x25d   : > { %1310 = vst [vmem:[%s2598_s14 + $0x138] sm:$0xf] (%p2050_p6), %v1309_v57  ;;  %1312 = vst [vmem:[%s2598_s14 + $0x144] sm:$0xf] (%p2050_p6), %v1311_v22 }
 0x25e   : > { %v1805_v63 = vpop.f32.mrf.mxu0  ;;  %v1820_v30 = vpop.f32.mrf.mxu1  ;;  %v1305_v42 = vld [vmem:[%s2572_s11 + $0x60] sm:$0xf] (%p2050_p6)  ;;  %v1307_v9 = vld [vmem:[%s2572_s11 + $0x64] sm:$0xf] (%p2050_p6) }
 0x25f   : > { %v1678_v38 = vpack.c.bf16 %v1805_v63, %v1804_v61  ;;  %1306 = vst [vmem:[%s2598_s14 + $0x120] sm:$0xf] (%p2050_p6), %v1305_v42  ;;  %1308 = vst [vmem:[%s2598_s14 + $0x12c] sm:$0xf] (%p2050_p6), %v1307_v9 }
 0x260   : > { %v993_v28 = vpop.f32.mrf.mxu0  ;;  %v1054_v51 = vpop.f32.mrf.mxu1 }
 0x261   : > { %1741 = vst [vmem:[%s2572_s11 + $0x38] sm:$0xff] %v1678_v38   ;;  %v1673_v20 = vpack.c.bf16 %v993_v28, %v990_v37 }
 0x262   : > { %v1821_v50 = vpop.f32.mrf.mxu1 }
 0x263   : > { %1740 = vst [vmem:[%s2572_s11 + $0x30] sm:$0xff] %v1673_v20   ;;  %v1718_v53 = vpack.c.bf16 %v1821_v50, %v1820_v30  ;;  %1235 = sbr.rel (!%p2050_p6) target bundleno = 624 (0x270), region = 81 }
 0x264   : > { %v1057_v21 = vpop.f32.mrf.mxu1 }
 0x265   : > { %1749 = vst [vmem:[%s2572_s11 + $0x78] sm:$0xff] %v1718_v53   ;;  %v1713_v17 = vpack.c.bf16 %v1057_v21, %v1054_v51 }
 0x267   : > { %1748 = vst [vmem:[%s2572_s11 + $0x70] sm:$0xff] %v1713_v17  }
 0x268   : > { %v1285_v31 = vld [vmem:[%s2572_s11 + $0x38] sm:$0xf]  ;;  %v1287_v54 = vld [vmem:[%s2572_s11 + $0x3c] sm:$0xf] }
 0x269   : > { %1286 = vst [vmem:[%s2598_s14 + $0xa8] sm:$0xf] %v1285_v31  ;;  %1288 = vst [vmem:[%s2598_s14 + $0xb4] sm:$0xf] %v1287_v54 }
 0x26a   : > { %v1281_v55 = vld [vmem:[%s2572_s11 + $0x30] sm:$0xf]  ;;  %v1283_v59 = vld [vmem:[%s2572_s11 + $0x34] sm:$0xf] }
 0x26b   : > { %1282 = vst [vmem:[%s2598_s14 + $0x90] sm:$0xf] %v1281_v55  ;;  %1284 = vst [vmem:[%s2598_s14 + $0x9c] sm:$0xf] %v1283_v59 }
 0x26c   : > { %v1317_v44 = vld [vmem:[%s2572_s11 + $0x78] sm:$0xf]  ;;  %v1319_v10 = vld [vmem:[%s2572_s11 + $0x7c] sm:$0xf] }
 0x26d   : > { %1318 = vst [vmem:[%s2598_s14 + $0x168] sm:$0xf] %v1317_v44  ;;  %1320 = vst [vmem:[%s2598_s14 + $0x174] sm:$0xf] %v1319_v10 }
 0x26e   : > { %v1313_v43 = vld [vmem:[%s2572_s11 + $0x70] sm:$0xf]  ;;  %v1315_v33 = vld [vmem:[%s2572_s11 + $0x74] sm:$0xf] }
 0x26f   : > { %1314 = vst [vmem:[%s2598_s14 + $0x150] sm:$0xf] %v1313_v43  ;;  %1316 = vst [vmem:[%s2598_s14 + $0x15c] sm:$0xf] %v1315_v33 }
 0x270 PF: > { %s14_s19 = sadd.s32 1, %s1988_s19   ;;  %s2683_s15 = smov %s1976_s16 }
 0x271   : > { %p11_p11 = scmp.ge.s32.totalorder %s14_s19, 5   ;;  %s2684_s16 = smov %s2055_s25 }
 0x272   : > { %s2685_s17 = smov %s1984_s18  ;;  %s2686_s18 = smov %s2688_s20 }
 0x273   :  { %13 = sbr.rel (!%p11_p11) target bundleno = 3 (0x3), region = 156 }

// kernel: _lambda_.12
= control target key start
LH: loop header
LB: loop body
LE: loop exit
PB: predicated region body
PF: predicated region fallthrough
CT: control target
= control target key end

     0   :  { %s2098_s12 = smov 0   ;;  %s2100_s13 = smov 0   ;;  %s2667_s0 = inlined_call_operand.vmem [shape: bf16[8,128,32], index: 0, kind: input, shape index: {}]   ;;  %s2668_s1 = inlined_call_operand.vmem [shape: bf16[8,128,32], index: 1, kind: input, shape index: {}]   ;;  %s2669_s2 = inlined_call_operand.vmem [shape: bf16[8,128,32], index: 2, kind: input, shape index: {}]   ;;  %s2670_s3 = inlined_call_operand.vmem [shape: bf16[8,128,32], index: 3, kind: output, shape index: {}]  }
   0x1   :  { %s2102_s14 = smov 0  }
   0x2 LB: > { %s32_s15 = sadd.s32 1, %s2069_s13  ;;  %p1719_p0 = scmp.ge.s32.totalorder %s2073_s14, 1  ;;  %s2073_s14 = sphi %s2102_s14, %s13_s14   ;;  %s2069_s13 = sphi %s2100_s13, %s2686_s13   ;;  %s2065_s12 = sphi %s2098_s12, %s2685_s12  }
   0x3   : > { %p34_p1 = scmp.ge.s32.totalorder %s32_s15, 8  ;;  %p199_p2 = scmp.lt.s32.totalorder %s2073_s14, 9 }
   0x5   : > { %s2688_s15 = smov (%p34_p1, %s32_s15), 0  ;;  %p200_p3 = pnand %p1719_p0, %p199_p2 }
   0x6   : > { %p250_p4 = scmp.lt.s32.totalorder (!%p200_p3), %s2065_s12, 7 }
   0x7   : > { %203 = sbr.rel (%p200_p3) target bundleno = 900 (0x384), region = 32 }
   0xc   : > { %s2690_s12 = smov (!%p250_p4, %s2065_s12), 7  ;;  %vm327_vm0 = vcmask 261120   ;;  %vm294_vm1 = vcmask 7168   ;;  %v2075_v24 = vmov -1e+30   ;;  %v641_v25 = vlaneseq }
   0xd   : > { %s2116_s16 = sshll.u32 %s2690_s12, 6  ;;  %297 = vst.msk [vmem:[#allocation2 + $0x10] sm:$0xff] %vm294_vm1, %v2075_v24  ;;  %295 = vst.msk [vmem:[#allocation2] sm:$0xff] %vm294_vm1, %v2075_v24  ;;  %v2076_v58 = vmov 0  }
   0xe   : > { %s2122_s19 = scalar_lea.vmem %s2668_s1, %s2116_s16  ;;  %s2133_s22 = scalar_lea.vmem %s2667_s0, %s2116_s16  ;;  %296 = vst.msk [vmem:[#allocation2 + $0x8] sm:$0xff] %vm294_vm1, %v2075_v24  ;;  %298 = vst.msk [vmem:[#allocation2 + $0x18] sm:$0xff] %vm294_vm1, %v2075_v24  ;;  %v2186_v26 = vshrl.u32 %v641_v25, 7  ;;  %v2189_v28 = vand.u32 127, %v641_v25  ;;  %1930 = vset.pattern.permute.xlu1 %v2076_v58  ;;  %1929 = vset.pattern.permute.xlu0 %v2076_v58 }
   0xf   : > { %v1931_v0 = vld [vmem:[%s2122_s19 + $0x38] sm:$0xff]   ;;  %v1932_v1 = vld [vmem:[%s2122_s19 + $0x30] sm:$0xff]   ;;  %v1933_v3 = vld [vmem:[%s2122_s19 + $0x28] sm:$0xff]   ;;  %299 = vst.msk [vmem:[#allocation2 + $0x20] sm:$0xff] %vm294_vm1, %v2075_v24  ;;  %s2310_s25 = scalar_lea.vmem %s2669_s2, %s2116_s16  ;;  %s2624_s28 = scalar_lea.vmem %s2670_s3, %s2116_s16 }
  0x10   : > { %1894 = vmatprep.subr.msk.bf16.mxu0 %vm327_vm0, %v1931_v0  ;;  %v526_v2 = vsel %vm327_vm0, %v1931_v0, 0  ;;  %v523_v4 = vsel %vm327_vm0, %v1932_v1, 0  ;;  %v1939_v5 = vld [vmem:[%s2133_s22] sm:$0xff]   ;;  %v520_v6 = vsel %vm327_vm0, %v1933_v3, 0  ;;  %v1935_v9 = vld [vmem:[%s2122_s19 + $0x18] sm:$0xff]   ;;  %v1936_v11 = vld [vmem:[%s2122_s19 + $0x10] sm:$0xff]   ;;  %vm679_vm3 = vcmp.le.s32.totalorder %v2189_v28, %v2186_v26 }
  0x11   : > { %1831 = vmatpush3.bf16.xpose.msra.mxu0 %v526_v2  ;;  %1846 = vmatprep.mubr.msk.bf16.mxu0 %vm327_vm0, %v1939_v5  ;;  %v1934_v7 = vld [vmem:[%s2122_s19 + $0x20] sm:$0xff]   ;;  %v514_v10 = vsel %vm327_vm0, %v1935_v9, 0  ;;  %v511_v12 = vsel %vm327_vm0, %v1936_v11, 0  ;;  %v1937_v13 = vld [vmem:[%s2122_s19 + $0x8] sm:$0xff]   ;;  %v1941_v18 = vld [vmem:[%s2133_s22 + $0x10] sm:$0xff]   ;;  %300 = vst.msk [vmem:[#allocation2 + $0x28] sm:$0xff] %vm294_vm1, %v2075_v24 }
  0x12   : > { %1895 = vmatprep.subr.msk.bf16.mxu0 %vm327_vm0, %v1932_v1  ;;  %v517_v8 = vsel %vm327_vm0, %v1934_v7, 0  ;;  %v508_v14 = vsel %vm327_vm0, %v1937_v13, 0  ;;  %v1938_v15 = vld [vmem:[%s2122_s19] sm:$0xff]   ;;  %v1940_v17 = vld [vmem:[%s2133_s22 + $0x8] sm:$0xff]   ;;  %v1942_v19 = vld [vmem:[%s2133_s22 + $0x18] sm:$0xff]   ;;  %301 = vst.msk [vmem:[#allocation2 + $0x30] sm:$0xff] %vm294_vm1, %v2075_v24 }
  0x13   : > { %v505_v16 = vsel %vm327_vm0, %v1938_v15, 0  ;;  %v1943_v20 = vld [vmem:[%s2133_s22 + $0x20] sm:$0xff]   ;;  %v1944_v21 = vld [vmem:[%s2133_s22 + $0x28] sm:$0xff]   ;;  %v1945_v22 = vld [vmem:[%s2133_s22 + $0x30] sm:$0xff]   ;;  %302 = vst.msk [vmem:[#allocation2 + $0x38] sm:$0xff] %vm294_vm1, %v2075_v24  ;;  %v644_v27 = vadd.s32 16, %v2186_v26 }
  0x14   : > { %v1946_v23 = vld [vmem:[%s2133_s22 + $0x38] sm:$0xff]   ;;  %303 = vst.msk [vmem:[#allocation2 + $0x40] sm:$0xff] %vm294_vm1, %v2075_v24  ;;  %304 = vst.msk [vmem:[#allocation2 + $0x48] sm:$0xff] %vm294_vm1, %v2075_v24  ;;  %v645_v30 = vadd.s32 24, %v2186_v26  ;;  %v643_v33 = vadd.s32 8, %v2186_v26  ;;  %v646_v40 = vadd.s32 32, %v2186_v26 }
  0x15   : > { %305 = vst.msk [vmem:[#allocation2 + $0x50] sm:$0xff] %vm294_vm1, %v2075_v24  ;;  %306 = vst.msk [vmem:[#allocation2 + $0x58] sm:$0xff] %vm294_vm1, %v2075_v24  ;;  %vm681_vm2 = vcmp.le.s32.totalorder %v2189_v28, %v644_v27  ;;  %v649_v44 = vadd.s32 56, %v2186_v26  ;;  %v648_v47 = vadd.s32 48, %v2186_v26  ;;  %v647_v50 = vadd.s32 40, %v2186_v26  ;;  %v1951_v58 = vld [vmem:[%s2310_s25 + $0x18] sm:$0xff]  }
  0x16   : > { %307 = vst.msk [vmem:[#allocation2 + $0x60] sm:$0xff] %vm294_vm1, %v2075_v24  ;;  %308 = vst.msk [vmem:[#allocation2 + $0x68] sm:$0xff] %vm294_vm1, %v2075_v24  ;;  %vm682_vm4 = vcmp.le.s32.totalorder %v2189_v28, %v645_v30  ;;  %vm680_vm5 = vcmp.le.s32.totalorder %v2189_v28, %v643_v33  ;;  %vm683_vm6 = vcmp.le.s32.totalorder %v2189_v28, %v646_v40  ;;  %v650_v55 = vadd.s32 64, %v2186_v26  ;;  %v1947_v30 = vld [vmem:[%s2310_s25 + $0x38] sm:$0xff]   ;;  %v2316_v33 = vld [vmem:[#allocation2] sm:$0xff] }
  0x17   : > { %309 = vst.msk [vmem:[#allocation2 + $0x70] sm:$0xff] %vm294_vm1, %v2075_v24  ;;  %310 = vst.msk [vmem:[#allocation2 + $0x78] sm:$0xff] %vm294_vm1, %v2075_v24  ;;  %vm686_vm7 = vcmp.le.s32.totalorder %v2189_v28, %v649_v44  ;;  %vm685_vm8 = vcmp.le.s32.totalorder %v2189_v28, %v648_v47  ;;  %vm684_vm9 = vcmp.le.s32.totalorder %v2189_v28, %v647_v50  ;;  %v653_v60 = vadd.s32 88, %v2186_v26  ;;  %v2332_v44 = vld [vmem:[#allocation2 + $0x8] sm:$0xff] }
  0x18   : > { %v652_v61 = vadd.s32 80, %v2186_v26  ;;  %vm687_vm10 = vcmp.le.s32.totalorder %v2189_v28, %v650_v55  ;;  %1862 = vmatprep.subr.bf16.mxu1 %v1947_v30 }
  0x19   : > { %1833 = vmatpush3.bf16.xpose.msra.mxu0 %v523_v4  ;;  %vm690_vm11 = vcmp.le.s32.totalorder %v2189_v28, %v653_v60  ;;  %v651_v4 = vadd.s32 72, %v2186_v26  ;;  %1863 = vmatpush3.bf16.msra.mxu1 %v1947_v30 }
  0x1a   : > { %1896 = vmatprep.subr.msk.bf16.mxu0 %vm327_vm0, %v1933_v3  ;;  %vm689_vm12 = vcmp.le.s32.totalorder %v2189_v28, %v652_v61  ;;  %v2364_v61 = vld [vmem:[#allocation2 + $0x30] sm:$0xff] }
  0x1b   : > { %vm688_vm13 = vcmp.le.s32.totalorder %v2189_v28, %v651_v4  ;;  %v1952_v4 = vld [vmem:[%s2310_s25 + $0x10] sm:$0xff]   ;;  %v2413_v30 = vld [vmem:[#allocation2 + $0x48] sm:$0xff] }
  0x21   : > { %1835 = vmatpush3.bf16.xpose.msra.mxu0 %v520_v6 }
  0x22   : > { %1897 = vmatprep.subr.msk.bf16.mxu0 %vm327_vm0, %v1934_v7 }
  0x29   : > { %1837 = vmatpush3.bf16.xpose.msra.mxu0 %v517_v8  ;;  %v654_v8 = vadd.s32 96, %v2186_v26 }
  0x2a   : > { %1898 = vmatprep.subr.msk.bf16.mxu0 %vm327_vm0, %v1935_v9 }
  0x2b   : > { %vm691_vm14 = vcmp.le.s32.totalorder %v2189_v28, %v654_v8 }
  0x31   : > { %1839 = vmatpush3.bf16.xpose.msra.mxu0 %v514_v10 }
  0x32   : > { %1899 = vmatprep.subr.msk.bf16.mxu0 %vm327_vm0, %v1936_v11 }
  0x39   : > { %1841 = vmatpush3.bf16.xpose.msra.mxu0 %v511_v12 }
  0x3a   : > { %1900 = vmatprep.subr.msk.bf16.mxu0 %vm327_vm0, %v1937_v13  ;;  %v657_v13 = vadd.s32 120, %v2186_v26 }
  0x3c   : > { %vm694_vm15 = vcmp.le.s32.totalorder %v2189_v28, %v657_v13 }
  0x41   : > { %1843 = vmatpush3.bf16.xpose.msra.mxu0 %v508_v14  ;;  %v656_v14 = vadd.s32 112, %v2186_v26 }
  0x42   : > { %1901 = vmatprep.subr.msk.bf16.mxu0 %vm327_vm0, %v1938_v15 }
  0x49   : > { %1845 = vmatpush3.bf16.xpose.msra.mxu0 %v505_v16  ;;  %v2077_v16 = vmov 0.0  }
  0x4a   : > { %313 = vst.msk [vmem:[#allocation3 + $0x10] sm:$0xff] %vm294_vm1, %v2077_v16  ;;  %311 = vst.msk [vmem:[#allocation3] sm:$0xff] %vm294_vm1, %v2077_v16 }
  0x4b   : > { %312 = vst.msk [vmem:[#allocation3 + $0x8] sm:$0xff] %vm294_vm1, %v2077_v16  ;;  %314 = vst.msk [vmem:[#allocation3 + $0x18] sm:$0xff] %vm294_vm1, %v2077_v16 }
  0x4c   : > { %315 = vst.msk [vmem:[#allocation3 + $0x20] sm:$0xff] %vm294_vm1, %v2077_v16  ;;  %316 = vst.msk [vmem:[#allocation3 + $0x28] sm:$0xff] %vm294_vm1, %v2077_v16 }
  0x4d   : > { %317 = vst.msk [vmem:[#allocation3 + $0x30] sm:$0xff] %vm294_vm1, %v2077_v16  ;;  %318 = vst.msk [vmem:[#allocation3 + $0x38] sm:$0xff] %vm294_vm1, %v2077_v16 }
  0x4e   : > { %319 = vst.msk [vmem:[#allocation3 + $0x40] sm:$0xff] %vm294_vm1, %v2077_v16  ;;  %320 = vst.msk [vmem:[#allocation3 + $0x48] sm:$0xff] %vm294_vm1, %v2077_v16 }
  0x4f   : > { %321 = vst.msk [vmem:[#allocation3 + $0x50] sm:$0xff] %vm294_vm1, %v2077_v16  ;;  %322 = vst.msk [vmem:[#allocation3 + $0x58] sm:$0xff] %vm294_vm1, %v2077_v16 }
  0x50   : > { %1847 = vmatmul.mubr.msk.bf16.vlgmr.msra.gmra.mxu0 %vm327_vm0, %v1940_v17  ;;  %323 = vst.msk [vmem:[#allocation3 + $0x60] sm:$0xff] %vm294_vm1, %v2077_v16  ;;  %324 = vst.msk [vmem:[#allocation3 + $0x68] sm:$0xff] %vm294_vm1, %v2077_v16 }
  0x51   : > { %1850 = vmatprep.mubr.msk.bf16.mxu0 %vm327_vm0, %v1941_v18  ;;  %325 = vst.msk [vmem:[#allocation3 + $0x70] sm:$0xff] %vm294_vm1, %v2077_v16  ;;  %326 = vst.msk [vmem:[#allocation3 + $0x78] sm:$0xff] %vm294_vm1, %v2077_v16 }
  0x52   : > { %328 = vst.msk [vmem:[#allocation4] sm:$0xff] %vm327_vm0, %v2077_v16  ;;  %329 = vst.msk [vmem:[#allocation4 + $0x8] sm:$0xff] %vm327_vm0, %v2077_v16 }
  0x53   : > { %330 = vst.msk [vmem:[#allocation4 + $0x10] sm:$0xff] %vm327_vm0, %v2077_v16  ;;  %331 = vst.msk [vmem:[#allocation4 + $0x18] sm:$0xff] %vm327_vm0, %v2077_v16 }
  0x54   : > { %332 = vst.msk [vmem:[#allocation4 + $0x20] sm:$0xff] %vm327_vm0, %v2077_v16  ;;  %333 = vst.msk [vmem:[#allocation4 + $0x28] sm:$0xff] %vm327_vm0, %v2077_v16 }
  0x55   : > { %334 = vst.msk [vmem:[#allocation4 + $0x30] sm:$0xff] %vm327_vm0, %v2077_v16  ;;  %335 = vst.msk [vmem:[#allocation4 + $0x38] sm:$0xff] %vm327_vm0, %v2077_v16 }
  0x56   : > { %336 = vst.msk [vmem:[#allocation4 + $0x40] sm:$0xff] %vm327_vm0, %v2077_v16  ;;  %337 = vst.msk [vmem:[#allocation4 + $0x48] sm:$0xff] %vm327_vm0, %v2077_v16 }
  0x57   : > { %338 = vst.msk [vmem:[#allocation4 + $0x50] sm:$0xff] %vm327_vm0, %v2077_v16  ;;  %339 = vst.msk [vmem:[#allocation4 + $0x58] sm:$0xff] %vm327_vm0, %v2077_v16 }
  0x58   : > { %1851 = vmatmul.mubr.msk.bf16.gmra.mxu0 %vm327_vm0, %v1942_v19  ;;  %340 = vst.msk [vmem:[#allocation4 + $0x60] sm:$0xff] %vm327_vm0, %v2077_v16  ;;  %341 = vst.msk [vmem:[#allocation4 + $0x68] sm:$0xff] %vm327_vm0, %v2077_v16 }
  0x59   : > { %1854 = vmatprep.mubr.msk.bf16.mxu0 %vm327_vm0, %v1943_v20  ;;  %342 = vst.msk [vmem:[#allocation4 + $0x70] sm:$0xff] %vm327_vm0, %v2077_v16  ;;  %343 = vst.msk [vmem:[#allocation4 + $0x78] sm:$0xff] %vm327_vm0, %v2077_v16  ;;  %v1953_v16 = vld [vmem:[%s2310_s25 + $0x8] sm:$0xff]  }
  0x60   : > { %1855 = vmatmul.mubr.msk.bf16.gmra.mxu0 %vm327_vm0, %v1944_v21  ;;  %v655_v21 = vadd.s32 104, %v2186_v26 }
  0x61   : > { %1858 = vmatprep.mubr.msk.bf16.mxu0 %vm327_vm0, %v1945_v22 }
  0x68   : > { %1859 = vmatmul.mubr.msk.bf16.gmra.mxu0 %vm327_vm0, %v1946_v23 }
 0x110   : > { %v1848_v29 = vpop.f32.mrf.mxu0 }
 0x111   : > { %v627_v31 = vmul.f32 0.17677669, %v1848_v29 }
 0x112   : > { %v562_v32 = vpop.f32.mrf.mxu0 }
 0x113   : > { %v625_v34 = vmul.f32 0.17677669, %v562_v32  ;;  %v2196_v35 = vsel %vm681_vm2, %v627_v31, -1e+30  ;;  %vm693_vm2 = vcmp.le.s32.totalorder %v2189_v28, %v656_v14  ;;  %v2313_v31 = vld [vmem:[#allocation2 + $0x10] sm:$0xff] }
 0x114   : > { %731 = vmax.xlane.f32.xlu1 %v2196_v35  ;;  %v1849_v36 = vpop.f32.mrf.mxu0 }
 0x115   : > { %v628_v37 = vmul.f32 0.17677669, %v1849_v36  ;;  %v2200_v38 = vsel %vm679_vm3, %v625_v34, -1e+30  ;;  %vm692_vm3 = vcmp.le.s32.totalorder %v2189_v28, %v655_v21  ;;  %v1948_v28 = vld [vmem:[%s2310_s25 + $0x30] sm:$0xff]  }
 0x116   : > { %727 = vmax.xlane.f32.xlu0 %v2200_v38  ;;  %v565_v39 = vpop.f32.mrf.mxu0  ;;  %1864 = vmatprep.subr.bf16.mxu1 %v1948_v28  ;;  %v2403_v21 = vld [vmem:[#allocation2 + $0x50] sm:$0xff] }
 0x117   : > { %v626_v41 = vmul.f32 0.17677669, %v565_v39  ;;  %v2205_v42 = vsel %vm682_vm4, %v628_v37, -1e+30  ;;  %1865 = vmatpush3.bf16.msra.mxu1 %v1948_v28  ;;  %v2321_v37 = vld [vmem:[#allocation2 + $0x18] sm:$0xff]  ;;  %v1949_v39 = vld [vmem:[%s2310_s25 + $0x28] sm:$0xff]  }
 0x118   : > { %733 = vmax.xlane.f32.xlu1 %v2205_v42  ;;  %v1852_v43 = vpop.f32.mrf.mxu0  ;;  %1866 = vmatprep.subr.bf16.mxu1 %v1949_v39  ;;  %v1954_v28 = vld [vmem:[%s2310_s25] sm:$0xff]  }
 0x119   : > { %v2209_v45 = vsel %vm680_vm5, %v626_v41, -1e+30  ;;  %v631_v51 = vmul.f32 0.17677669, %v1852_v43 }
 0x11a   : > { %729 = vmax.xlane.f32.xlu0 %v2209_v45  ;;  %v578_v46 = vpop.f32.mrf.mxu0 }
 0x11b   : > { %v629_v48 = vmul.f32 0.17677669, %v578_v46  ;;  %v2227_v62 = vsel %vm685_vm8, %v631_v51, -1e+30  ;;  %1867 = vmatpush3.bf16.msra.mxu1 %v1949_v39 }
 0x11c   : > { %v1853_v49 = vpop.f32.mrf.mxu0 }
 0x11d   : > { %v632_v52 = vmul.f32 0.17677669, %v1853_v49  ;;  %v2216_v53 = vsel %vm683_vm6, %v629_v48, -1e+30  ;;  %v1950_v49 = vld [vmem:[%s2310_s25 + $0x20] sm:$0xff]  }
 0x11e   : > { %735 = vmax.xlane.f32.xlu0 %v2216_v53  ;;  %v581_v54 = vpop.f32.mrf.mxu0  ;;  %1868 = vmatprep.subr.bf16.mxu1 %v1950_v49 }
 0x11f   : > { %v630_v56 = vmul.f32 0.17677669, %v581_v54  ;;  %v2221_v57 = vsel %vm686_vm7, %v632_v52, -1e+30  ;;  %v2351_v52 = vld [vmem:[#allocation2 + $0x20] sm:$0xff]  ;;  %1869 = vmatpush3.bf16.msra.mxu1 %v1950_v49 }
 0x120   : > { %741 = vmax.xlane.f32.xlu1 %v2221_v57  ;;  %v1856_v59 = vpop.f32.mrf.mxu0  ;;  %1870 = vmatprep.subr.bf16.mxu1 %v1951_v58 }
 0x121   : > { %v635_v0 = vmul.f32 0.17677669, %v1856_v59  ;;  %v2231_v2 = vsel %vm684_vm9, %v630_v56, -1e+30  ;;  %v2357_v56 = vld [vmem:[#allocation2 + $0x38] sm:$0xff] }
 0x122   : > { %739 = vmax.xlane.f32.xlu0 %v2227_v62  ;;  %v594_v63 = vpop.f32.mrf.mxu0 }
 0x123   : > { %v633_v1 = vmul.f32 0.17677669, %v594_v63  ;;  %v2243_v11 = vsel %vm689_vm12, %v635_v0, -1e+30  ;;  %1871 = vmatpush3.bf16.msra.mxu1 %v1951_v58  ;;  %v2433_v58 = vld [vmem:[#allocation2 + $0x78] sm:$0xff] }
 0x124   : > { %737 = vmax.xlane.f32.xlu1 %v2231_v2  ;;  %v1857_v3 = vpop.f32.mrf.mxu0  ;;  %1872 = vmatprep.subr.bf16.mxu1 %v1952_v4 }
 0x125   : > { %v636_v5 = vmul.f32 0.17677669, %v1857_v3  ;;  %v2237_v6 = vsel %vm687_vm10, %v633_v1, -1e+30  ;;  %v2373_v3 = vld [vmem:[#allocation2 + $0x28] sm:$0xff] }
 0x126   : > { %743 = vmax.xlane.f32.xlu0 %v2237_v6  ;;  %v597_v7 = vpop.f32.mrf.mxu0 }
 0x127   : > { %v634_v9 = vmul.f32 0.17677669, %v597_v7  ;;  %v2241_v10 = vsel %vm690_vm11, %v636_v5, -1e+30  ;;  %1873 = vmatpush3.bf16.msra.mxu1 %v1952_v4 }
 0x128   : > { %749 = vmax.xlane.f32.xlu1 %v2241_v10  ;;  %v1860_v12 = vpop.f32.mrf.mxu0  ;;  %1874 = vmatprep.subr.bf16.mxu1 %v1953_v16 }
 0x129   : > { %v639_v17 = vmul.f32 0.17677669, %v1860_v12  ;;  %v2285_v19 = vsel %vm688_vm13, %v634_v9, -1e+30  ;;  %v2383_v9 = vld [vmem:[#allocation2 + $0x40] sm:$0xff] }
 0x12a   : > { %747 = vmax.xlane.f32.xlu0 %v2243_v11  ;;  %v610_v15 = vpop.f32.mrf.mxu0 }
 0x12b   : > { %v637_v18 = vmul.f32 0.17677669, %v610_v15  ;;  %v2298_v29 = vsel %vm693_vm2, %v639_v17, -1e+30  ;;  %v2393_v15 = vld [vmem:[#allocation2 + $0x58] sm:$0xff]  ;;  %1875 = vmatpush3.bf16.msra.mxu1 %v1953_v16 }
 0x12c   : > { %745 = vmax.xlane.f32.xlu1 %v2285_v19  ;;  %v1861_v20 = vpop.f32.mrf.mxu0  ;;  %1876 = vmatprep.subr.bf16.mxu1 %v1954_v28 }
 0x12d   : > { %v640_v22 = vmul.f32 0.17677669, %v1861_v20  ;;  %v2293_v23 = vsel %vm691_vm14, %v637_v18, -1e+30 }
 0x12e   : > { %751 = vmax.xlane.f32.xlu0 %v2293_v23  ;;  %v613_v24 = vpop.f32.mrf.mxu0 }
 0x12f   : > { %v638_v25 = vmul.f32 0.17677669, %v613_v24  ;;  %v2296_v27 = vsel %vm694_vm15, %v640_v22, -1e+30  ;;  %1877 = vmatpush3.bf16.msra.mxu1 %v1954_v28 }
 0x130   : > { %757 = vmax.xlane.f32.xlu1 %v2296_v27 }
 0x131   : > { %v2303_v26 = vsel %vm692_vm3, %v638_v25, -1e+30 }
 0x132   : > { %755 = vmax.xlane.f32.xlu0 %v2298_v29 }
 0x134   : > { %753 = vmax.xlane.f32.xlu1 %v2303_v26 }
 0x19d   : > { %v732_v32 = vpop.xlane.xlu1 %731 }
 0x19e   : > { %v2319_v34 = vmax.f32 %v2313_v31, %v732_v32 }
 0x19f   : > { %v728_v36 = vpop.xlane.xlu0 %727 }
 0x1a0   : > { %v777_v40 = vsub.f32 %v2313_v31, %v2319_v34  ;;  %1347 = vst.msk [vmem:[#allocation2 + $0x10] sm:$0xff] %vm294_vm1, %v2319_v34  ;;  %v2329_v41 = vmax.f32 %v2316_v33, %v728_v36  ;;  %835 = vperm.xlu1 %1930, %v2319_v34  }
 0x1a1   : > { %v734_v43 = vpop.xlane.xlu1 %733 }
 0x1a2   : > { %1345 = vst.msk [vmem:[#allocation2] sm:$0xff] %vm294_vm1, %v2329_v41  ;;  %v2339_v47 = vmax.f32 %v2321_v37, %v734_v43  ;;  %825 = vperm.xlu0 %1929, %v2329_v41   ;;  %v2423_v43 = vld [vmem:[#allocation2 + $0x60] sm:$0xff] }
 0x1a3   : > { %v730_v48 = vpop.xlane.xlu0 %729 }
 0x1a4   : > { %1348 = vst.msk [vmem:[#allocation2 + $0x18] sm:$0xff] %vm294_vm1, %v2339_v47  ;;  %v2348_v51 = vmax.f32 %v2332_v44, %v730_v48  ;;  %840 = vperm.xlu1 %1930, %v2339_v47  }
 0x1a6   : > { %v776_v54 = vsub.f32 %v2332_v44, %v2348_v51  ;;  %1346 = vst.msk [vmem:[#allocation2 + $0x8] sm:$0xff] %vm294_vm1, %v2348_v51  ;;  %v2673_v44 = vsub.f32 %v2321_v37, %v2339_v47 }
 0x1a7   : > { %v736_v55 = vpop.xlane.xlu0 %735 }
 0x1a8   : > { %v2361_v59 = vmax.f32 %v2351_v52, %v736_v55  ;;  %830 = vperm.xlu1 %1930, %v2348_v51   ;;  %v797_v51 = vmul.f32 1.442695, %v2673_v44 }
 0x1a9   : > { %v742_v60 = vpop.xlane.xlu1 %741 }
 0x1aa   : > { %1349 = vst.msk [vmem:[#allocation2 + $0x20] sm:$0xff] %vm294_vm1, %v2361_v59  ;;  %v2371_v0 = vmax.f32 %v2357_v56, %v742_v60 }
 0x1ab   : > { %v740_v1 = vpop.xlane.xlu0 %739 }
 0x1ac   : > { %1352 = vst.msk [vmem:[#allocation2 + $0x38] sm:$0xff] %vm294_vm1, %v2371_v0  ;;  %v2381_v7 = vmax.f32 %v2364_v61, %v740_v1  ;;  %v2677_v37 = vsub.f32 %v2357_v56, %v2371_v0 }
 0x1ad   : > { %v738_v8 = vpop.xlane.xlu1 %737 }
 0x1ae   : > { %1351 = vst.msk [vmem:[#allocation2 + $0x30] sm:$0xff] %vm294_vm1, %v2381_v7  ;;  %v2390_v13 = vmax.f32 %v2373_v3, %v738_v8  ;;  %855 = vperm.xlu1 %1930, %v2381_v7   ;;  %v2443_v8 = vld [vmem:[#allocation2 + $0x70] sm:$0xff]  ;;  %v2674_v31 = vsub.f32 %v2364_v61, %v2381_v7  ;;  %v805_v47 = vmul.f32 1.442695, %v2677_v37  ;;  %v956_v37 = vld [vmem:[#allocation3 + $0x28] sm:$0xff] }
 0x1af   : > { %v744_v14 = vpop.xlane.xlu0 %743 }
 0x1b0   : > { %1350 = vst.msk [vmem:[#allocation2 + $0x28] sm:$0xff] %vm294_vm1, %v2390_v13  ;;  %v2401_v18 = vmax.f32 %v2383_v9, %v744_v14  ;;  %v803_v34 = vmul.f32 1.442695, %v2674_v31 }
 0x1b1   : > { %v750_v20 = vpop.xlane.xlu1 %749 }
 0x1b2   : > { %1353 = vst.msk [vmem:[#allocation2 + $0x40] sm:$0xff] %vm294_vm1, %v2401_v18  ;;  %v2410_v24 = vmax.f32 %v2393_v15, %v750_v20  ;;  %845 = vperm.xlu1 %1930, %v2361_v59  }
 0x1b3   : > { %v748_v25 = vpop.xlane.xlu0 %747 }
 0x1b4   : > { %1356 = vst.msk [vmem:[#allocation2 + $0x58] sm:$0xff] %vm294_vm1, %v2410_v24  ;;  %v2421_v36 = vmax.f32 %v2403_v21, %v748_v25  ;;  %v2453_v25 = vld [vmem:[#allocation2 + $0x68] sm:$0xff] }
 0x1b5   : > { %v746_v39 = vpop.xlane.xlu1 %745 }
 0x1b6   : > { %1355 = vst.msk [vmem:[#allocation2 + $0x50] sm:$0xff] %vm294_vm1, %v2421_v36  ;;  %v2430_v49 = vmax.f32 %v2413_v30, %v746_v39  ;;  %850 = vperm.xlu1 %1930, %v2390_v13  }
 0x1b7   : > { %v752_v55 = vpop.xlane.xlu0 %751 }
 0x1b8   : > { %1354 = vst.msk [vmem:[#allocation2 + $0x48] sm:$0xff] %vm294_vm1, %v2430_v49  ;;  %v2440_v1 = vmax.f32 %v2423_v43, %v752_v55  ;;  %870 = vperm.xlu0 %1929, %v2430_v49   ;;  %v2679_v7 = vsub.f32 %v2413_v30, %v2430_v49 }
 0x1b9   : > { %v758_v4 = vpop.xlane.xlu1 %757 }
 0x1ba   : > { %1357 = vst.msk [vmem:[#allocation2 + $0x60] sm:$0xff] %vm294_vm1, %v2440_v1  ;;  %v2450_v16 = vmax.f32 %v2433_v58, %v758_v4  ;;  %860 = vperm.xlu1 %1930, %v2371_v0   ;;  %v2680_v56 = vsub.f32 %v2423_v43, %v2440_v1 }
 0x1bb   : > { %v756_v20 = vpop.xlane.xlu0 %755 }
 0x1bc   : > { %1360 = vst.msk [vmem:[#allocation2 + $0x78] sm:$0xff] %vm294_vm1, %v2450_v16  ;;  %v2460_v39 = vmax.f32 %v2443_v8, %v756_v20  ;;  %880 = vperm.xlu0 %1929, %v2410_v24   ;;  %v815_v0 = vmul.f32 1.442695, %v2680_v56  ;;  %v962_v56 = vld [vmem:[#allocation3 + $0x58] sm:$0xff] }
 0x1bd   : > { %v754_v55 = vpop.xlane.xlu1 %753 }
 0x1be   : > { %1359 = vst.msk [vmem:[#allocation2 + $0x70] sm:$0xff] %vm294_vm1, %v2460_v39  ;;  %v2468_v32 = vmax.f32 %v2453_v25, %v754_v55  ;;  %865 = vperm.xlu1 %1930, %v2401_v18   ;;  %v2682_v30 = vsub.f32 %v2443_v8, %v2460_v39 }
 0x1c0   : > { %1358 = vst.msk [vmem:[#allocation2 + $0x68] sm:$0xff] %vm294_vm1, %v2468_v32  ;;  %890 = vperm.xlu0 %1929, %v2468_v32   ;;  %v819_v49 = vmul.f32 1.442695, %v2682_v30  ;;  %v2683_v43 = vsub.f32 %v2453_v25, %v2468_v32 }
 0x1c2   : > { %875 = vperm.xlu1 %1930, %v2421_v36  }
 0x1c4   : > { %900 = vperm.xlu0 %1929, %v2450_v16  }
 0x1c6   : > { %885 = vperm.xlu1 %1930, %v2440_v1   ;;  %v817_v1 = vmul.f32 1.442695, %v2683_v43 }
 0x1ca   : > { %895 = vperm.xlu1 %1930, %v2460_v39  }
 0x21b   : > { %v836_v20 = vpop.permute.xlu1 %835 }
 0x21c   : > { %v905_v55 = vsub.f32 %v2196_v35, %v836_v20 }
 0x21d   : > { %v826_v4 = vpop.permute.xlu0 %825 }
 0x21e   : > { %v923_v14 = vmul.f32 1.442695, %v905_v55  ;;  %v903_v28 = vsub.f32 %v2200_v38, %v826_v4 }
 0x21f   : > { %v841_v60 = vpop.permute.xlu1 %840 }
 0x220   : > { %1955 = vpow2.f32 %v923_v14  ;;  %v919_v48 = vmul.f32 1.442695, %v903_v28  ;;  %v906_v5 = vsub.f32 %v2205_v42, %v841_v60 }
 0x222   : > { %1957 = vpow2.f32 %v919_v48  ;;  %v925_v22 = vmul.f32 1.442695, %v906_v5 }
 0x223   : > { %v831_v17 = vpop.permute.xlu1 %830 }
 0x224   : > { %v904_v12 = vsub.f32 %v2209_v45, %v831_v17  ;;  %1959 = vpow2.f32 %v925_v22 }
 0x226   : > { %v921_v50 = vmul.f32 1.442695, %v904_v12 }
 0x228   : > { %1961 = vpow2.f32 %v921_v50 }
 0x229   : > { %v856_v63 = vpop.permute.xlu1 %855 }
 0x22a   : > { %v909_v35 = vsub.f32 %v2227_v62, %v856_v63 }
 0x22c   : > { %v931_v20 = vmul.f32 1.442695, %v909_v35 }
 0x22d   : > { %v1956_v55 = vpop.eup %1955  ;;  %v846_v46 = vpop.permute.xlu1 %845 }
 0x22e   : > { %1963 = vpow2.f32 %v931_v20  ;;  %v907_v38 = vsub.f32 %v2216_v53, %v846_v46  ;;  %987 = vadd.xlane.f32.xlu0 %v1956_v55 }
 0x22f   : > { %v1958_v14 = vpop.eup %1957 }
 0x230   : > { %v927_v42 = vmul.f32 1.442695, %v907_v38  ;;  %983 = vadd.xlane.f32.xlu1 %v1958_v14 }
 0x231   : > { %v851_v5 = vpop.permute.xlu1 %850  ;;  %v1960_v17 = vpop.eup %1959 }
 0x232   : > { %1965 = vpow2.f32 %v927_v42  ;;  %v908_v45 = vsub.f32 %v2231_v2, %v851_v5  ;;  %v1161_v60 = vpack.c.bf16 %v1960_v17, %v1956_v55 }
 0x233   : > { %v871_v12 = vpop.permute.xlu0 %870 }
 0x234   : > { %v929_v50 = vmul.f32 1.442695, %v908_v45  ;;  %989 = vadd.xlane.f32.xlu1 %v1960_v17  ;;  %v912_v62 = vsub.f32 %v2285_v19, %v871_v12 }
 0x235   : > { %v1962_v22 = vpop.eup %1961  ;;  %v861_v63 = vpop.permute.xlu1 %860 }
 0x236   : > { %1967 = vpow2.f32 %v929_v50  ;;  %v910_v48 = vsub.f32 %v2221_v57, %v861_v63  ;;  %985 = vadd.xlane.f32.xlu0 %v1962_v22  ;;  %v1160_v53 = vpack.c.bf16 %v1962_v22, %v1958_v14  ;;  %v937_v4 = vmul.f32 1.442695, %v912_v62 }
 0x237   : > { %v881_v46 = vpop.permute.xlu0 %880 }
 0x238   : > { %v933_v28 = vmul.f32 1.442695, %v910_v48  ;;  %1878 = vmatprep.mubr.bf16.mxu1 %v1160_v53  ;;  %v914_v2 = vsub.f32 %v2241_v10, %v881_v46 }
 0x239   : > { %1879 = vmatmul.mubr.bf16.vlgmr.msra.gmra.mxu1 %v1161_v60  ;;  %v866_v35 = vpop.permute.xlu1 %865 }
 0x23a   : > { %1969 = vpow2.f32 %v933_v28  ;;  %v911_v20 = vsub.f32 %v2237_v6, %v866_v35  ;;  %v941_v57 = vmul.f32 1.442695, %v914_v2 }
 0x23b   : > { %v1964_v38 = vpop.eup %1963  ;;  %v891_v19 = vpop.permute.xlu0 %890  ;;  %1971 = vpow2.f32 %v937_v4 }
 0x23c   : > { %v935_v42 = vmul.f32 1.442695, %v911_v20  ;;  %995 = vadd.xlane.f32.xlu0 %v1964_v38  ;;  %v916_v14 = vsub.f32 %v2303_v26, %v891_v19 }
 0x23d   : > { %v876_v5 = vpop.permute.xlu1 %875 }
 0x23e   : > { %1973 = vpow2.f32 %v935_v42  ;;  %v913_v55 = vsub.f32 %v2243_v11, %v876_v5  ;;  %v945_v12 = vmul.f32 1.442695, %v916_v14  ;;  %v793_v5 = vmul.f32 1.442695, %v776_v54 }
 0x23f   : > { %v1966_v45 = vpop.eup %1965  ;;  %v901_v17 = vpop.permute.xlu0 %900  ;;  %1975 = vpow2.f32 %v941_v57 }
 0x240   : > { %v939_v10 = vmul.f32 1.442695, %v913_v55  ;;  %991 = vadd.xlane.f32.xlu0 %v1966_v45  ;;  %v918_v6 = vsub.f32 %v2296_v27, %v901_v17  ;;  %v795_v55 = vmul.f32 1.442695, %v777_v40 }
 0x241   : > { %v886_v50 = vpop.permute.xlu1 %885 }
 0x242   : > { %1977 = vpow2.f32 %v939_v10  ;;  %v915_v22 = vsub.f32 %v2293_v23, %v886_v50  ;;  %v949_v26 = vmul.f32 1.442695, %v918_v6  ;;  %v2672_v10 = vsub.f32 %v2351_v52, %v2361_v59 }
 0x243   : > { %v1968_v62 = vpop.eup %1967  ;;  %1979 = vpow2.f32 %v945_v12  ;;  %v2678_v59 = vsub.f32 %v2403_v21, %v2421_v36  ;;  %v2681_v21 = vsub.f32 %v2393_v15, %v2410_v24  ;;  %v2684_v24 = vsub.f32 %v2433_v58, %v2450_v16 }
 0x244   : > { %v943_v63 = vmul.f32 1.442695, %v915_v22  ;;  %v1162_v48 = vpack.c.bf16 %v1968_v62, %v1966_v45  ;;  %v2671_v45 = vsub.f32 %v2316_v33, %v2329_v41  ;;  %v799_v12 = vmul.f32 1.442695, %v2672_v10 }
 0x245   : > { %v896_v53 = vpop.permute.xlu1 %895  ;;  %v2675_v33 = vsub.f32 %v2373_v3, %v2390_v13  ;;  %v2676_v41 = vsub.f32 %v2383_v9, %v2401_v18  ;;  %v811_v61 = vmul.f32 1.442695, %v2678_v59  ;;  %v809_v9 = vmul.f32 1.442695, %v2679_v7 }
 0x246   : > { %1981 = vpow2.f32 %v943_v63  ;;  %v917_v11 = vsub.f32 %v2298_v29, %v896_v53  ;;  %1882 = vmatprep.mubr.bf16.mxu1 %v1162_v48  ;;  %v791_v17 = vmul.f32 1.442695, %v2671_v45  ;;  %v813_v36 = vmul.f32 1.442695, %v2681_v21  ;;  %v951_v53 = vld [vmem:[#allocation3] sm:$0xff] }
 0x247   : > { %v1970_v46 = vpop.eup %1969  ;;  %1983 = vpow2.f32 %v949_v26  ;;  %v801_v40 = vmul.f32 1.442695, %v2675_v33  ;;  %v807_v52 = vmul.f32 1.442695, %v2676_v41  ;;  %v953_v26 = vld [vmem:[#allocation3 + $0x10] sm:$0xff]  ;;  %v958_v33 = vld [vmem:[#allocation3 + $0x38] sm:$0xff] }
 0x248   : > { %v947_v60 = vmul.f32 1.442695, %v917_v11  ;;  %997 = vadd.xlane.f32.xlu1 %v1970_v46  ;;  %v1163_v28 = vpack.c.bf16 %v1970_v46, %v1964_v38  ;;  %v1972_v27 = vpop.eup %1971 }
 0x24a   : > { %1985 = vpow2.f32 %v947_v60  ;;  %1883 = vmatmul.mubr.bf16.gmra.mxu1 %v1163_v28 }
 0x24b   : > { %v1974_v4 = vpop.eup %1973  ;;  %1987 = vpow2.f32 %v793_v5 }
 0x24c   : > { %993 = vadd.xlane.f32.xlu1 %v1968_v62  ;;  %v1164_v23 = vpack.c.bf16 %v1972_v27, %v1974_v4  ;;  %v1976_v2 = vpop.eup %1975  ;;  %1989 = vpow2.f32 %v795_v55  ;;  %v821_v62 = vmul.f32 1.442695, %v2684_v24 }
 0x24d   : > { %1991 = vpow2.f32 %v791_v17  ;;  %v955_v17 = vld [vmem:[#allocation3 + $0x20] sm:$0xff] }
 0x24e   : > { %1886 = vmatprep.mubr.bf16.mxu1 %v1164_v23  ;;  %1993 = vpow2.f32 %v799_v12 }
 0x24f   : > { %v1978_v35 = vpop.eup %1977  ;;  %1995 = vpow2.f32 %v797_v51 }
 0x250   : > { %1005 = vadd.xlane.f32.xlu1 %v1976_v2  ;;  %1003 = vadd.xlane.f32.xlu0 %v1978_v35  ;;  %v1165_v20 = vpack.c.bf16 %v1976_v2, %v1978_v35  ;;  %v1980_v19 = vpop.eup %1979  ;;  %1997 = vpow2.f32 %v803_v34  ;;  %v952_v2 = vld [vmem:[#allocation3 + $0x8] sm:$0xff] }
 0x251   : > { %1999 = vpow2.f32 %v801_v40 }
 0x252   : > { %1887 = vmatmul.mubr.bf16.gmra.mxu1 %v1165_v20  ;;  %2001 = vpow2.f32 %v807_v52 }
 0x253   : > { %v1982_v29 = vpop.eup %1981  ;;  %2003 = vpow2.f32 %v805_v47 }
 0x254   : > { %1001 = vadd.xlane.f32.xlu1 %v1972_v27  ;;  %999 = vadd.xlane.f32.xlu0 %v1974_v4  ;;  %v1166_v42 = vpack.c.bf16 %v1980_v19, %v1982_v29  ;;  %v1984_v38 = vpop.eup %1983  ;;  %2005 = vpow2.f32 %v811_v61  ;;  %v954_v4 = vld [vmem:[#allocation3 + $0x18] sm:$0xff] }
 0x255   : > { %2007 = vpow2.f32 %v809_v9 }
 0x256   : > { %1890 = vmatprep.mubr.bf16.mxu1 %v1166_v42  ;;  %2009 = vpow2.f32 %v815_v0 }
 0x257   : > { %v1986_v57 = vpop.eup %1985  ;;  %2011 = vpow2.f32 %v813_v36 }
 0x258   : > { %1013 = vadd.xlane.f32.xlu1 %v1984_v38  ;;  %1007 = vadd.xlane.f32.xlu0 %v1982_v29  ;;  %v1167_v14 = vpack.c.bf16 %v1984_v38, %v1986_v57  ;;  %v2520_v54 = vpop.eup %1987  ;;  %2013 = vpow2.f32 %v819_v49  ;;  %v959_v49 = vld [vmem:[#allocation3 + $0x40] sm:$0xff] }
 0x259   : > { %v1990_v3 = vpop.eup %1989  ;;  %2015 = vpow2.f32 %v817_v1  ;;  %v968_v29 = vmul.f32 %v2520_v54, %v952_v2  ;;  %v964_v2 = vld [vmem:[#allocation3 + $0x68] sm:$0xff] }
 0x25a   : > { %1891 = vmatmul.mubr.bf16.gmra.mxu1 %v1167_v14  ;;  %v1992_v13 = vpop.eup %1991  ;;  %2017 = vpow2.f32 %v821_v62  ;;  %v969_v11 = vmul.f32 %v1990_v3, %v953_v26  ;;  %v963_v26 = vld [vmem:[#allocation3 + $0x60] sm:$0xff] }
 0x25b   : > { %v2535_v18 = vpop.eup %1993  ;;  %v967_v28 = vmul.f32 %v1992_v13, %v951_v53  ;;  %v966_v53 = vld [vmem:[#allocation3 + $0x78] sm:$0xff] }
 0x25c   : > { %1009 = vadd.xlane.f32.xlu1 %v1980_v19  ;;  %1011 = vadd.xlane.f32.xlu0 %v1986_v57  ;;  %v1996_v6 = vpop.eup %1995  ;;  %v957_v57 = vld [vmem:[#allocation3 + $0x30] sm:$0xff]  ;;  %v971_v44 = vmul.f32 %v2535_v18, %v955_v17 }
 0x25d   : > { %v1998_v50 = vpop.eup %1997  ;;  %v970_v35 = vmul.f32 %v1996_v6, %v954_v4 }
 0x25e   : > { %v2547_v22 = vpop.eup %1999  ;;  %v973_v55 = vmul.f32 %v1998_v50, %v957_v57 }
 0x25f   : > { %v2550_v15 = vpop.eup %2001 }
 0x260   : > { %v2004_v8 = vpop.eup %2003  ;;  %v975_v24 = vmul.f32 %v2550_v15, %v959_v49 }
 0x261   : > { %v2556_v39 = vpop.eup %2005  ;;  %v974_v52 = vmul.f32 %v2004_v8, %v958_v33 }
 0x262   : > { %v2558_v32 = vpop.eup %2007 }
 0x263   : > { %v2562_v25 = vpop.eup %2009 }
 0x264   : > { %v2564_v63 = vpop.eup %2011 }
 0x265   : > { %v2568_v58 = vpop.eup %2013  ;;  %v978_v21 = vmul.f32 %v2564_v63, %v962_v56  ;;  %v1049_v56 = vld [vmem:[#allocation4 + $0x8] sm:$0xff] }
 0x266   : > { %v2570_v16 = vpop.eup %2015 }
 0x267   : > { %v2574_v48 = vpop.eup %2017 }
 0x26d   : > { %1071 = vperm.xlu1 %1930, %v2520_v54  }
 0x271   : > { %1076 = vperm.xlu1 %1930, %v1990_v3   ;;  %v972_v3 = vmul.f32 %v2547_v22, %v956_v37  ;;  %v1048_v37 = vld [vmem:[#allocation4] sm:$0xff] }
 0x272   : > { %1066 = vperm.xlu0 %1929, %v1992_v13   ;;  %v961_v13 = vld [vmem:[#allocation3 + $0x50] sm:$0xff] }
 0x275   : > { %1086 = vperm.xlu1 %1930, %v2535_v18   ;;  %v977_v18 = vmul.f32 %v2556_v39, %v961_v13 }
 0x276   : > { %1081 = vperm.xlu0 %1929, %v1996_v6  }
 0x279   : > { %1096 = vperm.xlu1 %1930, %v1998_v50   ;;  %v960_v50 = vld [vmem:[#allocation3 + $0x48] sm:$0xff] }
 0x27a   : > { %1091 = vperm.xlu0 %1929, %v2547_v22   ;;  %v976_v62 = vmul.f32 %v2558_v32, %v960_v50 }
 0x27d   : > { %1106 = vperm.xlu1 %1930, %v2550_v15   ;;  %v982_v15 = vmul.f32 %v2574_v48, %v966_v53 }
 0x27e   : > { %1101 = vperm.xlu0 %1929, %v2004_v8  }
 0x281   : > { %1116 = vperm.xlu1 %1930, %v2556_v39  }
 0x282   : > { %1111 = vperm.xlu0 %1929, %v2558_v32  }
 0x285   : > { %1126 = vperm.xlu1 %1930, %v2562_v25  }
 0x286   : > { %1121 = vperm.xlu0 %1929, %v2564_v63  }
 0x289   : > { %1136 = vperm.xlu1 %1930, %v2568_v58  }
 0x28a   : > { %1131 = vperm.xlu0 %1929, %v2570_v16  }
 0x28e   : > { %1141 = vperm.xlu0 %1929, %v2574_v48  }
 0x2b7   : > { %v988_v46 = vpop.xlane.xlu0 %987 }
 0x2b8   : > { %v1017_v60 = vadd.f32 %v988_v46, %v969_v11 }
 0x2b9   : > { %v984_v27 = vpop.xlane.xlu1 %983 }
 0x2ba   : > { %1034 = vst.msk [vmem:[#allocation3 + $0x10] sm:$0xff] %vm294_vm1, %v1017_v60  ;;  %v1015_v23 = vadd.f32 %v984_v27, %v967_v28  ;;  %v979_v28 = vmul.f32 %v2562_v25, %v963_v26  ;;  %v980_v25 = vmul.f32 %v2570_v16, %v964_v2  ;;  %v1052_v26 = vld [vmem:[#allocation4 + $0x20] sm:$0xff] }
 0x2bc   : > { %1032 = vst.msk [vmem:[#allocation3] sm:$0xff] %vm294_vm1, %v1015_v23  ;;  %v965_v23 = vld [vmem:[#allocation3 + $0x70] sm:$0xff] }
 0x2bd   : > { %v990_v20 = vpop.xlane.xlu1 %989 }
 0x2be   : > { %v1018_v19 = vadd.f32 %v990_v20, %v970_v35 }
 0x2bf   : > { %v986_v42 = vpop.xlane.xlu0 %985 }
 0x2c0   : > { %1035 = vst.msk [vmem:[#allocation3 + $0x18] sm:$0xff] %vm294_vm1, %v1018_v19  ;;  %v1016_v38 = vadd.f32 %v986_v42, %v968_v29  ;;  %v981_v42 = vmul.f32 %v2568_v58, %v965_v23 }
 0x2c1   : > { %v1366_v14 = vld [vmem:[#allocation3 + $0x10] sm:$0xff] }
 0x2c2   : > { %1033 = vst.msk [vmem:[#allocation3 + $0x8] sm:$0xff] %vm294_vm1, %v1016_v38  ;;  %2019 = vrcp.f32 %v1366_v14 }
 0x2c3   : > { %v1364_v5 = vld [vmem:[#allocation3] sm:$0xff] }
 0x2c4   : > { %2021 = vrcp.f32 %v1364_v5 }
 0x2c5   : > { %v996_v45 = vpop.xlane.xlu0 %995 }
 0x2c6   : > { %v1021_v10 = vadd.f32 %v996_v45, %v973_v55 }
 0x2c7   : > { %v1367_v12 = vld [vmem:[#allocation3 + $0x18] sm:$0xff] }
 0x2c8   : > { %1038 = vst.msk [vmem:[#allocation3 + $0x30] sm:$0xff] %vm294_vm1, %v1021_v10  ;;  %2023 = vrcp.f32 %v1367_v12 }
 0x2c9   : > { %v992_v51 = vpop.xlane.xlu0 %991  ;;  %v1365_v31 = vld [vmem:[#allocation3 + $0x8] sm:$0xff] }
 0x2ca   : > { %v1019_v34 = vadd.f32 %v992_v51, %v971_v44  ;;  %2025 = vrcp.f32 %v1365_v31 }
 0x2cc   : > { %1036 = vst.msk [vmem:[#allocation3 + $0x20] sm:$0xff] %vm294_vm1, %v1019_v34 }
 0x2cf   : > { %v2020_v40 = vpop.eup %2019  ;;  %v1370_v41 = vld [vmem:[#allocation3 + $0x30] sm:$0xff] }
 0x2d0   : > { %1424 = vperm.xlu1 %1930, %v2020_v40   ;;  %2027 = vrcp.f32 %v1370_v41  ;;  %v1050_v41 = vld [vmem:[#allocation4 + $0x10] sm:$0xff] }
 0x2d1   : > { %v998_v54 = vpop.xlane.xlu1 %997  ;;  %v2022_v59 = vpop.eup %2021 }
 0x2d2   : > { %v1022_v47 = vadd.f32 %v998_v54, %v974_v52 }
 0x2d3   : > { %v1368_v61 = vld [vmem:[#allocation3 + $0x20] sm:$0xff] }
 0x2d4   : > { %1039 = vst.msk [vmem:[#allocation3 + $0x38] sm:$0xff] %vm294_vm1, %v1022_v47  ;;  %1414 = vperm.xlu1 %1930, %v2022_v59   ;;  %2029 = vrcp.f32 %v1368_v61 }
 0x2d5   : > { %v2024_v7 = vpop.eup %2023  ;;  %v994_v9 = vpop.xlane.xlu1 %993 }
 0x2d6   : > { %v1020_v0 = vadd.f32 %v994_v9, %v972_v3  ;;  %1429 = vperm.xlu0 %1929, %v2024_v7   ;;  %v1051_v3 = vld [vmem:[#allocation4 + $0x18] sm:$0xff] }
 0x2d7   : > { %v2026_v36 = vpop.eup %2025 }
 0x2d8   : > { %1037 = vst.msk [vmem:[#allocation3 + $0x28] sm:$0xff] %vm294_vm1, %v1020_v0 }
 0x2d9   : > { %v1004_v6 = vpop.xlane.xlu0 %1003  ;;  %v1006_v30 = vpop.xlane.xlu1 %1005 }
 0x2da   : > { %v1025_v43 = vadd.f32 %v1004_v6, %v977_v18  ;;  %v1026_v1 = vadd.f32 %v1006_v30, %v978_v21  ;;  %1419 = vperm.xlu0 %1929, %v2026_v36  }
 0x2db   : > { %v1371_v22 = vld [vmem:[#allocation3 + $0x38] sm:$0xff] }
 0x2dc   : > { %1042 = vst.msk [vmem:[#allocation3 + $0x50] sm:$0xff] %vm294_vm1, %v1025_v43  ;;  %1043 = vst.msk [vmem:[#allocation3 + $0x58] sm:$0xff] %vm294_vm1, %v1026_v1  ;;  %2031 = vrcp.f32 %v1371_v22 }
 0x2dd   : > { %v2028_v8 = vpop.eup %2027  ;;  %v1000_v39 = vpop.xlane.xlu0 %999 }
 0x2de   : > { %v1002_v63 = vpop.xlane.xlu1 %1001  ;;  %v1023_v11 = vadd.f32 %v1000_v39, %v975_v24  ;;  %1444 = vperm.xlu1 %1930, %v2028_v8  }
 0x2df   : > { %v1024_v46 = vadd.f32 %v1002_v63, %v976_v62  ;;  %v1369_v60 = vld [vmem:[#allocation3 + $0x28] sm:$0xff]  ;;  %v1054_v63 = vld [vmem:[#allocation4 + $0x30] sm:$0xff] }
 0x2e0   : > { %1040 = vst.msk [vmem:[#allocation3 + $0x40] sm:$0xff] %vm294_vm1, %v1023_v11  ;;  %2033 = vrcp.f32 %v1369_v60 }
 0x2e1   : > { %1041 = vst.msk [vmem:[#allocation3 + $0x48] sm:$0xff] %vm294_vm1, %v1024_v46  ;;  %v2030_v32 = vpop.eup %2029  ;;  %v1008_v27 = vpop.xlane.xlu0 %1007  ;;  %v1055_v46 = vld [vmem:[#allocation4 + $0x38] sm:$0xff] }
 0x2e2   : > { %v1014_v4 = vpop.xlane.xlu1 %1013  ;;  %v1027_v35 = vadd.f32 %v1008_v27, %v979_v28  ;;  %1434 = vperm.xlu1 %1930, %v2030_v32   ;;  %v1053_v27 = vld [vmem:[#allocation4 + $0x28] sm:$0xff] }
 0x2e3   : > { %v1030_v20 = vadd.f32 %v1014_v4, %v982_v15  ;;  %v1374_v19 = vld [vmem:[#allocation3 + $0x50] sm:$0xff]  ;;  %v1375_v29 = vld [vmem:[#allocation3 + $0x58] sm:$0xff] }
 0x2e4   : > { %1044 = vst.msk [vmem:[#allocation3 + $0x60] sm:$0xff] %vm294_vm1, %v1027_v35  ;;  %2035 = vrcp.f32 %v1374_v19  ;;  %v1058_v35 = vld [vmem:[#allocation4 + $0x50] sm:$0xff] }
 0x2e5   : > { %1047 = vst.msk [vmem:[#allocation3 + $0x78] sm:$0xff] %vm294_vm1, %v1030_v20  ;;  %v1012_v48 = vpop.xlane.xlu0 %1011  ;;  %2037 = vrcp.f32 %v1375_v29 }
 0x2e6   : > { %v1010_v38 = vpop.xlane.xlu1 %1009  ;;  %v1029_v57 = vadd.f32 %v1012_v48, %v981_v42 }
 0x2e7   : > { %v1028_v14 = vadd.f32 %v1010_v38, %v980_v25  ;;  %v1372_v5 = vld [vmem:[#allocation3 + $0x40] sm:$0xff] }
 0x2e8   : > { %v1373_v55 = vld [vmem:[#allocation3 + $0x48] sm:$0xff]  ;;  %1046 = vst.msk [vmem:[#allocation3 + $0x70] sm:$0xff] %vm294_vm1, %v1029_v57  ;;  %2039 = vrcp.f32 %v1372_v5  ;;  %v1056_v25 = vld [vmem:[#allocation4 + $0x40] sm:$0xff]  ;;  %v1059_v5 = vld [vmem:[#allocation4 + $0x58] sm:$0xff] }
 0x2e9   : > { %1045 = vst.msk [vmem:[#allocation3 + $0x68] sm:$0xff] %vm294_vm1, %v1028_v14  ;;  %v2032_v45 = vpop.eup %2031  ;;  %2041 = vrcp.f32 %v1373_v55  ;;  %vm1572_vm1 = vcmask 257024  }
 0x2ea   : > { %1449 = vperm.xlu0 %1929, %v2032_v45   ;;  %v1072_v58 = vpop.permute.xlu1 %1071 }
 0x2eb   : > { %v1376_v17 = vld [vmem:[#allocation3 + $0x60] sm:$0xff]  ;;  %v1145_v50 = vmul.f32 %v1072_v58, %v1049_v56  ;;  %v1057_v58 = vld [vmem:[#allocation4 + $0x48] sm:$0xff] }
 0x2ec   : > { %2043 = vrcp.f32 %v1376_v17  ;;  %v1379_v33 = vld [vmem:[#allocation3 + $0x78] sm:$0xff] }
 0x2ed   : > { %v2034_v16 = vpop.eup %2033  ;;  %v1067_v44 = vpop.permute.xlu0 %1066 }
 0x2ee   : > { %1439 = vperm.xlu0 %1929, %v2034_v16   ;;  %v1077_v34 = vpop.permute.xlu1 %1076  ;;  %v1144_v9 = vmul.f32 %v1067_v44, %v1048_v37 }
 0x2ef   : > { %v1378_v10 = vld [vmem:[#allocation3 + $0x70] sm:$0xff]  ;;  %v1146_v47 = vmul.f32 %v1077_v34, %v1050_v41  ;;  %v1060_v41 = vld [vmem:[#allocation4 + $0x60] sm:$0xff] }
 0x2f0   : > { %v1377_v12 = vld [vmem:[#allocation3 + $0x68] sm:$0xff]  ;;  %2045 = vrcp.f32 %v1378_v10 }
 0x2f1   : > { %v2036_v51 = vpop.eup %2035  ;;  %2047 = vrcp.f32 %v1377_v12  ;;  %v1082_v54 = vpop.permute.xlu0 %1081 }
 0x2f2   : > { %v2038_v31 = vpop.eup %2037  ;;  %1464 = vperm.xlu1 %1930, %v2036_v51   ;;  %2049 = vrcp.f32 %v1379_v33  ;;  %v1087_v59 = vpop.permute.xlu1 %1086  ;;  %v1147_v18 = vmul.f32 %v1082_v54, %v1051_v3  ;;  %v1062_v51 = vld [vmem:[#allocation4 + $0x70] sm:$0xff] }
 0x2f3   : > { %1469 = vperm.xlu0 %1929, %v2038_v31   ;;  %v1148_v15 = vmul.f32 %v1087_v59, %v1052_v26 }
 0x2f5   : > { %v2040_v40 = vpop.eup %2039  ;;  %v1092_v21 = vpop.permute.xlu0 %1091 }
 0x2f6   : > { %v2042_v52 = vpop.eup %2041  ;;  %1454 = vperm.xlu1 %1930, %v2040_v40   ;;  %v1097_v43 = vpop.permute.xlu1 %1096  ;;  %v1149_v29 = vmul.f32 %v1092_v21, %v1053_v27 }
 0x2f7   : > { %1459 = vperm.xlu0 %1929, %v2042_v52   ;;  %v1150_v11 = vmul.f32 %v1097_v43, %v1054_v63 }
 0x2f9   : > { %v2044_v61 = vpop.eup %2043  ;;  %v1880_v7 = vpop.f32.mrf.mxu1 }
 0x2fa   : > { %v1315_v13 = vadd.f32 %v1880_v7, %v1146_v47  ;;  %1474 = vperm.xlu1 %1930, %v2044_v61   ;;  %v1102_v8 = vpop.permute.xlu0 %1101  ;;  %v1107_v39 = vpop.permute.xlu1 %1106  ;;  %v1063_v47 = vld [vmem:[#allocation4 + $0x78] sm:$0xff] }
 0x2fb   : > { %v1250_v0 = vpop.f32.mrf.mxu1  ;;  %v1151_v23 = vmul.f32 %v1102_v8, %v1055_v46  ;;  %v1152_v45 = vmul.f32 %v1107_v39, %v1056_v25 }
 0x2fc   : > { %1331 = vst.msk [vmem:[#allocation4 + $0x10] sm:$0xff] %vm327_vm0, %v1315_v13  ;;  %v1313_v36 = vadd.f32 %v1250_v0, %v1144_v9  ;;  %v1061_v9 = vld [vmem:[#allocation4 + $0x68] sm:$0xff] }
 0x2fd   : > { %v2046_v6 = vpop.eup %2045  ;;  %v1881_v30 = vpop.f32.mrf.mxu1 }
 0x2fe   : > { %v2048_v49 = vpop.eup %2047  ;;  %1329 = vst.msk [vmem:[#allocation4] sm:$0xff] %vm327_vm0, %v1313_v36  ;;  %v1316_v1 = vadd.f32 %v1881_v30, %v1147_v18  ;;  %1484 = vperm.xlu1 %1930, %v2046_v6   ;;  %v1112_v53 = vpop.permute.xlu0 %1111 }
 0x2ff   : > { %1479 = vperm.xlu0 %1929, %v2048_v49   ;;  %v1253_v22 = vpop.f32.mrf.mxu1  ;;  %v2050_v62 = vpop.eup %2049  ;;  %v1153_v33 = vmul.f32 %v1112_v53, %v1057_v58 }
 0x300   : > { %1332 = vst.msk [vmem:[#allocation4 + $0x18] sm:$0xff] %vm327_vm0, %v1316_v1  ;;  %v1314_v24 = vadd.f32 %v1253_v22, %v1145_v50  ;;  %v1117_v60 = vpop.permute.xlu1 %1116 }
 0x301   : > { %v1154_v57 = vmul.f32 %v1117_v60, %v1058_v35 }
 0x302   : > { %1330 = vst.msk [vmem:[#allocation4 + $0x8] sm:$0xff] %vm327_vm0, %v1314_v24  ;;  %v1122_v20 = vpop.permute.xlu0 %1121 }
 0x303   : > { %1489 = vperm.xlu0 %1929, %v2050_v62   ;;  %v1155_v12 = vmul.f32 %v1122_v20, %v1059_v5  ;;  %v1398_v49 = vld [vmem:[#allocation4 + $0x10] sm:$0xff] }
 0x304   : > { %v1127_v48 = vpop.permute.xlu1 %1126 }
 0x305   : > { %v1156_v3 = vmul.f32 %v1127_v48, %v1060_v41  ;;  %v1396_v22 = vld [vmem:[#allocation4] sm:$0xff] }
 0x306   : > { %v1132_v16 = vpop.permute.xlu0 %1131 }
 0x307   : > { %v1157_v21 = vmul.f32 %v1132_v16, %v1061_v9  ;;  %v1399_v8 = vld [vmem:[#allocation4 + $0x18] sm:$0xff] }
 0x308   : > { %v1137_v31 = vpop.permute.xlu1 %1136 }
 0x309   : > { %v1158_v54 = vmul.f32 %v1137_v31, %v1062_v51  ;;  %v1397_v46 = vld [vmem:[#allocation4 + $0x8] sm:$0xff] }
 0x30a   : > { %v1884_v28 = vpop.f32.mrf.mxu1  ;;  %v1142_v59 = vpop.permute.xlu0 %1141 }
 0x30b   : > { %v1319_v32 = vadd.f32 %v1884_v28, %v1150_v11  ;;  %v1159_v56 = vmul.f32 %v1142_v59, %v1063_v47 }
 0x30c   : > { %v1266_v4 = vpop.f32.mrf.mxu1 }
 0x30d   : > { %1335 = vst.msk [vmem:[#allocation4 + $0x30] sm:$0xff] %vm327_vm0, %v1319_v32  ;;  %v1317_v2 = vadd.f32 %v1266_v4, %v1148_v15 }
 0x30e   : > { %v1885_v19 = vpop.f32.mrf.mxu1 }
 0x30f   : > { %1333 = vst.msk [vmem:[#allocation4 + $0x20] sm:$0xff] %vm327_vm0, %v1317_v2  ;;  %v1320_v42 = vadd.f32 %v1885_v19, %v1151_v23 }
 0x310   : > { %v1269_v38 = vpop.f32.mrf.mxu1 }
 0x311   : > { %1336 = vst.msk [vmem:[#allocation4 + $0x38] sm:$0xff] %vm327_vm0, %v1320_v42  ;;  %v1318_v14 = vadd.f32 %v1269_v38, %v1149_v29 }
 0x312   : > { %v1888_v55 = vpop.f32.mrf.mxu1 }
 0x313   : > { %1334 = vst.msk [vmem:[#allocation4 + $0x28] sm:$0xff] %vm327_vm0, %v1318_v14  ;;  %v1323_v17 = vadd.f32 %v1888_v55, %v1154_v57 }
 0x314   : > { %v1282_v10 = vpop.f32.mrf.mxu1  ;;  %v1402_v15 = vld [vmem:[#allocation4 + $0x30] sm:$0xff] }
 0x315   : > { %1339 = vst.msk [vmem:[#allocation4 + $0x50] sm:$0xff] %vm327_vm0, %v1323_v17  ;;  %v1321_v44 = vadd.f32 %v1282_v10, %v1152_v45 }
 0x316   : > { %v1889_v34 = vpop.f32.mrf.mxu1  ;;  %v1400_v23 = vld [vmem:[#allocation4 + $0x20] sm:$0xff] }
 0x317   : > { %1337 = vst.msk [vmem:[#allocation4 + $0x40] sm:$0xff] %vm327_vm0, %v1321_v44  ;;  %v1324_v40 = vadd.f32 %v1889_v34, %v1155_v12 }
 0x318   : > { %v1285_v52 = vpop.f32.mrf.mxu1  ;;  %v1403_v19 = vld [vmem:[#allocation4 + $0x38] sm:$0xff] }
 0x319   : > { %1340 = vst.msk [vmem:[#allocation4 + $0x58] sm:$0xff] %vm327_vm0, %v1324_v40  ;;  %v1322_v37 = vadd.f32 %v1285_v52, %v1153_v33 }
 0x31a   : > { %v1892_v61 = vpop.f32.mrf.mxu1  ;;  %v1401_v48 = vld [vmem:[#allocation4 + $0x28] sm:$0xff] }
 0x31b   : > { %1338 = vst.msk [vmem:[#allocation4 + $0x48] sm:$0xff] %vm327_vm0, %v1322_v37  ;;  %v1327_v7 = vadd.f32 %v1892_v61, %v1158_v54 }
 0x31c   : > { %v1298_v13 = vpop.f32.mrf.mxu1  ;;  %v1406_v5 = vld [vmem:[#allocation4 + $0x50] sm:$0xff] }
 0x31d   : > { %1343 = vst.msk [vmem:[#allocation4 + $0x70] sm:$0xff] %vm327_vm0, %v1327_v7  ;;  %v1325_v0 = vadd.f32 %v1298_v13, %v1156_v3 }
 0x31e   : > { %v1893_v18 = vpop.f32.mrf.mxu1  ;;  %v1404_v44 = vld [vmem:[#allocation4 + $0x40] sm:$0xff] }
 0x31f   : > { %1341 = vst.msk [vmem:[#allocation4 + $0x60] sm:$0xff] %vm327_vm0, %v1325_v0  ;;  %v1328_v36 = vadd.f32 %v1893_v18, %v1159_v56 }
 0x320   : > { %v1301_v6 = vpop.f32.mrf.mxu1  ;;  %v1407_v45 = vld [vmem:[#allocation4 + $0x58] sm:$0xff] }
 0x321   : > { %1344 = vst.msk [vmem:[#allocation4 + $0x78] sm:$0xff] %vm327_vm0, %v1328_v36  ;;  %v1326_v30 = vadd.f32 %v1301_v6, %v1157_v21 }
 0x322   : > { %v1405_v31 = vld [vmem:[#allocation4 + $0x48] sm:$0xff] }
 0x323   : > { %1342 = vst.msk [vmem:[#allocation4 + $0x68] sm:$0xff] %vm327_vm0, %v1326_v30 }
 0x324   : > { %v1410_v61 = vld [vmem:[#allocation4 + $0x70] sm:$0xff] }
 0x326   : > { %v1408_v54 = vld [vmem:[#allocation4 + $0x60] sm:$0xff] }
 0x328   : > { %v1411_v21 = vld [vmem:[#allocation4 + $0x78] sm:$0xff] }
 0x32a   : > { %v1409_v7 = vld [vmem:[#allocation4 + $0x68] sm:$0xff] }
 0x34b   : > { %v1425_v50 = vpop.permute.xlu1 %1424 }
 0x34c   : > { %v1494_v43 = vmul.f32 %v1425_v50, %v1398_v49 }
 0x34e   : > { %v1784_v1 = vpack.c.bf16 %v1494_v43, %v1494_v43 }
 0x34f   : > { %v1415_v24 = vpop.permute.xlu1 %1414 }
 0x350   : > { %1575 = vst.msk [vmem:[%s2624_s28 + $0x8] sm:$0xf] %vm1572_vm1, %v1784_v1  ;;  %v1492_v62 = vmul.f32 %v1415_v24, %v1396_v22 }
 0x351   : > { %v1430_v39 = vpop.permute.xlu0 %1429 }
 0x352   : > { %v1782_v63 = vpack.c.bf16 %v1492_v62, %v1492_v62  ;;  %v1495_v26 = vmul.f32 %v1430_v39, %v1399_v8 }
 0x354   : > { %1573 = vst.msk [vmem:[%s2624_s28] sm:$0xf] %vm1572_vm1, %v1782_v63  ;;  %v1785_v53 = vpack.c.bf16 %v1495_v26, %v1495_v26 }
 0x355   : > { %v1420_v11 = vpop.permute.xlu0 %1419 }
 0x356   : > { %1576 = vst.msk [vmem:[%s2624_s28 + $0xc] sm:$0xf] %vm1572_vm1, %v1785_v53  ;;  %v1493_v60 = vmul.f32 %v1420_v11, %v1397_v46 }
 0x358   : > { %v1783_v28 = vpack.c.bf16 %v1493_v60, %v1493_v60 }
 0x359   : > { %v1445_v32 = vpop.permute.xlu1 %1444 }
 0x35a   : > { %1574 = vst.msk [vmem:[%s2624_s28 + $0x4] sm:$0xf] %vm1572_vm1, %v1783_v28  ;;  %v1498_v27 = vmul.f32 %v1445_v32, %v1402_v15 }
 0x35c   : > { %v1788_v4 = vpack.c.bf16 %v1498_v27, %v1498_v27 }
 0x35d   : > { %v1435_v2 = vpop.permute.xlu1 %1434 }
 0x35e   : > { %1579 = vst.msk [vmem:[%s2624_s28 + $0x18] sm:$0xf] %vm1572_vm1, %v1788_v4  ;;  %v1496_v35 = vmul.f32 %v1435_v2, %v1400_v23 }
 0x360   : > { %v1786_v20 = vpack.c.bf16 %v1496_v35, %v1496_v35 }
 0x362   : > { %1577 = vst.msk [vmem:[%s2624_s28 + $0x10] sm:$0xf] %vm1572_vm1, %v1786_v20 }
 0x365   : > { %v1450_v29 = vpop.permute.xlu0 %1449 }
 0x366   : > { %v1499_v42 = vmul.f32 %v1450_v29, %v1403_v19 }
 0x368   : > { %v1789_v25 = vpack.c.bf16 %v1499_v42, %v1499_v42 }
 0x369   : > { %v1440_v38 = vpop.permute.xlu0 %1439 }
 0x36a   : > { %1580 = vst.msk [vmem:[%s2624_s28 + $0x1c] sm:$0xf] %vm1572_vm1, %v1789_v25  ;;  %v1497_v57 = vmul.f32 %v1440_v38, %v1401_v48 }
 0x36c   : > { %v1787_v14 = vpack.c.bf16 %v1497_v57, %v1497_v57 }
 0x36d   : > { %v1465_v55 = vpop.permute.xlu1 %1464 }
 0x36e   : > { %1578 = vst.msk [vmem:[%s2624_s28 + $0x14] sm:$0xf] %vm1572_vm1, %v1787_v14  ;;  %v1470_v17 = vpop.permute.xlu0 %1469  ;;  %v1502_v58 = vmul.f32 %v1465_v55, %v1406_v5 }
 0x36f   : > { %v1503_v16 = vmul.f32 %v1470_v17, %v1407_v45 }
 0x370   : > { %v1792_v10 = vpack.c.bf16 %v1502_v58, %v1502_v58 }
 0x371   : > { %v1793_v12 = vpack.c.bf16 %v1503_v16, %v1503_v16  ;;  %v1455_v51 = vpop.permute.xlu1 %1454 }
 0x372   : > { %1583 = vst.msk [vmem:[%s2624_s28 + $0x28] sm:$0xf] %vm1572_vm1, %v1792_v10  ;;  %v1460_v34 = vpop.permute.xlu0 %1459  ;;  %v1500_v33 = vmul.f32 %v1455_v51, %v1404_v44 }
 0x373   : > { %1584 = vst.msk [vmem:[%s2624_s28 + $0x2c] sm:$0xf] %vm1572_vm1, %v1793_v12  ;;  %v1501_v40 = vmul.f32 %v1460_v34, %v1405_v31 }
 0x374   : > { %v1790_v41 = vpack.c.bf16 %v1500_v33, %v1500_v33 }
 0x375   : > { %v1791_v52 = vpack.c.bf16 %v1501_v40, %v1501_v40  ;;  %v1475_v37 = vpop.permute.xlu1 %1474 }
 0x376   : > { %1581 = vst.msk [vmem:[%s2624_s28 + $0x20] sm:$0xf] %vm1572_vm1, %v1790_v41  ;;  %v1504_v47 = vmul.f32 %v1475_v37, %v1408_v54 }
 0x377   : > { %1582 = vst.msk [vmem:[%s2624_s28 + $0x24] sm:$0xf] %vm1572_vm1, %v1791_v52 }
 0x378   : > { %v1794_v59 = vpack.c.bf16 %v1504_v47, %v1504_v47 }
 0x379   : > { %v1485_v3 = vpop.permute.xlu1 %1484 }
 0x37a   : > { %1585 = vst.msk [vmem:[%s2624_s28 + $0x30] sm:$0xf] %vm1572_vm1, %v1794_v59  ;;  %v1480_v9 = vpop.permute.xlu0 %1479  ;;  %v1506_v13 = vmul.f32 %v1485_v3, %v1410_v61 }
 0x37b   : > { %v1505_v56 = vmul.f32 %v1480_v9, %v1409_v7 }
 0x37c   : > { %v1796_v0 = vpack.c.bf16 %v1506_v13, %v1506_v13 }
 0x37d   : > { %v1795_v18 = vpack.c.bf16 %v1505_v56, %v1505_v56 }
 0x37e   : > { %1587 = vst.msk [vmem:[%s2624_s28 + $0x38] sm:$0xf] %vm1572_vm1, %v1796_v0  ;;  %v1490_v36 = vpop.permute.xlu0 %1489 }
 0x37f   : > { %1586 = vst.msk [vmem:[%s2624_s28 + $0x34] sm:$0xf] %vm1572_vm1, %v1795_v18  ;;  %v1507_v6 = vmul.f32 %v1490_v36, %v1411_v21 }
 0x381   : > { %v1797_v30 = vpack.c.bf16 %v1507_v6, %v1507_v6 }
 0x383   : > { %1588 = vst.msk [vmem:[%s2624_s28 + $0x3c] sm:$0xf] %vm1572_vm1, %v1797_v30 }
 0x384 PF: > { %s13_s14 = sadd.s32 1, %s2073_s14   ;;  %s2685_s12 = smov %s2069_s13 }
 0x385   : > { %p10_p5 = scmp.ge.s32.totalorder %s13_s14, 10   ;;  %s2686_s13 = smov %s2688_s15 }
 0x387   :  { %12 = sbr.rel (!%p10_p5) target bundleno = 2 (0x2), region = 80 }

// kernel: _lambda_.13
= control target key start
LH: loop header
LB: loop body
LE: loop exit
PB: predicated region body
PF: predicated region fallthrough
CT: control target
= control target key end

     0   :  { %s1357_s1 = inlined_call_operand.vmem [shape: bf16[128,128], index: 1, kind: input, shape index: {}]   ;;  %s1358_s0 = inlined_call_operand.vmem [shape: bf16[256,128], index: 0, kind: input, shape index: {}]   ;;  %s1359_s2 = inlined_call_operand.vmem [shape: bf16[256,128], index: 2, kind: input, shape index: {}]   ;;  %s1360_s3 = inlined_call_operand.vmem [shape: bf16[256,128], index: 3, kind: output, shape index: {}]  }
   0x1   :  { %v1145_v0 = vld [vmem:[%s1357_s1 + $0x38] sm:$0xff]   ;;  %v1146_v1 = vld [vmem:[%s1357_s1 + $0x30] sm:$0xff]   ;;  %v1147_v2 = vld [vmem:[%s1357_s1 + $0x28] sm:$0xff]  }
   0x2   :  { %1081 = vmatprep.subr.bf16.mxu0 %v1145_v0  ;;  %1129 = vmatprep.subr.bf16.mxu1 %v1145_v0  ;;  %v1148_v3 = vld [vmem:[%s1357_s1 + $0x20] sm:$0xff]   ;;  %v1149_v6 = vld [vmem:[%s1357_s1 + $0x18] sm:$0xff]   ;;  %v1150_v7 = vld [vmem:[%s1357_s1 + $0x10] sm:$0xff]  }
   0x3   :  { %1082 = vmatpush3.bf16.msra.mxu0 %v1145_v0  ;;  %1137 = vmatpush3.bf16.msra.mxu1 %v1145_v0  ;;  %v1153_v4 = vld [vmem:[%s1358_s0] sm:$0xff]   ;;  %v1151_v8 = vld [vmem:[%s1357_s1 + $0x8] sm:$0xff]   ;;  %v1157_v12 = vld [vmem:[%s1358_s0 + $0x10] sm:$0xff]  }
   0x4   :  { %1083 = vmatprep.subr.bf16.mxu0 %v1146_v1  ;;  %1130 = vmatprep.subr.bf16.mxu1 %v1146_v1  ;;  %v1154_v5 = vld [vmem:[%s1358_s0 + $0x40] sm:$0xff]   ;;  %v1155_v10 = vld [vmem:[%s1358_s0 + $0x8] sm:$0xff]   ;;  %v1158_v13 = vld [vmem:[%s1358_s0 + $0x50] sm:$0xff]  }
   0x5   :  { %1097 = vmatprep.mubr.bf16.mxu0 %v1153_v4  ;;  %1113 = vmatprep.mubr.bf16.mxu1 %v1154_v5  ;;  %v1152_v9 = vld [vmem:[%s1357_s1] sm:$0xff]   ;;  %v1156_v11 = vld [vmem:[%s1358_s0 + $0x48] sm:$0xff]   ;;  %v1159_v14 = vld [vmem:[%s1358_s0 + $0x18] sm:$0xff]  }
   0x6   :  { %v1160_v15 = vld [vmem:[%s1358_s0 + $0x58] sm:$0xff]   ;;  %v1161_v16 = vld [vmem:[%s1358_s0 + $0x20] sm:$0xff]   ;;  %v1163_v18 = vld [vmem:[%s1358_s0 + $0x28] sm:$0xff]  }
   0x7   :  { %1084 = vmatpush3.bf16.msra.mxu0 %v1146_v1  ;;  %1138 = vmatpush3.bf16.msra.mxu1 %v1146_v1  ;;  %v1162_v17 = vld [vmem:[%s1358_s0 + $0x60] sm:$0xff]   ;;  %v1164_v19 = vld [vmem:[%s1358_s0 + $0x68] sm:$0xff]   ;;  %v1165_v20 = vld [vmem:[%s1358_s0 + $0x30] sm:$0xff]  }
   0x8   :  { %1085 = vmatprep.subr.bf16.mxu0 %v1147_v2  ;;  %1131 = vmatprep.subr.bf16.mxu1 %v1147_v2  ;;  %v1166_v21 = vld [vmem:[%s1358_s0 + $0x70] sm:$0xff]   ;;  %v1167_v22 = vld [vmem:[%s1358_s0 + $0x38] sm:$0xff]   ;;  %v1027_v24 = vld [vmem:[%s1359_s2 + $0x8] sm:$0xff]  }
   0x9   :  { %v1168_v23 = vld [vmem:[%s1358_s0 + $0x78] sm:$0xff]   ;;  %v1035_v25 = vld [vmem:[%s1359_s2 + $0x48] sm:$0xff]   ;;  %v884_v26 = vld [vmem:[%s1359_s2] sm:$0xff]   ;;  %v889_v30 = vunpack.c.l.bf16 %v1027_v24  ;;  %v890_v32 = vunpack.c.h.bf16 %v1027_v24 }
   0xa   :  { %v1034_v27 = vld [vmem:[%s1359_s2 + $0x40] sm:$0xff]   ;;  %v921_v31 = vunpack.c.l.bf16 %v1035_v25  ;;  %v922_v33 = vunpack.c.h.bf16 %v1035_v25  ;;  %v885_v35 = vunpack.c.l.bf16 %v884_v26  ;;  %v886_v38 = vunpack.c.h.bf16 %v884_v26  ;;  %v1029_v46 = vld [vmem:[%s1359_s2 + $0x18] sm:$0xff]   ;;  %v1028_v56 = vld [vmem:[%s1359_s2 + $0x10] sm:$0xff]  }
   0xb   :  { %1086 = vmatpush3.bf16.msra.mxu0 %v1147_v2  ;;  %1139 = vmatpush3.bf16.msra.mxu1 %v1147_v2  ;;  %v917_v37 = vunpack.c.l.bf16 %v1034_v27  ;;  %v918_v39 = vunpack.c.h.bf16 %v1034_v27  ;;  %v1037_v47 = vld [vmem:[%s1359_s2 + $0x58] sm:$0xff]   ;;  %v1036_v57 = vld [vmem:[%s1359_s2 + $0x50] sm:$0xff]   ;;  %v897_v59 = vunpack.c.l.bf16 %v1029_v46  ;;  %v898_v0 = vunpack.c.h.bf16 %v1029_v46  ;;  %v1030_v24 = vld [vmem:[%s1359_s2 + $0x20] sm:$0xff]  }
   0xc   :  { %1087 = vmatprep.subr.bf16.mxu0 %v1148_v3  ;;  %1132 = vmatprep.subr.bf16.mxu1 %v1148_v3  ;;  %v929_v61 = vunpack.c.l.bf16 %v1037_v47  ;;  %v930_v1 = vunpack.c.h.bf16 %v1037_v47  ;;  %v925_v5 = vunpack.c.l.bf16 %v1036_v57  ;;  %v1038_v25 = vld [vmem:[%s1359_s2 + $0x60] sm:$0xff]   ;;  %v1033_v46 = vld [vmem:[%s1359_s2 + $0x38] sm:$0xff]  }
   0xd   :  { %v1041_v47 = vld [vmem:[%s1359_s2 + $0x78] sm:$0xff]  }
   0xf   :  { %1088 = vmatpush3.bf16.msra.mxu0 %v1148_v3  ;;  %1140 = vmatpush3.bf16.msra.mxu1 %v1148_v3  ;;  %v893_v3 = vunpack.c.l.bf16 %v1028_v56 }
  0x10   :  { %1089 = vmatprep.subr.bf16.mxu0 %v1149_v6  ;;  %1133 = vmatprep.subr.bf16.mxu1 %v1149_v6 }
  0x13   :  { %1090 = vmatpush3.bf16.msra.mxu0 %v1149_v6  ;;  %1141 = vmatpush3.bf16.msra.mxu1 %v1149_v6  ;;  %v894_v6 = vunpack.c.h.bf16 %v1028_v56  ;;  %v1032_v56 = vld [vmem:[%s1359_s2 + $0x30] sm:$0xff]  }
  0x14   :  { %1091 = vmatprep.subr.bf16.mxu0 %v1150_v7  ;;  %1134 = vmatprep.subr.bf16.mxu1 %v1150_v7 }
  0x17   :  { %1092 = vmatpush3.bf16.msra.mxu0 %v1150_v7  ;;  %1142 = vmatpush3.bf16.msra.mxu1 %v1150_v7  ;;  %v926_v7 = vunpack.c.h.bf16 %v1036_v57  ;;  %v1040_v57 = vld [vmem:[%s1359_s2 + $0x70] sm:$0xff]  }
  0x18   :  { %1093 = vmatprep.subr.bf16.mxu0 %v1151_v8  ;;  %1135 = vmatprep.subr.bf16.mxu1 %v1151_v8 }
  0x1b   :  { %1094 = vmatpush3.bf16.msra.mxu0 %v1151_v8  ;;  %1143 = vmatpush3.bf16.msra.mxu1 %v1151_v8 }
  0x1c   :  { %1095 = vmatprep.subr.bf16.mxu0 %v1152_v9  ;;  %1136 = vmatprep.subr.bf16.mxu1 %v1152_v9 }
  0x1f   :  { %1096 = vmatpush3.bf16.msra.mxu0 %v1152_v9  ;;  %1144 = vmatpush3.bf16.msra.mxu1 %v1152_v9 }
  0x22   :  { %1098 = vmatmul.mubr.bf16.vlgmr.msra.gmra.mxu0 %v1155_v10  ;;  %1114 = vmatmul.mubr.bf16.vlgmr.msra.gmra.mxu1 %v1156_v11 }
  0x23   :  { %1101 = vmatprep.mubr.bf16.mxu0 %v1157_v12  ;;  %1117 = vmatprep.mubr.bf16.mxu1 %v1158_v13 }
  0x2a   :  { %1102 = vmatmul.mubr.bf16.gmra.mxu0 %v1159_v14  ;;  %1118 = vmatmul.mubr.bf16.gmra.mxu1 %v1160_v15  ;;  %v1031_v14 = vld [vmem:[%s1359_s2 + $0x28] sm:$0xff]  }
  0x2b   :  { %1105 = vmatprep.mubr.bf16.mxu0 %v1161_v16  ;;  %1121 = vmatprep.mubr.bf16.mxu1 %v1162_v17  ;;  %v1039_v15 = vld [vmem:[%s1359_s2 + $0x68] sm:$0xff]   ;;  %v905_v27 = vunpack.c.l.bf16 %v1031_v14 }
  0x32   :  { %1106 = vmatmul.mubr.bf16.gmra.mxu0 %v1163_v18  ;;  %1122 = vmatmul.mubr.bf16.gmra.mxu1 %v1164_v19 }
  0x33   :  { %1109 = vmatprep.mubr.bf16.mxu0 %v1165_v20  ;;  %1125 = vmatprep.mubr.bf16.mxu1 %v1166_v21 }
  0x3a   :  { %1110 = vmatmul.mubr.bf16.gmra.mxu0 %v1167_v22  ;;  %1126 = vmatmul.mubr.bf16.gmra.mxu1 %v1168_v23 }
  0xe2   :  { %v1099_v28 = vpop.f32.mrf.mxu0  ;;  %v1115_v29 = vpop.f32.mrf.mxu1 }
  0xe3   :  { %v601_v42 = vadd.f32 %v1099_v28, %v889_v30  ;;  %v617_v43 = vadd.f32 %v1115_v29, %v921_v31  ;;  %v937_v29 = vunpack.c.l.bf16 %v1039_v15 }
  0xe4   :  { %v309_v34 = vpop.f32.mrf.mxu0  ;;  %v373_v36 = vpop.f32.mrf.mxu1 }
  0xe5   :  { %v599_v48 = vadd.f32 %v885_v35, %v309_v34  ;;  %v615_v49 = vadd.f32 %v917_v37, %v373_v36  ;;  %v901_v35 = vunpack.c.l.bf16 %v1030_v24  ;;  %v933_v37 = vunpack.c.l.bf16 %v1038_v25 }
  0xe6   :  { %v1100_v40 = vpop.f32.mrf.mxu0  ;;  %v1116_v41 = vpop.f32.mrf.mxu1 }
  0xe7   :  { %v602_v44 = vadd.f32 %v1100_v40, %v890_v32  ;;  %v618_v45 = vadd.f32 %v1116_v41, %v922_v33  ;;  %v906_v32 = vunpack.c.h.bf16 %v1031_v14  ;;  %v938_v33 = vunpack.c.h.bf16 %v1039_v15 }
  0xe8   :  { %v312_v50 = vpop.f32.mrf.mxu0  ;;  %v376_v51 = vpop.f32.mrf.mxu1 }
  0xe9   :  { %v955_v52 = vpack.c.bf16 %v602_v44, %v601_v42  ;;  %v995_v53 = vpack.c.bf16 %v618_v45, %v617_v43  ;;  %v600_v54 = vadd.f32 %v886_v38, %v312_v50  ;;  %v616_v55 = vadd.f32 %v918_v39, %v376_v51 }
  0xea   :  { %v1103_v58 = vpop.f32.mrf.mxu0  ;;  %v1119_v60 = vpop.f32.mrf.mxu1  ;;  %v902_v38 = vunpack.c.h.bf16 %v1030_v24  ;;  %v934_v39 = vunpack.c.h.bf16 %v1038_v25 }
  0xeb   :  { %1042 = vst [vmem:[%s1360_s3 + $0x8] sm:$0xff] %v955_v52   ;;  %1050 = vst [vmem:[%s1360_s3 + $0x48] sm:$0xff] %v995_v53   ;;  %v950_v62 = vpack.c.bf16 %v600_v54, %v599_v48  ;;  %v990_v63 = vpack.c.bf16 %v616_v55, %v615_v49  ;;  %v605_v10 = vadd.f32 %v1103_v58, %v897_v59  ;;  %v913_v59 = vunpack.c.l.bf16 %v1033_v46 }
  0xec   :  { %v325_v2 = vpop.f32.mrf.mxu0  ;;  %v389_v4 = vpop.f32.mrf.mxu1  ;;  %v621_v11 = vadd.f32 %v1119_v60, %v929_v61  ;;  %v945_v61 = vunpack.c.l.bf16 %v1041_v47 }
  0xed   :  { %951 = vst [vmem:[%s1360_s3] sm:$0xff] %v950_v62   ;;  %1049 = vst [vmem:[%s1360_s3 + $0x40] sm:$0xff] %v990_v63   ;;  %v603_v16 = vadd.f32 %v893_v3, %v325_v2  ;;  %v619_v17 = vadd.f32 %v925_v5, %v389_v4  ;;  %v909_v3 = vunpack.c.l.bf16 %v1032_v56  ;;  %v941_v5 = vunpack.c.l.bf16 %v1040_v57 }
  0xee   :  { %v1104_v8 = vpop.f32.mrf.mxu0  ;;  %v1120_v9 = vpop.f32.mrf.mxu1 }
  0xef   :  { %v606_v12 = vadd.f32 %v1104_v8, %v898_v0  ;;  %v622_v13 = vadd.f32 %v1120_v9, %v930_v1  ;;  %v914_v0 = vunpack.c.h.bf16 %v1033_v46  ;;  %v946_v1 = vunpack.c.h.bf16 %v1041_v47 }
  0xf0   :  { %v328_v18 = vpop.f32.mrf.mxu0  ;;  %v392_v19 = vpop.f32.mrf.mxu1 }
  0xf1   :  { %v965_v20 = vpack.c.bf16 %v606_v12, %v605_v10  ;;  %v1005_v21 = vpack.c.bf16 %v622_v13, %v621_v11  ;;  %v604_v22 = vadd.f32 %v894_v6, %v328_v18  ;;  %v620_v23 = vadd.f32 %v926_v7, %v392_v19 }
  0xf2   :  { %v1107_v26 = vpop.f32.mrf.mxu0  ;;  %v1123_v28 = vpop.f32.mrf.mxu1  ;;  %v910_v6 = vunpack.c.h.bf16 %v1032_v56  ;;  %v942_v7 = vunpack.c.h.bf16 %v1040_v57 }
  0xf3   :  { %1044 = vst [vmem:[%s1360_s3 + $0x18] sm:$0xff] %v965_v20   ;;  %1052 = vst [vmem:[%s1360_s3 + $0x58] sm:$0xff] %v1005_v21   ;;  %v960_v30 = vpack.c.bf16 %v604_v22, %v603_v16  ;;  %v1000_v31 = vpack.c.bf16 %v620_v23, %v619_v17  ;;  %v609_v42 = vadd.f32 %v1107_v26, %v905_v27 }
  0xf4   :  { %v341_v34 = vpop.f32.mrf.mxu0  ;;  %v405_v36 = vpop.f32.mrf.mxu1  ;;  %v625_v43 = vadd.f32 %v1123_v28, %v937_v29 }
  0xf5   :  { %1043 = vst [vmem:[%s1360_s3 + $0x10] sm:$0xff] %v960_v30   ;;  %1051 = vst [vmem:[%s1360_s3 + $0x50] sm:$0xff] %v1000_v31   ;;  %v607_v48 = vadd.f32 %v901_v35, %v341_v34  ;;  %v623_v49 = vadd.f32 %v933_v37, %v405_v36 }
  0xf6   :  { %v1108_v40 = vpop.f32.mrf.mxu0  ;;  %v1124_v41 = vpop.f32.mrf.mxu1 }
  0xf7   :  { %v610_v44 = vadd.f32 %v1108_v40, %v906_v32  ;;  %v626_v45 = vadd.f32 %v1124_v41, %v938_v33 }
  0xf8   :  { %v344_v50 = vpop.f32.mrf.mxu0  ;;  %v408_v51 = vpop.f32.mrf.mxu1 }
  0xf9   :  { %v975_v52 = vpack.c.bf16 %v610_v44, %v609_v42  ;;  %v1015_v53 = vpack.c.bf16 %v626_v45, %v625_v43  ;;  %v608_v54 = vadd.f32 %v902_v38, %v344_v50  ;;  %v624_v55 = vadd.f32 %v934_v39, %v408_v51 }
  0xfa   :  { %v1111_v58 = vpop.f32.mrf.mxu0  ;;  %v1127_v60 = vpop.f32.mrf.mxu1 }
  0xfb   :  { %1046 = vst [vmem:[%s1360_s3 + $0x28] sm:$0xff] %v975_v52   ;;  %1054 = vst [vmem:[%s1360_s3 + $0x68] sm:$0xff] %v1015_v53   ;;  %v970_v62 = vpack.c.bf16 %v608_v54, %v607_v48  ;;  %v1010_v63 = vpack.c.bf16 %v624_v55, %v623_v49  ;;  %v613_v10 = vadd.f32 %v1111_v58, %v913_v59 }
  0xfc   :  { %v357_v2 = vpop.f32.mrf.mxu0  ;;  %v421_v4 = vpop.f32.mrf.mxu1  ;;  %v629_v11 = vadd.f32 %v1127_v60, %v945_v61 }
  0xfd   :  { %1045 = vst [vmem:[%s1360_s3 + $0x20] sm:$0xff] %v970_v62   ;;  %1053 = vst [vmem:[%s1360_s3 + $0x60] sm:$0xff] %v1010_v63   ;;  %v611_v14 = vadd.f32 %v909_v3, %v357_v2  ;;  %v627_v15 = vadd.f32 %v941_v5, %v421_v4 }
  0xfe   :  { %v1112_v8 = vpop.f32.mrf.mxu0  ;;  %v1128_v9 = vpop.f32.mrf.mxu1 }
  0xff   :  { %v614_v12 = vadd.f32 %v1112_v8, %v914_v0  ;;  %v630_v13 = vadd.f32 %v1128_v9, %v946_v1 }
 0x100   :  { %v360_v16 = vpop.f32.mrf.mxu0  ;;  %v424_v17 = vpop.f32.mrf.mxu1 }
 0x101   :  { %v985_v18 = vpack.c.bf16 %v614_v12, %v613_v10  ;;  %v1025_v19 = vpack.c.bf16 %v630_v13, %v629_v11  ;;  %v612_v20 = vadd.f32 %v910_v6, %v360_v16  ;;  %v628_v21 = vadd.f32 %v942_v7, %v424_v17 }
 0x103   :  { %1048 = vst [vmem:[%s1360_s3 + $0x38] sm:$0xff] %v985_v18   ;;  %1056 = vst [vmem:[%s1360_s3 + $0x78] sm:$0xff] %v1025_v19   ;;  %v980_v22 = vpack.c.bf16 %v612_v20, %v611_v14  ;;  %v1020_v23 = vpack.c.bf16 %v628_v21, %v627_v15 }
 0x105   :  { %1047 = vst [vmem:[%s1360_s3 + $0x30] sm:$0xff] %v980_v22   ;;  %1055 = vst [vmem:[%s1360_s3 + $0x70] sm:$0xff] %v1020_v23  }

// kernel: _lambda_.14
= control target key start
LH: loop header
LB: loop body
LE: loop exit
PB: predicated region body
PF: predicated region fallthrough
CT: control target
= control target key end

     0   :  { %s2699_s15 = smov 0   ;;  %s2701_s16 = smov 0   ;;  %s3857_s0 = inlined_call_operand.vmem [shape: bf16[256,128], index: 0, kind: input, shape index: {}]   ;;  %s3858_s1 = inlined_call_operand.vmem [shape: bf16[128,512], index: 1, kind: input, shape index: {}]   ;;  %s3859_s2 = inlined_call_operand.vmem [shape: f32[1,128], index: 2, kind: input, shape index: {}]   ;;  %s3860_s3 = inlined_call_operand.vmem [shape: f32[1,128], index: 3, kind: input, shape index: {}]   ;;  %s3861_s4 = inlined_call_operand.vmem [shape: bf16[256,512], index: 4, kind: output, shape index: {}]  }
   0x1   :  { %s2703_s17 = smov 0   ;;  %s2705_s18 = smov 0  }
   0x2   :  { %s2707_s19 = smov 0  }
   0x3 LB: > { %s23_s20 = sadd.s32 1, %s2667_s18  ;;  %s2181_s21 = sadd.s32 4294967295, %s2671_s19   ;;  %s2671_s19 = sphi %s2707_s19, %s14_s19   ;;  %s2667_s18 = sphi %s2705_s18, %s3866_s18   ;;  %s2663_s17 = sphi %s2703_s17, %s3865_s17   ;;  %s2659_s16 = sphi %s2701_s16, %s3864_s16   ;;  %s2655_s15 = sphi %s2699_s15, %s3863_s15  }
   0x4   : > { %p24_p0 = scmp.ge.s32.totalorder %s23_s20, 2  ;;  %p66_p1 = scmp.ne.s32.totalorder %s2659_s16, %s2655_s15 }
   0x5   : > { %p67_p2 = scmp.eq.s32.totalorder %s2671_s19, 0  ;;  %p140_p4 = scmp.eq.s32.totalorder %s2181_s21, 1 }
   0x6   : > { %s3868_s20 = smov (%p24_p0, %s23_s20), 0  ;;  %s59_s23 = sadd.s32 1, %s2659_s16 }
   0x7   : > { %p68_p3 = por %p67_p2, %p66_p1  ;;  %s56_s22 = ssub.s32 %s2667_s18, %s3868_s20 }
   0x8   : > { %p57_p5 = scmp.eq.s32.totalorder %s56_s22, 0  ;;  %p2734_p6 = por %p140_p4, %p66_p1 }
   0x9   : > { %p2185_p7 = scmp.ge.s32.totalorder %s2671_s19, 2 }
   0xa   : > { %s2739_s25 = scalar_select %p57_p5, %s2659_s16, %s59_s23  }
   0xb   : > { %177 = sbr.rel (%p2185_p7) target bundleno = 28 (0x1c), region = 28 }
  0x10   : > { %180 = sbr.rel (!%p68_p3) target bundleno = 28 (0x1c), region = 32  ;;  %s182_s26 = sand.u32 (%p68_p3), 1, %s2659_s16  }
  0x11   : > { %s2247_s27 = sshll.u32 (%p68_p3), %s2667_s18, 3  ;;  %s2186_s28 = sshll.u32 (%p68_p3), %s182_s26, 7 }
  0x12   : > { %s2747_s5 = scalar_lea.vmem (%p68_p3), %s3858_s1, %s2247_s27  ;;  %s184_s6 = scalar_lea.vmem (%p68_p3), [#allocation2], %s2186_s28 }
  0x13   : > { %v246_v0 = vld [vmem:[%s2747_s5] sm:$0xff] (%p68_p3)  ;;  %v248_v1 = vld [vmem:[%s2747_s5 + $0x10] sm:$0xff] (%p68_p3) }
  0x14   : > { %v250_v2 = vld [vmem:[%s2747_s5 + $0x20] sm:$0xff] (%p68_p3)  ;;  %247 = vst [vmem:[%s184_s6] sm:$0xff] (%p68_p3), %v246_v0  ;;  %249 = vst [vmem:[%s184_s6 + $0x8] sm:$0xff] (%p68_p3), %v248_v1  ;;  %v252_v3 = vld [vmem:[%s2747_s5 + $0x30] sm:$0xff] (%p68_p3) }
  0x15   : > { %251 = vst [vmem:[%s184_s6 + $0x10] sm:$0xff] %v250_v2  ;;  %v254_v4 = vld [vmem:[%s2747_s5 + $0x40] sm:$0xff]  ;;  %v256_v5 = vld [vmem:[%s2747_s5 + $0x50] sm:$0xff]  ;;  %253 = vst [vmem:[%s184_s6 + $0x18] sm:$0xff] %v252_v3 }
  0x16   : > { %255 = vst [vmem:[%s184_s6 + $0x20] sm:$0xff] %v254_v4  ;;  %257 = vst [vmem:[%s184_s6 + $0x28] sm:$0xff] %v256_v5  ;;  %v258_v6 = vld [vmem:[%s2747_s5 + $0x60] sm:$0xff]  ;;  %v260_v7 = vld [vmem:[%s2747_s5 + $0x70] sm:$0xff] }
  0x17   : > { %v262_v8 = vld [vmem:[%s2747_s5 + $0x80] sm:$0xff]  ;;  %259 = vst [vmem:[%s184_s6 + $0x30] sm:$0xff] %v258_v6  ;;  %261 = vst [vmem:[%s184_s6 + $0x38] sm:$0xff] %v260_v7  ;;  %v264_v9 = vld [vmem:[%s2747_s5 + $0x90] sm:$0xff] }
  0x18   : > { %263 = vst [vmem:[%s184_s6 + $0x40] sm:$0xff] %v262_v8  ;;  %v266_v10 = vld [vmem:[%s2747_s5 + $0xa0] sm:$0xff]  ;;  %v268_v11 = vld [vmem:[%s2747_s5 + $0xb0] sm:$0xff]  ;;  %265 = vst [vmem:[%s184_s6 + $0x48] sm:$0xff] %v264_v9 }
  0x19   : > { %267 = vst [vmem:[%s184_s6 + $0x50] sm:$0xff] %v266_v10  ;;  %269 = vst [vmem:[%s184_s6 + $0x58] sm:$0xff] %v268_v11  ;;  %v270_v12 = vld [vmem:[%s2747_s5 + $0xc0] sm:$0xff]  ;;  %v272_v13 = vld [vmem:[%s2747_s5 + $0xd0] sm:$0xff] }
  0x1a   : > { %v274_v14 = vld [vmem:[%s2747_s5 + $0xe0] sm:$0xff]  ;;  %271 = vst [vmem:[%s184_s6 + $0x60] sm:$0xff] %v270_v12  ;;  %273 = vst [vmem:[%s184_s6 + $0x68] sm:$0xff] %v272_v13  ;;  %v276_v15 = vld [vmem:[%s2747_s5 + $0xf0] sm:$0xff] }
  0x1b   : > { %275 = vst [vmem:[%s184_s6 + $0x70] sm:$0xff] %v274_v14  ;;  %277 = vst [vmem:[%s184_s6 + $0x78] sm:$0xff] %v276_v15 }
  0x1c PF: > { %p2189_p8 = scmp.ge.s32.totalorder %s2671_s19, 1  ;;  %p282_p9 = scmp.lt.s32.totalorder %s2671_s19, 3 }
  0x1e   : > { %p283_p10 = pnand %p2189_p8, %p282_p9 }
  0x1f   : > { %s289_s29 = sand.u32 (!%p283_p10), 1, %s2655_s15  }
  0x20   : > { %286 = sbr.rel (%p283_p10) target bundleno = 725 (0x2d5), region = 70  ;;  %s2190_s30 = sshll.u32 (!%p283_p10), %s289_s29, 7 }
  0x21   : > { %s2946_s5 = scalar_lea.vmem (!%p283_p10), [#allocation2], %s2190_s30  ;;  %s3351_s10 = sshll.u32 (!%p283_p10), %s289_s29, 8 }
  0x22   : > { %s3372_s15 = scalar_lea.vmem (!%p283_p10), [#allocation3], %s3351_s10 }
  0x25   : > { %v2770_v16 = vld [vmem:[%s3857_s0] sm:$0xff]   ;;  %v2788_v22 = vld [vmem:[%s3857_s0 + $0x8] sm:$0xff]   ;;  %v2810_v28 = vld [vmem:[%s3857_s0 + $0x10] sm:$0xff]   ;;  %s2280_s11 = sshll.u32 (%p2734_p6), %s2663_s17, 3 }
  0x26   : > { %v2775_v17 = vld [vmem:[%s3857_s0 + $0x40] sm:$0xff]   ;;  %v2283_v18 = vunpack.c.l.bf16 %v2770_v16  ;;  %v2284_v20 = vunpack.c.h.bf16 %v2770_v16  ;;  %v2287_v23 = vunpack.c.l.bf16 %v2788_v22  ;;  %v2288_v24 = vunpack.c.h.bf16 %v2788_v22  ;;  %v2799_v25 = vld [vmem:[%s3857_s0 + $0x48] sm:$0xff]   ;;  %v2821_v31 = vld [vmem:[%s3857_s0 + $0x50] sm:$0xff]   ;;  %s3779_s14 = scalar_lea.vmem (%p2734_p6), %s3861_s4, %s2280_s11 }
  0x27   : > { %v2315_v19 = vunpack.c.l.bf16 %v2775_v17  ;;  %v2316_v21 = vunpack.c.h.bf16 %v2775_v17  ;;  %v2319_v26 = vunpack.c.l.bf16 %v2799_v25  ;;  %v2320_v27 = vunpack.c.h.bf16 %v2799_v25  ;;  %v2832_v34 = vld [vmem:[%s3857_s0 + $0x18] sm:$0xff]   ;;  %v2854_v40 = vld [vmem:[%s3857_s0 + $0x20] sm:$0xff]   ;;  %v2876_v46 = vld [vmem:[%s3857_s0 + $0x28] sm:$0xff]  }
  0x28   : > { %392 = vadd.xlane.f32.xlu0 %v2283_v18  ;;  %v2291_v29 = vunpack.c.l.bf16 %v2810_v28  ;;  %v2292_v30 = vunpack.c.h.bf16 %v2810_v28  ;;  %v2323_v32 = vunpack.c.l.bf16 %v2821_v31  ;;  %v2324_v33 = vunpack.c.h.bf16 %v2821_v31  ;;  %v2843_v37 = vld [vmem:[%s3857_s0 + $0x58] sm:$0xff]   ;;  %v2865_v43 = vld [vmem:[%s3857_s0 + $0x60] sm:$0xff]   ;;  %v2887_v49 = vld [vmem:[%s3857_s0 + $0x68] sm:$0xff]  }
  0x29   : > { %424 = vadd.xlane.f32.xlu1 %v2315_v19  ;;  %v2295_v35 = vunpack.c.l.bf16 %v2832_v34  ;;  %v2296_v36 = vunpack.c.h.bf16 %v2832_v34  ;;  %v2327_v38 = vunpack.c.l.bf16 %v2843_v37  ;;  %v2328_v39 = vunpack.c.h.bf16 %v2843_v37  ;;  %v2898_v52 = vld [vmem:[%s3857_s0 + $0x30] sm:$0xff]   ;;  %v2920_v58 = vld [vmem:[%s3857_s0 + $0x38] sm:$0xff]  }
  0x2a   : > { %v2299_v41 = vunpack.c.l.bf16 %v2854_v40  ;;  %v2300_v42 = vunpack.c.h.bf16 %v2854_v40  ;;  %v2331_v44 = vunpack.c.l.bf16 %v2865_v43  ;;  %v2332_v45 = vunpack.c.h.bf16 %v2865_v43  ;;  %v2909_v55 = vld [vmem:[%s3857_s0 + $0x70] sm:$0xff]   ;;  %v2931_v61 = vld [vmem:[%s3857_s0 + $0x78] sm:$0xff]  }
  0x2b   : > { %v2303_v47 = vunpack.c.l.bf16 %v2876_v46  ;;  %v2304_v48 = vunpack.c.h.bf16 %v2876_v46  ;;  %v2335_v50 = vunpack.c.l.bf16 %v2887_v49  ;;  %v2336_v51 = vunpack.c.h.bf16 %v2887_v49  ;;  %v2417_v0 = vld [vmem:[%s2946_s5 + $0x74] ss:$8 sps:$4 sm:$0xff]  }
  0x2c   : > { %394 = vadd.xlane.f32.xlu0 %v2284_v20  ;;  %v2307_v53 = vunpack.c.l.bf16 %v2898_v52  ;;  %v2308_v54 = vunpack.c.h.bf16 %v2898_v52  ;;  %v2339_v56 = vunpack.c.l.bf16 %v2909_v55  ;;  %v2340_v57 = vunpack.c.h.bf16 %v2909_v55  ;;  %935 = vmatprep.subr.bf16.mxu0 %v2417_v0 }
  0x2d   : > { %426 = vadd.xlane.f32.xlu1 %v2316_v21  ;;  %v2311_v59 = vunpack.c.l.bf16 %v2920_v58  ;;  %v2312_v60 = vunpack.c.h.bf16 %v2920_v58  ;;  %v2343_v62 = vunpack.c.l.bf16 %v2931_v61  ;;  %v2344_v63 = vunpack.c.h.bf16 %v2931_v61  ;;  %2360 = vmatprep.subr.bf16.mxu1 %v2417_v0 }
  0x30   : > { %396 = vadd.xlane.f32.xlu0 %v2287_v23 }
  0x31   : > { %398 = vadd.xlane.f32.xlu1 %v2288_v24 }
  0x34   : > { %428 = vadd.xlane.f32.xlu0 %v2319_v26 }
  0x35   : > { %430 = vadd.xlane.f32.xlu1 %v2320_v27 }
  0x38   : > { %400 = vadd.xlane.f32.xlu0 %v2291_v29 }
  0x39   : > { %402 = vadd.xlane.f32.xlu1 %v2292_v30 }
  0x3c   : > { %432 = vadd.xlane.f32.xlu0 %v2323_v32 }
  0x3d   : > { %434 = vadd.xlane.f32.xlu1 %v2324_v33 }
  0x40   : > { %404 = vadd.xlane.f32.xlu0 %v2295_v35 }
  0x41   : > { %406 = vadd.xlane.f32.xlu1 %v2296_v36 }
  0x44   : > { %436 = vadd.xlane.f32.xlu0 %v2327_v38 }
  0x45   : > { %438 = vadd.xlane.f32.xlu1 %v2328_v39 }
  0x48   : > { %408 = vadd.xlane.f32.xlu0 %v2299_v41 }
  0x49   : > { %410 = vadd.xlane.f32.xlu1 %v2300_v42 }
  0x4c   : > { %440 = vadd.xlane.f32.xlu0 %v2331_v44 }
  0x4d   : > { %442 = vadd.xlane.f32.xlu1 %v2332_v45 }
  0x50   : > { %412 = vadd.xlane.f32.xlu0 %v2303_v47 }
  0x51   : > { %414 = vadd.xlane.f32.xlu1 %v2304_v48 }
  0x54   : > { %444 = vadd.xlane.f32.xlu0 %v2335_v50 }
  0x55   : > { %446 = vadd.xlane.f32.xlu1 %v2336_v51 }
  0x58   : > { %416 = vadd.xlane.f32.xlu0 %v2307_v53 }
  0x59   : > { %418 = vadd.xlane.f32.xlu1 %v2308_v54 }
  0x5c   : > { %448 = vadd.xlane.f32.xlu0 %v2339_v56 }
  0x5d   : > { %450 = vadd.xlane.f32.xlu1 %v2340_v57 }
  0x60   : > { %420 = vadd.xlane.f32.xlu0 %v2311_v59 }
  0x61   : > { %422 = vadd.xlane.f32.xlu1 %v2312_v60 }
  0x64   : > { %452 = vadd.xlane.f32.xlu0 %v2343_v62 }
  0x65   : > { %454 = vadd.xlane.f32.xlu1 %v2344_v63 }
  0xb1   : > { %v393_v1 = vpop.xlane.xlu0 %392 }
  0xb2   : > { %v425_v2 = vpop.xlane.xlu1 %424  ;;  %v457_v3 = vmul.f32 0.0078125, %v393_v1 }
  0xb3   : > { %v473_v4 = vmul.f32 0.0078125, %v425_v2 }
  0xb4   : > { %v2951_v5 = vsub.f32 %v2283_v18, %v457_v3 }
  0xb5   : > { %v2955_v6 = vsub.f32 %v2315_v19, %v473_v4  ;;  %v395_v7 = vpop.xlane.xlu0 %394 }
  0xb6   : > { %v427_v8 = vpop.xlane.xlu1 %426  ;;  %v458_v9 = vmul.f32 0.0078125, %v395_v7  ;;  %v521_v10 = vmul.f32 %v2951_v5, %v2951_v5 }
  0xb7   : > { %v474_v11 = vmul.f32 0.0078125, %v427_v8  ;;  %v537_v14 = vmul.f32 %v2955_v6, %v2955_v6  ;;  %v2419_v8 = vld [vmem:[%s2946_s5 + $0x70] ss:$8 sps:$4 sm:$0xff]  }
  0xb8   : > { %v2961_v12 = vsub.f32 %v2284_v20, %v458_v9  ;;  %553 = vadd.xlane.f32.xlu0 %v521_v10  ;;  %936 = vmatpush1.bf16.msra.mxu0 %v2419_v8 }
  0xb9   : > { %v2965_v13 = vsub.f32 %v2316_v21, %v474_v11  ;;  %v397_v15 = vpop.xlane.xlu0 %396  ;;  %2368 = vmatpush1.bf16.msra.mxu1 %v2419_v8 }
  0xba   : > { %v399_v18 = vpop.xlane.xlu1 %398  ;;  %v459_v19 = vmul.f32 0.0078125, %v397_v15  ;;  %v522_v0 = vmul.f32 %v2961_v12, %v2961_v12  ;;  %v2420_v15 = vld [vmem:[%s2946_s5 + $0x64] ss:$8 sps:$4 sm:$0xff]  }
  0xbb   : > { %v460_v1 = vmul.f32 0.0078125, %v399_v18  ;;  %v538_v20 = vmul.f32 %v2965_v13, %v2965_v13  ;;  %937 = vmatprep.subr.bf16.mxu0 %v2420_v15  ;;  %2361 = vmatprep.subr.bf16.mxu1 %v2420_v15 }
  0xbc   : > { %v2973_v16 = vsub.f32 %v2287_v23, %v459_v19  ;;  %585 = vadd.xlane.f32.xlu0 %v537_v14  ;;  %555 = vadd.xlane.f32.xlu1 %v522_v0  ;;  %v2422_v19 = vld [vmem:[%s2946_s5 + $0x60] ss:$8 sps:$4 sm:$0xff]  }
  0xbd   : > { %v2977_v17 = vsub.f32 %v2288_v24, %v460_v1  ;;  %v429_v21 = vpop.xlane.xlu0 %428  ;;  %938 = vmatpush1.bf16.msra.mxu0 %v2422_v19  ;;  %2369 = vmatpush1.bf16.msra.mxu1 %v2422_v19 }
  0xbe   : > { %v431_v2 = vpop.xlane.xlu1 %430  ;;  %v475_v3 = vmul.f32 0.0078125, %v429_v21  ;;  %v523_v4 = vmul.f32 %v2973_v16, %v2973_v16 }
  0xbf   : > { %v476_v7 = vmul.f32 0.0078125, %v431_v2  ;;  %v524_v24 = vmul.f32 %v2977_v17, %v2977_v17  ;;  %v2423_v2 = vld [vmem:[%s2946_s5 + $0x54] ss:$8 sps:$4 sm:$0xff]  }
  0xc0   : > { %v2986_v23 = vsub.f32 %v2319_v26, %v475_v3  ;;  %587 = vadd.xlane.f32.xlu1 %v538_v20  ;;  %557 = vadd.xlane.f32.xlu0 %v523_v4  ;;  %v2425_v4 = vld [vmem:[%s2946_s5 + $0x50] ss:$8 sps:$4 sm:$0xff]  }
  0xc1   : > { %v2990_v22 = vsub.f32 %v2320_v27, %v476_v7  ;;  %v401_v9 = vpop.xlane.xlu0 %400  ;;  %939 = vmatprep.subr.bf16.mxu0 %v2423_v2  ;;  %2362 = vmatprep.subr.bf16.mxu1 %v2423_v2 }
  0xc2   : > { %v403_v10 = vpop.xlane.xlu1 %402  ;;  %v461_v11 = vmul.f32 0.0078125, %v401_v9  ;;  %v539_v14 = vmul.f32 %v2986_v23, %v2986_v23  ;;  %940 = vmatpush1.bf16.msra.mxu0 %v2425_v4  ;;  %2370 = vmatpush1.bf16.msra.mxu1 %v2425_v4  ;;  %v2432_v4 = vld [vmem:[%s2946_s5 + $0x24] ss:$8 sps:$4 sm:$0xff]  }
  0xc3   : > { %v462_v26 = vmul.f32 0.0078125, %v403_v10  ;;  %v540_v18 = vmul.f32 %v2990_v22, %v2990_v22  ;;  %v2426_v10 = vld [vmem:[%s2946_s5 + $0x44] ss:$8 sps:$4 sm:$0xff]  }
  0xc4   : > { %v2999_v25 = vsub.f32 %v2291_v29, %v461_v11  ;;  %559 = vadd.xlane.f32.xlu1 %v524_v24  ;;  %589 = vadd.xlane.f32.xlu0 %v539_v14  ;;  %v2428_v14 = vld [vmem:[%s2946_s5 + $0x40] ss:$8 sps:$4 sm:$0xff]  }
  0xc5   : > { %v3003_v27 = vsub.f32 %v2292_v30, %v462_v26  ;;  %v433_v0 = vpop.xlane.xlu0 %432  ;;  %941 = vmatprep.subr.bf16.mxu0 %v2426_v10  ;;  %2363 = vmatprep.subr.bf16.mxu1 %v2426_v10 }
  0xc6   : > { %v435_v1 = vpop.xlane.xlu1 %434  ;;  %v477_v20 = vmul.f32 0.0078125, %v433_v0  ;;  %v525_v29 = vmul.f32 %v2999_v25, %v2999_v25  ;;  %942 = vmatpush1.bf16.msra.mxu0 %v2428_v14  ;;  %2371 = vmatpush1.bf16.msra.mxu1 %v2428_v14  ;;  %v2429_v0 = vld [vmem:[%s2946_s5 + $0x34] ss:$8 sps:$4 sm:$0xff]  }
  0xc7   : > { %v478_v21 = vmul.f32 0.0078125, %v435_v1  ;;  %v526_v3 = vmul.f32 %v3003_v27, %v3003_v27  ;;  %943 = vmatprep.subr.bf16.mxu0 %v2429_v0  ;;  %2364 = vmatprep.subr.bf16.mxu1 %v2429_v0  ;;  %v2438_v0 = vld [vmem:[%s2946_s5 + $0x4] ss:$8 sps:$4 sm:$0xff]  }
  0xc8   : > { %v3013_v28 = vsub.f32 %v2323_v32, %v477_v20  ;;  %591 = vadd.xlane.f32.xlu1 %v540_v18  ;;  %561 = vadd.xlane.f32.xlu0 %v525_v29  ;;  %v2431_v20 = vld [vmem:[%s2946_s5 + $0x30] ss:$8 sps:$4 sm:$0xff]  }
  0xc9   : > { %v3017_v30 = vsub.f32 %v2324_v33, %v478_v21  ;;  %v405_v7 = vpop.xlane.xlu0 %404 }
  0xca   : > { %v407_v8 = vpop.xlane.xlu1 %406  ;;  %v463_v24 = vmul.f32 0.0078125, %v405_v7  ;;  %v541_v32 = vmul.f32 %v3013_v28, %v3013_v28  ;;  %944 = vmatpush1.bf16.msra.mxu0 %v2431_v20  ;;  %2372 = vmatpush1.bf16.msra.mxu1 %v2431_v20  ;;  %v2440_v20 = vld [vmem:[%s2946_s5] ss:$8 sps:$4 sm:$0xff]  }
  0xcb   : > { %v464_v9 = vmul.f32 0.0078125, %v407_v8  ;;  %v542_v11 = vmul.f32 %v3017_v30, %v3017_v30  ;;  %v2434_v8 = vld [vmem:[%s2946_s5 + $0x20] ss:$8 sps:$4 sm:$0xff]   ;;  %945 = vmatprep.subr.bf16.mxu0 %v2432_v4  ;;  %2365 = vmatprep.subr.bf16.mxu1 %v2432_v4 }
  0xcc   : > { %v3027_v31 = vsub.f32 %v2295_v35, %v463_v24  ;;  %563 = vadd.xlane.f32.xlu1 %v526_v3  ;;  %593 = vadd.xlane.f32.xlu0 %v541_v32 }
  0xcd   : > { %v3031_v33 = vsub.f32 %v2296_v36, %v464_v9  ;;  %v437_v26 = vpop.xlane.xlu0 %436 }
  0xce   : > { %v439_v15 = vpop.xlane.xlu1 %438  ;;  %v479_v18 = vmul.f32 0.0078125, %v437_v26  ;;  %v527_v35 = vmul.f32 %v3027_v31, %v3027_v31  ;;  %946 = vmatpush1.bf16.msra.mxu0 %v2434_v8  ;;  %2373 = vmatpush1.bf16.msra.mxu1 %v2434_v8  ;;  %v2437_v26 = vld [vmem:[%s2946_s5 + $0x10] ss:$8 sps:$4 sm:$0xff]   ;;  %v2673_v8 = vmov 0  }
  0xcf   : > { %v480_v19 = vmul.f32 0.0078125, %v439_v15  ;;  %v528_v1 = vmul.f32 %v3031_v33, %v3031_v33  ;;  %967 = vmatprep.mubr.bf16.mxu0 %v2673_v8  ;;  %1047 = vmatprep.mubr.bf16.mxu1 %v2673_v8 }
  0xd0   : > { %v3041_v34 = vsub.f32 %v2327_v38, %v479_v18  ;;  %595 = vadd.xlane.f32.xlu1 %v542_v11  ;;  %565 = vadd.xlane.f32.xlu0 %v527_v35  ;;  %v2435_v11 = vld [vmem:[%s2946_s5 + $0x14] ss:$8 sps:$4 sm:$0xff]  }
  0xd1   : > { %v3045_v36 = vsub.f32 %v2328_v39, %v480_v19  ;;  %v409_v29 = vpop.xlane.xlu0 %408  ;;  %947 = vmatprep.subr.bf16.mxu0 %v2435_v11  ;;  %2366 = vmatprep.subr.bf16.mxu1 %v2435_v11 }
  0xd2   : > { %v411_v21 = vpop.xlane.xlu1 %410  ;;  %v465_v2 = vmul.f32 0.0078125, %v409_v29  ;;  %v543_v38 = vmul.f32 %v3041_v34, %v3041_v34  ;;  %948 = vmatpush1.bf16.msra.mxu0 %v2437_v26  ;;  %2374 = vmatpush1.bf16.msra.mxu1 %v2437_v26 }
  0xd3   : > { %v466_v3 = vmul.f32 0.0078125, %v411_v21  ;;  %v544_v7 = vmul.f32 %v3045_v36, %v3045_v36  ;;  %949 = vmatprep.subr.bf16.mxu0 %v2438_v0  ;;  %2367 = vmatprep.subr.bf16.mxu1 %v2438_v0 }
  0xd4   : > { %v3055_v37 = vsub.f32 %v2299_v41, %v465_v2  ;;  %567 = vadd.xlane.f32.xlu1 %v528_v1  ;;  %597 = vadd.xlane.f32.xlu0 %v543_v38 }
  0xd5   : > { %v3059_v39 = vsub.f32 %v2300_v42, %v466_v3  ;;  %v441_v24 = vpop.xlane.xlu0 %440 }
  0xd6   : > { %v443_v32 = vpop.xlane.xlu1 %442  ;;  %v481_v9 = vmul.f32 0.0078125, %v441_v24  ;;  %v529_v41 = vmul.f32 %v3055_v37, %v3055_v37  ;;  %950 = vmatpush1.bf16.msra.mxu0 %v2440_v20  ;;  %2375 = vmatpush1.bf16.msra.mxu1 %v2440_v20 }
  0xd7   : > { %v482_v10 = vmul.f32 0.0078125, %v443_v32  ;;  %v530_v14 = vmul.f32 %v3059_v39, %v3059_v39 }
  0xd8   : > { %v3069_v40 = vsub.f32 %v2331_v44, %v481_v9  ;;  %599 = vadd.xlane.f32.xlu1 %v544_v7  ;;  %569 = vadd.xlane.f32.xlu0 %v529_v41 }
  0xd9   : > { %v3073_v42 = vsub.f32 %v2332_v45, %v482_v10  ;;  %v413_v15 = vpop.xlane.xlu0 %412 }
  0xda   : > { %v415_v18 = vpop.xlane.xlu1 %414  ;;  %v467_v35 = vmul.f32 0.0078125, %v413_v15  ;;  %v545_v44 = vmul.f32 %v3069_v40, %v3069_v40 }
  0xdb   : > { %v468_v19 = vmul.f32 0.0078125, %v415_v18  ;;  %v546_v1 = vmul.f32 %v3073_v42, %v3073_v42 }
  0xdc   : > { %v3083_v43 = vsub.f32 %v2303_v47, %v467_v35  ;;  %571 = vadd.xlane.f32.xlu1 %v530_v14  ;;  %601 = vadd.xlane.f32.xlu0 %v545_v44 }
  0xdd   : > { %v3087_v45 = vsub.f32 %v2304_v48, %v468_v19  ;;  %v445_v29 = vpop.xlane.xlu0 %444 }
  0xde   : > { %v447_v21 = vpop.xlane.xlu1 %446  ;;  %v483_v2 = vmul.f32 0.0078125, %v445_v29  ;;  %v531_v38 = vmul.f32 %v3083_v43, %v3083_v43 }
  0xdf   : > { %v484_v47 = vmul.f32 0.0078125, %v447_v21  ;;  %v532_v3 = vmul.f32 %v3087_v45, %v3087_v45 }
  0xe0   : > { %v3096_v46 = vsub.f32 %v2335_v50, %v483_v2  ;;  %603 = vadd.xlane.f32.xlu1 %v546_v1  ;;  %573 = vadd.xlane.f32.xlu0 %v531_v38 }
  0xe1   : > { %v3100_v48 = vsub.f32 %v2336_v51, %v484_v47  ;;  %v417_v4 = vpop.xlane.xlu0 %416 }
  0xe2   : > { %v419_v7 = vpop.xlane.xlu1 %418  ;;  %v469_v24 = vmul.f32 0.0078125, %v417_v4  ;;  %v547_v50 = vmul.f32 %v3096_v46, %v3096_v46 }
  0xe3   : > { %v470_v32 = vmul.f32 0.0078125, %v419_v7  ;;  %v548_v9 = vmul.f32 %v3100_v48, %v3100_v48 }
  0xe4   : > { %v3110_v49 = vsub.f32 %v2307_v53, %v469_v24  ;;  %575 = vadd.xlane.f32.xlu1 %v532_v3  ;;  %605 = vadd.xlane.f32.xlu0 %v547_v50 }
  0xe5   : > { %v3114_v51 = vsub.f32 %v2308_v54, %v470_v32  ;;  %v449_v41 = vpop.xlane.xlu0 %448 }
  0xe6   : > { %v451_v10 = vpop.xlane.xlu1 %450  ;;  %v485_v11 = vmul.f32 0.0078125, %v449_v41  ;;  %v533_v14 = vmul.f32 %v3110_v49, %v3110_v49 }
  0xe7   : > { %v486_v26 = vmul.f32 0.0078125, %v451_v10  ;;  %v534_v54 = vmul.f32 %v3114_v51, %v3114_v51 }
  0xe8   : > { %v3122_v53 = vsub.f32 %v2339_v56, %v485_v11  ;;  %607 = vadd.xlane.f32.xlu1 %v548_v9  ;;  %577 = vadd.xlane.f32.xlu0 %v533_v14 }
  0xe9   : > { %v3126_v52 = vsub.f32 %v2340_v57, %v486_v26  ;;  %v421_v15 = vpop.xlane.xlu0 %420 }
  0xea   : > { %v423_v18 = vpop.xlane.xlu1 %422  ;;  %v471_v35 = vmul.f32 0.0078125, %v421_v15  ;;  %v549_v44 = vmul.f32 %v3122_v53, %v3122_v53 }
  0xeb   : > { %v472_v19 = vmul.f32 0.0078125, %v423_v18  ;;  %v550_v57 = vmul.f32 %v3126_v52, %v3126_v52 }
  0xec   : > { %v3134_v56 = vsub.f32 %v2311_v59, %v471_v35  ;;  %579 = vadd.xlane.f32.xlu1 %v534_v54  ;;  %609 = vadd.xlane.f32.xlu0 %v549_v44 }
  0xed   : > { %v3138_v55 = vsub.f32 %v2312_v60, %v472_v19  ;;  %v453_v0 = vpop.xlane.xlu0 %452 }
  0xee   : > { %v455_v1 = vpop.xlane.xlu1 %454  ;;  %v487_v20 = vmul.f32 0.0078125, %v453_v0  ;;  %v535_v29 = vmul.f32 %v3134_v56, %v3134_v56 }
  0xef   : > { %v488_v21 = vmul.f32 0.0078125, %v455_v1  ;;  %v536_v60 = vmul.f32 %v3138_v55, %v3138_v55 }
  0xf0   : > { %v3146_v59 = vsub.f32 %v2343_v62, %v487_v20  ;;  %611 = vadd.xlane.f32.xlu1 %v550_v57  ;;  %581 = vadd.xlane.f32.xlu0 %v535_v29 }
  0xf1   : > { %v3150_v58 = vsub.f32 %v2344_v63, %v488_v21 }
  0xf2   : > { %v551_v2 = vmul.f32 %v3146_v59, %v3146_v59 }
  0xf3   : > { %v552_v38 = vmul.f32 %v3150_v58, %v3150_v58 }
  0xf4   : > { %583 = vadd.xlane.f32.xlu1 %v536_v60  ;;  %613 = vadd.xlane.f32.xlu0 %v551_v2  ;;  %v3162_v2 = vld [vmem:[%s3859_s2] ss:$0 sm:$0xff] }
  0xf8   : > { %615 = vadd.xlane.f32.xlu1 %v552_v38 }
 0x141   : > { %v554_v62 = vpop.xlane.xlu0 %553 }
 0x142   : > { %v617_v47 = vmul.f32 0.0078125, %v554_v62 }
 0x144   : > { %v649_v3 = vadd.f32 1e-05, %v617_v47 }
 0x145   : > { %v556_v4 = vpop.xlane.xlu1 %555  ;;  %v586_v7 = vpop.xlane.xlu0 %585 }
 0x146   : > { %2441 = vrsqrt.f32 %v649_v3  ;;  %v618_v61 = vmul.f32 0.0078125, %v556_v4  ;;  %v633_v63 = vmul.f32 0.0078125, %v586_v7 }
 0x148   : > { %v650_v24 = vadd.f32 1e-05, %v618_v61  ;;  %v665_v50 = vadd.f32 1e-05, %v633_v63 }
 0x149   : > { %v588_v32 = vpop.xlane.xlu1 %587  ;;  %v558_v9 = vpop.xlane.xlu0 %557 }
 0x14a   : > { %2443 = vrsqrt.f32 %v650_v24  ;;  %v634_v41 = vmul.f32 0.0078125, %v588_v32  ;;  %v619_v10 = vmul.f32 0.0078125, %v558_v9 }
 0x14b   : > { %2445 = vrsqrt.f32 %v665_v50 }
 0x14c   : > { %v666_v11 = vadd.f32 1e-05, %v634_v41  ;;  %v651_v14 = vadd.f32 1e-05, %v619_v10 }
 0x14d   : > { %v560_v26 = vpop.xlane.xlu1 %559  ;;  %v590_v54 = vpop.xlane.xlu0 %589 }
 0x14e   : > { %2447 = vrsqrt.f32 %v666_v11  ;;  %v620_v15 = vmul.f32 0.0078125, %v560_v26  ;;  %v635_v18 = vmul.f32 0.0078125, %v590_v54 }
 0x14f   : > { %2449 = vrsqrt.f32 %v651_v14 }
 0x150   : > { %v652_v35 = vadd.f32 1e-05, %v620_v15  ;;  %v667_v44 = vadd.f32 1e-05, %v635_v18 }
 0x151   : > { %v592_v19 = vpop.xlane.xlu1 %591  ;;  %v562_v57 = vpop.xlane.xlu0 %561 }
 0x152   : > { %2451 = vrsqrt.f32 %v652_v35  ;;  %v636_v0 = vmul.f32 0.0078125, %v592_v19  ;;  %v621_v1 = vmul.f32 0.0078125, %v562_v57 }
 0x153   : > { %v2442_v20 = vpop.eup %2441  ;;  %2453 = vrsqrt.f32 %v667_v44 }
 0x154   : > { %v668_v29 = vadd.f32 1e-05, %v636_v0  ;;  %v653_v21 = vadd.f32 1e-05, %v621_v1  ;;  %v713_v60 = vmul.f32 %v2442_v20, %v2951_v5  ;;  %v3169_v5 = vld [vmem:[%s3860_s3] ss:$0 sm:$0xff] }
 0x155   : > { %v564_v38 = vpop.xlane.xlu1 %563  ;;  %v594_v62 = vpop.xlane.xlu0 %593 }
 0x156   : > { %2455 = vrsqrt.f32 %v668_v29  ;;  %v622_v47 = vmul.f32 0.0078125, %v564_v38  ;;  %v637_v3 = vmul.f32 0.0078125, %v594_v62  ;;  %v752_v7 = vmul.f32 %v3162_v2, %v713_v60 }
 0x157   : > { %v2444_v4 = vpop.eup %2443  ;;  %2457 = vrsqrt.f32 %v653_v21 }
 0x158   : > { %v2446_v61 = vpop.eup %2445  ;;  %v654_v63 = vadd.f32 1e-05, %v622_v47  ;;  %v669_v24 = vadd.f32 1e-05, %v637_v3  ;;  %v714_v50 = vmul.f32 %v2444_v4, %v2961_v12  ;;  %v791_v54 = vadd.f32 %v3169_v5, %v752_v7 }
 0x159   : > { %v596_v32 = vpop.xlane.xlu1 %595  ;;  %v566_v9 = vpop.xlane.xlu0 %565  ;;  %v729_v41 = vmul.f32 %v2446_v61, %v2955_v6 }
 0x15a   : > { %2459 = vrsqrt.f32 %v654_v63  ;;  %v638_v10 = vmul.f32 0.0078125, %v596_v32  ;;  %v623_v11 = vmul.f32 0.0078125, %v566_v9  ;;  %v753_v14 = vmul.f32 %v3162_v2, %v714_v50 }
 0x15b   : > { %v2448_v26 = vpop.eup %2447  ;;  %2461 = vrsqrt.f32 %v669_v24  ;;  %v768_v6 = vmul.f32 %v3162_v2, %v729_v41 }
 0x15c   : > { %v2450_v15 = vpop.eup %2449  ;;  %v670_v12 = vadd.f32 1e-05, %v638_v10  ;;  %v655_v18 = vadd.f32 1e-05, %v623_v11  ;;  %v792_v35 = vadd.f32 %v3169_v5, %v753_v14  ;;  %v730_v44 = vmul.f32 %v2448_v26, %v2965_v13 }
 0x15d   : > { %v568_v19 = vpop.xlane.xlu1 %567  ;;  %v598_v57 = vpop.xlane.xlu0 %597  ;;  %v715_v0 = vmul.f32 %v2450_v15, %v2973_v16  ;;  %v807_v16 = vadd.f32 %v3169_v5, %v768_v6 }
 0x15e   : > { %2463 = vrsqrt.f32 %v670_v12  ;;  %v624_v1 = vmul.f32 0.0078125, %v568_v19  ;;  %v639_v20 = vmul.f32 0.0078125, %v598_v57  ;;  %v823_v29 = vpack.c.bf16 %v792_v35, %v791_v54 }
 0x15f   : > { %v2452_v21 = vpop.eup %2451  ;;  %2465 = vrsqrt.f32 %v655_v18  ;;  %v769_v60 = vmul.f32 %v3162_v2, %v730_v44  ;;  %v754_v38 = vmul.f32 %v3162_v2, %v715_v0 }
 0x160   : > { %v2454_v62 = vpop.eup %2453  ;;  %v656_v47 = vadd.f32 1e-05, %v624_v1  ;;  %v671_v3 = vadd.f32 1e-05, %v639_v20  ;;  %968 = vmatmul.mubr.bf16.vlgmr.msra.gmra.mxu0 %v823_v29  ;;  %v716_v13 = vmul.f32 %v2452_v21, %v2977_v17 }
 0x161   : > { %v600_v4 = vpop.xlane.xlu1 %599  ;;  %v570_v7 = vpop.xlane.xlu0 %569  ;;  %v808_v61 = vadd.f32 %v3169_v5, %v769_v60  ;;  %977 = vmatprep.mubr.bf16.mxu0 %v2673_v8  ;;  %v731_v63 = vmul.f32 %v2454_v62, %v2986_v23  ;;  %v793_v17 = vadd.f32 %v3169_v5, %v754_v38 }
 0x162   : > { %2467 = vrsqrt.f32 %v656_v47  ;;  %v640_v24 = vmul.f32 0.0078125, %v600_v4  ;;  %v625_v50 = vmul.f32 0.0078125, %v570_v7  ;;  %v755_v32 = vmul.f32 %v3162_v2, %v716_v13 }
 0x163   : > { %v2456_v9 = vpop.eup %2455  ;;  %2469 = vrsqrt.f32 %v671_v3  ;;  %v831_v41 = vpack.c.bf16 %v808_v61, %v807_v16  ;;  %v770_v12 = vmul.f32 %v3162_v2, %v731_v63 }
 0x164   : > { %v2458_v10 = vpop.eup %2457  ;;  %v672_v11 = vadd.f32 1e-05, %v640_v24  ;;  %v657_v14 = vadd.f32 1e-05, %v625_v50  ;;  %v794_v26 = vadd.f32 %v3169_v5, %v755_v32  ;;  %v732_v54 = vmul.f32 %v2456_v9, %v2990_v22 }
 0x165   : > { %1048 = vmatmul.mubr.bf16.vlgmr.msra.gmra.mxu1 %v831_v41  ;;  %v572_v15 = vpop.xlane.xlu1 %571  ;;  %v602_v23 = vpop.xlane.xlu0 %601  ;;  %v717_v18 = vmul.f32 %v2458_v10, %v2999_v25  ;;  %v809_v60 = vadd.f32 %v3169_v5, %v770_v12 }
 0x166   : > { %2471 = vrsqrt.f32 %v672_v11  ;;  %v626_v35 = vmul.f32 0.0078125, %v572_v15  ;;  %v641_v44 = vmul.f32 0.0078125, %v602_v23  ;;  %v824_v19 = vpack.c.bf16 %v794_v26, %v793_v17  ;;  %1057 = vmatprep.mubr.bf16.mxu1 %v2673_v8 }
 0x167   : > { %v2460_v57 = vpop.eup %2459  ;;  %2473 = vrsqrt.f32 %v657_v14  ;;  %v771_v6 = vmul.f32 %v3162_v2, %v732_v54  ;;  %v756_v0 = vmul.f32 %v3162_v2, %v717_v18 }
 0x168   : > { %v2462_v22 = vpop.eup %2461  ;;  %v658_v1 = vadd.f32 1e-05, %v626_v35  ;;  %v673_v20 = vadd.f32 1e-05, %v641_v44  ;;  %978 = vmatmul.mubr.bf16.gmra.mxu0 %v824_v19  ;;  %v718_v29 = vmul.f32 %v2460_v57, %v3003_v27 }
 0x169   : > { %v604_v21 = vpop.xlane.xlu1 %603  ;;  %v574_v25 = vpop.xlane.xlu0 %573  ;;  %v810_v38 = vadd.f32 %v3169_v5, %v771_v6  ;;  %987 = vmatprep.mubr.bf16.mxu0 %v2673_v8  ;;  %v733_v62 = vmul.f32 %v2462_v22, %v3013_v28  ;;  %v795_v27 = vadd.f32 %v3169_v5, %v756_v0 }
 0x16a   : > { %2475 = vrsqrt.f32 %v658_v1  ;;  %v642_v47 = vmul.f32 0.0078125, %v604_v21  ;;  %v627_v3 = vmul.f32 0.0078125, %v574_v25  ;;  %v757_v13 = vmul.f32 %v3162_v2, %v718_v29 }
 0x16b   : > { %v2464_v4 = vpop.eup %2463  ;;  %2477 = vrsqrt.f32 %v673_v20  ;;  %v832_v7 = vpack.c.bf16 %v810_v38, %v809_v60  ;;  %v772_v9 = vmul.f32 %v3162_v2, %v733_v62 }
 0x16c   : > { %v2466_v16 = vpop.eup %2465  ;;  %v674_v61 = vadd.f32 1e-05, %v642_v47  ;;  %v659_v63 = vadd.f32 1e-05, %v627_v3  ;;  %v796_v24 = vadd.f32 %v3169_v5, %v757_v13  ;;  %v734_v50 = vmul.f32 %v2464_v4, %v3017_v30 }
 0x16d   : > { %1058 = vmatmul.mubr.bf16.gmra.mxu1 %v832_v7  ;;  %v576_v32 = vpop.xlane.xlu1 %575  ;;  %v606_v28 = vpop.xlane.xlu0 %605  ;;  %v719_v41 = vmul.f32 %v2466_v16, %v3027_v31  ;;  %v811_v35 = vadd.f32 %v3169_v5, %v772_v9 }
 0x16e   : > { %2479 = vrsqrt.f32 %v674_v61  ;;  %v628_v17 = vmul.f32 0.0078125, %v576_v32  ;;  %v643_v10 = vmul.f32 0.0078125, %v606_v28  ;;  %v825_v11 = vpack.c.bf16 %v796_v24, %v795_v27  ;;  %1067 = vmatprep.mubr.bf16.mxu1 %v2673_v8 }
 0x16f   : > { %v2468_v14 = vpop.eup %2467  ;;  %2481 = vrsqrt.f32 %v659_v63  ;;  %v773_v26 = vmul.f32 %v3162_v2, %v734_v50  ;;  %v758_v54 = vmul.f32 %v3162_v2, %v719_v41 }
 0x170   : > { %v2470_v30 = vpop.eup %2469  ;;  %v660_v15 = vadd.f32 1e-05, %v628_v17  ;;  %v675_v23 = vadd.f32 1e-05, %v643_v10  ;;  %988 = vmatmul.mubr.bf16.gmra.mxu0 %v825_v11  ;;  %v720_v12 = vmul.f32 %v2468_v14, %v3031_v33 }
 0x171   : > { %v608_v18 = vpop.xlane.xlu1 %607  ;;  %v578_v31 = vpop.xlane.xlu0 %577  ;;  %v812_v44 = vadd.f32 %v3169_v5, %v773_v26  ;;  %997 = vmatprep.mubr.bf16.mxu0 %v2673_v8  ;;  %v735_v19 = vmul.f32 %v2470_v30, %v3041_v34  ;;  %v797_v33 = vadd.f32 %v3169_v5, %v758_v54 }
 0x172   : > { %2483 = vrsqrt.f32 %v660_v15  ;;  %v644_v57 = vmul.f32 0.0078125, %v608_v18  ;;  %v629_v6 = vmul.f32 0.0078125, %v578_v31  ;;  %v759_v0 = vmul.f32 %v3162_v2, %v720_v12 }
 0x173   : > { %v2472_v22 = vpop.eup %2471  ;;  %2485 = vrsqrt.f32 %v675_v23  ;;  %v833_v1 = vpack.c.bf16 %v812_v44, %v811_v35  ;;  %v774_v62 = vmul.f32 %v3162_v2, %v735_v19 }
 0x174   : > { %v2474_v20 = vpop.eup %2473  ;;  %v676_v29 = vadd.f32 1e-05, %v644_v57  ;;  %v661_v21 = vadd.f32 1e-05, %v629_v6  ;;  %v798_v25 = vadd.f32 %v3169_v5, %v759_v0  ;;  %v736_v60 = vmul.f32 %v2472_v22, %v3045_v36 }
 0x175   : > { %1068 = vmatmul.mubr.bf16.gmra.mxu1 %v833_v1  ;;  %v580_v38 = vpop.xlane.xlu1 %579  ;;  %v610_v34 = vpop.xlane.xlu0 %609  ;;  %v721_v47 = vmul.f32 %v2474_v20, %v3055_v37  ;;  %v813_v32 = vadd.f32 %v3169_v5, %v774_v62 }
 0x176   : > { %2487 = vrsqrt.f32 %v676_v29  ;;  %v630_v3 = vmul.f32 0.0078125, %v580_v38  ;;  %v645_v13 = vmul.f32 0.0078125, %v610_v34  ;;  %v826_v4 = vpack.c.bf16 %v798_v25, %v797_v33  ;;  %1077 = vmatprep.mubr.bf16.mxu1 %v2673_v8 }
 0x177   : > { %v2476_v7 = vpop.eup %2475  ;;  %2489 = vrsqrt.f32 %v661_v21  ;;  %v775_v27 = vmul.f32 %v3162_v2, %v736_v60  ;;  %v760_v16 = vmul.f32 %v3162_v2, %v721_v47 }
 0x178   : > { %v2478_v36 = vpop.eup %2477  ;;  %v662_v61 = vadd.f32 1e-05, %v630_v3  ;;  %v677_v63 = vadd.f32 1e-05, %v645_v13  ;;  %998 = vmatmul.mubr.bf16.gmra.mxu0 %v826_v4  ;;  %v722_v24 = vmul.f32 %v2476_v7, %v3059_v39 }
 0x179   : > { %v612_v50 = vpop.xlane.xlu1 %611  ;;  %v582_v37 = vpop.xlane.xlu0 %581  ;;  %v814_v28 = vadd.f32 %v3169_v5, %v775_v27  ;;  %1007 = vmatprep.mubr.bf16.mxu0 %v2673_v8  ;;  %v737_v9 = vmul.f32 %v2478_v36, %v3069_v40  ;;  %v799_v39 = vadd.f32 %v3169_v5, %v760_v16 }
 0x17a   : > { %2491 = vrsqrt.f32 %v662_v61  ;;  %v646_v41 = vmul.f32 0.0078125, %v612_v50  ;;  %v631_v17 = vmul.f32 0.0078125, %v582_v37  ;;  %v761_v10 = vmul.f32 %v3162_v2, %v722_v24 }
 0x17b   : > { %v2480_v11 = vpop.eup %2479  ;;  %2493 = vrsqrt.f32 %v677_v63  ;;  %v834_v14 = vpack.c.bf16 %v814_v28, %v813_v32  ;;  %v776_v18 = vmul.f32 %v3162_v2, %v737_v9 }
 0x17c   : > { %v2482_v26 = vpop.eup %2481  ;;  %v678_v54 = vadd.f32 1e-05, %v646_v41  ;;  %v663_v30 = vadd.f32 1e-05, %v631_v17  ;;  %v800_v15 = vadd.f32 %v3169_v5, %v761_v10  ;;  %v738_v23 = vmul.f32 %v2480_v11, %v3073_v42 }
 0x17d   : > { %1078 = vmatmul.mubr.bf16.gmra.mxu1 %v834_v14  ;;  %v584_v12 = vpop.xlane.xlu1 %583  ;;  %v614_v40 = vpop.xlane.xlu0 %613  ;;  %v723_v31 = vmul.f32 %v2482_v26, %v3083_v43  ;;  %v815_v43 = vadd.f32 %v3169_v5, %v776_v18 }
 0x17e   : > { %2495 = vrsqrt.f32 %v678_v54  ;;  %v632_v35 = vmul.f32 0.0078125, %v584_v12  ;;  %v647_v44 = vmul.f32 0.0078125, %v614_v40  ;;  %v827_v19 = vpack.c.bf16 %v800_v15, %v799_v39  ;;  %1087 = vmatprep.mubr.bf16.mxu1 %v2673_v8 }
 0x17f   : > { %v2484_v57 = vpop.eup %2483  ;;  %2497 = vrsqrt.f32 %v663_v30  ;;  %v777_v6 = vmul.f32 %v3162_v2, %v738_v23  ;;  %v762_v0 = vmul.f32 %v3162_v2, %v723_v31 }
 0x180   : > { %v2486_v42 = vpop.eup %2485  ;;  %v664_v22 = vadd.f32 1e-05, %v632_v35  ;;  %v679_v1 = vadd.f32 1e-05, %v647_v44  ;;  %1008 = vmatmul.mubr.bf16.gmra.mxu0 %v827_v19  ;;  %v724_v33 = vmul.f32 %v2484_v57, %v3087_v45 }
 0x181   : > { %v616_v20 = vpop.xlane.xlu1 %615  ;;  %v816_v29 = vadd.f32 %v3169_v5, %v777_v6  ;;  %1017 = vmatprep.mubr.bf16.mxu0 %v2673_v8  ;;  %v739_v21 = vmul.f32 %v2486_v42, %v3096_v46  ;;  %v801_v62 = vadd.f32 %v3169_v5, %v762_v0 }
 0x182   : > { %2499 = vrsqrt.f32 %v664_v22  ;;  %v648_v25 = vmul.f32 0.0078125, %v616_v20  ;;  %v763_v60 = vmul.f32 %v3162_v2, %v724_v33 }
 0x183   : > { %v2488_v38 = vpop.eup %2487  ;;  %2501 = vrsqrt.f32 %v679_v1  ;;  %v835_v34 = vpack.c.bf16 %v816_v29, %v815_v43  ;;  %v778_v4 = vmul.f32 %v3162_v2, %v739_v21 }
 0x184   : > { %v2490_v47 = vpop.eup %2489  ;;  %v680_v45 = vadd.f32 1e-05, %v648_v25  ;;  %v802_v3 = vadd.f32 %v3169_v5, %v763_v60  ;;  %v740_v13 = vmul.f32 %v2488_v38, %v3100_v48 }
 0x185   : > { %1088 = vmatmul.mubr.bf16.gmra.mxu1 %v835_v34  ;;  %v725_v46 = vmul.f32 %v2490_v47, %v3110_v49  ;;  %v817_v61 = vadd.f32 %v3169_v5, %v778_v4 }
 0x186   : > { %2503 = vrsqrt.f32 %v680_v45  ;;  %v828_v7 = vpack.c.bf16 %v802_v3, %v801_v62  ;;  %1097 = vmatprep.mubr.bf16.mxu1 %v2673_v8  ;;  %v779_v27 = vmul.f32 %v3162_v2, %v740_v13 }
 0x187   : > { %v2492_v16 = vpop.eup %2491  ;;  %v764_v24 = vmul.f32 %v3162_v2, %v725_v46 }
 0x188   : > { %v2494_v36 = vpop.eup %2493  ;;  %1018 = vmatmul.mubr.bf16.gmra.mxu0 %v828_v7  ;;  %v818_v63 = vadd.f32 %v3169_v5, %v779_v27  ;;  %v726_v48 = vmul.f32 %v2492_v16, %v3114_v51 }
 0x189   : > { %1027 = vmatprep.mubr.bf16.mxu0 %v2673_v8  ;;  %v741_v49 = vmul.f32 %v2494_v36, %v3122_v53  ;;  %v803_v9 = vadd.f32 %v3169_v5, %v764_v24 }
 0x18a   : > { %v836_v50 = vpack.c.bf16 %v818_v63, %v817_v61  ;;  %v765_v37 = vmul.f32 %v3162_v2, %v726_v48 }
 0x18b   : > { %v2496_v32 = vpop.eup %2495  ;;  %v780_v10 = vmul.f32 %v3162_v2, %v741_v49 }
 0x18c   : > { %v2498_v28 = vpop.eup %2497  ;;  %v804_v41 = vadd.f32 %v3169_v5, %v765_v37  ;;  %v742_v17 = vmul.f32 %v2496_v32, %v3126_v52 }
 0x18d   : > { %1098 = vmatmul.mubr.bf16.gmra.mxu1 %v836_v50  ;;  %v727_v51 = vmul.f32 %v2498_v28, %v3134_v56  ;;  %v819_v26 = vadd.f32 %v3169_v5, %v780_v10 }
 0x18e   : > { %v829_v11 = vpack.c.bf16 %v804_v41, %v803_v9  ;;  %1107 = vmatprep.mubr.bf16.mxu1 %v2673_v8  ;;  %v781_v53 = vmul.f32 %v3162_v2, %v742_v17 }
 0x18f   : > { %v2500_v14 = vpop.eup %2499  ;;  %v766_v52 = vmul.f32 %v3162_v2, %v727_v51 }
 0x190   : > { %v2502_v39 = vpop.eup %2501  ;;  %1028 = vmatmul.mubr.bf16.gmra.mxu0 %v829_v11  ;;  %v820_v54 = vadd.f32 %v3169_v5, %v781_v53  ;;  %v728_v30 = vmul.f32 %v2500_v14, %v3138_v55 }
 0x191   : > { %1037 = vmatprep.mubr.bf16.mxu0 %v2673_v8  ;;  %v743_v56 = vmul.f32 %v2502_v39, %v3146_v59  ;;  %v805_v40 = vadd.f32 %v3169_v5, %v766_v52 }
 0x192   : > { %v837_v15 = vpack.c.bf16 %v820_v54, %v819_v26  ;;  %v767_v23 = vmul.f32 %v3162_v2, %v728_v30 }
 0x193   : > { %v2504_v12 = vpop.eup %2503  ;;  %v782_v35 = vmul.f32 %v3162_v2, %v743_v56 }
 0x194   : > { %v806_v18 = vadd.f32 %v3169_v5, %v767_v23  ;;  %v744_v31 = vmul.f32 %v2504_v12, %v3150_v58 }
 0x195   : > { %1108 = vmatmul.mubr.bf16.gmra.mxu1 %v837_v15  ;;  %v821_v59 = vadd.f32 %v3169_v5, %v782_v35 }
 0x196   : > { %v830_v55 = vpack.c.bf16 %v806_v18, %v805_v40  ;;  %1117 = vmatprep.mubr.bf16.mxu1 %v2673_v8  ;;  %v783_v44 = vmul.f32 %v3162_v2, %v744_v31 }
 0x198   : > { %1038 = vmatmul.mubr.bf16.gmra.mxu0 %v830_v55  ;;  %v822_v19 = vadd.f32 %v3169_v5, %v783_v44 }
 0x19a   : > { %v838_v57 = vpack.c.bf16 %v822_v19, %v821_v59 }
 0x19d   : > { %1118 = vmatmul.mubr.bf16.gmra.mxu1 %v838_v57 }
 0x220   : > { %v969_v6 = vpop.f32.mrf.mxu0 }
 0x221   : > { %v1192_v0 = vmul.f32 0.044715, %v969_v6  ;;  %v3304_v11 = vmul.f32 0.5, %v969_v6 }
 0x222   : > { %v971_v42 = vpop.f32.mrf.mxu0 }
 0x223   : > { %v1256_v22 = vmul.f32 %v1192_v0, %v969_v6  ;;  %v1193_v58 = vmul.f32 0.044715, %v971_v42  ;;  %v1129_v52 = vmul.f32 0.5, %v971_v42 }
 0x224   : > { %v973_v1 = vpop.f32.mrf.mxu0 }
 0x225   : > { %v1320_v33 = vmul.f32 %v1256_v22, %v969_v6  ;;  %v1257_v20 = vmul.f32 %v1193_v58, %v971_v42  ;;  %v1194_v43 = vmul.f32 0.044715, %v973_v1  ;;  %v1049_v29 = vpop.f32.mrf.mxu1  ;;  %v3314_v12 = vmul.f32 0.5, %v973_v1 }
 0x226   : > { %v1224_v8 = vmul.f32 0.044715, %v1049_v29  ;;  %v3278_v21 = vpop.f32.mrf.mxu0  ;;  %v3324_v19 = vmul.f32 0.5, %v1049_v29 }
 0x227   : > { %v1384_v2 = vadd.f32 %v1320_v33, %v969_v6  ;;  %v1321_v25 = vmul.f32 %v1257_v20, %v971_v42  ;;  %v1258_v60 = vmul.f32 %v1194_v43, %v973_v1  ;;  %v3280_v38 = vpop.f32.mrf.mxu1  ;;  %v1195_v34 = vmul.f32 0.044715, %v3278_v21 }
 0x228   : > { %v1288_v5 = vmul.f32 %v1224_v8, %v1049_v29  ;;  %v1225_v62 = vmul.f32 0.044715, %v3280_v38  ;;  %v3284_v47 = vpop.f32.mrf.mxu0 }
 0x229   : > { %v1448_v45 = vmul.f32 0.7978846, %v1384_v2  ;;  %v1385_v3 = vadd.f32 %v1321_v25, %v971_v42  ;;  %v1322_v13 = vmul.f32 %v1258_v60, %v973_v1  ;;  %v3286_v4 = vpop.f32.mrf.mxu1  ;;  %v1259_v7 = vmul.f32 %v1195_v34, %v3278_v21 }
 0x22a   : > { %v1352_v46 = vmul.f32 %v1288_v5, %v1049_v29  ;;  %v1289_v27 = vmul.f32 %v1225_v62, %v3280_v38  ;;  %v1196_v16 = vmul.f32 0.044715, %v3284_v47  ;;  %v3291_v36 = vpop.f32.mrf.mxu0  ;;  %v1226_v28 = vmul.f32 0.044715, %v3286_v4 }
 0x22b   : > { %2505 = vtanh.f32 %v1448_v45  ;;  %v1449_v61 = vmul.f32 0.7978846, %v1385_v3  ;;  %v1386_v63 = vadd.f32 %v1322_v13, %v973_v1  ;;  %v3293_v48 = vpop.f32.mrf.mxu1  ;;  %v1323_v49 = vmul.f32 %v1259_v7, %v3278_v21 }
 0x22c   : > { %v1416_v24 = vadd.f32 %v1352_v46, %v1049_v29  ;;  %v1353_v50 = vmul.f32 %v1289_v27, %v3280_v38  ;;  %v1260_v37 = vmul.f32 %v1196_v16, %v3284_v47  ;;  %v3302_v51 = vpop.f32.mrf.mxu0  ;;  %v1290_v53 = vmul.f32 %v1226_v28, %v3286_v4 }
 0x22d   : > { %2507 = vtanh.f32 %v1449_v61  ;;  %v1450_v32 = vmul.f32 0.7978846, %v1386_v63  ;;  %v1387_v41 = vadd.f32 %v1323_v49, %v3278_v21  ;;  %v1197_v14 = vmul.f32 0.044715, %v3291_v36  ;;  %v3308_v39 = vpop.f32.mrf.mxu1 }
 0x22e   : > { %v1480_v9 = vmul.f32 0.7978846, %v1416_v24  ;;  %v1417_v17 = vadd.f32 %v1353_v50, %v3280_v38  ;;  %v1324_v10 = vmul.f32 %v1260_v37, %v3284_v47  ;;  %v1354_v56 = vmul.f32 %v1290_v53, %v3286_v4  ;;  %v3317_v31 = vpop.f32.mrf.mxu0 }
 0x22f   : > { %2509 = vtanh.f32 %v1450_v32  ;;  %v1451_v26 = vmul.f32 0.7978846, %v1387_v41  ;;  %v1261_v15 = vmul.f32 %v1197_v14, %v3291_v36  ;;  %v1227_v23 = vmul.f32 0.044715, %v3293_v48  ;;  %v3322_v59 = vpop.f32.mrf.mxu1 }
 0x230   : > { %2511 = vtanh.f32 %v1480_v9  ;;  %v1481_v54 = vmul.f32 0.7978846, %v1417_v17  ;;  %v1388_v30 = vadd.f32 %v1324_v10, %v3284_v47  ;;  %v1198_v18 = vmul.f32 0.044715, %v3302_v51  ;;  %v3339_v25 = vpop.f32.mrf.mxu0 }
 0x231   : > { %2513 = vtanh.f32 %v1451_v26  ;;  %v1418_v35 = vadd.f32 %v1354_v56, %v3286_v4  ;;  %v1325_v55 = vmul.f32 %v1261_v15, %v3291_v36  ;;  %v1291_v44 = vmul.f32 %v1227_v23, %v3293_v48  ;;  %v3357_v49 = vpop.f32.mrf.mxu1 }
 0x232   : > { %v1452_v40 = vmul.f32 0.7978846, %v1388_v30  ;;  %2515 = vtanh.f32 %v1481_v54  ;;  %v1262_v57 = vmul.f32 %v1198_v18, %v3302_v51  ;;  %v1228_v6 = vmul.f32 0.044715, %v3308_v39  ;;  %v3363_v54 = vpop.f32.mrf.mxu0 }
 0x233   : > { %v1482_v0 = vmul.f32 0.7978846, %v1418_v35  ;;  %v1389_v42 = vadd.f32 %v1325_v55, %v3291_v36  ;;  %v1355_v22 = vmul.f32 %v1291_v44, %v3293_v48  ;;  %v1199_v58 = vmul.f32 0.044715, %v3317_v31 }
 0x234   : > { %2517 = vtanh.f32 %v1452_v40  ;;  %v3332_v1 = vmul.f32 0.5, %v3278_v21  ;;  %v1326_v33 = vmul.f32 %v1262_v57, %v3302_v51  ;;  %v1292_v20 = vmul.f32 %v1228_v6, %v3308_v39  ;;  %v3367_v40 = vpop.f32.mrf.mxu1 }
 0x235   : > { %v1229_v43 = vmul.f32 0.044715, %v3322_v59  ;;  %2519 = vtanh.f32 %v1482_v0  ;;  %v1453_v29 = vmul.f32 0.7978846, %v1389_v42  ;;  %v1419_v8 = vadd.f32 %v1355_v22, %v3293_v48 }
 0x236   : > { %v1263_v2 = vmul.f32 %v1199_v58, %v3317_v31  ;;  %v1161_v5 = vmul.f32 0.5, %v3280_v38  ;;  %v1390_v21 = vadd.f32 %v1326_v33, %v3302_v51  ;;  %v1356_v34 = vmul.f32 %v1292_v20, %v3308_v39 }
 0x237   : > { %v1293_v62 = vmul.f32 %v1229_v43, %v3322_v59  ;;  %2521 = vtanh.f32 %v1453_v29  ;;  %v1483_v3 = vmul.f32 0.7978846, %v1419_v8  ;;  %v1200_v61 = vmul.f32 0.044715, %v3339_v25  ;;  %v3385_v29 = vpop.f32.mrf.mxu1 }
 0x238   : > { %v2506_v60 = vpop.eup %2505  ;;  %v1327_v13 = vmul.f32 %v1263_v2, %v3317_v31  ;;  %v1454_v7 = vmul.f32 0.7978846, %v1390_v21  ;;  %v1420_v27 = vadd.f32 %v1356_v34, %v3308_v39  ;;  %v3354_v63 = vmul.f32 0.5, %v3284_v47 }
 0x239   : > { %v1576_v45 = vadd.f32 1.0, %v2506_v60  ;;  %v1357_v16 = vmul.f32 %v1293_v62, %v3322_v59  ;;  %2523 = vtanh.f32 %v1483_v3  ;;  %v1264_v28 = vmul.f32 %v1200_v61, %v3339_v25 }
 0x23a   : > { %v2508_v46 = vpop.eup %2507  ;;  %v1391_v24 = vadd.f32 %v1327_v13, %v3317_v31  ;;  %2525 = vtanh.f32 %v1454_v7  ;;  %v1484_v37 = vmul.f32 0.7978846, %v1420_v27  ;;  %v1162_v15 = vmul.f32 0.5, %v3286_v4 }
 0x23b   : > { %v1577_v38 = vadd.f32 1.0, %v2508_v46  ;;  %v1421_v32 = vadd.f32 %v1357_v16, %v3322_v59  ;;  %v1640_v41 = vmul.f32 %v1576_v45, %v3304_v11  ;;  %v1328_v26 = vmul.f32 %v1264_v28, %v3339_v25 }
 0x23c   : > { %v2510_v50 = vpop.eup %2509  ;;  %v1455_v53 = vmul.f32 0.7978846, %v1391_v24  ;;  %2527 = vtanh.f32 %v1484_v37  ;;  %v1230_v23 = vmul.f32 0.044715, %v3357_v49  ;;  %v1133_v18 = vmul.f32 0.5, %v3291_v36 }
 0x23d   : > { %v2512_v9 = vpop.eup %2511  ;;  %v1641_v17 = vmul.f32 %v1577_v38, %v1129_v52  ;;  %v1578_v10 = vadd.f32 1.0, %v2510_v50  ;;  %v1485_v14 = vmul.f32 0.7978846, %v1421_v32  ;;  %v1392_v35 = vadd.f32 %v1328_v26, %v3339_v25 }
 0x23e   : > { %v1608_v47 = vadd.f32 1.0, %v2512_v9  ;;  %v2514_v30 = vpop.eup %2513  ;;  %2529 = vtanh.f32 %v1455_v53  ;;  %v1294_v57 = vmul.f32 %v1230_v23, %v3357_v49  ;;  %v1201_v6 = vmul.f32 0.044715, %v3363_v54  ;;  %v3407_v53 = vpop.f32.mrf.mxu1 }
 0x23f   : > { %v2248_v56 = vpack.c.bf16 %v1641_v17, %v1640_v41  ;;  %v2516_v11 = vpop.eup %2515  ;;  %v1579_v52 = vadd.f32 1.0, %v2514_v30  ;;  %2531 = vtanh.f32 %v1485_v14  ;;  %v1642_v44 = vmul.f32 %v1578_v10, %v3314_v12  ;;  %v3383_v12 = vpop.f32.mrf.mxu0 }
 0x240   : > { %v1609_v4 = vadd.f32 1.0, %v2516_v11  ;;  %v1672_v0 = vmul.f32 %v1608_v47, %v3324_v19  ;;  %v1456_v22 = vmul.f32 0.7978846, %v1392_v35  ;;  %v1358_v33 = vmul.f32 %v1294_v57, %v3357_v49 }
 0x241   : > { %v2518_v55 = vpop.eup %2517  ;;  %1896 = vst [vmem:[%s3372_s15] sm:$0xff] %v2248_v56  ;;  %v1643_v42 = vmul.f32 %v1579_v52, %v3332_v1  ;;  %v1265_v20 = vmul.f32 %v1201_v6, %v3363_v54  ;;  %v1231_v43 = vmul.f32 0.044715, %v3367_v40  ;;  %v1163_v19 = vmul.f32 0.5, %v3293_v48  ;;  %v3399_v16 = vpop.f32.mrf.mxu0 }
 0x242   : > { %v1580_v36 = vadd.f32 1.0, %v2518_v55  ;;  %v1673_v58 = vmul.f32 %v1609_v4, %v1161_v5  ;;  %v2520_v8 = vpop.eup %2519  ;;  %v1134_v1 = vmul.f32 0.5, %v3302_v51  ;;  %2533 = vtanh.f32 %v1456_v22 }
 0x243   : > { %v2249_v2 = vpack.c.bf16 %v1643_v42, %v1642_v44  ;;  %v1610_v5 = vadd.f32 1.0, %v2520_v8  ;;  %v1422_v21 = vadd.f32 %v1358_v33, %v3357_v49  ;;  %v1329_v34 = vmul.f32 %v1265_v20, %v3363_v54  ;;  %v3410_v56 = vpop.f32.mrf.mxu0 }
 0x244   : > { %v2264_v60 = vpack.c.bf16 %v1673_v58, %v1672_v0  ;;  %v2522_v62 = vpop.eup %2521  ;;  %v1164_v45 = vmul.f32 0.5, %v3308_v39  ;;  %v1295_v3 = vmul.f32 %v1231_v43, %v3367_v40  ;;  %v1202_v13 = vmul.f32 0.044715, %v3383_v12 }
 0x245   : > { %1897 = vst [vmem:[%s3372_s15 + $0x8] sm:$0xff] %v2249_v2  ;;  %v1232_v46 = vmul.f32 0.044715, %v3385_v29  ;;  %v1644_v48 = vmul.f32 %v1580_v36, %v3354_v63  ;;  %v1581_v51 = vadd.f32 1.0, %v2522_v62  ;;  %v1486_v7 = vmul.f32 0.7978846, %v1422_v21  ;;  %v3418_v36 = vpop.f32.mrf.mxu1  ;;  %v3422_v20 = vpop.f32.mrf.mxu0 }
 0x246   : > { %1912 = vst [vmem:[%s3372_s15 + $0x80] sm:$0xff] %v2264_v60  ;;  %v1393_v27 = vadd.f32 %v1329_v34, %v3363_v54  ;;  %v2524_v61 = vpop.eup %2523  ;;  %v1674_v38 = vmul.f32 %v1610_v5, %v1162_v15  ;;  %v1359_v24 = vmul.f32 %v1295_v3, %v3367_v40  ;;  %v1266_v39 = vmul.f32 %v1202_v13, %v3383_v12 }
 0x247   : > { %v1296_v50 = vmul.f32 %v1232_v46, %v3385_v29  ;;  %v2526_v37 = vpop.eup %2525  ;;  %v1645_v32 = vmul.f32 %v1581_v51, %v1133_v18  ;;  %v1611_v28 = vadd.f32 1.0, %v2524_v61  ;;  %2535 = vtanh.f32 %v1486_v7  ;;  %v3436_v51 = vpop.f32.mrf.mxu0 }
 0x248   : > { %v1457_v9 = vmul.f32 0.7978846, %v1393_v27  ;;  %v1582_v63 = vadd.f32 1.0, %v2526_v37  ;;  %v1423_v41 = vadd.f32 %v1359_v24, %v3367_v40  ;;  %v1330_v17 = vmul.f32 %v1266_v39, %v3383_v12 }
 0x249   : > { %v1360_v10 = vmul.f32 %v1296_v50, %v3385_v29  ;;  %v2528_v47 = vpop.eup %2527  ;;  %v2250_v14 = vpack.c.bf16 %v1645_v32, %v1644_v48  ;;  %v1675_v26 = vmul.f32 %v1611_v28, %v1163_v19  ;;  %v1203_v30 = vmul.f32 0.044715, %v3399_v16 }
 0x24a   : > { %2537 = vtanh.f32 %v1457_v9  ;;  %v1612_v23 = vadd.f32 1.0, %v2528_v47  ;;  %v1135_v11 = vmul.f32 0.5, %v3317_v31  ;;  %v1487_v52 = vmul.f32 0.7978846, %v1423_v41 }
 0x24b   : > { %v2530_v15 = vpop.eup %2529  ;;  %v1394_v18 = vadd.f32 %v1330_v17, %v3383_v12  ;;  %1898 = vst [vmem:[%s3372_s15 + $0x10] sm:$0xff] %v2250_v14  ;;  %v2265_v55 = vpack.c.bf16 %v1675_v26, %v1674_v38  ;;  %v1424_v4 = vadd.f32 %v1360_v10, %v3385_v29  ;;  %v1267_v57 = vmul.f32 %v1203_v30, %v3399_v16 }
 0x24c   : > { %v2532_v35 = vpop.eup %2531  ;;  %v1583_v44 = vadd.f32 1.0, %v2530_v15  ;;  %v1165_v6 = vmul.f32 0.5, %v3322_v59  ;;  %2539 = vtanh.f32 %v1487_v52  ;;  %v1646_v31 = vmul.f32 %v1582_v63, %v1134_v1 }
 0x24d   : > { %v1613_v0 = vadd.f32 1.0, %v2532_v35  ;;  %v1458_v42 = vmul.f32 0.7978846, %v1394_v18  ;;  %1913 = vst [vmem:[%s3372_s15 + $0x88] sm:$0xff] %v2265_v55  ;;  %v1488_v58 = vmul.f32 0.7978846, %v1424_v4  ;;  %v1331_v33 = vmul.f32 %v1267_v57, %v3399_v16 }
 0x24e   : > { %v1647_v22 = vmul.f32 %v1583_v44, %v1135_v11  ;;  %v1676_v43 = vmul.f32 %v1612_v23, %v1164_v45  ;;  %v1233_v2 = vmul.f32 0.044715, %v3407_v53  ;;  %v1204_v1 = vmul.f32 0.044715, %v3410_v56  ;;  %v3430_v45 = vpop.f32.mrf.mxu1  ;;  %v3462_v23 = vpop.f32.mrf.mxu0 }
 0x24f   : > { %v1677_v8 = vmul.f32 %v1613_v0, %v1165_v6  ;;  %2541 = vtanh.f32 %v1458_v42  ;;  %v2534_v59 = vpop.eup %2533  ;;  %v1395_v60 = vadd.f32 %v1331_v33, %v3399_v16  ;;  %v1136_v21 = vmul.f32 0.5, %v3339_v25 }
 0x250   : > { %v2251_v19 = vpack.c.bf16 %v1647_v22, %v1646_v31  ;;  %2543 = vtanh.f32 %v1488_v58  ;;  %v1166_v34 = vmul.f32 0.5, %v3357_v49  ;;  %v1297_v62 = vmul.f32 %v1233_v2, %v3407_v53  ;;  %v3459_v14 = vpop.f32.mrf.mxu1 }
 0x251   : > { %v2266_v5 = vpack.c.bf16 %v1677_v8, %v1676_v43  ;;  %v1137_v3 = vmul.f32 0.5, %v3363_v54  ;;  %v1459_v13 = vmul.f32 0.7978846, %v1395_v60  ;;  %v1268_v46 = vmul.f32 %v1204_v1, %v3410_v56  ;;  %v3474_v8 = vpop.f32.mrf.mxu0 }
 0x252   : > { %1899 = vst [vmem:[%s3372_s15 + $0x18] sm:$0xff] %v2251_v19  ;;  %v1234_v48 = vmul.f32 0.044715, %v3418_v36  ;;  %v1584_v7 = vadd.f32 1.0, %v2534_v59  ;;  %v1167_v25 = vmul.f32 0.5, %v3367_v40  ;;  %v1361_v49 = vmul.f32 %v1297_v62, %v3407_v53  ;;  %v3470_v31 = vpop.f32.mrf.mxu1 }
 0x253   : > { %1914 = vst [vmem:[%s3372_s15 + $0x90] sm:$0xff] %v2266_v5  ;;  %v1205_v27 = vmul.f32 0.044715, %v3422_v20  ;;  %2545 = vtanh.f32 %v1459_v13  ;;  %v1332_v61 = vmul.f32 %v1268_v46, %v3410_v56  ;;  %v1235_v38 = vmul.f32 0.044715, %v3430_v45 }
 0x254   : > { %v1298_v54 = vmul.f32 %v1234_v48, %v3418_v36  ;;  %v2536_v24 = vpop.eup %2535  ;;  %v3446_v39 = vmul.f32 0.5, %v3383_v12  ;;  %v1425_v50 = vadd.f32 %v1361_v49, %v3407_v53  ;;  %v1206_v40 = vmul.f32 0.044715, %v3436_v51  ;;  %v3483_v46 = vpop.f32.mrf.mxu1 }
 0x255   : > { %v1269_v37 = vmul.f32 %v1205_v27, %v3422_v20  ;;  %v3452_v32 = vmul.f32 0.5, %v3385_v29  ;;  %v1396_v28 = vadd.f32 %v1332_v61, %v3410_v56  ;;  %v1299_v63 = vmul.f32 %v1235_v38, %v3430_v45 }
 0x256   : > { %v1362_v9 = vmul.f32 %v1298_v54, %v3418_v36  ;;  %v1648_v17 = vmul.f32 %v1584_v7, %v1136_v21  ;;  %v1489_v10 = vmul.f32 0.7978846, %v1425_v50  ;;  %v1270_v47 = vmul.f32 %v1206_v40, %v3436_v51 }
 0x257   : > { %v2538_v41 = vpop.eup %2537  ;;  %v1333_v12 = vmul.f32 %v1269_v37, %v3422_v20  ;;  %v1614_v26 = vadd.f32 1.0, %v2536_v24  ;;  %v1460_v15 = vmul.f32 0.7978846, %v1396_v28  ;;  %v1363_v52 = vmul.f32 %v1299_v63, %v3430_v45 }
 0x258   : > { %v1585_v30 = vadd.f32 1.0, %v2538_v41  ;;  %v1426_v29 = vadd.f32 %v1362_v9, %v3418_v36  ;;  %2547 = vtanh.f32 %v1489_v10  ;;  %v1334_v18 = vmul.f32 %v1270_v47, %v3436_v51  ;;  %v3502_v9 = vpop.f32.mrf.mxu1 }
 0x259   : > { %v1397_v11 = vadd.f32 %v1333_v12, %v3422_v20  ;;  %v2540_v35 = vpop.eup %2539  ;;  %2549 = vtanh.f32 %v1460_v15  ;;  %v1236_v4 = vmul.f32 0.044715, %v3459_v14  ;;  %v1427_v0 = vadd.f32 %v1363_v52, %v3430_v45 }
 0x25a   : > { %v1649_v55 = vmul.f32 %v1585_v30, %v1137_v3  ;;  %v1490_v44 = vmul.f32 0.7978846, %v1426_v29  ;;  %v1615_v57 = vadd.f32 1.0, %v2540_v35  ;;  %v1398_v42 = vadd.f32 %v1334_v18, %v3436_v51 }
 0x25b   : > { %v1461_v6 = vmul.f32 0.7978846, %v1397_v11  ;;  %v1139_v33 = vmul.f32 0.5, %v3399_v16  ;;  %v1300_v43 = vmul.f32 %v1236_v4, %v3459_v14  ;;  %v1678_v59 = vmul.f32 %v1614_v26, %v1166_v34 }
 0x25c   : > { %v2542_v22 = vpop.eup %2541  ;;  %v2252_v58 = vpack.c.bf16 %v1649_v55, %v1648_v17  ;;  %2551 = vtanh.f32 %v1490_v44  ;;  %v1679_v19 = vmul.f32 %v1615_v57, %v1167_v25  ;;  %v1491_v60 = vmul.f32 0.7978846, %v1427_v0 }
 0x25d   : > { %v2544_v2 = vpop.eup %2543  ;;  %2553 = vtanh.f32 %v1461_v6  ;;  %v1169_v1 = vmul.f32 0.5, %v3407_v53  ;;  %v1462_v5 = vmul.f32 0.7978846, %v1398_v42  ;;  %v1364_v21 = vmul.f32 %v1300_v43, %v3459_v14  ;;  %v3487_v53 = vpop.f32.mrf.mxu0 }
 0x25e   : > { %1900 = vst [vmem:[%s3372_s15 + $0x20] sm:$0xff] %v2252_v58  ;;  %v1207_v62 = vmul.f32 0.044715, %v3462_v23  ;;  %v2267_v16 = vpack.c.bf16 %v1679_v19, %v1678_v59  ;;  %v1586_v3 = vadd.f32 1.0, %v2542_v22  ;;  %v3481_v13 = vmul.f32 0.5, %v3410_v56 }
 0x25f   : > { %2555 = vtanh.f32 %v1491_v60  ;;  %v1616_v34 = vadd.f32 1.0, %v2544_v2  ;;  %v1428_v48 = vadd.f32 %v1364_v21, %v3459_v14  ;;  %v3491_v49 = vmul.f32 0.5, %v3418_v36  ;;  %v3518_v57 = vpop.f32.mrf.mxu0 }
 0x260   : > { %2557 = vtanh.f32 %v1462_v5  ;;  %v1271_v7 = vmul.f32 %v1207_v62, %v3462_v23  ;;  %v2546_v25 = vpop.eup %2545  ;;  %1915 = vst [vmem:[%s3372_s15 + $0x98] sm:$0xff] %v2267_v16  ;;  %v1141_v27 = vmul.f32 0.5, %v3422_v20  ;;  %v1237_v56 = vmul.f32 0.044715, %v3470_v31 }
 0x261   : > { %v1208_v61 = vmul.f32 0.044715, %v3474_v8  ;;  %v1587_v54 = vadd.f32 1.0, %v2546_v25  ;;  %v1492_v38 = vmul.f32 0.7978846, %v1428_v48  ;;  %v1650_v37 = vmul.f32 %v1586_v3, %v3446_v39  ;;  %v3528_v48 = vpop.f32.mrf.mxu0 }
 0x262   : > { %v1335_v24 = vmul.f32 %v1271_v7, %v3462_v23  ;;  %v1238_v50 = vmul.f32 0.044715, %v3483_v46  ;;  %v1301_v40 = vmul.f32 %v1237_v56, %v3470_v31  ;;  %v1209_v36 = vmul.f32 0.044715, %v3487_v53 }
 0x263   : > { %v1272_v28 = vmul.f32 %v1208_v61, %v3474_v8  ;;  %v1680_v20 = vmul.f32 %v1616_v34, %v3452_v32  ;;  %v1651_v63 = vmul.f32 %v1587_v54, %v1139_v33  ;;  %2559 = vtanh.f32 %v1492_v38  ;;  %v3521_v33 = vpop.f32.mrf.mxu1 }
 0x264   : > { %v1399_v41 = vadd.f32 %v1335_v24, %v3462_v23  ;;  %v1302_v17 = vmul.f32 %v1238_v50, %v3483_v46  ;;  %v1365_v10 = vmul.f32 %v1301_v40, %v3470_v31  ;;  %v1273_v12 = vmul.f32 %v1209_v36, %v3487_v53  ;;  %v3542_v36 = vpop.f32.mrf.mxu0 }
 0x265   : > { %v1336_v39 = vmul.f32 %v1272_v28, %v3474_v8  ;;  %v2548_v47 = vpop.eup %2547  ;;  %v2253_v26 = vpack.c.bf16 %v1651_v63, %v1650_v37  ;;  %v1239_v32 = vmul.f32 0.044715, %v3502_v9  ;;  %v1171_v59 = vmul.f32 0.5, %v3430_v45  ;;  %v3532_v61 = vpop.f32.mrf.mxu1 }
 0x266   : > { %v1463_v30 = vmul.f32 0.7978846, %v1399_v41  ;;  %v1366_v15 = vmul.f32 %v1302_v17, %v3483_v46  ;;  %v2550_v29 = vpop.eup %2549  ;;  %v1617_v11 = vadd.f32 1.0, %v2548_v47  ;;  %v1429_v52 = vadd.f32 %v1365_v10, %v3470_v31 }
 0x267   : > { %v1400_v18 = vadd.f32 %v1336_v39, %v3474_v8  ;;  %v1337_v35 = vmul.f32 %v1273_v12, %v3487_v53  ;;  %1901 = vst [vmem:[%s3372_s15 + $0x28] sm:$0xff] %v2253_v26  ;;  %v1588_v55 = vadd.f32 1.0, %v2550_v29  ;;  %v1303_v4 = vmul.f32 %v1239_v32, %v3502_v9  ;;  %v3548_v41 = vpop.f32.mrf.mxu1  ;;  %v3564_v29 = vpop.f32.mrf.mxu0 }
 0x268   : > { %2561 = vtanh.f32 %v1463_v30  ;;  %v1430_v44 = vadd.f32 %v1366_v15, %v3483_v46  ;;  %v1681_v0 = vmul.f32 %v1617_v11, %v1169_v1  ;;  %v1493_v42 = vmul.f32 0.7978846, %v1429_v52 }
 0x269   : > { %v2552_v6 = vpop.eup %2551  ;;  %v1464_v22 = vmul.f32 0.7978846, %v1400_v18  ;;  %v1401_v58 = vadd.f32 %v1337_v35, %v3487_v53  ;;  %v1367_v60 = vmul.f32 %v1303_v4, %v3502_v9  ;;  %v1652_v1 = vmul.f32 %v1588_v55, %v3481_v13 }
 0x26a   : > { %v2554_v43 = vpop.eup %2553  ;;  %v1618_v2 = vadd.f32 1.0, %v2552_v6  ;;  %v1494_v19 = vmul.f32 0.7978846, %v1430_v44  ;;  %v2268_v5 = vpack.c.bf16 %v1681_v0, %v1680_v20  ;;  %2563 = vtanh.f32 %v1493_v42 }
 0x26b   : > { %v1589_v21 = vadd.f32 1.0, %v2554_v43  ;;  %v1465_v62 = vmul.f32 0.7978846, %v1401_v58  ;;  %v1142_v3 = vmul.f32 0.5, %v3436_v51  ;;  %2565 = vtanh.f32 %v1464_v22  ;;  %v3573_v58 = vpop.f32.mrf.mxu1 }
 0x26c   : > { %v2556_v16 = vpop.eup %2555  ;;  %v1431_v34 = vadd.f32 %v1367_v60, %v3502_v9  ;;  %1916 = vst [vmem:[%s3372_s15 + $0xa0] sm:$0xff] %v2268_v5  ;;  %2567 = vtanh.f32 %v1494_v19  ;;  %v1210_v56 = vmul.f32 0.044715, %v3518_v57  ;;  %v1682_v54 = vmul.f32 %v1618_v2, %v3491_v49 }
 0x26d   : > { %v2558_v7 = vpop.eup %2557  ;;  %v1653_v45 = vmul.f32 %v1589_v21, %v1141_v27  ;;  %v1619_v25 = vadd.f32 1.0, %v2556_v16  ;;  %v3536_v13 = vmul.f32 0.5, %v3459_v14  ;;  %2569 = vtanh.f32 %v1465_v62 }
 0x26e   : > { %v1495_v51 = vmul.f32 0.7978846, %v1431_v34  ;;  %v1274_v50 = vmul.f32 %v1210_v56, %v3518_v57  ;;  %v1240_v27 = vmul.f32 0.044715, %v3521_v33  ;;  %v1590_v37 = vadd.f32 1.0, %v2558_v7 }
 0x26f   : > { %v2254_v38 = vpack.c.bf16 %v1653_v45, %v1652_v1  ;;  %v1683_v24 = vmul.f32 %v1619_v25, %v1171_v59  ;;  %v1143_v40 = vmul.f32 0.5, %v3462_v23  ;;  %v1211_v28 = vmul.f32 0.044715, %v3528_v48  ;;  %v3579_v1 = vpop.f32.mrf.mxu0 }
 0x270   : > { %2571 = vtanh.f32 %v1495_v51  ;;  %v1173_v49 = vmul.f32 0.5, %v3470_v31  ;;  %v1338_v20 = vmul.f32 %v1274_v50, %v3518_v57  ;;  %v1304_v63 = vmul.f32 %v1240_v27, %v3521_v33  ;;  %v2560_v17 = vpop.eup %2559 }
 0x271   : > { %1902 = vst [vmem:[%s3372_s15 + $0x30] sm:$0xff] %v2254_v38  ;;  %v2269_v14 = vpack.c.bf16 %v1683_v24, %v1682_v54  ;;  %v1144_v10 = vmul.f32 0.5, %v3474_v8  ;;  %v3552_v23 = vmul.f32 0.5, %v3483_v46  ;;  %v1275_v39 = vmul.f32 %v1211_v28, %v3528_v48  ;;  %v3583_v24 = vpop.f32.mrf.mxu1 }
 0x272   : > { %v1241_v12 = vmul.f32 0.044715, %v3532_v61  ;;  %v1145_v47 = vmul.f32 0.5, %v3487_v53  ;;  %v1402_v31 = vadd.f32 %v1338_v20, %v3518_v57  ;;  %v1368_v26 = vmul.f32 %v1304_v63, %v3521_v33 }
 0x273   : > { %1917 = vst [vmem:[%s3372_s15 + $0xa8] sm:$0xff] %v2269_v14  ;;  %v1212_v30 = vmul.f32 0.044715, %v3542_v36  ;;  %v1654_v15 = vmul.f32 %v1590_v37, %v1142_v3  ;;  %v1339_v32 = vmul.f32 %v1275_v39, %v3528_v48  ;;  %v1242_v46 = vmul.f32 0.044715, %v3548_v41 }
 0x274   : > { %v1305_v8 = vmul.f32 %v1241_v12, %v3532_v61  ;;  %v1620_v52 = vadd.f32 1.0, %v2560_v17  ;;  %v1466_v18 = vmul.f32 0.7978846, %v1402_v31  ;;  %v1432_v53 = vadd.f32 %v1368_v26, %v3521_v33  ;;  %v3594_v26 = vpop.f32.mrf.mxu1 }
 0x275   : > { %v2562_v11 = vpop.eup %2561  ;;  %v1276_v35 = vmul.f32 %v1212_v30, %v3542_v36  ;;  %v1403_v44 = vadd.f32 %v1339_v32, %v3528_v48  ;;  %v1306_v6 = vmul.f32 %v1242_v46, %v3548_v41  ;;  %v1213_v22 = vmul.f32 0.044715, %v3564_v29 }
 0x276   : > { %v1591_v55 = vadd.f32 1.0, %v2562_v11  ;;  %v1369_v4 = vmul.f32 %v1305_v8, %v3532_v61  ;;  %2573 = vtanh.f32 %v1466_v18  ;;  %v1496_v0 = vmul.f32 0.7978846, %v1432_v53 }
 0x277   : > { %v1340_v42 = vmul.f32 %v1276_v35, %v3542_v36  ;;  %v2564_v43 = vpop.eup %2563  ;;  %v1467_v59 = vmul.f32 0.7978846, %v1403_v44  ;;  %v1370_v60 = vmul.f32 %v1306_v6, %v3548_v41  ;;  %v1277_v16 = vmul.f32 %v1213_v22, %v3564_v29  ;;  %v3609_v44 = vpop.f32.mrf.mxu1 }
 0x278   : > { %v1655_v2 = vmul.f32 %v1591_v55, %v1143_v40  ;;  %v1433_v19 = vadd.f32 %v1369_v4, %v3532_v61  ;;  %v2566_v5 = vpop.eup %2565  ;;  %v1621_v21 = vadd.f32 1.0, %v2564_v43  ;;  %2575 = vtanh.f32 %v1496_v0 }
 0x279   : > { %v1404_v62 = vadd.f32 %v1340_v42, %v3542_v36  ;;  %v2568_v3 = vpop.eup %2567  ;;  %v1592_v7 = vadd.f32 1.0, %v2566_v5  ;;  %2577 = vtanh.f32 %v1467_v59  ;;  %v1684_v56 = vmul.f32 %v1620_v52, %v3536_v13  ;;  %v3588_v13 = vpop.f32.mrf.mxu0 }
 0x27a   : > { %v2255_v34 = vpack.c.bf16 %v1655_v2, %v1654_v15  ;;  %v1497_v45 = vmul.f32 0.7978846, %v1433_v19  ;;  %v2570_v25 = vpop.eup %2569  ;;  %v1685_v54 = vmul.f32 %v1621_v21, %v1173_v49  ;;  %v1434_v38 = vadd.f32 %v1370_v60, %v3548_v41 }
 0x27b   : > { %v1468_v51 = vmul.f32 0.7978846, %v1404_v62  ;;  %v1622_v50 = vadd.f32 1.0, %v2568_v3  ;;  %v1593_v27 = vadd.f32 1.0, %v2570_v25  ;;  %v1341_v37 = vmul.f32 %v1277_v16, %v3564_v29  ;;  %v3600_v46 = vpop.f32.mrf.mxu0 }
 0x27c   : > { %1903 = vst [vmem:[%s3372_s15 + $0x38] sm:$0xff] %v2255_v34  ;;  %2579 = vtanh.f32 %v1497_v45  ;;  %v2270_v28 = vpack.c.bf16 %v1685_v54, %v1684_v56  ;;  %v1175_v14 = vmul.f32 0.5, %v3502_v9  ;;  %v1498_v20 = vmul.f32 0.7978846, %v1434_v38 }
 0x27d   : > { %v2572_v40 = vpop.eup %2571  ;;  %2581 = vtanh.f32 %v1468_v51  ;;  %v1656_v49 = vmul.f32 %v1592_v7, %v1144_v10  ;;  %v1657_v63 = vmul.f32 %v1593_v27, %v1145_v47  ;;  %v1405_v39 = vadd.f32 %v1341_v37, %v3564_v29  ;;  %v3624_v7 = vpop.f32.mrf.mxu0 }
 0x27e   : > { %v1623_v17 = vadd.f32 1.0, %v2572_v40  ;;  %1918 = vst [vmem:[%s3372_s15 + $0xb0] sm:$0xff] %v2270_v28  ;;  %v1243_v12 = vmul.f32 0.044715, %v3573_v58  ;;  %v1214_v31 = vmul.f32 0.044715, %v3579_v1  ;;  %v1686_v30 = vmul.f32 %v1622_v50, %v3552_v23 }
 0x27f   : > { %v2256_v9 = vpack.c.bf16 %v1657_v63, %v1656_v49  ;;  %v1469_v32 = vmul.f32 0.7978846, %v1405_v39  ;;  %2583 = vtanh.f32 %v1498_v20  ;;  %v1244_v8 = vmul.f32 0.044715, %v3583_v24  ;;  %v3635_v39 = vpop.f32.mrf.mxu0 }
 0x280   : > { %v1687_v15 = vmul.f32 %v1623_v17, %v1175_v14  ;;  %v1307_v10 = vmul.f32 %v1243_v12, %v3573_v58  ;;  %v1278_v47 = vmul.f32 %v1214_v31, %v3579_v1  ;;  %v1146_v52 = vmul.f32 0.5, %v3518_v57  ;;  %v3631_v14 = vpop.f32.mrf.mxu1 }
 0x281   : > { %1904 = vst [vmem:[%s3372_s15 + $0x40] sm:$0xff] %v2256_v9  ;;  %2585 = vtanh.f32 %v1469_v32  ;;  %v1215_v23 = vmul.f32 0.044715, %v3588_v13  ;;  %v1308_v35 = vmul.f32 %v1244_v8, %v3583_v24  ;;  %v1245_v55 = vmul.f32 0.044715, %v3594_v26 }
 0x282   : > { %v2271_v11 = vpack.c.bf16 %v1687_v15, %v1686_v30  ;;  %v1371_v18 = vmul.f32 %v1307_v10, %v3573_v58  ;;  %v1342_v53 = vmul.f32 %v1278_v47, %v3579_v1  ;;  %v1176_v6 = vmul.f32 0.5, %v3521_v33 }
 0x283   : > { %v2574_v4 = vpop.eup %2573  ;;  %v1147_v0 = vmul.f32 0.5, %v3528_v48  ;;  %v1279_v57 = vmul.f32 %v1215_v23, %v3588_v13  ;;  %v1216_v42 = vmul.f32 0.044715, %v3600_v46  ;;  %v1372_v59 = vmul.f32 %v1308_v35, %v3583_v24 }
 0x284   : > { %1919 = vst [vmem:[%s3372_s15 + $0xb8] sm:$0xff] %v2271_v11  ;;  %v1594_v22 = vadd.f32 1.0, %v2574_v4  ;;  %v1435_v43 = vadd.f32 %v1371_v18, %v3573_v58  ;;  %v1406_v2 = vadd.f32 %v1342_v53, %v3579_v1  ;;  %v1309_v5 = vmul.f32 %v1245_v55, %v3594_v26  ;;  %v3646_v55 = vpop.f32.mrf.mxu0 }
 0x285   : > { %v2576_v19 = vpop.eup %2575  ;;  %v1343_v60 = vmul.f32 %v1279_v57, %v3588_v13  ;;  %v1280_v33 = vmul.f32 %v1216_v42, %v3600_v46  ;;  %v1246_v48 = vmul.f32 0.044715, %v3609_v44  ;;  %v1177_v16 = vmul.f32 0.5, %v3532_v61 }
 0x286   : > { %v2578_v21 = vpop.eup %2577  ;;  %v1624_v62 = vadd.f32 1.0, %v2576_v19  ;;  %v1499_v3 = vmul.f32 0.7978846, %v1435_v43  ;;  %v1470_v34 = vmul.f32 0.7978846, %v1406_v2  ;;  %v1436_v25 = vadd.f32 %v1372_v59, %v3583_v24 }
 0x287   : > { %v1595_v45 = vadd.f32 1.0, %v2578_v21  ;;  %v1407_v56 = vadd.f32 %v1343_v60, %v3588_v13  ;;  %v1373_v54 = vmul.f32 %v1309_v5, %v3594_v26  ;;  %v1658_v38 = vmul.f32 %v1594_v22, %v1146_v52  ;;  %v3641_v52 = vpop.f32.mrf.mxu1 }
 0x288   : > { %2587 = vtanh.f32 %v1499_v3  ;;  %v1344_v50 = vmul.f32 %v1280_v33, %v3600_v46  ;;  %v1310_v27 = vmul.f32 %v1246_v48, %v3609_v44  ;;  %v1500_v28 = vmul.f32 0.7978846, %v1436_v25  ;;  %v3661_v33 = vpop.f32.mrf.mxu0 }
 0x289   : > { %v2580_v51 = vpop.eup %2579  ;;  %v1659_v61 = vmul.f32 %v1595_v45, %v1147_v0  ;;  %2589 = vtanh.f32 %v1470_v34  ;;  %v1688_v20 = vmul.f32 %v1624_v62, %v1176_v6  ;;  %v1471_v49 = vmul.f32 0.7978846, %v1407_v56  ;;  %v3655_v59 = vpop.f32.mrf.mxu1 }
 0x28a   : > { %v2582_v37 = vpop.eup %2581  ;;  %v1625_v40 = vadd.f32 1.0, %v2580_v51  ;;  %v1437_v63 = vadd.f32 %v1373_v54, %v3594_v26  ;;  %v1408_v17 = vadd.f32 %v1344_v50, %v3600_v46  ;;  %2591 = vtanh.f32 %v1500_v28 }
 0x28b   : > { %v2257_v12 = vpack.c.bf16 %v1659_v61, %v1658_v38  ;;  %v1374_v30 = vmul.f32 %v1310_v27, %v3609_v44  ;;  %v1596_v9 = vadd.f32 1.0, %v2582_v37  ;;  %2593 = vtanh.f32 %v1471_v49 }
 0x28c   : > { %v1689_v31 = vmul.f32 %v1625_v40, %v1177_v16  ;;  %v1501_v15 = vmul.f32 0.7978846, %v1437_v63  ;;  %v2584_v32 = vpop.eup %2583  ;;  %v1148_v47 = vmul.f32 0.5, %v3542_v36  ;;  %v1472_v8 = vmul.f32 0.7978846, %v1408_v17  ;;  %v3677_v63 = vpop.f32.mrf.mxu1 }
 0x28d   : > { %1905 = vst [vmem:[%s3372_s15 + $0x48] sm:$0xff] %v2257_v12  ;;  %v1438_v11 = vadd.f32 %v1374_v30, %v3609_v44  ;;  %v1178_v18 = vmul.f32 0.5, %v3548_v41  ;;  %v1149_v53 = vmul.f32 0.5, %v3564_v29  ;;  %v1217_v35 = vmul.f32 0.044715, %v3624_v7 }
 0x28e   : > { %v2272_v10 = vpack.c.bf16 %v1689_v31, %v1688_v20  ;;  %v2586_v23 = vpop.eup %2585  ;;  %2595 = vtanh.f32 %v1501_v15  ;;  %v1247_v36 = vmul.f32 0.044715, %v3631_v14  ;;  %v1660_v0 = vmul.f32 %v1596_v9, %v1148_v47 }
 0x28f   : > { %v1597_v4 = vadd.f32 1.0, %v2586_v23  ;;  %2597 = vtanh.f32 %v1472_v8  ;;  %v1502_v6 = vmul.f32 0.7978846, %v1438_v11  ;;  %v1179_v57 = vmul.f32 0.5, %v3573_v58  ;;  %v3681_v23 = vpop.f32.mrf.mxu0 }
 0x290   : > { %1920 = vst [vmem:[%s3372_s15 + $0xc0] sm:$0xff] %v2272_v10  ;;  %v1281_v42 = vmul.f32 %v1217_v35, %v3624_v7  ;;  %v1218_v41 = vmul.f32 0.044715, %v3635_v39  ;;  %v1626_v22 = vadd.f32 1.0, %v2584_v32  ;;  %v1311_v43 = vmul.f32 %v1247_v36, %v3631_v14  ;;  %v3687_v36 = vpop.f32.mrf.mxu1 }
 0x291   : > { %v1661_v29 = vmul.f32 %v1597_v4, %v1149_v53  ;;  %v1248_v2 = vmul.f32 0.044715, %v3641_v52  ;;  %v1150_v19 = vmul.f32 0.5, %v3579_v1  ;;  %v1219_v58 = vmul.f32 0.044715, %v3646_v55 }
 0x292   : > { %v1345_v60 = vmul.f32 %v1281_v42, %v3624_v7  ;;  %v1282_v5 = vmul.f32 %v1218_v41, %v3635_v39  ;;  %2599 = vtanh.f32 %v1502_v6  ;;  %v1375_v21 = vmul.f32 %v1311_v43, %v3631_v14 }
 0x293   : > { %v2258_v48 = vpack.c.bf16 %v1661_v29, %v1660_v0  ;;  %v1312_v62 = vmul.f32 %v1248_v2, %v3641_v52  ;;  %v1283_v1 = vmul.f32 %v1219_v58, %v3646_v55  ;;  %v1249_v34 = vmul.f32 0.044715, %v3655_v59 }
 0x294   : > { %v1409_v16 = vadd.f32 %v1345_v60, %v3624_v7  ;;  %v1346_v3 = vmul.f32 %v1282_v5, %v3635_v39  ;;  %v1690_v25 = vmul.f32 %v1626_v22, %v1178_v18  ;;  %v1439_v56 = vadd.f32 %v1375_v21, %v3631_v14  ;;  %v3694_v60 = vpop.f32.mrf.mxu0  ;;  %v3698_v21 = vpop.f32.mrf.mxu1 }
 0x295   : > { %v2588_v45 = vpop.eup %2587  ;;  %1906 = vst [vmem:[%s3372_s15 + $0x50] sm:$0xff] %v2258_v48  ;;  %v1376_v54 = vmul.f32 %v1312_v62, %v3641_v52  ;;  %v1220_v51 = vmul.f32 0.044715, %v3661_v33  ;;  %v1347_v61 = vmul.f32 %v1283_v1, %v3646_v55  ;;  %v1313_v49 = vmul.f32 %v1249_v34, %v3655_v59 }
 0x296   : > { %v2590_v38 = vpop.eup %2589  ;;  %v1627_v50 = vadd.f32 1.0, %v2588_v45  ;;  %v1473_v27 = vmul.f32 0.7978846, %v1409_v16  ;;  %v1410_v37 = vadd.f32 %v1346_v3, %v3635_v39  ;;  %v1503_v28 = vmul.f32 0.7978846, %v1439_v56 }
 0x297   : > { %v1598_v40 = vadd.f32 1.0, %v2590_v38  ;;  %v1440_v20 = vadd.f32 %v1376_v54, %v3641_v52  ;;  %v2592_v17 = vpop.eup %2591  ;;  %v1411_v30 = vadd.f32 %v1347_v61, %v3646_v55  ;;  %v1151_v32 = vmul.f32 0.5, %v3588_v13  ;;  %v3716_v61 = vpop.f32.mrf.mxu1 }
 0x298   : > { %v1691_v12 = vmul.f32 %v1627_v50, %v1179_v57  ;;  %2601 = vtanh.f32 %v1473_v27  ;;  %v1474_v31 = vmul.f32 0.7978846, %v1410_v37  ;;  %v2594_v9 = vpop.eup %2593  ;;  %v1628_v15 = vadd.f32 1.0, %v2592_v17 }
 0x299   : > { %2603 = vtanh.f32 %v1503_v28  ;;  %v1504_v10 = vmul.f32 0.7978846, %v1440_v20  ;;  %v1599_v8 = vadd.f32 1.0, %v2594_v9  ;;  %v1475_v11 = vmul.f32 0.7978846, %v1411_v30 }
 0x29a   : > { %v2273_v47 = vpack.c.bf16 %v1691_v12, %v1690_v25  ;;  %2605 = vtanh.f32 %v1474_v31  ;;  %v1180_v53 = vmul.f32 0.5, %v3583_v24  ;;  %v1181_v35 = vmul.f32 0.5, %v3594_v26 }
 0x29b   : > { %v2596_v18 = vpop.eup %2595  ;;  %v1377_v4 = vmul.f32 %v1313_v49, %v3655_v59  ;;  %v1284_v6 = vmul.f32 %v1220_v51, %v3661_v33  ;;  %v1662_v0 = vmul.f32 %v1598_v40, %v1150_v19  ;;  %v1663_v57 = vmul.f32 %v1599_v8, %v1151_v32 }
 0x29c   : > { %v2598_v13 = vpop.eup %2597  ;;  %1921 = vst [vmem:[%s3372_s15 + $0xc8] sm:$0xff] %v2273_v47  ;;  %v1629_v42 = vadd.f32 1.0, %v2596_v18  ;;  %2607 = vtanh.f32 %v1475_v11  ;;  %v1250_v26 = vmul.f32 0.044715, %v3677_v63  ;;  %v1692_v22 = vmul.f32 %v1628_v15, %v1180_v53  ;;  %v3728_v53 = vpop.f32.mrf.mxu1 }
 0x29d   : > { %2609 = vtanh.f32 %v1504_v10  ;;  %v1441_v41 = vadd.f32 %v1377_v4, %v3655_v59  ;;  %v1348_v24 = vmul.f32 %v1284_v6, %v3661_v33  ;;  %v2259_v29 = vpack.c.bf16 %v1663_v57, %v1662_v0 }
 0x29e   : > { %v1693_v43 = vmul.f32 %v1629_v42, %v1181_v35  ;;  %v1221_v2 = vmul.f32 0.044715, %v3681_v23  ;;  %v1152_v19 = vmul.f32 0.5, %v3600_v46  ;;  %v1600_v5 = vadd.f32 1.0, %v2598_v13 }
 0x29f   : > { %v1505_v58 = vmul.f32 0.7978846, %v1441_v41  ;;  %v1412_v48 = vadd.f32 %v1348_v24, %v3661_v33  ;;  %v2600_v62 = vpop.eup %2599  ;;  %1907 = vst [vmem:[%s3372_s15 + $0x58] sm:$0xff] %v2259_v29  ;;  %v1182_v3 = vmul.f32 0.5, %v3609_v44  ;;  %v1314_v1 = vmul.f32 %v1250_v26, %v3677_v63  ;;  %v3711_v44 = vpop.f32.mrf.mxu0 }
 0x2a0   : > { %v2274_v16 = vpack.c.bf16 %v1693_v43, %v1692_v22  ;;  %v1285_v34 = vmul.f32 %v1221_v2, %v3681_v23  ;;  %v1153_v45 = vmul.f32 0.5, %v3624_v7  ;;  %v1251_v46 = vmul.f32 0.044715, %v3687_v36 }
 0x2a1   : > { %2611 = vtanh.f32 %v1505_v58  ;;  %v1476_v25 = vmul.f32 0.7978846, %v1412_v48  ;;  %v1183_v56 = vmul.f32 0.5, %v3631_v14  ;;  %v1378_v54 = vmul.f32 %v1314_v1, %v3677_v63 }
 0x2a2   : > { %1922 = vst [vmem:[%s3372_s15 + $0xd0] sm:$0xff] %v2274_v16  ;;  %v1349_v51 = vmul.f32 %v1285_v34, %v3681_v23  ;;  %v1222_v38 = vmul.f32 0.044715, %v3694_v60  ;;  %v1664_v50 = vmul.f32 %v1600_v5, %v1152_v19  ;;  %v1154_v27 = vmul.f32 0.5, %v3635_v39  ;;  %v3733_v19 = vpop.f32.mrf.mxu1 }
 0x2a3   : > { %v1315_v7 = vmul.f32 %v1251_v46, %v3687_v36  ;;  %v1252_v37 = vmul.f32 0.044715, %v3698_v21  ;;  %v1630_v40 = vadd.f32 1.0, %v2600_v62  ;;  %v1442_v14 = vadd.f32 %v1378_v54, %v3677_v63 }
 0x2a4   : > { %v1413_v28 = vadd.f32 %v1349_v51, %v3681_v23  ;;  %v1286_v20 = vmul.f32 %v1222_v38, %v3694_v60  ;;  %2613 = vtanh.f32 %v1476_v25  ;;  %v1223_v39 = vmul.f32 0.044715, %v3711_v44 }
 0x2a5   : > { %v2602_v49 = vpop.eup %2601  ;;  %v1379_v17 = vmul.f32 %v1315_v7, %v3687_v36  ;;  %v1316_v12 = vmul.f32 %v1252_v37, %v3698_v21  ;;  %v1506_v9 = vmul.f32 0.7978846, %v1442_v14  ;;  %v1694_v0 = vmul.f32 %v1630_v40, %v1182_v3 }
 0x2a6   : > { %v2604_v31 = vpop.eup %2603  ;;  %v1601_v30 = vadd.f32 1.0, %v2602_v49  ;;  %v1477_v15 = vmul.f32 0.7978846, %v1413_v28  ;;  %v1350_v32 = vmul.f32 %v1286_v20, %v3694_v60  ;;  %v1287_v18 = vmul.f32 %v1223_v39, %v3711_v44 }
 0x2a7   : > { %v2606_v10 = vpop.eup %2605  ;;  %v1631_v47 = vadd.f32 1.0, %v2604_v31  ;;  %v1443_v8 = vadd.f32 %v1379_v17, %v3687_v36  ;;  %v1380_v11 = vmul.f32 %v1316_v12, %v3698_v21  ;;  %2615 = vtanh.f32 %v1506_v9 }
 0x2a8   : > { %v1665_v35 = vmul.f32 %v1601_v30, %v1153_v45  ;;  %v1602_v4 = vadd.f32 1.0, %v2606_v10  ;;  %v1414_v6 = vadd.f32 %v1350_v32, %v3694_v60  ;;  %2617 = vtanh.f32 %v1477_v15 }
 0x2a9   : > { %v2608_v13 = vpop.eup %2607  ;;  %v1695_v57 = vmul.f32 %v1631_v47, %v1183_v56  ;;  %v1507_v42 = vmul.f32 0.7978846, %v1443_v8  ;;  %v1155_v26 = vmul.f32 0.5, %v3646_v55  ;;  %v1444_v2 = vadd.f32 %v1380_v11, %v3698_v21 }
 0x2aa   : > { %v2610_v41 = vpop.eup %2609  ;;  %v2260_v24 = vpack.c.bf16 %v1665_v35, %v1664_v50  ;;  %v1603_v22 = vadd.f32 1.0, %v2608_v13  ;;  %v1478_v29 = vmul.f32 0.7978846, %v1414_v6  ;;  %v1666_v5 = vmul.f32 %v1602_v4, %v1154_v27 }
 0x2ab   : > { %v2275_v43 = vpack.c.bf16 %v1695_v57, %v1694_v0  ;;  %2619 = vtanh.f32 %v1507_v42  ;;  %v1351_v48 = vmul.f32 %v1287_v18, %v3711_v44  ;;  %v1253_v62 = vmul.f32 0.044715, %v3716_v61 }
 0x2ac   : > { %1908 = vst [vmem:[%s3372_s15 + $0x60] sm:$0xff] %v2260_v24  ;;  %v1667_v58 = vmul.f32 %v1603_v22, %v1155_v26  ;;  %v1632_v16 = vadd.f32 1.0, %v2610_v41  ;;  %2621 = vtanh.f32 %v1478_v29  ;;  %v1508_v55 = vmul.f32 0.7978846, %v1444_v2 }
 0x2ad   : > { %1923 = vst [vmem:[%s3372_s15 + $0xd8] sm:$0xff] %v2275_v43  ;;  %v1254_v3 = vmul.f32 0.044715, %v3728_v53  ;;  %v1415_v45 = vadd.f32 %v1351_v48, %v3711_v44  ;;  %v1317_v25 = vmul.f32 %v1253_v62, %v3716_v61  ;;  %v1255_v46 = vmul.f32 0.044715, %v3733_v19 }
 0x2ae   : > { %v2612_v1 = vpop.eup %2611  ;;  %v2261_v34 = vpack.c.bf16 %v1667_v58, %v1666_v5  ;;  %v1184_v56 = vmul.f32 0.5, %v3641_v52  ;;  %v1185_v54 = vmul.f32 0.5, %v3655_v59  ;;  %2623 = vtanh.f32 %v1508_v55 }
 0x2af   : > { %v1633_v51 = vadd.f32 1.0, %v2612_v1  ;;  %v1318_v38 = vmul.f32 %v1254_v3, %v3728_v53  ;;  %v1479_v50 = vmul.f32 0.7978846, %v1415_v45  ;;  %v1381_v27 = vmul.f32 %v1317_v25, %v3716_v61 }
 0x2b0   : > { %1909 = vst [vmem:[%s3372_s15 + $0x68] sm:$0xff] %v2261_v34  ;;  %v1319_v7 = vmul.f32 %v1255_v46, %v3733_v19  ;;  %v1696_v37 = vmul.f32 %v1632_v16, %v1184_v56  ;;  %v1156_v15 = vmul.f32 0.5, %v3661_v33  ;;  %v1157_v47 = vmul.f32 0.5, %v3681_v23 }
 0x2b1   : > { %v1697_v40 = vmul.f32 %v1633_v51, %v1185_v54  ;;  %v1382_v14 = vmul.f32 %v1318_v38, %v3728_v53  ;;  %v2614_v28 = vpop.eup %2613  ;;  %2625 = vtanh.f32 %v1479_v50  ;;  %v1445_v52 = vadd.f32 %v1381_v27, %v3716_v61  ;;  %v2037_v51 = vld [vmem:[%s3372_s15 + $0x18] sm:$0xff] (%p2734_p6)  ;;  %v2039_v38 = vld [vmem:[%s3372_s15 + $0x20] sm:$0xff] (%p2734_p6)  ;;  %v2041_v50 = vld [vmem:[%s3372_s15 + $0x28] sm:$0xff] (%p2734_p6) }
 0x2b2   : > { %v1383_v59 = vmul.f32 %v1319_v7, %v3733_v19  ;;  %v1604_v31 = vadd.f32 1.0, %v2614_v28  ;;  %v1186_v18 = vmul.f32 0.5, %v3677_v63  ;;  %v1187_v6 = vmul.f32 0.5, %v3687_v36  ;;  %2038 = vst [vmem:[%s3779_s14 + $0x30] sm:$0xff] (%p2734_p6), %v2037_v51  ;;  %2040 = vst [vmem:[%s3779_s14 + $0x40] sm:$0xff] (%p2734_p6), %v2039_v38  ;;  %v2043_v27 = vld [vmem:[%s3372_s15 + $0x30] sm:$0xff] (%p2734_p6) }
 0x2b3   : > { %v2276_v20 = vpack.c.bf16 %v1697_v40, %v1696_v37  ;;  %v1446_v49 = vadd.f32 %v1382_v14, %v3728_v53  ;;  %v1509_v17 = vmul.f32 0.7978846, %v1445_v52  ;;  %v1158_v22 = vmul.f32 0.5, %v3694_v60  ;;  %2042 = vst [vmem:[%s3779_s14 + $0x50] sm:$0xff] (%p2734_p6), %v2041_v50  ;;  %v2045_v7 = vld [vmem:[%s3372_s15 + $0x38] sm:$0xff] (%p2734_p6)  ;;  %v2047_v37 = vld [vmem:[%s3372_s15 + $0x40] sm:$0xff] (%p2734_p6) }
 0x2b4   : > { %v1447_v12 = vadd.f32 %v1383_v59, %v3733_v19  ;;  %v2616_v39 = vpop.eup %2615  ;;  %v1668_v35 = vmul.f32 %v1604_v31, %v1156_v15  ;;  %v1159_v63 = vmul.f32 0.5, %v3711_v44  ;;  %v1188_v48 = vmul.f32 0.5, %v3698_v21  ;;  %2044 = vst [vmem:[%s3779_s14 + $0x60] sm:$0xff] (%p2734_p6), %v2043_v27  ;;  %2046 = vst [vmem:[%s3779_s14 + $0x70] sm:$0xff] (%p2734_p6), %v2045_v7  ;;  %v2049_v40 = vld [vmem:[%s3372_s15 + $0x48] sm:$0xff] (%p2734_p6)  ;;  %v2051_v14 = vld [vmem:[%s3372_s15 + $0x50] sm:$0xff] (%p2734_p6) }
 0x2b5   : > { %1924 = vst [vmem:[%s3372_s15 + $0xe0] sm:$0xff] %v2276_v20  ;;  %v1510_v30 = vmul.f32 0.7978846, %v1446_v49  ;;  %v2618_v9 = vpop.eup %2617  ;;  %2627 = vtanh.f32 %v1509_v17  ;;  %v1634_v10 = vadd.f32 1.0, %v2616_v39  ;;  %v1189_v16 = vmul.f32 0.5, %v3716_v61  ;;  %v2031_v61 = vld [vmem:[%s3372_s15] sm:$0xff] (%p2734_p6) }
 0x2b6   : > { %v1511_v32 = vmul.f32 0.7978846, %v1447_v12  ;;  %v1605_v8 = vadd.f32 1.0, %v2618_v9  ;;  %v1190_v60 = vmul.f32 0.5, %v3728_v53  ;;  %v1191_v45 = vmul.f32 0.5, %v3733_v19  ;;  %v2033_v53 = vld [vmem:[%s3372_s15 + $0x8] sm:$0xff] (%p2734_p6)  ;;  %2032 = vst [vmem:[%s3779_s14] sm:$0xff] (%p2734_p6), %v2031_v61 }
 0x2b7   : > { %2629 = vtanh.f32 %v1510_v30  ;;  %v1698_v33 = vmul.f32 %v1634_v10, %v1186_v18  ;;  %v2035_v19 = vld [vmem:[%s3372_s15 + $0x10] sm:$0xff] (%p2734_p6)  ;;  %2034 = vst [vmem:[%s3779_s14 + $0x10] sm:$0xff] (%p2734_p6), %v2033_v53  ;;  %2048 = vst [vmem:[%s3779_s14 + $0x80] sm:$0xff] (%p2734_p6), %v2047_v37  ;;  %v2053_v28 = vld [vmem:[%s3372_s15 + $0x58] sm:$0xff] (%p2734_p6) }
 0x2b8   : > { %v2620_v11 = vpop.eup %2619  ;;  %2631 = vtanh.f32 %v1511_v32  ;;  %v1669_v4 = vmul.f32 %v1605_v8, %v1157_v47  ;;  %2036 = vst [vmem:[%s3779_s14 + $0x20] sm:$0xff] (%p2734_p6), %v2035_v19  ;;  %2050 = vst [vmem:[%s3779_s14 + $0x90] sm:$0xff] (%p2734_p6), %v2049_v40  ;;  %v2055_v52 = vld [vmem:[%s3372_s15 + $0x60] sm:$0xff] (%p2734_p6)  ;;  %v2057_v59 = vld [vmem:[%s3372_s15 + $0x68] sm:$0xff] (%p2734_p6) }
 0x2b9   : > { %v1635_v13 = vadd.f32 1.0, %v2620_v11  ;;  %v2622_v0 = vpop.eup %2621  ;;  %2052 = vst [vmem:[%s3779_s14 + $0xa0] sm:$0xff] (%p2734_p6), %v2051_v14  ;;  %2054 = vst [vmem:[%s3779_s14 + $0xb0] sm:$0xff] (%p2734_p6), %v2053_v28  ;;  %v2063_v17 = vld [vmem:[%s3372_s15 + $0x80] sm:$0xff] (%p2734_p6)  ;;  %v2065_v12 = vld [vmem:[%s3372_s15 + $0x88] sm:$0xff] (%p2734_p6) }
 0x2ba   : > { %v2262_v57 = vpack.c.bf16 %v1669_v4, %v1668_v35  ;;  %v1606_v23 = vadd.f32 1.0, %v2622_v0  ;;  %2056 = vst [vmem:[%s3779_s14 + $0xc0] sm:$0xff] (%p2734_p6), %v2055_v52  ;;  %2058 = vst [vmem:[%s3779_s14 + $0xd0] sm:$0xff] (%p2734_p6), %v2057_v59  ;;  %v2067_v39 = vld [vmem:[%s3372_s15 + $0x90] sm:$0xff] (%p2734_p6)  ;;  %v2069_v31 = vld [vmem:[%s3372_s15 + $0x98] sm:$0xff] (%p2734_p6) }
 0x2bb   : > { %v1699_v42 = vmul.f32 %v1635_v13, %v1187_v6  ;;  %v2624_v24 = vpop.eup %2623  ;;  %2064 = vst [vmem:[%s3779_s14 + $0x100] sm:$0xff] (%p2734_p6), %v2063_v17  ;;  %2066 = vst [vmem:[%s3779_s14 + $0x110] sm:$0xff] (%p2734_p6), %v2065_v12  ;;  %v2071_v30 = vld [vmem:[%s3372_s15 + $0xa0] sm:$0xff] (%p2734_p6)  ;;  %v2073_v9 = vld [vmem:[%s3372_s15 + $0xa8] sm:$0xff] (%p2734_p6) }
 0x2bc   : > { %1910 = vst [vmem:[%s3372_s15 + $0x70] sm:$0xff] %v2262_v57  ;;  %v1670_v43 = vmul.f32 %v1606_v23, %v1158_v22  ;;  %v1636_v2 = vadd.f32 1.0, %v2624_v24  ;;  %2068 = vst [vmem:[%s3779_s14 + $0x120] sm:$0xff] (%p2734_p6), %v2067_v39  ;;  %v2075_v15 = vld [vmem:[%s3372_s15 + $0xb0] sm:$0xff] (%p2734_p6)  ;;  %v2077_v32 = vld [vmem:[%s3372_s15 + $0xb8] sm:$0xff] (%p2734_p6) }
 0x2bd   : > { %v2277_v41 = vpack.c.bf16 %v1699_v42, %v1698_v33  ;;  %2070 = vst [vmem:[%s3779_s14 + $0x130] sm:$0xff] (%p2734_p6), %v2069_v31  ;;  %2072 = vst [vmem:[%s3779_s14 + $0x140] sm:$0xff] (%p2734_p6), %v2071_v30  ;;  %v2079_v10 = vld [vmem:[%s3372_s15 + $0xc0] sm:$0xff] (%p2734_p6)  ;;  %v2081_v47 = vld [vmem:[%s3372_s15 + $0xc8] sm:$0xff] (%p2734_p6) }
 0x2be   : > { %v2626_v26 = vpop.eup %2625  ;;  %v1700_v34 = vmul.f32 %v1636_v2, %v1188_v48  ;;  %2074 = vst [vmem:[%s3779_s14 + $0x150] sm:$0xff] (%p2734_p6), %v2073_v9  ;;  %2076 = vst [vmem:[%s3779_s14 + $0x160] sm:$0xff] (%p2734_p6), %v2075_v15  ;;  %v2083_v8 = vld [vmem:[%s3372_s15 + $0xd0] sm:$0xff] (%p2734_p6)  ;;  %v2085_v11 = vld [vmem:[%s3372_s15 + $0xd8] sm:$0xff] (%p2734_p6) }
 0x2bf   : > { %1925 = vst [vmem:[%s3372_s15 + $0xe8] sm:$0xff] %v2277_v41  ;;  %v1607_v29 = vadd.f32 1.0, %v2626_v26  ;;  %2078 = vst [vmem:[%s3779_s14 + $0x170] sm:$0xff] (%p2734_p6), %v2077_v32  ;;  %v2087_v18 = vld [vmem:[%s3372_s15 + $0xe0] sm:$0xff] (%p2734_p6) }
 0x2c0   : > { %2080 = vst [vmem:[%s3779_s14 + $0x180] sm:$0xff] (%p2734_p6), %v2079_v10  ;;  %2082 = vst [vmem:[%s3779_s14 + $0x190] sm:$0xff] (%p2734_p6), %v2081_v47 }
 0x2c1   : > { %v1671_v36 = vmul.f32 %v1607_v29, %v1159_v63  ;;  %2084 = vst [vmem:[%s3779_s14 + $0x1a0] sm:$0xff] (%p2734_p6), %v2083_v8  ;;  %2086 = vst [vmem:[%s3779_s14 + $0x1b0] sm:$0xff] (%p2734_p6), %v2085_v11 }
 0x2c2   : > { %v2628_v5 = vpop.eup %2627  ;;  %2088 = vst [vmem:[%s3779_s14 + $0x1c0] sm:$0xff] (%p2734_p6), %v2087_v18 }
 0x2c3   : > { %v2263_v62 = vpack.c.bf16 %v1671_v36, %v1670_v43  ;;  %v1637_v55 = vadd.f32 1.0, %v2628_v5  ;;  %v2059_v20 = vld [vmem:[%s3372_s15 + $0x70] sm:$0xff] (%p2734_p6) }
 0x2c4   : > { %v2630_v58 = vpop.eup %2629  ;;  %2060 = vst [vmem:[%s3779_s14 + $0xe0] sm:$0xff] (%p2734_p6), %v2059_v20 }
 0x2c5   : > { %v2632_v3 = vpop.eup %2631  ;;  %v1638_v1 = vadd.f32 1.0, %v2630_v58  ;;  %1911 = vst [vmem:[%s3372_s15 + $0x78] sm:$0xff] %v2263_v62  ;;  %v1701_v44 = vmul.f32 %v1637_v55, %v1189_v16 }
 0x2c6   : > { %v1639_v25 = vadd.f32 1.0, %v2632_v3  ;;  %v2089_v35 = vld [vmem:[%s3372_s15 + $0xe8] sm:$0xff] (%p2734_p6) }
 0x2c7   : > { %v2278_v46 = vpack.c.bf16 %v1701_v44, %v1700_v34  ;;  %v1702_v56 = vmul.f32 %v1638_v1, %v1190_v60  ;;  %2090 = vst [vmem:[%s3779_s14 + $0x1d0] sm:$0xff] (%p2734_p6), %v2089_v35 }
 0x2c8   : > { %v1703_v54 = vmul.f32 %v1639_v25, %v1191_v45  ;;  %1934 = sbr.rel (!%p2734_p6) target bundleno = 725 (0x2d5), region = 78 }
 0x2c9   : > { %1926 = vst [vmem:[%s3372_s15 + $0xf0] sm:$0xff] %v2278_v46 }
 0x2ca   : > { %v2279_v21 = vpack.c.bf16 %v1703_v54, %v1702_v56 }
 0x2cc   : > { %1927 = vst [vmem:[%s3372_s15 + $0xf8] sm:$0xff] %v2279_v21  ;;  %v2061_v49 = vld [vmem:[%s3372_s15 + $0x78] sm:$0xff] (%p2734_p6) }
 0x2cd   : > { %2062 = vst [vmem:[%s3779_s14 + $0xf0] sm:$0xff] %v2061_v49 }
 0x2d0   : > { %v2091_v4 = vld [vmem:[%s3372_s15 + $0xf0] sm:$0xff] }
 0x2d1   : > { %2092 = vst [vmem:[%s3779_s14 + $0x1e0] sm:$0xff] %v2091_v4 }
 0x2d3   : > { %v2093_v6 = vld [vmem:[%s3372_s15 + $0xf8] sm:$0xff] }
 0x2d4   : > { %2094 = vst [vmem:[%s3779_s14 + $0x1f0] sm:$0xff] %v2093_v6 }
 0x2d5 PF: > { %s14_s19 = sadd.s32 1, %s2671_s19   ;;  %s3863_s15 = smov %s2659_s16 }
 0x2d6   : > { %p11_p11 = scmp.ge.s32.totalorder %s14_s19, 4   ;;  %s3864_s16 = smov %s2739_s25 }
 0x2d7   : > { %s3865_s17 = smov %s2667_s18  ;;  %s3866_s18 = smov %s3868_s20 }
 0x2d8   :  { %13 = sbr.rel (!%p11_p11) target bundleno = 3 (0x3), region = 150 }

// kernel: _lambda_.15
= control target key start
LH: loop header
LB: loop body
LE: loop exit
PB: predicated region body
PF: predicated region fallthrough
CT: control target
= control target key end

     0   :  { %s2494_s1 = inlined_call_operand.vmem [shape: bf16[512,128], index: 1, kind: input, shape index: {}]   ;;  %s2495_s0 = inlined_call_operand.vmem [shape: bf16[256,512], index: 0, kind: input, shape index: {}]   ;;  %s2496_s2 = inlined_call_operand.vmem [shape: bf16[256,128], index: 2, kind: input, shape index: {}]   ;;  %s2497_s3 = inlined_call_operand.vmem [shape: bf16[256,128], index: 3, kind: output, shape index: {}]  }
   0x1   :  { %v1962_v0 = vld [vmem:[%s2494_s1 + $0x78] sm:$0xff]   ;;  %v1966_v4 = vld [vmem:[%s2494_s1 + $0x70] sm:$0xff]   ;;  %v1970_v8 = vld [vmem:[%s2494_s1 + $0x68] sm:$0xff]  }
   0x2   :  { %v1963_v1 = vld [vmem:[%s2494_s1 + $0xf8] sm:$0xff]   ;;  %1738 = vmatprep.subr.bf16.mxu0 %v1962_v0  ;;  %v1967_v5 = vld [vmem:[%s2494_s1 + $0xf0] sm:$0xff]   ;;  %v1971_v9 = vld [vmem:[%s2494_s1 + $0xe8] sm:$0xff]  }
   0x3   :  { %v1964_v2 = vld [vmem:[%s2494_s1 + $0x38] sm:$0xff]   ;;  %1850 = vmatprep.subr.bf16.mxu1 %v1963_v1  ;;  %v1968_v6 = vld [vmem:[%s2494_s1 + $0x30] sm:$0xff]   ;;  %v1972_v10 = vld [vmem:[%s2494_s1 + $0x28] sm:$0xff]  }
   0x4   :  { %v1965_v3 = vld [vmem:[%s2494_s1 + $0xb8] sm:$0xff]   ;;  %1739 = vmatpush3.bf16.msra.mxu0 %v1964_v2  ;;  %v1969_v7 = vld [vmem:[%s2494_s1 + $0xb0] sm:$0xff]   ;;  %v1973_v11 = vld [vmem:[%s2494_s1 + $0xa8] sm:$0xff]  }
   0x5   :  { %1851 = vmatpush3.bf16.msra.mxu1 %v1965_v3  ;;  %1740 = vmatprep.subr.bf16.mxu0 %v1966_v4  ;;  %v1974_v12 = vld [vmem:[%s2494_s1 + $0x60] sm:$0xff]   ;;  %v1978_v16 = vld [vmem:[%s2494_s1 + $0x58] sm:$0xff]   ;;  %v1982_v20 = vld [vmem:[%s2494_s1 + $0x50] sm:$0xff]  }
   0x6   :  { %1852 = vmatprep.subr.bf16.mxu1 %v1967_v5  ;;  %v1975_v13 = vld [vmem:[%s2494_s1 + $0xe0] sm:$0xff]   ;;  %v1979_v17 = vld [vmem:[%s2494_s1 + $0xd8] sm:$0xff]   ;;  %v1983_v21 = vld [vmem:[%s2494_s1 + $0xd0] sm:$0xff]  }
   0x7   :  { %v1976_v14 = vld [vmem:[%s2494_s1 + $0x20] sm:$0xff]   ;;  %v1980_v18 = vld [vmem:[%s2494_s1 + $0x18] sm:$0xff]   ;;  %v1984_v22 = vld [vmem:[%s2494_s1 + $0x10] sm:$0xff]  }
   0x8   :  { %1741 = vmatpush3.bf16.msra.mxu0 %v1968_v6  ;;  %v1977_v15 = vld [vmem:[%s2494_s1 + $0xa0] sm:$0xff]   ;;  %v1981_v19 = vld [vmem:[%s2494_s1 + $0x98] sm:$0xff]   ;;  %v1985_v23 = vld [vmem:[%s2494_s1 + $0x90] sm:$0xff]  }
   0x9   :  { %1853 = vmatpush3.bf16.msra.mxu1 %v1969_v7  ;;  %1742 = vmatprep.subr.bf16.mxu0 %v1970_v8  ;;  %v1986_v24 = vld [vmem:[%s2494_s1 + $0x48] sm:$0xff]   ;;  %v1990_v28 = vld [vmem:[%s2494_s1 + $0x40] sm:$0xff]  }
   0xa   :  { %1854 = vmatprep.subr.bf16.mxu1 %v1971_v9  ;;  %v1987_v25 = vld [vmem:[%s2494_s1 + $0xc8] sm:$0xff]   ;;  %v1991_v29 = vld [vmem:[%s2494_s1 + $0xc0] sm:$0xff]  }
   0xb   :  { %v1988_v26 = vld [vmem:[%s2494_s1 + $0x8] sm:$0xff]   ;;  %v1992_v30 = vld [vmem:[%s2494_s1] sm:$0xff]  }
   0xc   :  { %1743 = vmatpush3.bf16.msra.mxu0 %v1972_v10  ;;  %v1989_v27 = vld [vmem:[%s2494_s1 + $0x88] sm:$0xff]   ;;  %v1993_v31 = vld [vmem:[%s2494_s1 + $0x80] sm:$0xff]  }
   0xd   :  { %1855 = vmatpush3.bf16.msra.mxu1 %v1973_v11  ;;  %1744 = vmatprep.subr.bf16.mxu0 %v1974_v12  ;;  %v1994_v32 = vld [vmem:[%s2495_s0] ss:$16 sps:$4 sm:$0xff]   ;;  %v1996_v33 = vld [vmem:[%s2495_s0 + $0x4] ss:$16 sps:$4 sm:$0xff]   ;;  %v1997_v34 = vld [vmem:[%s2495_s0 + $0x8] ss:$16 sps:$4 sm:$0xff]  }
   0xe   :  { %1856 = vmatprep.subr.bf16.mxu1 %v1975_v13  ;;  %v1999_v35 = vld [vmem:[%s2495_s0 + $0xc] ss:$16 sps:$4 sm:$0xff]   ;;  %755 = vmatprep.mubr.bf16.mxu0 %v1996_v33  ;;  %v2000_v36 = vld [vmem:[%s2495_s0 + $0x24] ss:$16 sps:$4 sm:$0xff]   ;;  %v2004_v38 = vld [vmem:[%s2495_s0 + $0x20] ss:$16 sps:$4 sm:$0xff]  }
   0xf   :  { %916 = vmatprep.mubr.bf16.mxu1 %v1999_v35  ;;  %v2002_v37 = vld [vmem:[%s2495_s0 + $0x2c] ss:$16 sps:$4 sm:$0xff]   ;;  %v2005_v39 = vld [vmem:[%s2495_s0 + $0x28] ss:$16 sps:$4 sm:$0xff]   ;;  %v2006_v40 = vld [vmem:[%s2495_s0 + $0x44] ss:$16 sps:$4 sm:$0xff]  }
  0x10   :  { %1745 = vmatpush3.bf16.msra.mxu0 %v1976_v14  ;;  %v2008_v41 = vld [vmem:[%s2495_s0 + $0x4c] ss:$16 sps:$4 sm:$0xff]   ;;  %v2010_v42 = vld [vmem:[%s2495_s0 + $0x40] ss:$16 sps:$4 sm:$0xff]   ;;  %v2011_v43 = vld [vmem:[%s2495_s0 + $0x48] ss:$16 sps:$4 sm:$0xff]  }
  0x11   :  { %1857 = vmatpush3.bf16.msra.mxu1 %v1977_v15  ;;  %1746 = vmatprep.subr.bf16.mxu0 %v1978_v16  ;;  %v2012_v44 = vld [vmem:[%s2495_s0 + $0x64] ss:$16 sps:$4 sm:$0xff]   ;;  %v2014_v45 = vld [vmem:[%s2495_s0 + $0x6c] ss:$16 sps:$4 sm:$0xff]   ;;  %v2016_v46 = vld [vmem:[%s2495_s0 + $0x60] ss:$16 sps:$4 sm:$0xff]  }
  0x12   :  { %1858 = vmatprep.subr.bf16.mxu1 %v1979_v17  ;;  %v2017_v47 = vld [vmem:[%s2495_s0 + $0x68] ss:$16 sps:$4 sm:$0xff]   ;;  %v2018_v48 = vld [vmem:[%s2495_s0 + $0x84] ss:$16 sps:$4 sm:$0xff]   ;;  %v2020_v49 = vld [vmem:[%s2495_s0 + $0x8c] ss:$16 sps:$4 sm:$0xff]  }
  0x13   :  { %v2022_v50 = vld [vmem:[%s2495_s0 + $0x80] ss:$16 sps:$4 sm:$0xff]   ;;  %v2023_v51 = vld [vmem:[%s2495_s0 + $0x88] ss:$16 sps:$4 sm:$0xff]   ;;  %v2024_v52 = vld [vmem:[%s2495_s0 + $0xa4] ss:$16 sps:$4 sm:$0xff]  }
  0x14   :  { %1747 = vmatpush3.bf16.msra.mxu0 %v1980_v18  ;;  %v2026_v53 = vld [vmem:[%s2495_s0 + $0xac] ss:$16 sps:$4 sm:$0xff]   ;;  %v2028_v54 = vld [vmem:[%s2495_s0 + $0xa0] ss:$16 sps:$4 sm:$0xff]   ;;  %v2029_v55 = vld [vmem:[%s2495_s0 + $0xa8] ss:$16 sps:$4 sm:$0xff]  }
  0x15   :  { %1859 = vmatpush3.bf16.msra.mxu1 %v1981_v19  ;;  %1748 = vmatprep.subr.bf16.mxu0 %v1982_v20  ;;  %v2030_v56 = vld [vmem:[%s2495_s0 + $0xc4] ss:$16 sps:$4 sm:$0xff]   ;;  %v2032_v57 = vld [vmem:[%s2495_s0 + $0xcc] ss:$16 sps:$4 sm:$0xff]   ;;  %v2034_v58 = vld [vmem:[%s2495_s0 + $0xc0] ss:$16 sps:$4 sm:$0xff]  }
  0x16   :  { %1860 = vmatprep.subr.bf16.mxu1 %v1983_v21  ;;  %v2035_v59 = vld [vmem:[%s2495_s0 + $0xc8] ss:$16 sps:$4 sm:$0xff]   ;;  %v2036_v60 = vld [vmem:[%s2495_s0 + $0xe4] ss:$16 sps:$4 sm:$0xff]   ;;  %v2038_v61 = vld [vmem:[%s2495_s0 + $0xec] ss:$16 sps:$4 sm:$0xff]  }
  0x17   :  { %v2040_v62 = vld [vmem:[%s2495_s0 + $0xe0] ss:$16 sps:$4 sm:$0xff]   ;;  %v2041_v63 = vld [vmem:[%s2495_s0 + $0xe8] ss:$16 sps:$4 sm:$0xff]   ;;  %v2042_v0 = vld [vmem:[%s2495_s0 + $0x104] ss:$16 sps:$4 sm:$0xff]  }
  0x18   :  { %1749 = vmatpush3.bf16.msra.mxu0 %v1984_v22  ;;  %v2044_v1 = vld [vmem:[%s2495_s0 + $0x10c] ss:$16 sps:$4 sm:$0xff]   ;;  %v2046_v2 = vld [vmem:[%s2495_s0 + $0x100] ss:$16 sps:$4 sm:$0xff]   ;;  %v2047_v3 = vld [vmem:[%s2495_s0 + $0x108] ss:$16 sps:$4 sm:$0xff]  }
  0x19   :  { %1861 = vmatpush3.bf16.msra.mxu1 %v1985_v23  ;;  %1750 = vmatprep.subr.bf16.mxu0 %v1986_v24  ;;  %v2048_v4 = vld [vmem:[%s2495_s0 + $0x124] ss:$16 sps:$4 sm:$0xff]   ;;  %v2050_v5 = vld [vmem:[%s2495_s0 + $0x12c] ss:$16 sps:$4 sm:$0xff]   ;;  %v2052_v6 = vld [vmem:[%s2495_s0 + $0x120] ss:$16 sps:$4 sm:$0xff]  }
  0x1a   :  { %1862 = vmatprep.subr.bf16.mxu1 %v1987_v25  ;;  %v2053_v7 = vld [vmem:[%s2495_s0 + $0x128] ss:$16 sps:$4 sm:$0xff]   ;;  %v2054_v8 = vld [vmem:[%s2495_s0 + $0x144] ss:$16 sps:$4 sm:$0xff]   ;;  %v2056_v9 = vld [vmem:[%s2495_s0 + $0x14c] ss:$16 sps:$4 sm:$0xff]  }
  0x1b   :  { %v2058_v10 = vld [vmem:[%s2495_s0 + $0x140] ss:$16 sps:$4 sm:$0xff]   ;;  %v2059_v11 = vld [vmem:[%s2495_s0 + $0x148] ss:$16 sps:$4 sm:$0xff]   ;;  %v2060_v12 = vld [vmem:[%s2495_s0 + $0x164] ss:$16 sps:$4 sm:$0xff]  }
  0x1c   :  { %1751 = vmatpush3.bf16.msra.mxu0 %v1988_v26  ;;  %v2062_v13 = vld [vmem:[%s2495_s0 + $0x16c] ss:$16 sps:$4 sm:$0xff]   ;;  %v2064_v14 = vld [vmem:[%s2495_s0 + $0x160] ss:$16 sps:$4 sm:$0xff]   ;;  %v2065_v15 = vld [vmem:[%s2495_s0 + $0x168] ss:$16 sps:$4 sm:$0xff]  }
  0x1d   :  { %1863 = vmatpush3.bf16.msra.mxu1 %v1989_v27  ;;  %1752 = vmatprep.subr.bf16.mxu0 %v1990_v28  ;;  %v2066_v16 = vld [vmem:[%s2495_s0 + $0x184] ss:$16 sps:$4 sm:$0xff]   ;;  %v2068_v17 = vld [vmem:[%s2495_s0 + $0x18c] ss:$16 sps:$4 sm:$0xff]   ;;  %v2070_v18 = vld [vmem:[%s2495_s0 + $0x180] ss:$16 sps:$4 sm:$0xff]  }
  0x1e   :  { %1864 = vmatprep.subr.bf16.mxu1 %v1991_v29  ;;  %v2071_v19 = vld [vmem:[%s2495_s0 + $0x188] ss:$16 sps:$4 sm:$0xff]   ;;  %v2072_v20 = vld [vmem:[%s2495_s0 + $0x1a4] ss:$16 sps:$4 sm:$0xff]   ;;  %v2074_v21 = vld [vmem:[%s2495_s0 + $0x1ac] ss:$16 sps:$4 sm:$0xff]  }
  0x1f   :  { %v2076_v22 = vld [vmem:[%s2495_s0 + $0x1a0] ss:$16 sps:$4 sm:$0xff]   ;;  %v2077_v23 = vld [vmem:[%s2495_s0 + $0x1a8] ss:$16 sps:$4 sm:$0xff]   ;;  %v2078_v24 = vld [vmem:[%s2495_s0 + $0x1c4] ss:$16 sps:$4 sm:$0xff]  }
  0x20   :  { %1753 = vmatpush3.bf16.msra.mxu0 %v1992_v30  ;;  %v2080_v25 = vld [vmem:[%s2495_s0 + $0x1cc] ss:$16 sps:$4 sm:$0xff]   ;;  %v2082_v26 = vld [vmem:[%s2495_s0 + $0x1c0] ss:$16 sps:$4 sm:$0xff]   ;;  %v2083_v27 = vld [vmem:[%s2495_s0 + $0x1c8] ss:$16 sps:$4 sm:$0xff]  }
  0x21   :  { %1865 = vmatpush3.bf16.msra.mxu1 %v1993_v31  ;;  %v2084_v28 = vld [vmem:[%s2495_s0 + $0x1e4] ss:$16 sps:$4 sm:$0xff]   ;;  %v2086_v29 = vld [vmem:[%s2495_s0 + $0x1ec] ss:$16 sps:$4 sm:$0xff]   ;;  %v2088_v30 = vld [vmem:[%s2495_s0 + $0x1e0] ss:$16 sps:$4 sm:$0xff]  }
  0x22   :  { %v2089_v31 = vld [vmem:[%s2495_s0 + $0x1e8] ss:$16 sps:$4 sm:$0xff]  }
  0x23   :  { %756 = vmatmul.mubr.bf16.vlgmr.msra.gmra.mxu0 %v1994_v32 }
  0x24   :  { %917 = vmatmul.mubr.bf16.vlgmr.msra.gmra.mxu1 %v1997_v34  ;;  %763 = vmatprep.mubr.bf16.mxu0 %v2000_v36 }
  0x25   :  { %924 = vmatprep.mubr.bf16.mxu1 %v2002_v37 }
  0x2b   :  { %764 = vmatmul.mubr.bf16.gmra.mxu0 %v2004_v38 }
  0x2c   :  { %925 = vmatmul.mubr.bf16.gmra.mxu1 %v2005_v39  ;;  %771 = vmatprep.mubr.bf16.mxu0 %v2006_v40  ;;  %v1565_v39 = vld [vmem:[%s2496_s2] sm:$0xff]  }
  0x2d   :  { %932 = vmatprep.mubr.bf16.mxu1 %v2008_v41 }
  0x33   :  { %772 = vmatmul.mubr.bf16.gmra.mxu0 %v2010_v42 }
  0x34   :  { %933 = vmatmul.mubr.bf16.gmra.mxu1 %v2011_v43  ;;  %779 = vmatprep.mubr.bf16.mxu0 %v2012_v44 }
  0x35   :  { %940 = vmatprep.mubr.bf16.mxu1 %v2014_v45  ;;  %v1566_v45 = vunpack.c.l.bf16 %v1565_v39 }
  0x3b   :  { %780 = vmatmul.mubr.bf16.gmra.mxu0 %v2016_v46 }
  0x3c   :  { %941 = vmatmul.mubr.bf16.gmra.mxu1 %v2017_v47  ;;  %787 = vmatprep.mubr.bf16.mxu0 %v2018_v48  ;;  %v1567_v47 = vunpack.c.h.bf16 %v1565_v39 }
  0x3d   :  { %948 = vmatprep.mubr.bf16.mxu1 %v2020_v49 }
  0x43   :  { %788 = vmatmul.mubr.bf16.gmra.mxu0 %v2022_v50 }
  0x44   :  { %949 = vmatmul.mubr.bf16.gmra.mxu1 %v2023_v51  ;;  %795 = vmatprep.mubr.bf16.mxu0 %v2024_v52 }
  0x45   :  { %956 = vmatprep.mubr.bf16.mxu1 %v2026_v53 }
  0x4b   :  { %796 = vmatmul.mubr.bf16.gmra.mxu0 %v2028_v54 }
  0x4c   :  { %957 = vmatmul.mubr.bf16.gmra.mxu1 %v2029_v55  ;;  %803 = vmatprep.mubr.bf16.mxu0 %v2030_v56 }
  0x4d   :  { %964 = vmatprep.mubr.bf16.mxu1 %v2032_v57 }
  0x53   :  { %804 = vmatmul.mubr.bf16.gmra.mxu0 %v2034_v58  ;;  %v1708_v58 = vld [vmem:[%s2496_s2 + $0x8] sm:$0xff]  }
  0x54   :  { %965 = vmatmul.mubr.bf16.gmra.mxu1 %v2035_v59  ;;  %811 = vmatprep.mubr.bf16.mxu0 %v2036_v60 }
  0x55   :  { %972 = vmatprep.mubr.bf16.mxu1 %v2038_v61 }
  0x5b   :  { %812 = vmatmul.mubr.bf16.gmra.mxu0 %v2040_v62 }
  0x5c   :  { %973 = vmatmul.mubr.bf16.gmra.mxu1 %v2041_v63  ;;  %819 = vmatprep.mubr.bf16.mxu0 %v2042_v0 }
  0x5d   :  { %980 = vmatprep.mubr.bf16.mxu1 %v2044_v1  ;;  %v1570_v1 = vunpack.c.l.bf16 %v1708_v58 }
  0x63   :  { %820 = vmatmul.mubr.bf16.gmra.mxu0 %v2046_v2 }
  0x64   :  { %981 = vmatmul.mubr.bf16.gmra.mxu1 %v2047_v3  ;;  %827 = vmatprep.mubr.bf16.mxu0 %v2048_v4  ;;  %v1571_v3 = vunpack.c.h.bf16 %v1708_v58 }
  0x65   :  { %988 = vmatprep.mubr.bf16.mxu1 %v2050_v5 }
  0x6b   :  { %828 = vmatmul.mubr.bf16.gmra.mxu0 %v2052_v6 }
  0x6c   :  { %989 = vmatmul.mubr.bf16.gmra.mxu1 %v2053_v7  ;;  %835 = vmatprep.mubr.bf16.mxu0 %v2054_v8 }
  0x6d   :  { %996 = vmatprep.mubr.bf16.mxu1 %v2056_v9 }
  0x73   :  { %836 = vmatmul.mubr.bf16.gmra.mxu0 %v2058_v10 }
  0x74   :  { %997 = vmatmul.mubr.bf16.gmra.mxu1 %v2059_v11  ;;  %843 = vmatprep.mubr.bf16.mxu0 %v2060_v12 }
  0x75   :  { %1004 = vmatprep.mubr.bf16.mxu1 %v2062_v13 }
  0x7b   :  { %844 = vmatmul.mubr.bf16.gmra.mxu0 %v2064_v14  ;;  %v1709_v14 = vld [vmem:[%s2496_s2 + $0x10] sm:$0xff]  }
  0x7c   :  { %1005 = vmatmul.mubr.bf16.gmra.mxu1 %v2065_v15  ;;  %851 = vmatprep.mubr.bf16.mxu0 %v2066_v16 }
  0x7d   :  { %1012 = vmatprep.mubr.bf16.mxu1 %v2068_v17 }
  0x83   :  { %852 = vmatmul.mubr.bf16.gmra.mxu0 %v2070_v18 }
  0x84   :  { %1013 = vmatmul.mubr.bf16.gmra.mxu1 %v2071_v19  ;;  %859 = vmatprep.mubr.bf16.mxu0 %v2072_v20 }
  0x85   :  { %1020 = vmatprep.mubr.bf16.mxu1 %v2074_v21  ;;  %v1574_v21 = vunpack.c.l.bf16 %v1709_v14 }
  0x8b   :  { %860 = vmatmul.mubr.bf16.gmra.mxu0 %v2076_v22 }
  0x8c   :  { %1021 = vmatmul.mubr.bf16.gmra.mxu1 %v2077_v23  ;;  %867 = vmatprep.mubr.bf16.mxu0 %v2078_v24  ;;  %v1575_v23 = vunpack.c.h.bf16 %v1709_v14 }
  0x8d   :  { %1028 = vmatprep.mubr.bf16.mxu1 %v2080_v25 }
  0x93   :  { %868 = vmatmul.mubr.bf16.gmra.mxu0 %v2082_v26 }
  0x94   :  { %1029 = vmatmul.mubr.bf16.gmra.mxu1 %v2083_v27  ;;  %875 = vmatprep.mubr.bf16.mxu0 %v2084_v28 }
  0x95   :  { %1036 = vmatprep.mubr.bf16.mxu1 %v2086_v29 }
  0x9b   :  { %876 = vmatmul.mubr.bf16.gmra.mxu0 %v2088_v30 }
  0x9c   :  { %1037 = vmatmul.mubr.bf16.gmra.mxu1 %v2089_v31 }
  0xe3   :  { %v1754_v32 = vpop.f32.mrf.mxu0 }
  0xe4   :  { %v1866_v33 = vpop.f32.mrf.mxu1 }
  0xe5   :  { %v1755_v34 = vpop.f32.mrf.mxu0 }
  0xe6   :  { %v1867_v35 = vpop.f32.mrf.mxu1  ;;  %v1756_v36 = vadd.f32 %v1755_v34, %v1754_v32  ;;  %v1710_v34 = vld [vmem:[%s2496_s2 + $0x18] sm:$0xff]  }
  0xe7   :  { %v1868_v37 = vadd.f32 %v1867_v35, %v1866_v33  ;;  %v1757_v38 = vpop.f32.mrf.mxu0 }
  0xe8   :  { %v1869_v40 = vpop.f32.mrf.mxu1 }
  0xe9   :  { %v1758_v41 = vpop.f32.mrf.mxu0  ;;  %v919_v44 = vadd.f32 %v1868_v37, %v1756_v36 }
  0xea   :  { %v1759_v42 = vadd.f32 %v1758_v41, %v1757_v38  ;;  %v1870_v43 = vpop.f32.mrf.mxu1  ;;  %v1578_v41 = vunpack.c.l.bf16 %v1710_v34 }
  0xeb   :  { %v1871_v46 = vadd.f32 %v1870_v43, %v1869_v40  ;;  %v1760_v48 = vpop.f32.mrf.mxu0  ;;  %v1208_v53 = vadd.f32 %v1566_v45, %v919_v44  ;;  %v1579_v43 = vunpack.c.h.bf16 %v1710_v34 }
  0xec   :  { %v1872_v49 = vpop.f32.mrf.mxu1 }
  0xed   :  { %v922_v50 = vadd.f32 %v1871_v46, %v1759_v42  ;;  %v1761_v51 = vpop.f32.mrf.mxu0 }
  0xee   :  { %v1873_v52 = vpop.f32.mrf.mxu1  ;;  %v1762_v55 = vadd.f32 %v1761_v51, %v1760_v48 }
  0xef   :  { %v1209_v54 = vadd.f32 %v1567_v47, %v922_v50  ;;  %v1874_v56 = vadd.f32 %v1873_v52, %v1872_v49  ;;  %v1763_v57 = vpop.f32.mrf.mxu0 }
  0xf0   :  { %v1875_v59 = vpop.f32.mrf.mxu1 }
  0xf1   :  { %v1631_v60 = vpack.c.bf16 %v1209_v54, %v1208_v53  ;;  %v1764_v61 = vpop.f32.mrf.mxu0  ;;  %v927_v0 = vadd.f32 %v1874_v56, %v1762_v55  ;;  %v1711_v54 = vld [vmem:[%s2496_s2 + $0x20] sm:$0xff]  }
  0xf2   :  { %v1765_v62 = vadd.f32 %v1764_v61, %v1763_v57  ;;  %v1876_v63 = vpop.f32.mrf.mxu1  ;;  %v1582_v61 = vunpack.c.l.bf16 %v1711_v54 }
  0xf3   :  { %1632 = vst [vmem:[%s2497_s3] sm:$0xff] %v1631_v60   ;;  %v1877_v2 = vadd.f32 %v1876_v63, %v1875_v59  ;;  %v1766_v4 = vpop.f32.mrf.mxu0  ;;  %v1210_v9 = vadd.f32 %v1570_v1, %v927_v0  ;;  %v1583_v63 = vunpack.c.h.bf16 %v1711_v54 }
  0xf4   :  { %v1878_v5 = vpop.f32.mrf.mxu1 }
  0xf5   :  { %v930_v6 = vadd.f32 %v1877_v2, %v1765_v62  ;;  %v1767_v7 = vpop.f32.mrf.mxu0 }
  0xf6   :  { %v1879_v8 = vpop.f32.mrf.mxu1  ;;  %v1768_v11 = vadd.f32 %v1767_v7, %v1766_v4 }
  0xf7   :  { %v1211_v10 = vadd.f32 %v1571_v3, %v930_v6  ;;  %v1880_v12 = vadd.f32 %v1879_v8, %v1878_v5  ;;  %v1769_v13 = vpop.f32.mrf.mxu0 }
  0xf8   :  { %v1881_v15 = vpop.f32.mrf.mxu1 }
  0xf9   :  { %v1636_v16 = vpack.c.bf16 %v1211_v10, %v1210_v9  ;;  %v1770_v17 = vpop.f32.mrf.mxu0  ;;  %v935_v20 = vadd.f32 %v1880_v12, %v1768_v11  ;;  %v1712_v10 = vld [vmem:[%s2496_s2 + $0x28] sm:$0xff]  }
  0xfa   :  { %v1771_v18 = vadd.f32 %v1770_v17, %v1769_v13  ;;  %v1882_v19 = vpop.f32.mrf.mxu1  ;;  %v1586_v17 = vunpack.c.l.bf16 %v1712_v10 }
  0xfb   :  { %1723 = vst [vmem:[%s2497_s3 + $0x8] sm:$0xff] %v1636_v16   ;;  %v1883_v22 = vadd.f32 %v1882_v19, %v1881_v15  ;;  %v1772_v24 = vpop.f32.mrf.mxu0  ;;  %v1212_v29 = vadd.f32 %v1574_v21, %v935_v20  ;;  %v1587_v19 = vunpack.c.h.bf16 %v1712_v10 }
  0xfc   :  { %v1884_v25 = vpop.f32.mrf.mxu1 }
  0xfd   :  { %v938_v26 = vadd.f32 %v1883_v22, %v1771_v18  ;;  %v1773_v27 = vpop.f32.mrf.mxu0 }
  0xfe   :  { %v1885_v28 = vpop.f32.mrf.mxu1  ;;  %v1774_v31 = vadd.f32 %v1773_v27, %v1772_v24 }
  0xff   :  { %v1213_v30 = vadd.f32 %v1575_v23, %v938_v26  ;;  %v1886_v32 = vadd.f32 %v1885_v28, %v1884_v25  ;;  %v1775_v33 = vpop.f32.mrf.mxu0 }
 0x100   :  { %v1887_v35 = vpop.f32.mrf.mxu1 }
 0x101   :  { %v1641_v36 = vpack.c.bf16 %v1213_v30, %v1212_v29  ;;  %v1776_v37 = vpop.f32.mrf.mxu0  ;;  %v943_v40 = vadd.f32 %v1886_v32, %v1774_v31  ;;  %v1713_v30 = vld [vmem:[%s2496_s2 + $0x30] sm:$0xff]  }
 0x102   :  { %v1777_v38 = vadd.f32 %v1776_v37, %v1775_v33  ;;  %v1888_v39 = vpop.f32.mrf.mxu1  ;;  %v1590_v37 = vunpack.c.l.bf16 %v1713_v30 }
 0x103   :  { %1724 = vst [vmem:[%s2497_s3 + $0x10] sm:$0xff] %v1641_v36   ;;  %v1889_v42 = vadd.f32 %v1888_v39, %v1887_v35  ;;  %v1778_v44 = vpop.f32.mrf.mxu0  ;;  %v1214_v49 = vadd.f32 %v1578_v41, %v943_v40  ;;  %v1591_v39 = vunpack.c.h.bf16 %v1713_v30 }
 0x104   :  { %v1890_v45 = vpop.f32.mrf.mxu1 }
 0x105   :  { %v946_v46 = vadd.f32 %v1889_v42, %v1777_v38  ;;  %v1779_v47 = vpop.f32.mrf.mxu0 }
 0x106   :  { %v1891_v48 = vpop.f32.mrf.mxu1  ;;  %v1780_v51 = vadd.f32 %v1779_v47, %v1778_v44 }
 0x107   :  { %v1215_v50 = vadd.f32 %v1579_v43, %v946_v46  ;;  %v1892_v52 = vadd.f32 %v1891_v48, %v1890_v45  ;;  %v1781_v53 = vpop.f32.mrf.mxu0 }
 0x108   :  { %v1893_v55 = vpop.f32.mrf.mxu1 }
 0x109   :  { %v1646_v56 = vpack.c.bf16 %v1215_v50, %v1214_v49  ;;  %v1782_v57 = vpop.f32.mrf.mxu0  ;;  %v951_v60 = vadd.f32 %v1892_v52, %v1780_v51  ;;  %v1714_v50 = vld [vmem:[%s2496_s2 + $0x38] sm:$0xff]  }
 0x10a   :  { %v1783_v58 = vadd.f32 %v1782_v57, %v1781_v53  ;;  %v1894_v59 = vpop.f32.mrf.mxu1  ;;  %v1594_v57 = vunpack.c.l.bf16 %v1714_v50 }
 0x10b   :  { %1725 = vst [vmem:[%s2497_s3 + $0x18] sm:$0xff] %v1646_v56   ;;  %v1895_v62 = vadd.f32 %v1894_v59, %v1893_v55  ;;  %v1784_v0 = vpop.f32.mrf.mxu0  ;;  %v1216_v5 = vadd.f32 %v1582_v61, %v951_v60  ;;  %v1595_v59 = vunpack.c.h.bf16 %v1714_v50 }
 0x10c   :  { %v1896_v1 = vpop.f32.mrf.mxu1 }
 0x10d   :  { %v954_v2 = vadd.f32 %v1895_v62, %v1783_v58  ;;  %v1785_v3 = vpop.f32.mrf.mxu0 }
 0x10e   :  { %v1897_v4 = vpop.f32.mrf.mxu1  ;;  %v1786_v7 = vadd.f32 %v1785_v3, %v1784_v0 }
 0x10f   :  { %v1217_v6 = vadd.f32 %v1583_v63, %v954_v2  ;;  %v1898_v8 = vadd.f32 %v1897_v4, %v1896_v1  ;;  %v1787_v9 = vpop.f32.mrf.mxu0 }
 0x110   :  { %v1899_v11 = vpop.f32.mrf.mxu1 }
 0x111   :  { %v1651_v12 = vpack.c.bf16 %v1217_v6, %v1216_v5  ;;  %v1788_v13 = vpop.f32.mrf.mxu0  ;;  %v959_v16 = vadd.f32 %v1898_v8, %v1786_v7  ;;  %v1715_v6 = vld [vmem:[%s2496_s2 + $0x40] sm:$0xff]  }
 0x112   :  { %v1789_v14 = vadd.f32 %v1788_v13, %v1787_v9  ;;  %v1900_v15 = vpop.f32.mrf.mxu1  ;;  %v1598_v13 = vunpack.c.l.bf16 %v1715_v6 }
 0x113   :  { %1726 = vst [vmem:[%s2497_s3 + $0x20] sm:$0xff] %v1651_v12   ;;  %v1901_v18 = vadd.f32 %v1900_v15, %v1899_v11  ;;  %v1790_v20 = vpop.f32.mrf.mxu0  ;;  %v1218_v25 = vadd.f32 %v1586_v17, %v959_v16  ;;  %v1599_v15 = vunpack.c.h.bf16 %v1715_v6 }
 0x114   :  { %v1902_v21 = vpop.f32.mrf.mxu1 }
 0x115   :  { %v962_v22 = vadd.f32 %v1901_v18, %v1789_v14  ;;  %v1791_v23 = vpop.f32.mrf.mxu0 }
 0x116   :  { %v1903_v24 = vpop.f32.mrf.mxu1  ;;  %v1792_v27 = vadd.f32 %v1791_v23, %v1790_v20 }
 0x117   :  { %v1219_v26 = vadd.f32 %v1587_v19, %v962_v22  ;;  %v1904_v28 = vadd.f32 %v1903_v24, %v1902_v21  ;;  %v1793_v29 = vpop.f32.mrf.mxu0 }
 0x118   :  { %v1905_v31 = vpop.f32.mrf.mxu1 }
 0x119   :  { %v1656_v32 = vpack.c.bf16 %v1219_v26, %v1218_v25  ;;  %v1794_v33 = vpop.f32.mrf.mxu0  ;;  %v967_v36 = vadd.f32 %v1904_v28, %v1792_v27  ;;  %v1716_v26 = vld [vmem:[%s2496_s2 + $0x48] sm:$0xff]  }
 0x11a   :  { %v1795_v34 = vadd.f32 %v1794_v33, %v1793_v29  ;;  %v1906_v35 = vpop.f32.mrf.mxu1  ;;  %v1602_v33 = vunpack.c.l.bf16 %v1716_v26 }
 0x11b   :  { %1727 = vst [vmem:[%s2497_s3 + $0x28] sm:$0xff] %v1656_v32   ;;  %v1907_v38 = vadd.f32 %v1906_v35, %v1905_v31  ;;  %v1796_v40 = vpop.f32.mrf.mxu0  ;;  %v1220_v45 = vadd.f32 %v1590_v37, %v967_v36  ;;  %v1603_v35 = vunpack.c.h.bf16 %v1716_v26 }
 0x11c   :  { %v1908_v41 = vpop.f32.mrf.mxu1 }
 0x11d   :  { %v970_v42 = vadd.f32 %v1907_v38, %v1795_v34  ;;  %v1797_v43 = vpop.f32.mrf.mxu0 }
 0x11e   :  { %v1909_v44 = vpop.f32.mrf.mxu1  ;;  %v1798_v47 = vadd.f32 %v1797_v43, %v1796_v40 }
 0x11f   :  { %v1221_v46 = vadd.f32 %v1591_v39, %v970_v42  ;;  %v1910_v48 = vadd.f32 %v1909_v44, %v1908_v41  ;;  %v1799_v49 = vpop.f32.mrf.mxu0 }
 0x120   :  { %v1911_v51 = vpop.f32.mrf.mxu1 }
 0x121   :  { %v1661_v52 = vpack.c.bf16 %v1221_v46, %v1220_v45  ;;  %v1800_v53 = vpop.f32.mrf.mxu0  ;;  %v975_v56 = vadd.f32 %v1910_v48, %v1798_v47  ;;  %v1717_v46 = vld [vmem:[%s2496_s2 + $0x50] sm:$0xff]  }
 0x122   :  { %v1801_v54 = vadd.f32 %v1800_v53, %v1799_v49  ;;  %v1912_v55 = vpop.f32.mrf.mxu1  ;;  %v1606_v53 = vunpack.c.l.bf16 %v1717_v46 }
 0x123   :  { %1728 = vst [vmem:[%s2497_s3 + $0x30] sm:$0xff] %v1661_v52   ;;  %v1913_v58 = vadd.f32 %v1912_v55, %v1911_v51  ;;  %v1802_v60 = vpop.f32.mrf.mxu0  ;;  %v1222_v1 = vadd.f32 %v1594_v57, %v975_v56  ;;  %v1607_v55 = vunpack.c.h.bf16 %v1717_v46 }
 0x124   :  { %v1914_v61 = vpop.f32.mrf.mxu1 }
 0x125   :  { %v978_v62 = vadd.f32 %v1913_v58, %v1801_v54  ;;  %v1803_v63 = vpop.f32.mrf.mxu0 }
 0x126   :  { %v1915_v0 = vpop.f32.mrf.mxu1  ;;  %v1804_v3 = vadd.f32 %v1803_v63, %v1802_v60 }
 0x127   :  { %v1223_v2 = vadd.f32 %v1595_v59, %v978_v62  ;;  %v1916_v4 = vadd.f32 %v1915_v0, %v1914_v61  ;;  %v1805_v5 = vpop.f32.mrf.mxu0 }
 0x128   :  { %v1917_v7 = vpop.f32.mrf.mxu1 }
 0x129   :  { %v1666_v8 = vpack.c.bf16 %v1223_v2, %v1222_v1  ;;  %v1806_v9 = vpop.f32.mrf.mxu0  ;;  %v983_v12 = vadd.f32 %v1916_v4, %v1804_v3  ;;  %v1718_v2 = vld [vmem:[%s2496_s2 + $0x58] sm:$0xff]  }
 0x12a   :  { %v1807_v10 = vadd.f32 %v1806_v9, %v1805_v5  ;;  %v1918_v11 = vpop.f32.mrf.mxu1  ;;  %v1610_v9 = vunpack.c.l.bf16 %v1718_v2 }
 0x12b   :  { %1729 = vst [vmem:[%s2497_s3 + $0x38] sm:$0xff] %v1666_v8   ;;  %v1919_v14 = vadd.f32 %v1918_v11, %v1917_v7  ;;  %v1808_v16 = vpop.f32.mrf.mxu0  ;;  %v1224_v21 = vadd.f32 %v1598_v13, %v983_v12  ;;  %v1611_v11 = vunpack.c.h.bf16 %v1718_v2 }
 0x12c   :  { %v1920_v17 = vpop.f32.mrf.mxu1 }
 0x12d   :  { %v986_v18 = vadd.f32 %v1919_v14, %v1807_v10  ;;  %v1809_v19 = vpop.f32.mrf.mxu0 }
 0x12e   :  { %v1921_v20 = vpop.f32.mrf.mxu1  ;;  %v1810_v23 = vadd.f32 %v1809_v19, %v1808_v16 }
 0x12f   :  { %v1225_v22 = vadd.f32 %v1599_v15, %v986_v18  ;;  %v1922_v24 = vadd.f32 %v1921_v20, %v1920_v17  ;;  %v1811_v25 = vpop.f32.mrf.mxu0 }
 0x130   :  { %v1923_v27 = vpop.f32.mrf.mxu1 }
 0x131   :  { %v1671_v28 = vpack.c.bf16 %v1225_v22, %v1224_v21  ;;  %v1812_v29 = vpop.f32.mrf.mxu0  ;;  %v991_v32 = vadd.f32 %v1922_v24, %v1810_v23  ;;  %v1719_v22 = vld [vmem:[%s2496_s2 + $0x60] sm:$0xff]  }
 0x132   :  { %v1813_v30 = vadd.f32 %v1812_v29, %v1811_v25  ;;  %v1924_v31 = vpop.f32.mrf.mxu1  ;;  %v1614_v29 = vunpack.c.l.bf16 %v1719_v22 }
 0x133   :  { %1730 = vst [vmem:[%s2497_s3 + $0x40] sm:$0xff] %v1671_v28   ;;  %v1925_v34 = vadd.f32 %v1924_v31, %v1923_v27  ;;  %v1814_v36 = vpop.f32.mrf.mxu0  ;;  %v1226_v41 = vadd.f32 %v1602_v33, %v991_v32  ;;  %v1615_v31 = vunpack.c.h.bf16 %v1719_v22 }
 0x134   :  { %v1926_v37 = vpop.f32.mrf.mxu1 }
 0x135   :  { %v994_v38 = vadd.f32 %v1925_v34, %v1813_v30  ;;  %v1815_v39 = vpop.f32.mrf.mxu0 }
 0x136   :  { %v1927_v40 = vpop.f32.mrf.mxu1  ;;  %v1816_v43 = vadd.f32 %v1815_v39, %v1814_v36 }
 0x137   :  { %v1227_v42 = vadd.f32 %v1603_v35, %v994_v38  ;;  %v1928_v44 = vadd.f32 %v1927_v40, %v1926_v37  ;;  %v1817_v45 = vpop.f32.mrf.mxu0 }
 0x138   :  { %v1929_v47 = vpop.f32.mrf.mxu1 }
 0x139   :  { %v1676_v48 = vpack.c.bf16 %v1227_v42, %v1226_v41  ;;  %v1818_v49 = vpop.f32.mrf.mxu0  ;;  %v999_v52 = vadd.f32 %v1928_v44, %v1816_v43  ;;  %v1720_v42 = vld [vmem:[%s2496_s2 + $0x68] sm:$0xff]  }
 0x13a   :  { %v1819_v50 = vadd.f32 %v1818_v49, %v1817_v45  ;;  %v1930_v51 = vpop.f32.mrf.mxu1  ;;  %v1618_v49 = vunpack.c.l.bf16 %v1720_v42 }
 0x13b   :  { %1731 = vst [vmem:[%s2497_s3 + $0x48] sm:$0xff] %v1676_v48   ;;  %v1931_v54 = vadd.f32 %v1930_v51, %v1929_v47  ;;  %v1820_v56 = vpop.f32.mrf.mxu0  ;;  %v1228_v61 = vadd.f32 %v1606_v53, %v999_v52  ;;  %v1619_v51 = vunpack.c.h.bf16 %v1720_v42 }
 0x13c   :  { %v1932_v57 = vpop.f32.mrf.mxu1 }
 0x13d   :  { %v1002_v58 = vadd.f32 %v1931_v54, %v1819_v50  ;;  %v1821_v59 = vpop.f32.mrf.mxu0 }
 0x13e   :  { %v1933_v60 = vpop.f32.mrf.mxu1  ;;  %v1822_v63 = vadd.f32 %v1821_v59, %v1820_v56 }
 0x13f   :  { %v1229_v62 = vadd.f32 %v1607_v55, %v1002_v58  ;;  %v1934_v0 = vadd.f32 %v1933_v60, %v1932_v57  ;;  %v1823_v1 = vpop.f32.mrf.mxu0 }
 0x140   :  { %v1935_v3 = vpop.f32.mrf.mxu1 }
 0x141   :  { %v1681_v4 = vpack.c.bf16 %v1229_v62, %v1228_v61  ;;  %v1824_v5 = vpop.f32.mrf.mxu0  ;;  %v1007_v8 = vadd.f32 %v1934_v0, %v1822_v63  ;;  %v1721_v62 = vld [vmem:[%s2496_s2 + $0x70] sm:$0xff]  }
 0x142   :  { %v1825_v6 = vadd.f32 %v1824_v5, %v1823_v1  ;;  %v1936_v7 = vpop.f32.mrf.mxu1  ;;  %v1622_v5 = vunpack.c.l.bf16 %v1721_v62 }
 0x143   :  { %1732 = vst [vmem:[%s2497_s3 + $0x50] sm:$0xff] %v1681_v4   ;;  %v1937_v10 = vadd.f32 %v1936_v7, %v1935_v3  ;;  %v1826_v12 = vpop.f32.mrf.mxu0  ;;  %v1230_v17 = vadd.f32 %v1610_v9, %v1007_v8  ;;  %v1623_v7 = vunpack.c.h.bf16 %v1721_v62 }
 0x144   :  { %v1938_v13 = vpop.f32.mrf.mxu1 }
 0x145   :  { %v1010_v14 = vadd.f32 %v1937_v10, %v1825_v6  ;;  %v1827_v15 = vpop.f32.mrf.mxu0 }
 0x146   :  { %v1939_v16 = vpop.f32.mrf.mxu1  ;;  %v1828_v19 = vadd.f32 %v1827_v15, %v1826_v12 }
 0x147   :  { %v1231_v18 = vadd.f32 %v1611_v11, %v1010_v14  ;;  %v1940_v20 = vadd.f32 %v1939_v16, %v1938_v13  ;;  %v1829_v21 = vpop.f32.mrf.mxu0 }
 0x148   :  { %v1941_v23 = vpop.f32.mrf.mxu1 }
 0x149   :  { %v1686_v24 = vpack.c.bf16 %v1231_v18, %v1230_v17  ;;  %v1830_v25 = vpop.f32.mrf.mxu0  ;;  %v1015_v28 = vadd.f32 %v1940_v20, %v1828_v19  ;;  %v1722_v18 = vld [vmem:[%s2496_s2 + $0x78] sm:$0xff]  }
 0x14a   :  { %v1831_v26 = vadd.f32 %v1830_v25, %v1829_v21  ;;  %v1942_v27 = vpop.f32.mrf.mxu1  ;;  %v1626_v25 = vunpack.c.l.bf16 %v1722_v18 }
 0x14b   :  { %1733 = vst [vmem:[%s2497_s3 + $0x58] sm:$0xff] %v1686_v24   ;;  %v1943_v30 = vadd.f32 %v1942_v27, %v1941_v23  ;;  %v1832_v32 = vpop.f32.mrf.mxu0  ;;  %v1232_v37 = vadd.f32 %v1614_v29, %v1015_v28  ;;  %v1627_v27 = vunpack.c.h.bf16 %v1722_v18 }
 0x14c   :  { %v1944_v33 = vpop.f32.mrf.mxu1 }
 0x14d   :  { %v1018_v34 = vadd.f32 %v1943_v30, %v1831_v26  ;;  %v1833_v35 = vpop.f32.mrf.mxu0 }
 0x14e   :  { %v1945_v36 = vpop.f32.mrf.mxu1  ;;  %v1834_v39 = vadd.f32 %v1833_v35, %v1832_v32 }
 0x14f   :  { %v1233_v38 = vadd.f32 %v1615_v31, %v1018_v34  ;;  %v1946_v40 = vadd.f32 %v1945_v36, %v1944_v33  ;;  %v1835_v41 = vpop.f32.mrf.mxu0 }
 0x150   :  { %v1947_v43 = vpop.f32.mrf.mxu1 }
 0x151   :  { %v1691_v44 = vpack.c.bf16 %v1233_v38, %v1232_v37  ;;  %v1836_v45 = vpop.f32.mrf.mxu0  ;;  %v1023_v48 = vadd.f32 %v1946_v40, %v1834_v39 }
 0x152   :  { %v1837_v46 = vadd.f32 %v1836_v45, %v1835_v41  ;;  %v1948_v47 = vpop.f32.mrf.mxu1 }
 0x153   :  { %1734 = vst [vmem:[%s2497_s3 + $0x60] sm:$0xff] %v1691_v44   ;;  %v1949_v50 = vadd.f32 %v1948_v47, %v1947_v43  ;;  %v1838_v52 = vpop.f32.mrf.mxu0  ;;  %v1234_v57 = vadd.f32 %v1618_v49, %v1023_v48 }
 0x154   :  { %v1950_v53 = vpop.f32.mrf.mxu1 }
 0x155   :  { %v1026_v54 = vadd.f32 %v1949_v50, %v1837_v46  ;;  %v1839_v55 = vpop.f32.mrf.mxu0 }
 0x156   :  { %v1951_v56 = vpop.f32.mrf.mxu1  ;;  %v1840_v59 = vadd.f32 %v1839_v55, %v1838_v52 }
 0x157   :  { %v1235_v58 = vadd.f32 %v1619_v51, %v1026_v54  ;;  %v1952_v60 = vadd.f32 %v1951_v56, %v1950_v53  ;;  %v1841_v61 = vpop.f32.mrf.mxu0 }
 0x158   :  { %v1953_v63 = vpop.f32.mrf.mxu1 }
 0x159   :  { %v1696_v0 = vpack.c.bf16 %v1235_v58, %v1234_v57  ;;  %v1842_v1 = vpop.f32.mrf.mxu0  ;;  %v1031_v4 = vadd.f32 %v1952_v60, %v1840_v59 }
 0x15a   :  { %v1843_v2 = vadd.f32 %v1842_v1, %v1841_v61  ;;  %v1954_v3 = vpop.f32.mrf.mxu1 }
 0x15b   :  { %1735 = vst [vmem:[%s2497_s3 + $0x68] sm:$0xff] %v1696_v0   ;;  %v1955_v6 = vadd.f32 %v1954_v3, %v1953_v63  ;;  %v1844_v8 = vpop.f32.mrf.mxu0  ;;  %v1236_v13 = vadd.f32 %v1622_v5, %v1031_v4 }
 0x15c   :  { %v1956_v9 = vpop.f32.mrf.mxu1 }
 0x15d   :  { %v1034_v10 = vadd.f32 %v1955_v6, %v1843_v2  ;;  %v1845_v11 = vpop.f32.mrf.mxu0 }
 0x15e   :  { %v1957_v12 = vpop.f32.mrf.mxu1  ;;  %v1846_v15 = vadd.f32 %v1845_v11, %v1844_v8 }
 0x15f   :  { %v1237_v14 = vadd.f32 %v1623_v7, %v1034_v10  ;;  %v1958_v16 = vadd.f32 %v1957_v12, %v1956_v9  ;;  %v1847_v17 = vpop.f32.mrf.mxu0 }
 0x160   :  { %v1959_v19 = vpop.f32.mrf.mxu1 }
 0x161   :  { %v1701_v20 = vpack.c.bf16 %v1237_v14, %v1236_v13  ;;  %v1848_v21 = vpop.f32.mrf.mxu0  ;;  %v1039_v24 = vadd.f32 %v1958_v16, %v1846_v15 }
 0x162   :  { %v1849_v22 = vadd.f32 %v1848_v21, %v1847_v17  ;;  %v1960_v23 = vpop.f32.mrf.mxu1 }
 0x163   :  { %1736 = vst [vmem:[%s2497_s3 + $0x70] sm:$0xff] %v1701_v20   ;;  %v1961_v26 = vadd.f32 %v1960_v23, %v1959_v19  ;;  %v1238_v29 = vadd.f32 %v1626_v25, %v1039_v24 }
 0x165   :  { %v1042_v28 = vadd.f32 %v1961_v26, %v1849_v22 }
 0x167   :  { %v1239_v30 = vadd.f32 %v1627_v27, %v1042_v28 }
 0x169   :  { %v1706_v31 = vpack.c.bf16 %v1239_v30, %v1238_v29 }
 0x16b   :  { %1737 = vst [vmem:[%s2497_s3 + $0x78] sm:$0xff] %v1706_v31  }

// kernel: _lambda_.21
= control target key start
LH: loop header
LB: loop body
LE: loop exit
PB: predicated region body
PF: predicated region fallthrough
CT: control target
= control target key end

     0   :  { %9 = vsyncpa [#allocation4], 0  ;;  %s2409_s0 = inlined_call_operand.vmem [shape: bf16[256,128], index: 0, kind: input, shape index: {}]   ;;  %s2410_s1 = inlined_call_operand.vmem [shape: bf16[128,512], index: 1, kind: input, shape index: {}]   ;;  %s2411_s2 = inlined_call_operand.vmem [shape: f32[1,128], index: 2, kind: input, shape index: {}]   ;;  %s2412_s3 = inlined_call_operand.vmem [shape: f32[1,128], index: 3, kind: input, shape index: {}]   ;;  %s2413_s4 = inlined_call_operand.hbm [shape: f32[256,512], index: 4, kind: output, shape index: {}]  }
   0x1   :  { %11 = vsyncpa [#allocation4 + $0x1], 0  ;;  %s1693_s15 = smov 0   ;;  %s1695_s16 = smov 0  }
   0x2   :  { %s1697_s17 = smov 0   ;;  %s1699_s18 = smov 0  }
   0x3   :  { %s1701_s19 = smov 0   ;;  %s1703_s20 = smov 0  }
   0x4 LB: > { %s1307_s21 = sadd.s32 4294967295, %s1661_s20   ;;  %s1308_s22 = sadd.s32 4294967294, %s1661_s20   ;;  %s1661_s20 = sphi %s1703_s20, %s17_s20   ;;  %s1657_s19 = sphi %s1701_s19, %s2420_s19   ;;  %s1653_s18 = sphi %s1699_s18, %s2419_s18   ;;  %s1649_s17 = sphi %s1697_s17, %s2418_s17   ;;  %s1645_s16 = sphi %s1695_s16, %s2417_s16   ;;  %s1641_s15 = sphi %s1693_s15, %s2416_s15  }
   0x5   : > { %s26_s23 = sadd.s32 1, %s1657_s19  ;;  %s62_s24 = sadd.s32 1, %s1649_s17 }
   0x6   : > { %p27_p0 = scmp.ge.s32.totalorder %s26_s23, 2  ;;  %p69_p1 = scmp.ne.s32.totalorder %s1649_s17, %s1645_s16 }
   0x7   : > { %p70_p2 = scmp.eq.s32.totalorder %s1661_s20, 0  ;;  %p143_p3 = scmp.eq.s32.totalorder %s1307_s21, 1 }
   0x8   : > { %s2422_s23 = smov (%p27_p0, %s26_s23), 0  ;;  %p148_p6 = scmp.ne.s32.totalorder %s1645_s16, %s1641_s15 }
   0x9   : > { %p71_p4 = por %p70_p2, %p69_p1  ;;  %p1732_p5 = por %p143_p3, %p69_p1 }
   0xa   : > { %s59_s26 = ssub.s32 %s1657_s19, %s2422_s23  ;;  %p149_p8 = scmp.eq.s32.totalorder %s1308_s22, 1 }
   0xb   : > { %p60_p7 = scmp.eq.s32.totalorder %s59_s26, 0  ;;  %p1311_p10 = scmp.ge.s32.totalorder %s1661_s20, 2 }
   0xc   : > { %p1743_p9 = por %p149_p8, %p148_p6 }
   0xd   : > { %s1741_s27 = scalar_select %p60_p7, %s1649_s17, %s62_s24  }
   0xe   : > { %180 = sbr.rel (%p1311_p10) target bundleno = 31 (0x1f), region = 28 }
  0x13   : > { %183 = sbr.rel (!%p71_p4) target bundleno = 31 (0x1f), region = 32  ;;  %s185_s29 = sand.u32 (%p71_p4), 1, %s1649_s17  }
  0x14   : > { %s1341_s30 = sshll.u32 (%p71_p4), %s1657_s19, 3  ;;  %s1312_s5 = sshll.u32 (%p71_p4), %s185_s29, 7 }
  0x15   : > { %s1755_s8 = scalar_lea.vmem (%p71_p4), %s2410_s1, %s1341_s30  ;;  %s187_s9 = scalar_lea.vmem (%p71_p4), [#allocation2], %s1312_s5 }
  0x16   : > { %v249_v0 = vld [vmem:[%s1755_s8] sm:$0xff] (%p71_p4)  ;;  %v251_v1 = vld [vmem:[%s1755_s8 + $0x10] sm:$0xff] (%p71_p4) }
  0x17   : > { %v253_v2 = vld [vmem:[%s1755_s8 + $0x20] sm:$0xff] (%p71_p4)  ;;  %250 = vst [vmem:[%s187_s9] sm:$0xff] (%p71_p4), %v249_v0  ;;  %252 = vst [vmem:[%s187_s9 + $0x8] sm:$0xff] (%p71_p4), %v251_v1  ;;  %v255_v3 = vld [vmem:[%s1755_s8 + $0x30] sm:$0xff] (%p71_p4) }
  0x18   : > { %254 = vst [vmem:[%s187_s9 + $0x10] sm:$0xff] %v253_v2  ;;  %v257_v4 = vld [vmem:[%s1755_s8 + $0x40] sm:$0xff]  ;;  %v259_v5 = vld [vmem:[%s1755_s8 + $0x50] sm:$0xff]  ;;  %256 = vst [vmem:[%s187_s9 + $0x18] sm:$0xff] %v255_v3 }
  0x19   : > { %258 = vst [vmem:[%s187_s9 + $0x20] sm:$0xff] %v257_v4  ;;  %260 = vst [vmem:[%s187_s9 + $0x28] sm:$0xff] %v259_v5  ;;  %v261_v6 = vld [vmem:[%s1755_s8 + $0x60] sm:$0xff]  ;;  %v263_v7 = vld [vmem:[%s1755_s8 + $0x70] sm:$0xff] }
  0x1a   : > { %v265_v8 = vld [vmem:[%s1755_s8 + $0x80] sm:$0xff]  ;;  %262 = vst [vmem:[%s187_s9 + $0x30] sm:$0xff] %v261_v6  ;;  %264 = vst [vmem:[%s187_s9 + $0x38] sm:$0xff] %v263_v7  ;;  %v267_v9 = vld [vmem:[%s1755_s8 + $0x90] sm:$0xff] }
  0x1b   : > { %266 = vst [vmem:[%s187_s9 + $0x40] sm:$0xff] %v265_v8  ;;  %v269_v10 = vld [vmem:[%s1755_s8 + $0xa0] sm:$0xff]  ;;  %v271_v11 = vld [vmem:[%s1755_s8 + $0xb0] sm:$0xff]  ;;  %268 = vst [vmem:[%s187_s9 + $0x48] sm:$0xff] %v267_v9 }
  0x1c   : > { %270 = vst [vmem:[%s187_s9 + $0x50] sm:$0xff] %v269_v10  ;;  %272 = vst [vmem:[%s187_s9 + $0x58] sm:$0xff] %v271_v11  ;;  %v273_v12 = vld [vmem:[%s1755_s8 + $0xc0] sm:$0xff]  ;;  %v275_v13 = vld [vmem:[%s1755_s8 + $0xd0] sm:$0xff] }
  0x1d   : > { %v277_v14 = vld [vmem:[%s1755_s8 + $0xe0] sm:$0xff]  ;;  %274 = vst [vmem:[%s187_s9 + $0x60] sm:$0xff] %v273_v12  ;;  %276 = vst [vmem:[%s187_s9 + $0x68] sm:$0xff] %v275_v13  ;;  %v279_v15 = vld [vmem:[%s1755_s8 + $0xf0] sm:$0xff] }
  0x1e   : > { %278 = vst [vmem:[%s187_s9 + $0x70] sm:$0xff] %v277_v14  ;;  %280 = vst [vmem:[%s187_s9 + $0x78] sm:$0xff] %v279_v15 }
  0x1f PF: > { %p1315_p11 = scmp.ge.s32.totalorder %s1661_s20, 1  ;;  %p285_p12 = scmp.lt.s32.totalorder %s1661_s20, 3 }
  0x21   : > { %p286_p13 = pnand %p1315_p11, %p285_p12 }
  0x22   : > { %s1952_s10 = sand.u32 (!%p286_p13), 1, %s1645_s16   ;;  %s1342_s29 = sshll.u32 (!%p286_p13), %s1653_s18, 8 }
  0x23   : > { %289 = sbr.rel (%p286_p13) target bundleno = 630 (0x276), region = 70  ;;  %s1316_s11 = sshll.u32 (!%p286_p13), %s1952_s10, 7 }
  0x24   : > { %s1955_s12 = scalar_lea.vmem (!%p286_p13), [#allocation2], %s1316_s11  ;;  %s1317_s24 = sshll.u32 (!%p286_p13), %s1952_s10, 9 }
  0x25   : > { %s2288_s26 = scalar_lea.vmem (!%p286_p13), [#allocation3], %s1317_s24  ;;  %s2357_s7 = scalar_lea.hbm (!%p286_p13), %s2413_s4, %s1342_s29 }
  0x26   : > { %s1213_s30 = sshll.u32 (!%p286_p13), %s2288_s26, 4  ;;  %s1197_s18 = scalar_lea.sflag (!%p286_p13), [#allocation4], %s1952_s10  ;;  %s2359_s30 = int_to_ptr.vmem [resolvable:$true] %s1213_s30 }
  0x27   : > { %s1585_s8 = scalar_lea.vmem (!%p286_p13), %s2359_s30, 8192  ;;  %s1664_s9 = smov (!%p286_p13), [#allocation3]  }
  0x28   : > { %v1778_v16 = vld [vmem:[%s2409_s0] sm:$0xff]   ;;  %v1796_v22 = vld [vmem:[%s2409_s0 + $0x8] sm:$0xff]   ;;  %v1818_v28 = vld [vmem:[%s2409_s0 + $0x10] sm:$0xff]   ;;  %p1586_p0 = scmp.ne.s32.totalorder %s2359_s30, %s1585_s8  ;;  %s1589_s11 = sshll.u32 %s1664_s9, 4  ;;  %s1590_s11 = int_to_ptr.vmem [resolvable:$false] %s1589_s11 }
  0x29   : > { %v1783_v17 = vld [vmem:[%s2409_s0 + $0x40] sm:$0xff]   ;;  %v1345_v18 = vunpack.c.l.bf16 %v1778_v16  ;;  %v1346_v20 = vunpack.c.h.bf16 %v1778_v16  ;;  %v1349_v23 = vunpack.c.l.bf16 %v1796_v22  ;;  %v1350_v24 = vunpack.c.h.bf16 %v1796_v22  ;;  %v1807_v25 = vld [vmem:[%s2409_s0 + $0x48] sm:$0xff]   ;;  %v1829_v31 = vld [vmem:[%s2409_s0 + $0x50] sm:$0xff]   ;;  %p1592_p3 = scmp.lt.s32.totalorder %s2359_s30, %s1590_s11 }
  0x2a   : > { %v1377_v19 = vunpack.c.l.bf16 %v1783_v17  ;;  %v1378_v21 = vunpack.c.h.bf16 %v1783_v17  ;;  %v1381_v26 = vunpack.c.l.bf16 %v1807_v25  ;;  %v1382_v27 = vunpack.c.h.bf16 %v1807_v25  ;;  %v1840_v34 = vld [vmem:[%s2409_s0 + $0x18] sm:$0xff]   ;;  %v1862_v40 = vld [vmem:[%s2409_s0 + $0x20] sm:$0xff]   ;;  %v1884_v46 = vld [vmem:[%s2409_s0 + $0x28] sm:$0xff]   ;;  %p1587_p1 = pnand %p1586_p0, %p1732_p5 }
  0x2b   : > { %396 = vadd.xlane.f32.xlu0 %v1345_v18  ;;  %v1353_v29 = vunpack.c.l.bf16 %v1818_v28  ;;  %v1354_v30 = vunpack.c.h.bf16 %v1818_v28  ;;  %v1385_v32 = vunpack.c.l.bf16 %v1829_v31  ;;  %v1386_v33 = vunpack.c.h.bf16 %v1829_v31  ;;  %v1851_v37 = vld [vmem:[%s2409_s0 + $0x58] sm:$0xff]   ;;  %v1873_v43 = vld [vmem:[%s2409_s0 + $0x60] sm:$0xff]   ;;  %v1895_v49 = vld [vmem:[%s2409_s0 + $0x68] sm:$0xff]  }
  0x2c   : > { %428 = vadd.xlane.f32.xlu1 %v1377_v19  ;;  %v1357_v35 = vunpack.c.l.bf16 %v1840_v34  ;;  %v1358_v36 = vunpack.c.h.bf16 %v1840_v34  ;;  %v1389_v38 = vunpack.c.l.bf16 %v1851_v37  ;;  %v1390_v39 = vunpack.c.h.bf16 %v1851_v37  ;;  %v1906_v52 = vld [vmem:[%s2409_s0 + $0x30] sm:$0xff]   ;;  %v1928_v58 = vld [vmem:[%s2409_s0 + $0x38] sm:$0xff]   ;;  %p1588_p2 = pneg %p1587_p1 }
  0x2d   : > { %v1361_v41 = vunpack.c.l.bf16 %v1862_v40  ;;  %v1362_v42 = vunpack.c.h.bf16 %v1862_v40  ;;  %v1393_v44 = vunpack.c.l.bf16 %v1873_v43  ;;  %v1394_v45 = vunpack.c.h.bf16 %v1873_v43  ;;  %v1917_v55 = vld [vmem:[%s2409_s0 + $0x70] sm:$0xff]   ;;  %v1939_v61 = vld [vmem:[%s2409_s0 + $0x78] sm:$0xff]  }
  0x2e   : > { %v1365_v47 = vunpack.c.l.bf16 %v1884_v46  ;;  %v1366_v48 = vunpack.c.h.bf16 %v1884_v46  ;;  %v1397_v50 = vunpack.c.l.bf16 %v1895_v49  ;;  %v1398_v51 = vunpack.c.h.bf16 %v1895_v49  ;;  %v1497_v0 = vld [vmem:[%s1955_s12 + $0x74] ss:$8 sps:$4 sm:$0xff]  }
  0x2f   : > { %398 = vadd.xlane.f32.xlu0 %v1346_v20  ;;  %v1369_v53 = vunpack.c.l.bf16 %v1906_v52  ;;  %v1370_v54 = vunpack.c.h.bf16 %v1906_v52  ;;  %v1401_v56 = vunpack.c.l.bf16 %v1917_v55  ;;  %v1402_v57 = vunpack.c.h.bf16 %v1917_v55  ;;  %939 = vmatprep.subr.bf16.mxu0 %v1497_v0 }
  0x30   : > { %430 = vadd.xlane.f32.xlu1 %v1378_v21  ;;  %v1373_v59 = vunpack.c.l.bf16 %v1928_v58  ;;  %v1374_v60 = vunpack.c.h.bf16 %v1928_v58  ;;  %v1405_v62 = vunpack.c.l.bf16 %v1939_v61  ;;  %v1406_v63 = vunpack.c.h.bf16 %v1939_v61  ;;  %1422 = vmatprep.subr.bf16.mxu1 %v1497_v0 }
  0x33   : > { %400 = vadd.xlane.f32.xlu0 %v1349_v23 }
  0x34   : > { %402 = vadd.xlane.f32.xlu1 %v1350_v24 }
  0x37   : > { %432 = vadd.xlane.f32.xlu0 %v1381_v26 }
  0x38   : > { %434 = vadd.xlane.f32.xlu1 %v1382_v27 }
  0x3b   : > { %404 = vadd.xlane.f32.xlu0 %v1353_v29 }
  0x3c   : > { %406 = vadd.xlane.f32.xlu1 %v1354_v30 }
  0x3f   : > { %436 = vadd.xlane.f32.xlu0 %v1385_v32 }
  0x40   : > { %438 = vadd.xlane.f32.xlu1 %v1386_v33 }
  0x43   : > { %408 = vadd.xlane.f32.xlu0 %v1357_v35 }
  0x44   : > { %410 = vadd.xlane.f32.xlu1 %v1358_v36 }
  0x47   : > { %440 = vadd.xlane.f32.xlu0 %v1389_v38 }
  0x48   : > { %442 = vadd.xlane.f32.xlu1 %v1390_v39 }
  0x4b   : > { %412 = vadd.xlane.f32.xlu0 %v1361_v41 }
  0x4c   : > { %414 = vadd.xlane.f32.xlu1 %v1362_v42 }
  0x4f   : > { %444 = vadd.xlane.f32.xlu0 %v1393_v44 }
  0x50   : > { %446 = vadd.xlane.f32.xlu1 %v1394_v45 }
  0x53   : > { %416 = vadd.xlane.f32.xlu0 %v1365_v47 }
  0x54   : > { %418 = vadd.xlane.f32.xlu1 %v1366_v48 }
  0x57   : > { %448 = vadd.xlane.f32.xlu0 %v1397_v50 }
  0x58   : > { %450 = vadd.xlane.f32.xlu1 %v1398_v51 }
  0x5b   : > { %420 = vadd.xlane.f32.xlu0 %v1369_v53 }
  0x5c   : > { %422 = vadd.xlane.f32.xlu1 %v1370_v54 }
  0x5f   : > { %452 = vadd.xlane.f32.xlu0 %v1401_v56 }
  0x60   : > { %454 = vadd.xlane.f32.xlu1 %v1402_v57 }
  0x63   : > { %424 = vadd.xlane.f32.xlu0 %v1373_v59 }
  0x64   : > { %426 = vadd.xlane.f32.xlu1 %v1374_v60 }
  0x67   : > { %456 = vadd.xlane.f32.xlu0 %v1405_v62 }
  0x68   : > { %458 = vadd.xlane.f32.xlu1 %v1406_v63 }
  0xb4   : > { %v397_v1 = vpop.xlane.xlu0 %396 }
  0xb5   : > { %v429_v2 = vpop.xlane.xlu1 %428  ;;  %v461_v3 = vmul.f32 0.0078125, %v397_v1 }
  0xb6   : > { %v477_v4 = vmul.f32 0.0078125, %v429_v2 }
  0xb7   : > { %v1960_v5 = vsub.f32 %v1345_v18, %v461_v3 }
  0xb8   : > { %v1964_v6 = vsub.f32 %v1377_v19, %v477_v4  ;;  %v399_v7 = vpop.xlane.xlu0 %398 }
  0xb9   : > { %v431_v8 = vpop.xlane.xlu1 %430  ;;  %v462_v9 = vmul.f32 0.0078125, %v399_v7  ;;  %v525_v10 = vmul.f32 %v1960_v5, %v1960_v5 }
  0xba   : > { %v478_v11 = vmul.f32 0.0078125, %v431_v8  ;;  %v541_v14 = vmul.f32 %v1964_v6, %v1964_v6  ;;  %v1499_v8 = vld [vmem:[%s1955_s12 + $0x70] ss:$8 sps:$4 sm:$0xff]  }
  0xbb   : > { %v1970_v12 = vsub.f32 %v1346_v20, %v462_v9  ;;  %557 = vadd.xlane.f32.xlu0 %v525_v10  ;;  %940 = vmatpush1.bf16.msra.mxu0 %v1499_v8 }
  0xbc   : > { %v1974_v13 = vsub.f32 %v1378_v21, %v478_v11  ;;  %v401_v15 = vpop.xlane.xlu0 %400  ;;  %1430 = vmatpush1.bf16.msra.mxu1 %v1499_v8 }
  0xbd   : > { %v403_v18 = vpop.xlane.xlu1 %402  ;;  %v463_v19 = vmul.f32 0.0078125, %v401_v15  ;;  %v526_v0 = vmul.f32 %v1970_v12, %v1970_v12  ;;  %v1500_v15 = vld [vmem:[%s1955_s12 + $0x64] ss:$8 sps:$4 sm:$0xff]  }
  0xbe   : > { %v464_v1 = vmul.f32 0.0078125, %v403_v18  ;;  %v542_v20 = vmul.f32 %v1974_v13, %v1974_v13  ;;  %941 = vmatprep.subr.bf16.mxu0 %v1500_v15  ;;  %1423 = vmatprep.subr.bf16.mxu1 %v1500_v15 }
  0xbf   : > { %v1982_v16 = vsub.f32 %v1349_v23, %v463_v19  ;;  %589 = vadd.xlane.f32.xlu0 %v541_v14  ;;  %559 = vadd.xlane.f32.xlu1 %v526_v0  ;;  %v1502_v19 = vld [vmem:[%s1955_s12 + $0x60] ss:$8 sps:$4 sm:$0xff]  }
  0xc0   : > { %v1986_v17 = vsub.f32 %v1350_v24, %v464_v1  ;;  %v433_v21 = vpop.xlane.xlu0 %432  ;;  %942 = vmatpush1.bf16.msra.mxu0 %v1502_v19  ;;  %1431 = vmatpush1.bf16.msra.mxu1 %v1502_v19 }
  0xc1   : > { %v435_v2 = vpop.xlane.xlu1 %434  ;;  %v479_v3 = vmul.f32 0.0078125, %v433_v21  ;;  %v527_v4 = vmul.f32 %v1982_v16, %v1982_v16 }
  0xc2   : > { %v480_v7 = vmul.f32 0.0078125, %v435_v2  ;;  %v528_v24 = vmul.f32 %v1986_v17, %v1986_v17  ;;  %v1503_v2 = vld [vmem:[%s1955_s12 + $0x54] ss:$8 sps:$4 sm:$0xff]  }
  0xc3   : > { %v1995_v23 = vsub.f32 %v1381_v26, %v479_v3  ;;  %591 = vadd.xlane.f32.xlu1 %v542_v20  ;;  %561 = vadd.xlane.f32.xlu0 %v527_v4  ;;  %v1505_v4 = vld [vmem:[%s1955_s12 + $0x50] ss:$8 sps:$4 sm:$0xff]  }
  0xc4   : > { %v1999_v22 = vsub.f32 %v1382_v27, %v480_v7  ;;  %v405_v9 = vpop.xlane.xlu0 %404  ;;  %943 = vmatprep.subr.bf16.mxu0 %v1503_v2  ;;  %1424 = vmatprep.subr.bf16.mxu1 %v1503_v2 }
  0xc5   : > { %v407_v10 = vpop.xlane.xlu1 %406  ;;  %v465_v11 = vmul.f32 0.0078125, %v405_v9  ;;  %v543_v14 = vmul.f32 %v1995_v23, %v1995_v23  ;;  %944 = vmatpush1.bf16.msra.mxu0 %v1505_v4  ;;  %1432 = vmatpush1.bf16.msra.mxu1 %v1505_v4  ;;  %v1512_v4 = vld [vmem:[%s1955_s12 + $0x24] ss:$8 sps:$4 sm:$0xff]  }
  0xc6   : > { %v466_v26 = vmul.f32 0.0078125, %v407_v10  ;;  %v544_v18 = vmul.f32 %v1999_v22, %v1999_v22  ;;  %v1506_v10 = vld [vmem:[%s1955_s12 + $0x44] ss:$8 sps:$4 sm:$0xff]  }
  0xc7   : > { %v2008_v25 = vsub.f32 %v1353_v29, %v465_v11  ;;  %563 = vadd.xlane.f32.xlu1 %v528_v24  ;;  %593 = vadd.xlane.f32.xlu0 %v543_v14  ;;  %v1508_v14 = vld [vmem:[%s1955_s12 + $0x40] ss:$8 sps:$4 sm:$0xff]  }
  0xc8   : > { %v2012_v27 = vsub.f32 %v1354_v30, %v466_v26  ;;  %v437_v0 = vpop.xlane.xlu0 %436  ;;  %945 = vmatprep.subr.bf16.mxu0 %v1506_v10  ;;  %1425 = vmatprep.subr.bf16.mxu1 %v1506_v10 }
  0xc9   : > { %v439_v1 = vpop.xlane.xlu1 %438  ;;  %v481_v20 = vmul.f32 0.0078125, %v437_v0  ;;  %v529_v29 = vmul.f32 %v2008_v25, %v2008_v25  ;;  %946 = vmatpush1.bf16.msra.mxu0 %v1508_v14  ;;  %1433 = vmatpush1.bf16.msra.mxu1 %v1508_v14  ;;  %v1509_v0 = vld [vmem:[%s1955_s12 + $0x34] ss:$8 sps:$4 sm:$0xff]  }
  0xca   : > { %v482_v21 = vmul.f32 0.0078125, %v439_v1  ;;  %v530_v3 = vmul.f32 %v2012_v27, %v2012_v27  ;;  %947 = vmatprep.subr.bf16.mxu0 %v1509_v0  ;;  %1426 = vmatprep.subr.bf16.mxu1 %v1509_v0  ;;  %v1518_v0 = vld [vmem:[%s1955_s12 + $0x4] ss:$8 sps:$4 sm:$0xff]  }
  0xcb   : > { %v2022_v28 = vsub.f32 %v1385_v32, %v481_v20  ;;  %595 = vadd.xlane.f32.xlu1 %v544_v18  ;;  %565 = vadd.xlane.f32.xlu0 %v529_v29  ;;  %v1511_v20 = vld [vmem:[%s1955_s12 + $0x30] ss:$8 sps:$4 sm:$0xff]  }
  0xcc   : > { %v2026_v30 = vsub.f32 %v1386_v33, %v482_v21  ;;  %v409_v7 = vpop.xlane.xlu0 %408 }
  0xcd   : > { %v411_v8 = vpop.xlane.xlu1 %410  ;;  %v467_v24 = vmul.f32 0.0078125, %v409_v7  ;;  %v545_v32 = vmul.f32 %v2022_v28, %v2022_v28  ;;  %948 = vmatpush1.bf16.msra.mxu0 %v1511_v20  ;;  %1434 = vmatpush1.bf16.msra.mxu1 %v1511_v20  ;;  %v1520_v20 = vld [vmem:[%s1955_s12] ss:$8 sps:$4 sm:$0xff]  }
  0xce   : > { %v468_v9 = vmul.f32 0.0078125, %v411_v8  ;;  %v546_v11 = vmul.f32 %v2026_v30, %v2026_v30  ;;  %v1514_v8 = vld [vmem:[%s1955_s12 + $0x20] ss:$8 sps:$4 sm:$0xff]   ;;  %949 = vmatprep.subr.bf16.mxu0 %v1512_v4  ;;  %1427 = vmatprep.subr.bf16.mxu1 %v1512_v4 }
  0xcf   : > { %v2036_v31 = vsub.f32 %v1357_v35, %v467_v24  ;;  %567 = vadd.xlane.f32.xlu1 %v530_v3  ;;  %597 = vadd.xlane.f32.xlu0 %v545_v32 }
  0xd0   : > { %v2040_v33 = vsub.f32 %v1358_v36, %v468_v9  ;;  %v441_v26 = vpop.xlane.xlu0 %440 }
  0xd1   : > { %v443_v15 = vpop.xlane.xlu1 %442  ;;  %v483_v18 = vmul.f32 0.0078125, %v441_v26  ;;  %v531_v35 = vmul.f32 %v2036_v31, %v2036_v31  ;;  %950 = vmatpush1.bf16.msra.mxu0 %v1514_v8  ;;  %1435 = vmatpush1.bf16.msra.mxu1 %v1514_v8  ;;  %v1517_v26 = vld [vmem:[%s1955_s12 + $0x10] ss:$8 sps:$4 sm:$0xff]   ;;  %v1663_v8 = vmov 0  }
  0xd2   : > { %v484_v19 = vmul.f32 0.0078125, %v443_v15  ;;  %v532_v1 = vmul.f32 %v2040_v33, %v2040_v33  ;;  %971 = vmatprep.mubr.bf16.mxu0 %v1663_v8  ;;  %1051 = vmatprep.mubr.bf16.mxu1 %v1663_v8 }
  0xd3   : > { %v2050_v34 = vsub.f32 %v1389_v38, %v483_v18  ;;  %599 = vadd.xlane.f32.xlu1 %v546_v11  ;;  %569 = vadd.xlane.f32.xlu0 %v531_v35  ;;  %v1515_v11 = vld [vmem:[%s1955_s12 + $0x14] ss:$8 sps:$4 sm:$0xff]   ;;  %s1591_s12 = scalar_lea.vmem %s1590_s11, 16384 }
  0xd4   : > { %v2054_v36 = vsub.f32 %v1390_v39, %v484_v19  ;;  %v413_v29 = vpop.xlane.xlu0 %412  ;;  %951 = vmatprep.subr.bf16.mxu0 %v1515_v11  ;;  %1428 = vmatprep.subr.bf16.mxu1 %v1515_v11  ;;  %p1593_p4 = scmp.lt.s32.totalorder %s1591_s12, %s1585_s8 }
  0xd5   : > { %v415_v21 = vpop.xlane.xlu1 %414  ;;  %v469_v2 = vmul.f32 0.0078125, %v413_v29  ;;  %v547_v38 = vmul.f32 %v2050_v34, %v2050_v34  ;;  %952 = vmatpush1.bf16.msra.mxu0 %v1517_v26  ;;  %1436 = vmatpush1.bf16.msra.mxu1 %v1517_v26 }
  0xd6   : > { %v470_v3 = vmul.f32 0.0078125, %v415_v21  ;;  %v548_v7 = vmul.f32 %v2054_v36, %v2054_v36  ;;  %953 = vmatprep.subr.bf16.mxu0 %v1518_v0  ;;  %1429 = vmatprep.subr.bf16.mxu1 %v1518_v0  ;;  %p1594_p6 = por %p1593_p4, %p1592_p3 }
  0xd7   : > { %v2064_v37 = vsub.f32 %v1361_v41, %v469_v2  ;;  %571 = vadd.xlane.f32.xlu1 %v532_v1  ;;  %601 = vadd.xlane.f32.xlu0 %v547_v38 }
  0xd8   : > { %v2068_v39 = vsub.f32 %v1362_v42, %v470_v3  ;;  %v445_v24 = vpop.xlane.xlu0 %444  ;;  %p1595_p7 = pnand %p1594_p6, %p1588_p2 }
  0xd9   : > { %v447_v32 = vpop.xlane.xlu1 %446  ;;  %v485_v9 = vmul.f32 0.0078125, %v445_v24  ;;  %v533_v41 = vmul.f32 %v2064_v37, %v2064_v37  ;;  %954 = vmatpush1.bf16.msra.mxu0 %v1520_v20  ;;  %1437 = vmatpush1.bf16.msra.mxu1 %v1520_v20 }
  0xda   : > { %v486_v10 = vmul.f32 0.0078125, %v447_v32  ;;  %v534_v14 = vmul.f32 %v2068_v39, %v2068_v39 }
  0xdb   : > { %v2078_v40 = vsub.f32 %v1393_v44, %v485_v9  ;;  %603 = vadd.xlane.f32.xlu1 %v548_v7  ;;  %573 = vadd.xlane.f32.xlu0 %v533_v41 }
  0xdc   : > { %v2082_v42 = vsub.f32 %v1394_v45, %v486_v10  ;;  %v417_v15 = vpop.xlane.xlu0 %416 }
  0xdd   : > { %v419_v18 = vpop.xlane.xlu1 %418  ;;  %v471_v35 = vmul.f32 0.0078125, %v417_v15  ;;  %v549_v44 = vmul.f32 %v2078_v40, %v2078_v40 }
  0xde   : > { %v472_v19 = vmul.f32 0.0078125, %v419_v18  ;;  %v550_v1 = vmul.f32 %v2082_v42, %v2082_v42 }
  0xdf   : > { %v2092_v43 = vsub.f32 %v1365_v47, %v471_v35  ;;  %575 = vadd.xlane.f32.xlu1 %v534_v14  ;;  %605 = vadd.xlane.f32.xlu0 %v549_v44 }
  0xe0   : > { %v2096_v45 = vsub.f32 %v1366_v48, %v472_v19  ;;  %v449_v29 = vpop.xlane.xlu0 %448 }
  0xe1   : > { %v451_v21 = vpop.xlane.xlu1 %450  ;;  %v487_v2 = vmul.f32 0.0078125, %v449_v29  ;;  %v535_v38 = vmul.f32 %v2092_v43, %v2092_v43 }
  0xe2   : > { %v488_v47 = vmul.f32 0.0078125, %v451_v21  ;;  %v536_v3 = vmul.f32 %v2096_v45, %v2096_v45 }
  0xe3   : > { %v2105_v46 = vsub.f32 %v1397_v50, %v487_v2  ;;  %607 = vadd.xlane.f32.xlu1 %v550_v1  ;;  %577 = vadd.xlane.f32.xlu0 %v535_v38 }
  0xe4   : > { %v2109_v48 = vsub.f32 %v1398_v51, %v488_v47  ;;  %v421_v4 = vpop.xlane.xlu0 %420 }
  0xe5   : > { %v423_v7 = vpop.xlane.xlu1 %422  ;;  %v473_v24 = vmul.f32 0.0078125, %v421_v4  ;;  %v551_v50 = vmul.f32 %v2105_v46, %v2105_v46 }
  0xe6   : > { %v474_v32 = vmul.f32 0.0078125, %v423_v7  ;;  %v552_v9 = vmul.f32 %v2109_v48, %v2109_v48 }
  0xe7   : > { %v2119_v49 = vsub.f32 %v1369_v53, %v473_v24  ;;  %579 = vadd.xlane.f32.xlu1 %v536_v3  ;;  %609 = vadd.xlane.f32.xlu0 %v551_v50 }
  0xe8   : > { %v2123_v51 = vsub.f32 %v1370_v54, %v474_v32  ;;  %v453_v41 = vpop.xlane.xlu0 %452 }
  0xe9   : > { %v455_v10 = vpop.xlane.xlu1 %454  ;;  %v489_v11 = vmul.f32 0.0078125, %v453_v41  ;;  %v537_v14 = vmul.f32 %v2119_v49, %v2119_v49 }
  0xea   : > { %v490_v26 = vmul.f32 0.0078125, %v455_v10  ;;  %v538_v54 = vmul.f32 %v2123_v51, %v2123_v51 }
  0xeb   : > { %v2131_v53 = vsub.f32 %v1401_v56, %v489_v11  ;;  %611 = vadd.xlane.f32.xlu1 %v552_v9  ;;  %581 = vadd.xlane.f32.xlu0 %v537_v14 }
  0xec   : > { %v2135_v52 = vsub.f32 %v1402_v57, %v490_v26  ;;  %v425_v15 = vpop.xlane.xlu0 %424 }
  0xed   : > { %v427_v18 = vpop.xlane.xlu1 %426  ;;  %v475_v35 = vmul.f32 0.0078125, %v425_v15  ;;  %v553_v44 = vmul.f32 %v2131_v53, %v2131_v53 }
  0xee   : > { %v476_v19 = vmul.f32 0.0078125, %v427_v18  ;;  %v554_v57 = vmul.f32 %v2135_v52, %v2135_v52 }
  0xef   : > { %v2143_v56 = vsub.f32 %v1373_v59, %v475_v35  ;;  %583 = vadd.xlane.f32.xlu1 %v538_v54  ;;  %613 = vadd.xlane.f32.xlu0 %v553_v44 }
  0xf0   : > { %v2147_v55 = vsub.f32 %v1374_v60, %v476_v19  ;;  %v457_v0 = vpop.xlane.xlu0 %456 }
  0xf1   : > { %v459_v1 = vpop.xlane.xlu1 %458  ;;  %v491_v20 = vmul.f32 0.0078125, %v457_v0  ;;  %v539_v29 = vmul.f32 %v2143_v56, %v2143_v56 }
  0xf2   : > { %v492_v21 = vmul.f32 0.0078125, %v459_v1  ;;  %v540_v60 = vmul.f32 %v2147_v55, %v2147_v55 }
  0xf3   : > { %v2155_v59 = vsub.f32 %v1405_v62, %v491_v20  ;;  %615 = vadd.xlane.f32.xlu1 %v554_v57  ;;  %585 = vadd.xlane.f32.xlu0 %v539_v29 }
  0xf4   : > { %v2159_v58 = vsub.f32 %v1406_v63, %v492_v21 }
  0xf5   : > { %v555_v2 = vmul.f32 %v2155_v59, %v2155_v59 }
  0xf6   : > { %v556_v38 = vmul.f32 %v2159_v58, %v2159_v58 }
  0xf7   : > { %587 = vadd.xlane.f32.xlu1 %v540_v60  ;;  %617 = vadd.xlane.f32.xlu0 %v555_v2  ;;  %v2171_v2 = vld [vmem:[%s2411_s2] ss:$0 sm:$0xff] }
  0xfb   : > { %619 = vadd.xlane.f32.xlu1 %v556_v38 }
 0x144   : > { %v558_v62 = vpop.xlane.xlu0 %557 }
 0x145   : > { %v621_v47 = vmul.f32 0.0078125, %v558_v62 }
 0x147   : > { %v653_v3 = vadd.f32 1e-05, %v621_v47 }
 0x148   : > { %v560_v4 = vpop.xlane.xlu1 %559  ;;  %v590_v7 = vpop.xlane.xlu0 %589 }
 0x149   : > { %1521 = vrsqrt.f32 %v653_v3  ;;  %v622_v61 = vmul.f32 0.0078125, %v560_v4  ;;  %v637_v63 = vmul.f32 0.0078125, %v590_v7 }
 0x14b   : > { %v654_v24 = vadd.f32 1e-05, %v622_v61  ;;  %v669_v50 = vadd.f32 1e-05, %v637_v63 }
 0x14c   : > { %v592_v32 = vpop.xlane.xlu1 %591  ;;  %v562_v9 = vpop.xlane.xlu0 %561 }
 0x14d   : > { %1523 = vrsqrt.f32 %v654_v24  ;;  %v638_v41 = vmul.f32 0.0078125, %v592_v32  ;;  %v623_v10 = vmul.f32 0.0078125, %v562_v9 }
 0x14e   : > { %1525 = vrsqrt.f32 %v669_v50 }
 0x14f   : > { %v670_v11 = vadd.f32 1e-05, %v638_v41  ;;  %v655_v14 = vadd.f32 1e-05, %v623_v10 }
 0x150   : > { %v564_v26 = vpop.xlane.xlu1 %563  ;;  %v594_v54 = vpop.xlane.xlu0 %593 }
 0x151   : > { %1527 = vrsqrt.f32 %v670_v11  ;;  %v624_v15 = vmul.f32 0.0078125, %v564_v26  ;;  %v639_v18 = vmul.f32 0.0078125, %v594_v54 }
 0x152   : > { %1529 = vrsqrt.f32 %v655_v14 }
 0x153   : > { %v656_v35 = vadd.f32 1e-05, %v624_v15  ;;  %v671_v44 = vadd.f32 1e-05, %v639_v18 }
 0x154   : > { %v596_v19 = vpop.xlane.xlu1 %595  ;;  %v566_v57 = vpop.xlane.xlu0 %565 }
 0x155   : > { %1531 = vrsqrt.f32 %v656_v35  ;;  %v640_v0 = vmul.f32 0.0078125, %v596_v19  ;;  %v625_v1 = vmul.f32 0.0078125, %v566_v57 }
 0x156   : > { %v1522_v20 = vpop.eup %1521  ;;  %1533 = vrsqrt.f32 %v671_v44 }
 0x157   : > { %v672_v29 = vadd.f32 1e-05, %v640_v0  ;;  %v657_v21 = vadd.f32 1e-05, %v625_v1  ;;  %v717_v60 = vmul.f32 %v1522_v20, %v1960_v5  ;;  %v2178_v5 = vld [vmem:[%s2412_s3] ss:$0 sm:$0xff] }
 0x158   : > { %v568_v38 = vpop.xlane.xlu1 %567  ;;  %v598_v62 = vpop.xlane.xlu0 %597 }
 0x159   : > { %1535 = vrsqrt.f32 %v672_v29  ;;  %v626_v47 = vmul.f32 0.0078125, %v568_v38  ;;  %v641_v3 = vmul.f32 0.0078125, %v598_v62  ;;  %v756_v7 = vmul.f32 %v2171_v2, %v717_v60 }
 0x15a   : > { %v1524_v4 = vpop.eup %1523  ;;  %1537 = vrsqrt.f32 %v657_v21 }
 0x15b   : > { %v1526_v61 = vpop.eup %1525  ;;  %v658_v63 = vadd.f32 1e-05, %v626_v47  ;;  %v673_v24 = vadd.f32 1e-05, %v641_v3  ;;  %v718_v50 = vmul.f32 %v1524_v4, %v1970_v12  ;;  %v795_v54 = vadd.f32 %v2178_v5, %v756_v7 }
 0x15c   : > { %v600_v32 = vpop.xlane.xlu1 %599  ;;  %v570_v9 = vpop.xlane.xlu0 %569  ;;  %v733_v41 = vmul.f32 %v1526_v61, %v1964_v6 }
 0x15d   : > { %1539 = vrsqrt.f32 %v658_v63  ;;  %v642_v10 = vmul.f32 0.0078125, %v600_v32  ;;  %v627_v11 = vmul.f32 0.0078125, %v570_v9  ;;  %v757_v14 = vmul.f32 %v2171_v2, %v718_v50 }
 0x15e   : > { %v1528_v26 = vpop.eup %1527  ;;  %1541 = vrsqrt.f32 %v673_v24  ;;  %v772_v6 = vmul.f32 %v2171_v2, %v733_v41 }
 0x15f   : > { %v1530_v15 = vpop.eup %1529  ;;  %v674_v12 = vadd.f32 1e-05, %v642_v10  ;;  %v659_v18 = vadd.f32 1e-05, %v627_v11  ;;  %v796_v35 = vadd.f32 %v2178_v5, %v757_v14  ;;  %v734_v44 = vmul.f32 %v1528_v26, %v1974_v13 }
 0x160   : > { %v572_v19 = vpop.xlane.xlu1 %571  ;;  %v602_v57 = vpop.xlane.xlu0 %601  ;;  %v719_v0 = vmul.f32 %v1530_v15, %v1982_v16  ;;  %v811_v16 = vadd.f32 %v2178_v5, %v772_v6 }
 0x161   : > { %1543 = vrsqrt.f32 %v674_v12  ;;  %v628_v1 = vmul.f32 0.0078125, %v572_v19  ;;  %v643_v20 = vmul.f32 0.0078125, %v602_v57  ;;  %v827_v29 = vpack.c.bf16 %v796_v35, %v795_v54 }
 0x162   : > { %v1532_v21 = vpop.eup %1531  ;;  %1545 = vrsqrt.f32 %v659_v18  ;;  %v773_v60 = vmul.f32 %v2171_v2, %v734_v44  ;;  %v758_v38 = vmul.f32 %v2171_v2, %v719_v0 }
 0x163   : > { %v1534_v62 = vpop.eup %1533  ;;  %v660_v47 = vadd.f32 1e-05, %v628_v1  ;;  %v675_v3 = vadd.f32 1e-05, %v643_v20  ;;  %972 = vmatmul.mubr.bf16.vlgmr.msra.gmra.mxu0 %v827_v29  ;;  %v720_v13 = vmul.f32 %v1532_v21, %v1986_v17 }
 0x164   : > { %v604_v4 = vpop.xlane.xlu1 %603  ;;  %v574_v7 = vpop.xlane.xlu0 %573  ;;  %v812_v61 = vadd.f32 %v2178_v5, %v773_v60  ;;  %981 = vmatprep.mubr.bf16.mxu0 %v1663_v8  ;;  %v735_v63 = vmul.f32 %v1534_v62, %v1995_v23  ;;  %v797_v17 = vadd.f32 %v2178_v5, %v758_v38 }
 0x165   : > { %1547 = vrsqrt.f32 %v660_v47  ;;  %v644_v24 = vmul.f32 0.0078125, %v604_v4  ;;  %v629_v50 = vmul.f32 0.0078125, %v574_v7  ;;  %v759_v32 = vmul.f32 %v2171_v2, %v720_v13 }
 0x166   : > { %v1536_v9 = vpop.eup %1535  ;;  %1549 = vrsqrt.f32 %v675_v3  ;;  %v835_v41 = vpack.c.bf16 %v812_v61, %v811_v16  ;;  %v774_v12 = vmul.f32 %v2171_v2, %v735_v63 }
 0x167   : > { %v1538_v10 = vpop.eup %1537  ;;  %v676_v11 = vadd.f32 1e-05, %v644_v24  ;;  %v661_v14 = vadd.f32 1e-05, %v629_v50  ;;  %v798_v26 = vadd.f32 %v2178_v5, %v759_v32  ;;  %v736_v54 = vmul.f32 %v1536_v9, %v1999_v22 }
 0x168   : > { %1052 = vmatmul.mubr.bf16.vlgmr.msra.gmra.mxu1 %v835_v41  ;;  %v576_v15 = vpop.xlane.xlu1 %575  ;;  %v606_v23 = vpop.xlane.xlu0 %605  ;;  %v721_v18 = vmul.f32 %v1538_v10, %v2008_v25  ;;  %v813_v60 = vadd.f32 %v2178_v5, %v774_v12 }
 0x169   : > { %1551 = vrsqrt.f32 %v676_v11  ;;  %v630_v35 = vmul.f32 0.0078125, %v576_v15  ;;  %v645_v44 = vmul.f32 0.0078125, %v606_v23  ;;  %v828_v19 = vpack.c.bf16 %v798_v26, %v797_v17  ;;  %1061 = vmatprep.mubr.bf16.mxu1 %v1663_v8 }
 0x16a   : > { %v1540_v57 = vpop.eup %1539  ;;  %1553 = vrsqrt.f32 %v661_v14  ;;  %v775_v6 = vmul.f32 %v2171_v2, %v736_v54  ;;  %v760_v0 = vmul.f32 %v2171_v2, %v721_v18 }
 0x16b   : > { %v1542_v22 = vpop.eup %1541  ;;  %v662_v1 = vadd.f32 1e-05, %v630_v35  ;;  %v677_v20 = vadd.f32 1e-05, %v645_v44  ;;  %982 = vmatmul.mubr.bf16.gmra.mxu0 %v828_v19  ;;  %v722_v29 = vmul.f32 %v1540_v57, %v2012_v27 }
 0x16c   : > { %v608_v21 = vpop.xlane.xlu1 %607  ;;  %v578_v25 = vpop.xlane.xlu0 %577  ;;  %v814_v38 = vadd.f32 %v2178_v5, %v775_v6  ;;  %991 = vmatprep.mubr.bf16.mxu0 %v1663_v8  ;;  %v737_v62 = vmul.f32 %v1542_v22, %v2022_v28  ;;  %v799_v27 = vadd.f32 %v2178_v5, %v760_v0 }
 0x16d   : > { %1555 = vrsqrt.f32 %v662_v1  ;;  %v646_v47 = vmul.f32 0.0078125, %v608_v21  ;;  %v631_v3 = vmul.f32 0.0078125, %v578_v25  ;;  %v761_v13 = vmul.f32 %v2171_v2, %v722_v29 }
 0x16e   : > { %v1544_v4 = vpop.eup %1543  ;;  %1557 = vrsqrt.f32 %v677_v20  ;;  %v836_v7 = vpack.c.bf16 %v814_v38, %v813_v60  ;;  %v776_v9 = vmul.f32 %v2171_v2, %v737_v62 }
 0x16f   : > { %v1546_v16 = vpop.eup %1545  ;;  %v678_v61 = vadd.f32 1e-05, %v646_v47  ;;  %v663_v63 = vadd.f32 1e-05, %v631_v3  ;;  %v800_v24 = vadd.f32 %v2178_v5, %v761_v13  ;;  %v738_v50 = vmul.f32 %v1544_v4, %v2026_v30 }
 0x170   : > { %1062 = vmatmul.mubr.bf16.gmra.mxu1 %v836_v7  ;;  %v580_v32 = vpop.xlane.xlu1 %579  ;;  %v610_v28 = vpop.xlane.xlu0 %609  ;;  %v723_v41 = vmul.f32 %v1546_v16, %v2036_v31  ;;  %v815_v35 = vadd.f32 %v2178_v5, %v776_v9 }
 0x171   : > { %1559 = vrsqrt.f32 %v678_v61  ;;  %v632_v17 = vmul.f32 0.0078125, %v580_v32  ;;  %v647_v10 = vmul.f32 0.0078125, %v610_v28  ;;  %v829_v11 = vpack.c.bf16 %v800_v24, %v799_v27  ;;  %1071 = vmatprep.mubr.bf16.mxu1 %v1663_v8 }
 0x172   : > { %v1548_v14 = vpop.eup %1547  ;;  %1561 = vrsqrt.f32 %v663_v63  ;;  %v777_v26 = vmul.f32 %v2171_v2, %v738_v50  ;;  %v762_v54 = vmul.f32 %v2171_v2, %v723_v41 }
 0x173   : > { %v1550_v30 = vpop.eup %1549  ;;  %v664_v15 = vadd.f32 1e-05, %v632_v17  ;;  %v679_v23 = vadd.f32 1e-05, %v647_v10  ;;  %992 = vmatmul.mubr.bf16.gmra.mxu0 %v829_v11  ;;  %v724_v12 = vmul.f32 %v1548_v14, %v2040_v33 }
 0x174   : > { %v612_v18 = vpop.xlane.xlu1 %611  ;;  %v582_v31 = vpop.xlane.xlu0 %581  ;;  %v816_v44 = vadd.f32 %v2178_v5, %v777_v26  ;;  %1001 = vmatprep.mubr.bf16.mxu0 %v1663_v8  ;;  %v739_v19 = vmul.f32 %v1550_v30, %v2050_v34  ;;  %v801_v33 = vadd.f32 %v2178_v5, %v762_v54 }
 0x175   : > { %1563 = vrsqrt.f32 %v664_v15  ;;  %v648_v57 = vmul.f32 0.0078125, %v612_v18  ;;  %v633_v6 = vmul.f32 0.0078125, %v582_v31  ;;  %v763_v0 = vmul.f32 %v2171_v2, %v724_v12 }
 0x176   : > { %v1552_v22 = vpop.eup %1551  ;;  %1565 = vrsqrt.f32 %v679_v23  ;;  %v837_v1 = vpack.c.bf16 %v816_v44, %v815_v35  ;;  %v778_v62 = vmul.f32 %v2171_v2, %v739_v19 }
 0x177   : > { %v1554_v20 = vpop.eup %1553  ;;  %v680_v29 = vadd.f32 1e-05, %v648_v57  ;;  %v665_v21 = vadd.f32 1e-05, %v633_v6  ;;  %v802_v25 = vadd.f32 %v2178_v5, %v763_v0  ;;  %v740_v60 = vmul.f32 %v1552_v22, %v2054_v36 }
 0x178   : > { %1072 = vmatmul.mubr.bf16.gmra.mxu1 %v837_v1  ;;  %v584_v38 = vpop.xlane.xlu1 %583  ;;  %v614_v34 = vpop.xlane.xlu0 %613  ;;  %v725_v47 = vmul.f32 %v1554_v20, %v2064_v37  ;;  %v817_v32 = vadd.f32 %v2178_v5, %v778_v62 }
 0x179   : > { %1567 = vrsqrt.f32 %v680_v29  ;;  %v634_v3 = vmul.f32 0.0078125, %v584_v38  ;;  %v649_v13 = vmul.f32 0.0078125, %v614_v34  ;;  %v830_v4 = vpack.c.bf16 %v802_v25, %v801_v33  ;;  %1081 = vmatprep.mubr.bf16.mxu1 %v1663_v8 }
 0x17a   : > { %v1556_v7 = vpop.eup %1555  ;;  %1569 = vrsqrt.f32 %v665_v21  ;;  %v779_v27 = vmul.f32 %v2171_v2, %v740_v60  ;;  %v764_v16 = vmul.f32 %v2171_v2, %v725_v47 }
 0x17b   : > { %v1558_v36 = vpop.eup %1557  ;;  %v666_v61 = vadd.f32 1e-05, %v634_v3  ;;  %v681_v63 = vadd.f32 1e-05, %v649_v13  ;;  %1002 = vmatmul.mubr.bf16.gmra.mxu0 %v830_v4  ;;  %v726_v24 = vmul.f32 %v1556_v7, %v2068_v39 }
 0x17c   : > { %v616_v50 = vpop.xlane.xlu1 %615  ;;  %v586_v37 = vpop.xlane.xlu0 %585  ;;  %v818_v28 = vadd.f32 %v2178_v5, %v779_v27  ;;  %1011 = vmatprep.mubr.bf16.mxu0 %v1663_v8  ;;  %v741_v9 = vmul.f32 %v1558_v36, %v2078_v40  ;;  %v803_v39 = vadd.f32 %v2178_v5, %v764_v16 }
 0x17d   : > { %1571 = vrsqrt.f32 %v666_v61  ;;  %v650_v41 = vmul.f32 0.0078125, %v616_v50  ;;  %v635_v17 = vmul.f32 0.0078125, %v586_v37  ;;  %v765_v10 = vmul.f32 %v2171_v2, %v726_v24 }
 0x17e   : > { %v1560_v11 = vpop.eup %1559  ;;  %1573 = vrsqrt.f32 %v681_v63  ;;  %v838_v14 = vpack.c.bf16 %v818_v28, %v817_v32  ;;  %v780_v18 = vmul.f32 %v2171_v2, %v741_v9 }
 0x17f   : > { %v1562_v26 = vpop.eup %1561  ;;  %v682_v54 = vadd.f32 1e-05, %v650_v41  ;;  %v667_v30 = vadd.f32 1e-05, %v635_v17  ;;  %v804_v15 = vadd.f32 %v2178_v5, %v765_v10  ;;  %v742_v23 = vmul.f32 %v1560_v11, %v2082_v42 }
 0x180   : > { %1082 = vmatmul.mubr.bf16.gmra.mxu1 %v838_v14  ;;  %v588_v12 = vpop.xlane.xlu1 %587  ;;  %v618_v40 = vpop.xlane.xlu0 %617  ;;  %v727_v31 = vmul.f32 %v1562_v26, %v2092_v43  ;;  %v819_v43 = vadd.f32 %v2178_v5, %v780_v18 }
 0x181   : > { %1575 = vrsqrt.f32 %v682_v54  ;;  %v636_v35 = vmul.f32 0.0078125, %v588_v12  ;;  %v651_v44 = vmul.f32 0.0078125, %v618_v40  ;;  %v831_v19 = vpack.c.bf16 %v804_v15, %v803_v39  ;;  %1091 = vmatprep.mubr.bf16.mxu1 %v1663_v8 }
 0x182   : > { %v1564_v57 = vpop.eup %1563  ;;  %1577 = vrsqrt.f32 %v667_v30  ;;  %v781_v6 = vmul.f32 %v2171_v2, %v742_v23  ;;  %v766_v0 = vmul.f32 %v2171_v2, %v727_v31 }
 0x183   : > { %v1566_v42 = vpop.eup %1565  ;;  %v668_v22 = vadd.f32 1e-05, %v636_v35  ;;  %v683_v1 = vadd.f32 1e-05, %v651_v44  ;;  %1012 = vmatmul.mubr.bf16.gmra.mxu0 %v831_v19  ;;  %v728_v33 = vmul.f32 %v1564_v57, %v2096_v45 }
 0x184   : > { %v620_v20 = vpop.xlane.xlu1 %619  ;;  %v820_v29 = vadd.f32 %v2178_v5, %v781_v6  ;;  %1021 = vmatprep.mubr.bf16.mxu0 %v1663_v8  ;;  %v743_v21 = vmul.f32 %v1566_v42, %v2105_v46  ;;  %v805_v62 = vadd.f32 %v2178_v5, %v766_v0 }
 0x185   : > { %1579 = vrsqrt.f32 %v668_v22  ;;  %v652_v25 = vmul.f32 0.0078125, %v620_v20  ;;  %v767_v60 = vmul.f32 %v2171_v2, %v728_v33 }
 0x186   : > { %v1568_v38 = vpop.eup %1567  ;;  %1581 = vrsqrt.f32 %v683_v1  ;;  %v839_v34 = vpack.c.bf16 %v820_v29, %v819_v43  ;;  %v782_v4 = vmul.f32 %v2171_v2, %v743_v21 }
 0x187   : > { %v1570_v47 = vpop.eup %1569  ;;  %v684_v45 = vadd.f32 1e-05, %v652_v25  ;;  %v806_v3 = vadd.f32 %v2178_v5, %v767_v60  ;;  %v744_v13 = vmul.f32 %v1568_v38, %v2109_v48 }
 0x188   : > { %1092 = vmatmul.mubr.bf16.gmra.mxu1 %v839_v34  ;;  %v729_v46 = vmul.f32 %v1570_v47, %v2119_v49  ;;  %v821_v61 = vadd.f32 %v2178_v5, %v782_v4 }
 0x189   : > { %1583 = vrsqrt.f32 %v684_v45  ;;  %v832_v7 = vpack.c.bf16 %v806_v3, %v805_v62  ;;  %1101 = vmatprep.mubr.bf16.mxu1 %v1663_v8  ;;  %v783_v27 = vmul.f32 %v2171_v2, %v744_v13 }
 0x18a   : > { %v1572_v16 = vpop.eup %1571  ;;  %v768_v24 = vmul.f32 %v2171_v2, %v729_v46 }
 0x18b   : > { %v1574_v36 = vpop.eup %1573  ;;  %1022 = vmatmul.mubr.bf16.gmra.mxu0 %v832_v7  ;;  %v822_v63 = vadd.f32 %v2178_v5, %v783_v27  ;;  %v730_v48 = vmul.f32 %v1572_v16, %v2123_v51 }
 0x18c   : > { %1031 = vmatprep.mubr.bf16.mxu0 %v1663_v8  ;;  %v745_v49 = vmul.f32 %v1574_v36, %v2131_v53  ;;  %v807_v9 = vadd.f32 %v2178_v5, %v768_v24 }
 0x18d   : > { %v840_v50 = vpack.c.bf16 %v822_v63, %v821_v61  ;;  %v769_v37 = vmul.f32 %v2171_v2, %v730_v48 }
 0x18e   : > { %v1576_v32 = vpop.eup %1575  ;;  %v784_v10 = vmul.f32 %v2171_v2, %v745_v49 }
 0x18f   : > { %v1578_v28 = vpop.eup %1577  ;;  %v808_v41 = vadd.f32 %v2178_v5, %v769_v37  ;;  %v746_v17 = vmul.f32 %v1576_v32, %v2135_v52 }
 0x190   : > { %1102 = vmatmul.mubr.bf16.gmra.mxu1 %v840_v50  ;;  %v731_v51 = vmul.f32 %v1578_v28, %v2143_v56  ;;  %v823_v26 = vadd.f32 %v2178_v5, %v784_v10 }
 0x191   : > { %v833_v11 = vpack.c.bf16 %v808_v41, %v807_v9  ;;  %1111 = vmatprep.mubr.bf16.mxu1 %v1663_v8  ;;  %v785_v53 = vmul.f32 %v2171_v2, %v746_v17 }
 0x192   : > { %v1580_v14 = vpop.eup %1579  ;;  %v770_v52 = vmul.f32 %v2171_v2, %v731_v51 }
 0x193   : > { %v1582_v39 = vpop.eup %1581  ;;  %1032 = vmatmul.mubr.bf16.gmra.mxu0 %v833_v11  ;;  %v824_v54 = vadd.f32 %v2178_v5, %v785_v53  ;;  %v732_v30 = vmul.f32 %v1580_v14, %v2147_v55 }
 0x194   : > { %1041 = vmatprep.mubr.bf16.mxu0 %v1663_v8  ;;  %v747_v56 = vmul.f32 %v1582_v39, %v2155_v59  ;;  %v809_v40 = vadd.f32 %v2178_v5, %v770_v52 }
 0x195   : > { %v841_v15 = vpack.c.bf16 %v824_v54, %v823_v26  ;;  %v771_v23 = vmul.f32 %v2171_v2, %v732_v30 }
 0x196   : > { %v1584_v12 = vpop.eup %1583  ;;  %v786_v35 = vmul.f32 %v2171_v2, %v747_v56 }
 0x197   : > { %v810_v18 = vadd.f32 %v2178_v5, %v771_v23  ;;  %v748_v31 = vmul.f32 %v1584_v12, %v2159_v58 }
 0x198   : > { %1112 = vmatmul.mubr.bf16.gmra.mxu1 %v841_v15  ;;  %v825_v59 = vadd.f32 %v2178_v5, %v786_v35 }
 0x199   : > { %v834_v55 = vpack.c.bf16 %v810_v18, %v809_v40  ;;  %1121 = vmatprep.mubr.bf16.mxu1 %v1663_v8  ;;  %v787_v44 = vmul.f32 %v2171_v2, %v748_v31 }
 0x19b   : > { %1042 = vmatmul.mubr.bf16.gmra.mxu0 %v834_v55  ;;  %v826_v19 = vadd.f32 %v2178_v5, %v787_v44 }
 0x19d   : > { %v842_v57 = vpack.c.bf16 %v826_v19, %v825_v59 }
 0x1a0   : > { %1122 = vmatmul.mubr.bf16.gmra.mxu1 %v842_v57 }
 0x223   : > { %v973_v6 = vpop.f32.mrf.mxu0 }
 0x224   : > { %1132 = vst [vmem:[%s2288_s26] sm:$0xff] %v973_v6 }
 0x225   : > { %v975_v8 = vpop.f32.mrf.mxu0 }
 0x226   : > { %1133 = vst [vmem:[%s2288_s26 + $0x8] sm:$0xff] %v975_v8 }
 0x227   : > { %v977_v58 = vpop.f32.mrf.mxu0 }
 0x228   : > { %1134 = vst [vmem:[%s2288_s26 + $0x10] sm:$0xff] %v977_v58  ;;  %v1053_v2 = vpop.f32.mrf.mxu1 }
 0x229   : > { %1164 = vst [vmem:[%s2288_s26 + $0x100] sm:$0xff] %v1053_v2  ;;  %v979_v5 = vpop.f32.mrf.mxu0 }
 0x22a   : > { %1135 = vst [vmem:[%s2288_s26 + $0x18] sm:$0xff] %v979_v5  ;;  %v1055_v0 = vpop.f32.mrf.mxu1 }
 0x22b   : > { %1165 = vst [vmem:[%s2288_s26 + $0x108] sm:$0xff] %v1055_v0  ;;  %v983_v42 = vpop.f32.mrf.mxu0 }
 0x22c   : > { %1136 = vst [vmem:[%s2288_s26 + $0x20] sm:$0xff] %v983_v42  ;;  %v1057_v22 = vpop.f32.mrf.mxu1 }
 0x22d   : > { %1166 = vst [vmem:[%s2288_s26 + $0x110] sm:$0xff] %v1057_v22  ;;  %v985_v1 = vpop.f32.mrf.mxu0 }
 0x22e   : > { %1137 = vst [vmem:[%s2288_s26 + $0x28] sm:$0xff] %v985_v1  ;;  %v1059_v33 = vpop.f32.mrf.mxu1 }
 0x22f   : > { %1167 = vst [vmem:[%s2288_s26 + $0x118] sm:$0xff] %v1059_v33  ;;  %v987_v20 = vpop.f32.mrf.mxu0 }
 0x230   : > { %1138 = vst [vmem:[%s2288_s26 + $0x30] sm:$0xff] %v987_v20  ;;  %v1063_v43 = vpop.f32.mrf.mxu1 }
 0x231   : > { %1168 = vst [vmem:[%s2288_s26 + $0x120] sm:$0xff] %v1063_v43  ;;  %v989_v29 = vpop.f32.mrf.mxu0 }
 0x232   : > { %1139 = vst [vmem:[%s2288_s26 + $0x38] sm:$0xff] %v989_v29  ;;  %v1065_v21 = vpop.f32.mrf.mxu1 }
 0x233   : > { %1169 = vst [vmem:[%s2288_s26 + $0x128] sm:$0xff] %v1065_v21  ;;  %v993_v25 = vpop.f32.mrf.mxu0 }
 0x234   : > { %1140 = vst [vmem:[%s2288_s26 + $0x40] sm:$0xff] %v993_v25  ;;  %v1067_v60 = vpop.f32.mrf.mxu1 }
 0x235   : > { %1170 = vst [vmem:[%s2288_s26 + $0x130] sm:$0xff] %v1067_v60  ;;  %v995_v38 = vpop.f32.mrf.mxu0 }
 0x236   : > { %1141 = vst [vmem:[%s2288_s26 + $0x48] sm:$0xff] %v995_v38  ;;  %v1069_v34 = vpop.f32.mrf.mxu1 }
 0x237   : > { %1171 = vst [vmem:[%s2288_s26 + $0x138] sm:$0xff] %v1069_v34  ;;  %v997_v62 = vpop.f32.mrf.mxu0 }
 0x238   : > { %1142 = vst [vmem:[%s2288_s26 + $0x50] sm:$0xff] %v997_v62  ;;  %v1073_v47 = vpop.f32.mrf.mxu1 }
 0x239   : > { %1172 = vst [vmem:[%s2288_s26 + $0x140] sm:$0xff] %v1073_v47  ;;  %v999_v45 = vpop.f32.mrf.mxu0 }
 0x23a   : > { %1143 = vst [vmem:[%s2288_s26 + $0x58] sm:$0xff] %v999_v45  ;;  %v1075_v3 = vpop.f32.mrf.mxu1 }
 0x23b   : > { %1173 = vst [vmem:[%s2288_s26 + $0x148] sm:$0xff] %v1075_v3  ;;  %v1003_v13 = vpop.f32.mrf.mxu0 }
 0x23c   : > { %1144 = vst [vmem:[%s2288_s26 + $0x60] sm:$0xff] %v1003_v13  ;;  %v1077_v4 = vpop.f32.mrf.mxu1 }
 0x23d   : > { %1174 = vst [vmem:[%s2288_s26 + $0x150] sm:$0xff] %v1077_v4  ;;  %v1005_v46 = vpop.f32.mrf.mxu0 }
 0x23e   : > { %1145 = vst [vmem:[%s2288_s26 + $0x68] sm:$0xff] %v1005_v46  ;;  %v1079_v7 = vpop.f32.mrf.mxu1 }
 0x23f   : > { %1175 = vst [vmem:[%s2288_s26 + $0x158] sm:$0xff] %v1079_v7  ;;  %v1007_v27 = vpop.f32.mrf.mxu0 }
 0x240   : > { %1146 = vst [vmem:[%s2288_s26 + $0x70] sm:$0xff] %v1007_v27  ;;  %v1083_v16 = vpop.f32.mrf.mxu1 }
 0x241   : > { %1176 = vst [vmem:[%s2288_s26 + $0x160] sm:$0xff] %v1083_v16  ;;  %v1009_v36 = vpop.f32.mrf.mxu0 }
 0x242   : > { %1147 = vst [vmem:[%s2288_s26 + $0x78] sm:$0xff] %v1009_v36  ;;  %v1085_v61 = vpop.f32.mrf.mxu1 }
 0x243   : > { %1177 = vst [vmem:[%s2288_s26 + $0x168] sm:$0xff] %v1085_v61  ;;  %v1013_v63 = vpop.f32.mrf.mxu0 }
 0x244   : > { %1148 = vst [vmem:[%s2288_s26 + $0x80] sm:$0xff] %v1013_v63  ;;  %v1087_v48 = vpop.f32.mrf.mxu1 }
 0x245   : > { %1178 = vst [vmem:[%s2288_s26 + $0x170] sm:$0xff] %v1087_v48  ;;  %v1015_v24 = vpop.f32.mrf.mxu0 }
 0x246   : > { %1149 = vst [vmem:[%s2288_s26 + $0x88] sm:$0xff] %v1015_v24  ;;  %v1089_v49 = vpop.f32.mrf.mxu1 }
 0x247   : > { %1179 = vst [vmem:[%s2288_s26 + $0x178] sm:$0xff] %v1089_v49  ;;  %v1017_v50 = vpop.f32.mrf.mxu0 }
 0x248   : > { %1150 = vst [vmem:[%s2288_s26 + $0x90] sm:$0xff] %v1017_v50  ;;  %v1093_v37 = vpop.f32.mrf.mxu1 }
 0x249   : > { %1180 = vst [vmem:[%s2288_s26 + $0x180] sm:$0xff] %v1093_v37  ;;  %v1019_v32 = vpop.f32.mrf.mxu0 }
 0x24a   : > { %1151 = vst [vmem:[%s2288_s26 + $0x98] sm:$0xff] %v1019_v32  ;;  %v1095_v28 = vpop.f32.mrf.mxu1 }
 0x24b   : > { %1181 = vst [vmem:[%s2288_s26 + $0x188] sm:$0xff] %v1095_v28  ;;  %v1023_v9 = vpop.f32.mrf.mxu0 }
 0x24c   : > { %1152 = vst [vmem:[%s2288_s26 + $0xa0] sm:$0xff] %v1023_v9  ;;  %v1097_v41 = vpop.f32.mrf.mxu1 }
 0x24d   : > { %1182 = vst [vmem:[%s2288_s26 + $0x190] sm:$0xff] %v1097_v41  ;;  %v1025_v17 = vpop.f32.mrf.mxu0 }
 0x24e   : > { %1153 = vst [vmem:[%s2288_s26 + $0xa8] sm:$0xff] %v1025_v17  ;;  %v1099_v10 = vpop.f32.mrf.mxu1 }
 0x24f   : > { %1183 = vst [vmem:[%s2288_s26 + $0x198] sm:$0xff] %v1099_v10  ;;  %v1027_v51 = vpop.f32.mrf.mxu0 }
 0x250   : > { %1154 = vst [vmem:[%s2288_s26 + $0xb0] sm:$0xff] %v1027_v51  ;;  %v1103_v11 = vpop.f32.mrf.mxu1 }
 0x251   : > { %1184 = vst [vmem:[%s2288_s26 + $0x1a0] sm:$0xff] %v1103_v11  ;;  %v1029_v53 = vpop.f32.mrf.mxu0 }
 0x252   : > { %1155 = vst [vmem:[%s2288_s26 + $0xb8] sm:$0xff] %v1029_v53  ;;  %v1105_v14 = vpop.f32.mrf.mxu1 }
 0x253   : > { %1185 = vst [vmem:[%s2288_s26 + $0x1a8] sm:$0xff] %v1105_v14  ;;  %v1033_v39 = vpop.f32.mrf.mxu0 }
 0x254   : > { %1156 = vst [vmem:[%s2288_s26 + $0xc0] sm:$0xff] %v1033_v39  ;;  %v1107_v26 = vpop.f32.mrf.mxu1 }
 0x255   : > { %1186 = vst [vmem:[%s2288_s26 + $0x1b0] sm:$0xff] %v1107_v26  ;;  %v1035_v54 = vpop.f32.mrf.mxu0 }
 0x256   : > { %1157 = vst [vmem:[%s2288_s26 + $0xc8] sm:$0xff] %v1035_v54  ;;  %v1109_v30 = vpop.f32.mrf.mxu1 }
 0x257   : > { %1187 = vst [vmem:[%s2288_s26 + $0x1b8] sm:$0xff] %v1109_v30  ;;  %v1037_v52 = vpop.f32.mrf.mxu0 }
 0x258   : > { %1158 = vst [vmem:[%s2288_s26 + $0xd0] sm:$0xff] %v1037_v52  ;;  %v1113_v56 = vpop.f32.mrf.mxu1 }
 0x259   : > { %1188 = vst [vmem:[%s2288_s26 + $0x1c0] sm:$0xff] %v1113_v56  ;;  %v1039_v15 = vpop.f32.mrf.mxu0 }
 0x25a   : > { %1159 = vst [vmem:[%s2288_s26 + $0xd8] sm:$0xff] %v1039_v15  ;;  %v1115_v23 = vpop.f32.mrf.mxu1 }
 0x25b   : > { %1189 = vst [vmem:[%s2288_s26 + $0x1c8] sm:$0xff] %v1115_v23  ;;  %v1043_v12 = vpop.f32.mrf.mxu0 }
 0x25c   : > { %1160 = vst [vmem:[%s2288_s26 + $0xe0] sm:$0xff] %v1043_v12  ;;  %v1117_v40 = vpop.f32.mrf.mxu1 }
 0x25d   : > { %1190 = vst [vmem:[%s2288_s26 + $0x1d0] sm:$0xff] %v1117_v40  ;;  %v1045_v18 = vpop.f32.mrf.mxu0 }
 0x25e   : > { %1161 = vst [vmem:[%s2288_s26 + $0xe8] sm:$0xff] %v1045_v18  ;;  %v1119_v31 = vpop.f32.mrf.mxu1 }
 0x25f   : > { %1191 = vst [vmem:[%s2288_s26 + $0x1d8] sm:$0xff] %v1119_v31  ;;  %v1047_v35 = vpop.f32.mrf.mxu0 }
 0x260   : > { %1162 = vst [vmem:[%s2288_s26 + $0xf0] sm:$0xff] %v1047_v35  ;;  %v1123_v55 = vpop.f32.mrf.mxu1 }
 0x261   : > { %1192 = vst [vmem:[%s2288_s26 + $0x1e0] sm:$0xff] %v1123_v55  ;;  %v1049_v44 = vpop.f32.mrf.mxu0 }
 0x262   : > { %1163 = vst [vmem:[%s2288_s26 + $0xf8] sm:$0xff] %v1049_v44  ;;  %v1125_v59 = vpop.f32.mrf.mxu1 }
 0x263   : > { %1193 = vst [vmem:[%s2288_s26 + $0x1e8] sm:$0xff] %v1125_v59 }
 0x264   : > { %v1127_v19 = vpop.f32.mrf.mxu1 }
 0x265   : > { %1194 = vst [vmem:[%s2288_s26 + $0x1f0] sm:$0xff] %v1127_v19 }
 0x266   : > { %v1129_v57 = vpop.f32.mrf.mxu1 }
 0x267   : > { %1195 = vst [vmem:[%s2288_s26 + $0x1f8] sm:$0xff] %v1129_v57 }
 0x268   : > { %1598 = shalt.err (!%p1595_p7)
}
 0x269   : > { %s1599_s13 = scalar_lea.hbm %s2357_s7, 8192  ;;  %s1603_s22 = scalar_lea.hbm %s2413_s4, 16384 }
 0x26a   : > { %p1600_p8 = scmp.ne.s32.totalorder %s2357_s7, %s1599_s13  ;;  %p1604_p13 = scmp.lt.s32.totalorder %s2357_s7, %s2413_s4 }
 0x26b   : > { %p1605_p0 = scmp.lt.s32.totalorder %s1603_s22, %s1599_s13 }
 0x26c   : > { %p1601_p11 = pnand %p1600_p8, %p1732_p5 }
 0x26d   : > { %p1606_p1 = por %p1605_p0, %p1604_p13 }
 0x26e   : > { %p1602_p12 = pneg %p1601_p11 }
 0x270   : > { %p1607_p2 = pnand %p1606_p1, %p1602_p12 }
 0x272   : > { %1610 = shalt.err (!%p1607_p2)
}
 0x273   : > { %s1665_s29 = smov 256   ;;  %s1666_s5 = smov 512  }
 0x274   : > { %s1667_s6 = smov 16  }
 0x275   : > { %1438 = dma.vmem_to_hbm [thread:$0]  (%p1732_p5), %s2359_s30, 8192, %s2357_s7, %s1197_s18, %s1665_s29, %s1666_s5, %s1667_s6  }
 0x276 PF: > { %s1228_s8 = sand.u32 1, %s1641_s15   ;;  %p1441_p3 = pnand %p1311_p10, %p1743_p9 }
 0x277   : > { %s1229_s9 = scalar_lea.sflag [#allocation4], %s1228_s8 }
 0x278   : > { %p1442_p4 = pneg %p1441_p3 }
 0x27a   : > { %1636 = dma.done.wait (%p1442_p4), %s1229_s9, 8192  }
 0x27b   : > { %1638 = vsyncadd (%p1442_p4), %s1229_s9, 4294959104  ;;  %s17_s20 = sadd.s32 1, %s1661_s20   ;;  %s2416_s15 = smov %s1645_s16 }
 0x27c   : > { %p14_p6 = scmp.ge.s32.totalorder %s17_s20, 4   ;;  %s2417_s16 = smov %s1649_s17 }
 0x27d   : > { %s2418_s17 = smov %s1741_s27  ;;  %s2419_s18 = smov %s1657_s19 }
 0x27e   : > { %s2420_s19 = smov %s2422_s23  ;;  %16 = sbr.rel (!%p14_p6) target bundleno = 4 (0x4), region = 117 }
 0x283   :  { %1234 = vsyncpa [#allocation4], 1 }
 0x284   :  { %1236 = vsyncpa [#allocation4 + $0x1], 1 }

</bundles_post_ra>
